<compile_context>
chip_gen: v5e
topology: v5e:2x2
jax: 0.10.0
libtpu: 0.0.40
codegen_flags: <defaults>
</compile_context>

<pallas_src>
import math
import functools

import numpy as np
import jax
import jax.numpy as jnp
from jax.experimental import pallas as pl
from jax.experimental.pallas import tpu as pltpu

H = 32            # hidden_size
ATOM_FDIM = 16
BOND_FDIM = 24
DEPTH = 3         # -> DEPTH - 1 = 2 message-passing steps (W_h_0, W_h_1)
NEG_INF = -1e30


def _round_up(x, m):
    return ((x + m - 1) // m) * m


def _vmem():
    return pl.BlockSpec(memory_space=pltpu.MemorySpace.VMEM)


# --------------------------------------------------------------------------
# The fused Pallas kernel (entire MPN forward), [H, rows] layout
# --------------------------------------------------------------------------

def _mpn_fused_kernel(
    # graph structure as dense operators (precomputed once per batch)
    gath_nb_ref,     # [NBp, max_nb*Ap] bf16  column j*Ap+i selects bond a2b[i, j]
    gath_b2a_ref,    # [Ap, NBp]        bf16  column b selects atom b2a[b]
    scat_pad_ref,    # [Ap, T*Mp]       bf16  scatter atoms -> time-major GRU slots
    negpad_ref,      # [1, T*Mp]        f32   0 valid slot, -1e30 padded slot
    pool_ref,        # [T*Mp, Mp]       f32   per-molecule mean pooling (1/sz)
    # features (transposed: feature dim on sublanes, rows on lanes)
    fa_ref,          # [ATOM_FDIM, Ap]  f32
    fb_ref,          # [BOND_FDIM, NBp] f32
    # parameters ([out, in] PyTorch weights used directly; biases as columns)
    wia_ref, bia_ref,            # W_i_atom  [H, AF], [H, 1]
    wib_ref, bib_ref,            # W_i_bond  [H, BF], [H, 1]
    whs_ref, bhs_ref,            # stacked W_h_d: [D-1, H, H], [D-1, H, 1]
    wlr_ref, blr_ref,            # lr: [H, 3H], [H, 1]
    grub_ref,                    # BatchGRU bias: [H, 1]
    wi_cat_ref, bi_cat_ref,      # fused GRU input proj (both dirs): [6H, H], [6H, 1]
    whf_ref, bhf_ref,            # fused fwd hidden proj (r|z|n): [3H, H], [3H, 1]
    whb_ref, bhb_ref,            # fused bwd hidden proj (r|z|n): [3H, H], [3H, 1]
    wo_ref, wob_ref,             # W_o: [H, 2H], [H, 1]
    # output
    out_ref,                     # [H, Mp] molecule vectors (transposed, padded)
    # scratch
    ycat_ref,                    # VMEM [2H, T*Mp] bidirectional GRU outputs
    *, ap, nbp, mp, seq_len, max_nb, n_steps):

    relu = lambda v: jnp.maximum(v, 0.0)
    dot = lambda a, b: jnp.dot(a, b, preferred_element_type=jnp.float32)

    # ---- input projections (MXU, lane-dense outputs) ----
    ia = relu(dot(wia_ref[...], fa_ref[...]) + bia_ref[...])   # input_atom  [H, Ap]
    ib = relu(dot(wib_ref[...], fb_ref[...]) + bib_ref[...])   # input_bond  [H, NBp]
    ma = ia                                                    # message_atom
    mb = ib                                                    # message_bond

    def neighbor_agg(mb_val):
        # One fused gather matmul for ALL neighbor slots (bf16 one-hot operator,
        # f32 accumulation), then lane-aligned slice max / sum on the VPU.
        # NOTE: includes padding bond index 0 on purpose (chemprop semantics).
        g = dot(mb_val, gath_nb_ref[...])                      # [H, max_nb*Ap]
        s = g[:, 0:ap]
        mx = g[:, 0:ap]
        for j in range(1, max_nb):
            sl = g[:, j * ap:(j + 1) * ap]
            s = s + sl
            mx = jnp.maximum(mx, sl)
        return s * mx                                          # sum * max, [H, Ap]

    # mb[b2revb] as a lane pair-swap: chemprop stores rev(b) adjacent to b
    # (pairs (1,2),(3,4),... with index 0 = padding, verified in prepare_batch).
    lane = jax.lax.broadcasted_iota(jnp.int32, (H, nbp), 1)
    is_odd = (lane & 1) == 1
    is_zero = lane == 0

    def rev_swap(mb_val):
        nxt = pltpu.roll(mb_val, nbp - 1, 1)    # column b <- mb[:, b+1]
        prv = pltpu.roll(mb_val, 1, 1)          # column b <- mb[:, b-1]
        return jnp.where(is_zero, mb_val, jnp.where(is_odd, nxt, prv))

    # ---- DEPTH-1 message-passing steps ----
    for d in range(n_steps):
        ma = ma + neighbor_agg(mb)
        pre = dot(ma, gath_b2a_ref[...]) - rev_swap(mb)        # [H, NBp]
        mb = relu(ib + dot(whs_ref[d], pre) + bhs_ref[d])
        # TODO(synk): nn.Dropout is identity here (p=0 / eval) and is omitted.

    # ---- final aggregation + lr ----
    agg = neighbor_agg(mb)
    node = dot(wlr_ref[...], jnp.concatenate([agg, ma, ia], axis=0)) + blr_ref[...]

    # ---- BatchGRU ----
    hidden = node                                              # [H, Ap]
    message = relu(node + grub_ref[...])

    # Scatter atoms into time-major zero-padded sequences: column = t*Mp + m.
    x_pad = dot(message, scat_pad_ref[...])                    # [H, T*Mp]
    hid_pad = dot(hidden, scat_pad_ref[...]) + negpad_ref[...] # [H, T*Mp]

    # Per-molecule max over atoms -> shared initial hidden of both directions.
    h0 = hid_pad[:, 0:mp]
    for t in range(1, seq_len):
        h0 = jnp.maximum(h0, hid_pad[:, t * mp:(t + 1) * mp])

    # GRU input projections for the whole padded sequence, both directions,
    # hoisted out of the recurrence as one matmul.
    gx = dot(wi_cat_ref[...], x_pad) + bi_cat_ref[...]         # [6H, T*Mp]

    def gru_cell(gx_t, h, wh_ref, bh_ref):
        gh = dot(wh_ref[...], h) + bh_ref[...]                 # fused r|z|n, [3H, Mp]
        rz = jax.nn.sigmoid(gx_t[0:2 * H, :] + gh[0:2 * H, :]) # one sigmoid for r|z
        r = rz[0:H, :]
        z = rz[H:2 * H, :]
        n = jnp.tanh(gx_t[2 * H:3 * H, :] + r * gh[2 * H:3 * H, :])
        return (1.0 - z) * n + z * h

    # Both directions interleaved in the same unrolled step (independent chains),
    # each timestep's hidden written straight into the VMEM scratch slab.
    # T is small & static here; for long sequences switch to lax.fori_loop.
    hf = h0
    hb = h0
    for s in range(seq_len):
        tb = seq_len - 1 - s
        hf = gru_cell(gx[0:3 * H, s * mp:(s + 1) * mp], hf, whf_ref, bhf_ref)
        hb = gru_cell(gx[3 * H:6 * H, tb * mp:(tb + 1) * mp], hb, whb_ref, bhb_ref)
        ycat_ref[0:H, s * mp:(s + 1) * mp] = hf
        ycat_ref[H:2 * H, tb * mp:(tb + 1) * mp] = hb

    # ---- W_o + ReLU + per-molecule mean pooling (pooling matmul) ----
    hdn = relu(dot(wo_ref[...], ycat_ref[...]) + wob_ref[...])  # [H, T*Mp]
    out_ref[...] = dot(hdn, pool_ref[...])                      # [H, Mp]


# --------------------------------------------------------------------------
# One-time preprocessing (hoisted out of the forward pass)
# --------------------------------------------------------------------------

def prepare_params(p):
    """Fused GRU gate matrices, stacked W_h, column biases -- done once.

    In the [H, rows] layout the PyTorch [out, in] weights are used directly.
    """
    g = p['gru']
    col = lambda b: b.reshape(-1, 1)
    wi = lambda d: jnp.concatenate([g[d]['wir'], g[d]['wiz'], g[d]['win']], axis=0)
    bi = lambda d: jnp.concatenate([g[d]['bir'], g[d]['biz'], g[d]['bin']])
    wh = lambda d: jnp.concatenate([g[d]['whr'], g[d]['whz'], g[d]['whn']], axis=0)
    bh = lambda d: jnp.concatenate([g[d]['bhr'], g[d]['bhz'], g[d]['bhn']])

    return dict(
        wia=p['W_i_atom_w'], bia=col(p['W_i_atom_b']),
        wib=p['W_i_bond_w'], bib=col(p['W_i_bond_b']),
        whs=jnp.stack([p[f'W_h_{d}_w'] for d in range(DEPTH - 1)]),
        bhs=jnp.stack([col(p[f'W_h_{d}_b']) for d in range(DEPTH - 1)]),
        wlr=p['lr_w'], blr=col(p['lr_b']),
        grub=col(p['gru_bias']),
        wi_cat=jnp.concatenate([wi('f'), wi('b')], axis=0),
        bi_cat=col(jnp.concatenate([bi('f'), bi('b')])),
        whf=wh('f'), bhf=col(bh('f')),
        whb=wh('b'), bhb=col(bh('b')),
        wo=p['W_o_w'], wob=col(p['W_o_b']))


def prepare_batch(a2b, b2a, b2revb, a_scope, n_atoms, n_bonds):
    """Dense gather / scatter / pooling operators for one batch.

    One-hot operators are bf16 (exact 0/1 values); pool / negpad stay f32.
    Lane-axis dims are padded to multiples of 128 so every MXU feed and store in
    the kernel is lane-dense and unmasked.
    """
    a2b = np.asarray(a2b); b2a = np.asarray(b2a); b2revb = np.asarray(b2revb)
    A, NB = int(n_atoms), int(n_bonds)
    max_nb = a2b.shape[1]
    M = len(a_scope)
    T = max(sz for _, sz in a_scope)
    Ap, NBp, Mp = _round_up(A, 128), _round_up(NB, 128), _round_up(M, 128)

    # Verify chemprop's paired reverse-bond layout (index 0 = padding, then
    # (1,2),(3,4),... pairs) so the kernel can use a lane pair-swap for b2revb.
    ok = (NB >= 1) and (int(b2revb[0]) == 0)
    for b in range(1, NB):
        exp = b + 1 if (b % 2 == 1) else b - 1
        ok = ok and (int(b2revb[b]) == exp)
    if not ok:
        # TODO(synk): fall back to an explicit one-hot gath_rev matmul for
        #             non-chemprop bond orderings.
        raise NotImplementedError("b2revb does not follow chemprop's paired layout")

    # Fused per-slot neighbor gather: column j*Ap + i selects bond a2b[i, j].
    gath_nb = np.zeros((NBp, max_nb * Ap), np.float32)
    for i in range(A):
        for j in range(max_nb):
            gath_nb[a2b[i, j], j * Ap + i] = 1.0

    gath_b2a = np.zeros((Ap, NBp), np.float32)
    for b in range(NB):
        gath_b2a[b2a[b], b] = 1.0

    scat_pad = np.zeros((Ap, T * Mp), np.float32)
    negpad = np.zeros((1, T * Mp), np.float32)
    pool = np.zeros((T * Mp, Mp), np.float32)
    for m, (st, sz) in enumerate(a_scope):
        for t in range(T):
            col = t * Mp + m
            if t < sz:
                scat_pad[st + t, col] = 1.0
                pool[col, m] = 1.0 / sz
            else:
                negpad[0, col] = NEG_INF   # masked out of the h0 max

    return dict(
        gath_nb=jnp.asarray(gath_nb, dtype=jnp.bfloat16),
        gath_b2a=jnp.asarray(gath_b2a, dtype=jnp.bfloat16),
        scat_pad=jnp.asarray(scat_pad, dtype=jnp.bfloat16),
        negpad=jnp.asarray(negpad),
        pool=jnp.asarray(pool),
        dims=dict(n_mols=M, mp=Mp, seq_len=T, max_nb=max_nb, ap=Ap, nbp=NBp))


# --------------------------------------------------------------------------
# Forward pass (single pallas_call)
# --------------------------------------------------------------------------

def mpn_forward_pallas(prep_p, prep_b, f_atoms, f_bonds):
    d = prep_b['dims']
    Ap, NBp, Mp, T = d['ap'], d['nbp'], d['mp'], d['seq_len']
    M = d['n_mols']
    # Transpose features so the graph row dims land on the lane axis.
    fa_t = jnp.pad(f_atoms, ((0, Ap - f_atoms.shape[0]), (0, 0))).T     # [AF, Ap]
    fb_t = jnp.pad(f_bonds, ((0, NBp - f_bonds.shape[0]), (0, 0))).T    # [BF, NBp]
    n_steps = int(prep_p['whs'].shape[0])

    kern = functools.partial(_mpn_fused_kernel, ap=Ap, nbp=NBp, mp=Mp,
                             seq_len=T, max_nb=d['max_nb'], n_steps=n_steps)
    args = [prep_b['gath_nb'], prep_b['gath_b2a'], prep_b['scat_pad'],
            prep_b['negpad'], prep_b['pool'],
            fa_t, fb_t,
            prep_p['wia'], prep_p['bia'], prep_p['wib'], prep_p['bib'],
            prep_p['whs'], prep_p['bhs'],
            prep_p['wlr'], prep_p['blr'],
            prep_p['grub'],
            prep_p['wi_cat'], prep_p['bi_cat'],
            prep_p['whf'], prep_p['bhf'], prep_p['whb'], prep_p['bhb'],
            prep_p['wo'], prep_p['wob']]

    out_t = pl.pallas_call(
        kern,
        out_shape=jax.ShapeDtypeStruct((H, Mp), jnp.float32),
        in_specs=[_vmem()] * len(args),
        out_specs=_vmem(),
        scratch_shapes=[pltpu.VMEM((2 * H, T * Mp), jnp.float32)],
        compiler_params=pltpu.CompilerParams(vmem_limit_bytes=48 * 1024 * 1024),
    )(*args)
    return out_t[:, :M].T                                       # [M, H]


# --------------------------------------------------------------------------
# Pure-JAX reference (same semantics as the PyTorch module) for validation
# --------------------------------------------------------------------------

def mpn_forward_ref(params, f_atoms, f_bonds, a2b, b2a, b2revb, a_scope):
    hp = jax.lax.Precision.HIGHEST
    relu = lambda x: jnp.maximum(x, 0.0)
    lin = lambda x, w, b: jnp.matmul(x, w.T, precision=hp) + b[None, :]

    input_atom = relu(lin(f_atoms, params['W_i_atom_w'], params['W_i_atom_b']))
    message_atom = input_atom
    input_bond = relu(lin(f_bonds, params['W_i_bond_w'], params['W_i_bond_b']))
    message_bond = input_bond

    for d in range(DEPTH - 1):
        nei = message_bond[a2b]
        agg = nei.sum(axis=1) * nei.max(axis=1)
        message_atom = message_atom + agg
        rev = message_bond[b2revb]
        pre = message_atom[b2a] - rev
        message_bond = relu(input_bond + lin(pre, params[f'W_h_{d}_w'], params[f'W_h_{d}_b']))

    nei = message_bond[a2b]
    agg = nei.sum(axis=1) * nei.max(axis=1)
    node = lin(jnp.concatenate([agg, message_atom, input_atom], axis=1),
               params['lr_w'], params['lr_b'])

    hidden = node
    message = relu(node + params['gru_bias'][None, :])
    max_len = max(sz for _, sz in a_scope)

    def cell(g, x_t, h):
        r = jax.nn.sigmoid(jnp.matmul(x_t, g['wir'].T, precision=hp) + g['bir'] +
                           jnp.matmul(h, g['whr'].T, precision=hp) + g['bhr'])
        z = jax.nn.sigmoid(jnp.matmul(x_t, g['wiz'].T, precision=hp) + g['biz'] +
                           jnp.matmul(h, g['whz'].T, precision=hp) + g['bhz'])
        n = jnp.tanh(jnp.matmul(x_t, g['win'].T, precision=hp) + g['bin'] +
                     r * (jnp.matmul(h, g['whn'].T, precision=hp) + g['bhn']))
        return (1.0 - z) * n + z * h

    rows = [jnp.concatenate([message[0:1], message[0:1]], axis=1)]
    for (st, sz) in a_scope:
        x = jnp.zeros((max_len, H), jnp.float32).at[:sz].set(message[st:st + sz])
        h0 = jnp.max(hidden[st:st + sz], axis=0, keepdims=True)
        hf = h0
        yf = []
        for t in range(max_len):
            hf = cell(params['gru']['f'], x[t:t + 1], hf)
            yf.append(hf)
        hb = h0
        yb = [None] * max_len
        for t in range(max_len - 1, -1, -1):
            hb = cell(params['gru']['b'], x[t:t + 1], hb)
            yb[t] = hb
        yf = jnp.concatenate(yf, axis=0)
        yb = jnp.concatenate(yb, axis=0)
        rows.append(jnp.concatenate([yf[:sz], yb[:sz]], axis=1))
    msg2 = jnp.concatenate(rows, axis=0)

    atom_hiddens = relu(lin(msg2, params['W_o_w'], params['W_o_b']))
    mol_vecs = [atom_hiddens[st:st + sz].mean(axis=0) for (st, sz) in a_scope]
    return jnp.stack(mol_vecs, axis=0)


# --------------------------------------------------------------------------
# Deterministic parameter init + synthetic graph
# --------------------------------------------------------------------------

def init_params(key):
    ks = jax.random.split(key, 16)
    p = {}

    def lin_init(k, dout, din):
        s = 1.0 / math.sqrt(din)
        k1, k2 = jax.random.split(k)
        return (jax.random.uniform(k1, (dout, din), jnp.float32, -s, s),
                jax.random.uniform(k2, (dout,), jnp.float32, -s, s))

    p['W_i_atom_w'], p['W_i_atom_b'] = lin_init(ks[0], H, ATOM_FDIM)
    p['W_i_bond_w'], p['W_i_bond_b'] = lin_init(ks[1], H, BOND_FDIM)
    for d in range(DEPTH - 1):
        p[f'W_h_{d}_w'], p[f'W_h_{d}_b'] = lin_init(ks[2 + d], H, H)
    p['lr_w'], p['lr_b'] = lin_init(ks[5], H, 3 * H)
    p['W_o_w'], p['W_o_b'] = lin_init(ks[6], H, 2 * H)

    s = 1.0 / math.sqrt(H)
    p['gru_bias'] = jax.random.uniform(ks[7], (H,), jnp.float32, -s, s)

    gru = {}
    for di, dname in enumerate(('f', 'b')):
        gk = jax.random.split(ks[8 + di], 12)
        g = {}
        for ni, nm in enumerate(['wir', 'wiz', 'win', 'whr', 'whz', 'whn']):
            g[nm] = jax.random.uniform(gk[ni], (H, H), jnp.float32, -s, s)
        for ni, nm in enumerate(['bir', 'biz', 'bin', 'bhr', 'bhz', 'bhn']):
            g[nm] = jax.random.uniform(gk[6 + ni], (H,), jnp.float32, -s, s)
        gru[dname] = g
    p['gru'] = gru
    return p


if __name__ == "__main__":
    # Synthetic BatchMolGraph (chemprop conventions: index 0 of atoms/bonds is padding).
    # Molecule 1: atoms 1-3, bonds (1-2),(2-3). Molecule 2: atoms 4-7, ring-ish bonds.
    a2b = np.array([[0, 0], [2, 0], [1, 4], [3, 0],
                    [6, 12], [5, 8], [7, 10], [9, 11]], np.int32)
    b2a = np.array([0, 1, 2, 2, 3, 4, 5, 5, 6, 6, 7, 4, 7], np.int32)
    b2revb = np.array([0, 2, 1, 4, 3, 6, 5, 8, 7, 10, 9, 12, 11], np.int32)
    a_scope = [(1, 3), (4, 4)]
    A, NB = 8, 13

    key = jax.random.PRNGKey(0)
    k_fa, k_fb, k_par = jax.random.split(key, 3)
    f_atoms = jax.random.normal(k_fa, (A, ATOM_FDIM), jnp.float32).at[0].set(0.0)
    f_bonds = jax.random.normal(k_fb, (NB, BOND_FDIM), jnp.float32).at[0].set(0.0)

    params = init_params(k_par)
    prep_p = prepare_params(params)                                  # one-time
    prep_b = prepare_batch(a2b, b2a, b2revb, a_scope, A, NB)         # one-time

    out = mpn_forward_pallas(prep_p, prep_b, f_atoms, f_bonds)
    out = jax.block_until_ready(out)

    ref = mpn_forward_ref(params, f_atoms, f_bonds, a2b, b2a, b2revb, a_scope)
    np.testing.assert_allclose(np.asarray(out), np.asarray(ref), rtol=5e-3, atol=5e-3)
    assert out.shape == (len(a_scope), H)
    print("KERNEL_OK")
</pallas_src>

<mosaic_0001>
module attributes {stable_mosaic.version = 11 : i64} {
  func.func @_mpn_fused_kernel(%arg0: memref<128x256xbf16, #tpu.memory_space<vmem>>, %arg1: memref<128x128xbf16, #tpu.memory_space<vmem>>, %arg2: memref<128x512xbf16, #tpu.memory_space<vmem>>, %arg3: memref<1x512xf32, #tpu.memory_space<vmem>>, %arg4: memref<512x128xf32, #tpu.memory_space<vmem>>, %arg5: memref<16x128xf32, #tpu.memory_space<vmem>>, %arg6: memref<24x128xf32, #tpu.memory_space<vmem>>, %arg7: memref<32x16xf32, #tpu.memory_space<vmem>>, %arg8: memref<32x1xf32, #tpu.memory_space<vmem>>, %arg9: memref<32x24xf32, #tpu.memory_space<vmem>>, %arg10: memref<32x1xf32, #tpu.memory_space<vmem>>, %arg11: memref<2x32x32xf32, #tpu.memory_space<vmem>>, %arg12: memref<2x32x1xf32, #tpu.memory_space<vmem>>, %arg13: memref<32x96xf32, #tpu.memory_space<vmem>>, %arg14: memref<32x1xf32, #tpu.memory_space<vmem>>, %arg15: memref<32x1xf32, #tpu.memory_space<vmem>>, %arg16: memref<192x32xf32, #tpu.memory_space<vmem>>, %arg17: memref<192x1xf32, #tpu.memory_space<vmem>>, %arg18: memref<96x32xf32, #tpu.memory_space<vmem>>, %arg19: memref<96x1xf32, #tpu.memory_space<vmem>>, %arg20: memref<96x32xf32, #tpu.memory_space<vmem>>, %arg21: memref<96x1xf32, #tpu.memory_space<vmem>>, %arg22: memref<32x64xf32, #tpu.memory_space<vmem>>, %arg23: memref<32x1xf32, #tpu.memory_space<vmem>>, %arg24: memref<32x128xf32, #tpu.memory_space<vmem>>, %arg25: memref<64x512xf32, #tpu.memory_space<vmem>>) attributes {dimension_semantics = [], scalar_prefetch = 0 : i64, scratch_operands = 1 : i64, tpu.core_type = #tpu.core_type<tc>} {
    %c0 = arith.constant 0 : index
    %c0_0 = arith.constant 0 : index
    %0 = vector.load %arg7[%c0, %c0_0] : memref<32x16xf32, #tpu.memory_space<vmem>>, vector<32x16xf32>
    %c0_1 = arith.constant 0 : index
    %c0_2 = arith.constant 0 : index
    %1 = vector.load %arg5[%c0_1, %c0_2] : memref<16x128xf32, #tpu.memory_space<vmem>>, vector<16x128xf32>
    %cst = arith.constant dense<0.000000e+00> : vector<32x128xf32>
    %2 = tpu.matmul %0, %1, %cst {dimension_numbers = #tpu.dot_dimension_numbers<[1], [0], [0], [1], [0, 0, 1, 1], [], []>} : vector<32x16xf32>, vector<16x128xf32>, vector<32x128xf32> -> vector<32x128xf32>
    %c0_3 = arith.constant 0 : index
    %c0_4 = arith.constant 0 : index
    %3 = vector.load %arg8[%c0_3, %c0_4] : memref<32x1xf32, #tpu.memory_space<vmem>>, vector<32x1xf32>
    %4 = vector.broadcast %3 : vector<32x1xf32> to vector<32x128xf32>
    %5 = arith.addf %2, %4 : vector<32x128xf32>
    %cst_5 = arith.constant 0.000000e+00 : f32
    %6 = vector.broadcast %cst_5 : f32 to vector<32x128xf32>
    %7 = arith.maximumf %5, %6 : vector<32x128xf32>
    %c0_6 = arith.constant 0 : index
    %c0_7 = arith.constant 0 : index
    %8 = vector.load %arg9[%c0_6, %c0_7] : memref<32x24xf32, #tpu.memory_space<vmem>>, vector<32x24xf32>
    %c0_8 = arith.constant 0 : index
    %c0_9 = arith.constant 0 : index
    %9 = vector.load %arg6[%c0_8, %c0_9] : memref<24x128xf32, #tpu.memory_space<vmem>>, vector<24x128xf32>
    %cst_10 = arith.constant dense<0.000000e+00> : vector<32x128xf32>
    %10 = tpu.matmul %8, %9, %cst_10 {dimension_numbers = #tpu.dot_dimension_numbers<[1], [0], [0], [1], [0, 0, 1, 1], [], []>} : vector<32x24xf32>, vector<24x128xf32>, vector<32x128xf32> -> vector<32x128xf32>
    %c0_11 = arith.constant 0 : index
    %c0_12 = arith.constant 0 : index
    %11 = vector.load %arg10[%c0_11, %c0_12] : memref<32x1xf32, #tpu.memory_space<vmem>>, vector<32x1xf32>
    %12 = vector.broadcast %11 : vector<32x1xf32> to vector<32x128xf32>
    %13 = arith.addf %10, %12 : vector<32x128xf32>
    %cst_13 = arith.constant 0.000000e+00 : f32
    %14 = vector.broadcast %cst_13 : f32 to vector<32x128xf32>
    %15 = arith.maximumf %13, %14 : vector<32x128xf32>
    %16 = tpu.iota {dimensions = array<i32: 1>} : vector<32x128xi32>
    %c1_i32 = arith.constant 1 : i32
    %17 = vector.broadcast %c1_i32 : i32 to vector<32x128xi32>
    %18 = arith.andi %16, %17 : vector<32x128xi32>
    %c1_i32_14 = arith.constant 1 : i32
    %19 = vector.broadcast %c1_i32_14 : i32 to vector<32x128xi32>
    %20 = arith.cmpi eq, %18, %19 : vector<32x128xi32>
    %c0_i32 = arith.constant 0 : i32
    %21 = vector.broadcast %c0_i32 : i32 to vector<32x128xi32>
    %22 = arith.cmpi eq, %16, %21 : vector<32x128xi32>
    %c0_15 = arith.constant 0 : index
    %c0_16 = arith.constant 0 : index
    %23 = vector.load %arg0[%c0_15, %c0_16] : memref<128x256xbf16, #tpu.memory_space<vmem>>, vector<128x256xbf16>
    %cst_17 = arith.constant dense<0.000000e+00> : vector<32x256xf32>
    %24 = tpu.matmul %15, %23, %cst_17 {dimension_numbers = #tpu.dot_dimension_numbers<[1], [0], [0], [1], [0, 0, 1, 1], [], []>} : vector<32x128xf32>, vector<128x256xbf16>, vector<32x256xf32> -> vector<32x256xf32>
    %25 = vector.extract_strided_slice %24 {offsets = [0, 0], sizes = [32, 128], strides = [1, 1]} : vector<32x256xf32> to vector<32x128xf32>
    %26 = vector.extract_strided_slice %24 {offsets = [0, 0], sizes = [32, 128], strides = [1, 1]} : vector<32x256xf32> to vector<32x128xf32>
    %27 = vector.extract_strided_slice %24 {offsets = [0, 128], sizes = [32, 128], strides = [1, 1]} : vector<32x256xf32> to vector<32x128xf32>
    %28 = arith.addf %25, %27 : vector<32x128xf32>
    %29 = arith.maximumf %26, %27 : vector<32x128xf32>
    %30 = arith.mulf %28, %29 : vector<32x128xf32>
    %31 = arith.addf %7, %30 : vector<32x128xf32>
    %c0_18 = arith.constant 0 : index
    %c0_19 = arith.constant 0 : index
    %32 = vector.load %arg1[%c0_18, %c0_19] : memref<128x128xbf16, #tpu.memory_space<vmem>>, vector<128x128xbf16>
    %cst_20 = arith.constant dense<0.000000e+00> : vector<32x128xf32>
    %33 = tpu.matmul %31, %32, %cst_20 {dimension_numbers = #tpu.dot_dimension_numbers<[1], [0], [0], [1], [0, 0, 1, 1], [], []>} : vector<32x128xf32>, vector<128x128xbf16>, vector<32x128xf32> -> vector<32x128xf32>
    %c127_i32 = arith.constant 127 : i32
    %34 = tpu.dynamic_rotate %15 by %c127_i32 dim 1 : vector<32x128xf32>, i32 -> vector<32x128xf32>
    %c1_i32_21 = arith.constant 1 : i32
    %35 = tpu.dynamic_rotate %15 by %c1_i32_21 dim 1 : vector<32x128xf32>, i32 -> vector<32x128xf32>
    %36 = arith.select %20, %34, %35 : vector<32x128xi1>, vector<32x128xf32>
    %37 = arith.select %22, %15, %36 : vector<32x128xi1>, vector<32x128xf32>
    %38 = arith.subf %33, %37 : vector<32x128xf32>
    %c0_22 = arith.constant 0 : index
    %c0_23 = arith.constant 0 : index
    %c0_24 = arith.constant 0 : index
    %39 = vector.load %arg11[%c0_22, %c0_23, %c0_24] : memref<2x32x32xf32, #tpu.memory_space<vmem>>, vector<1x32x32xf32>
    %40 = vector.shape_cast %39 : vector<1x32x32xf32> to vector<32x32xf32>
    %cst_25 = arith.constant dense<0.000000e+00> : vector<32x128xf32>
    %41 = tpu.matmul %40, %38, %cst_25 {dimension_numbers = #tpu.dot_dimension_numbers<[1], [0], [0], [1], [0, 0, 1, 1], [], []>} : vector<32x32xf32>, vector<32x128xf32>, vector<32x128xf32> -> vector<32x128xf32>
    %42 = arith.addf %15, %41 : vector<32x128xf32>
    %c0_26 = arith.constant 0 : index
    %c0_27 = arith.constant 0 : index
    %c0_28 = arith.constant 0 : index
    %43 = vector.load %arg12[%c0_26, %c0_27, %c0_28] : memref<2x32x1xf32, #tpu.memory_space<vmem>>, vector<1x32x1xf32>
    %44 = vector.shape_cast %43 : vector<1x32x1xf32> to vector<32x1xf32>
    %45 = vector.broadcast %44 : vector<32x1xf32> to vector<32x128xf32>
    %46 = arith.addf %42, %45 : vector<32x128xf32>
    %cst_29 = arith.constant 0.000000e+00 : f32
    %47 = vector.broadcast %cst_29 : f32 to vector<32x128xf32>
    %48 = arith.maximumf %46, %47 : vector<32x128xf32>
    %c0_30 = arith.constant 0 : index
    %c0_31 = arith.constant 0 : index
    %49 = vector.load %arg0[%c0_30, %c0_31] : memref<128x256xbf16, #tpu.memory_space<vmem>>, vector<128x256xbf16>
    %cst_32 = arith.constant dense<0.000000e+00> : vector<32x256xf32>
    %50 = tpu.matmul %48, %49, %cst_32 {dimension_numbers = #tpu.dot_dimension_numbers<[1], [0], [0], [1], [0, 0, 1, 1], [], []>} : vector<32x128xf32>, vector<128x256xbf16>, vector<32x256xf32> -> vector<32x256xf32>
    %51 = vector.extract_strided_slice %50 {offsets = [0, 0], sizes = [32, 128], strides = [1, 1]} : vector<32x256xf32> to vector<32x128xf32>
    %52 = vector.extract_strided_slice %50 {offsets = [0, 0], sizes = [32, 128], strides = [1, 1]} : vector<32x256xf32> to vector<32x128xf32>
    %53 = vector.extract_strided_slice %50 {offsets = [0, 128], sizes = [32, 128], strides = [1, 1]} : vector<32x256xf32> to vector<32x128xf32>
    %54 = arith.addf %51, %53 : vector<32x128xf32>
    %55 = arith.maximumf %52, %53 : vector<32x128xf32>
    %56 = arith.mulf %54, %55 : vector<32x128xf32>
    %57 = arith.addf %31, %56 : vector<32x128xf32>
    %c0_33 = arith.constant 0 : index
    %c0_34 = arith.constant 0 : index
    %58 = vector.load %arg1[%c0_33, %c0_34] : memref<128x128xbf16, #tpu.memory_space<vmem>>, vector<128x128xbf16>
    %cst_35 = arith.constant dense<0.000000e+00> : vector<32x128xf32>
    %59 = tpu.matmul %57, %58, %cst_35 {dimension_numbers = #tpu.dot_dimension_numbers<[1], [0], [0], [1], [0, 0, 1, 1], [], []>} : vector<32x128xf32>, vector<128x128xbf16>, vector<32x128xf32> -> vector<32x128xf32>
    %c127_i32_36 = arith.constant 127 : i32
    %60 = tpu.dynamic_rotate %48 by %c127_i32_36 dim 1 : vector<32x128xf32>, i32 -> vector<32x128xf32>
    %c1_i32_37 = arith.constant 1 : i32
    %61 = tpu.dynamic_rotate %48 by %c1_i32_37 dim 1 : vector<32x128xf32>, i32 -> vector<32x128xf32>
    %62 = arith.select %20, %60, %61 : vector<32x128xi1>, vector<32x128xf32>
    %63 = arith.select %22, %48, %62 : vector<32x128xi1>, vector<32x128xf32>
    %64 = arith.subf %59, %63 : vector<32x128xf32>
    %c1 = arith.constant 1 : index
    %c0_38 = arith.constant 0 : index
    %c0_39 = arith.constant 0 : index
    %65 = vector.load %arg11[%c1, %c0_38, %c0_39] : memref<2x32x32xf32, #tpu.memory_space<vmem>>, vector<1x32x32xf32>
    %66 = vector.shape_cast %65 : vector<1x32x32xf32> to vector<32x32xf32>
    %cst_40 = arith.constant dense<0.000000e+00> : vector<32x128xf32>
    %67 = tpu.matmul %66, %64, %cst_40 {dimension_numbers = #tpu.dot_dimension_numbers<[1], [0], [0], [1], [0, 0, 1, 1], [], []>} : vector<32x32xf32>, vector<32x128xf32>, vector<32x128xf32> -> vector<32x128xf32>
    %68 = arith.addf %15, %67 : vector<32x128xf32>
    %c1_41 = arith.constant 1 : index
    %c0_42 = arith.constant 0 : index
    %c0_43 = arith.constant 0 : index
    %69 = vector.load %arg12[%c1_41, %c0_42, %c0_43] : memref<2x32x1xf32, #tpu.memory_space<vmem>>, vector<1x32x1xf32>
    %70 = vector.shape_cast %69 : vector<1x32x1xf32> to vector<32x1xf32>
    %71 = vector.broadcast %70 : vector<32x1xf32> to vector<32x128xf32>
    %72 = arith.addf %68, %71 : vector<32x128xf32>
    %cst_44 = arith.constant 0.000000e+00 : f32
    %73 = vector.broadcast %cst_44 : f32 to vector<32x128xf32>
    %74 = arith.maximumf %72, %73 : vector<32x128xf32>
    %c0_45 = arith.constant 0 : index
    %c0_46 = arith.constant 0 : index
    %75 = vector.load %arg0[%c0_45, %c0_46] : memref<128x256xbf16, #tpu.memory_space<vmem>>, vector<128x256xbf16>
    %cst_47 = arith.constant dense<0.000000e+00> : vector<32x256xf32>
    %76 = tpu.matmul %74, %75, %cst_47 {dimension_numbers = #tpu.dot_dimension_numbers<[1], [0], [0], [1], [0, 0, 1, 1], [], []>} : vector<32x128xf32>, vector<128x256xbf16>, vector<32x256xf32> -> vector<32x256xf32>
    %77 = vector.extract_strided_slice %76 {offsets = [0, 0], sizes = [32, 128], strides = [1, 1]} : vector<32x256xf32> to vector<32x128xf32>
    %78 = vector.extract_strided_slice %76 {offsets = [0, 0], sizes = [32, 128], strides = [1, 1]} : vector<32x256xf32> to vector<32x128xf32>
    %79 = vector.extract_strided_slice %76 {offsets = [0, 128], sizes = [32, 128], strides = [1, 1]} : vector<32x256xf32> to vector<32x128xf32>
    %80 = arith.addf %77, %79 : vector<32x128xf32>
    %81 = arith.maximumf %78, %79 : vector<32x128xf32>
    %82 = arith.mulf %80, %81 : vector<32x128xf32>
    %c0_48 = arith.constant 0 : index
    %c0_49 = arith.constant 0 : index
    %83 = vector.load %arg13[%c0_48, %c0_49] : memref<32x96xf32, #tpu.memory_space<vmem>>, vector<32x96xf32>
    %84 = tpu.concatenate %82, %57, %7 in 0 : vector<32x128xf32>, vector<32x128xf32>, vector<32x128xf32> -> vector<96x128xf32>
    %cst_50 = arith.constant dense<0.000000e+00> : vector<32x128xf32>
    %85 = tpu.matmul %83, %84, %cst_50 {dimension_numbers = #tpu.dot_dimension_numbers<[1], [0], [0], [1], [0, 0, 1, 1], [], []>} : vector<32x96xf32>, vector<96x128xf32>, vector<32x128xf32> -> vector<32x128xf32>
    %c0_51 = arith.constant 0 : index
    %c0_52 = arith.constant 0 : index
    %86 = vector.load %arg14[%c0_51, %c0_52] : memref<32x1xf32, #tpu.memory_space<vmem>>, vector<32x1xf32>
    %87 = vector.broadcast %86 : vector<32x1xf32> to vector<32x128xf32>
    %88 = arith.addf %85, %87 : vector<32x128xf32>
    %c0_53 = arith.constant 0 : index
    %c0_54 = arith.constant 0 : index
    %89 = vector.load %arg15[%c0_53, %c0_54] : memref<32x1xf32, #tpu.memory_space<vmem>>, vector<32x1xf32>
    %90 = vector.broadcast %89 : vector<32x1xf32> to vector<32x128xf32>
    %91 = arith.addf %88, %90 : vector<32x128xf32>
    %cst_55 = arith.constant 0.000000e+00 : f32
    %92 = vector.broadcast %cst_55 : f32 to vector<32x128xf32>
    %93 = arith.maximumf %91, %92 : vector<32x128xf32>
    %c0_56 = arith.constant 0 : index
    %c0_57 = arith.constant 0 : index
    %94 = vector.load %arg2[%c0_56, %c0_57] : memref<128x512xbf16, #tpu.memory_space<vmem>>, vector<128x512xbf16>
    %cst_58 = arith.constant dense<0.000000e+00> : vector<32x512xf32>
    %95 = tpu.matmul %93, %94, %cst_58 {dimension_numbers = #tpu.dot_dimension_numbers<[1], [0], [0], [1], [0, 0, 1, 1], [], []>} : vector<32x128xf32>, vector<128x512xbf16>, vector<32x512xf32> -> vector<32x512xf32>
    %c0_59 = arith.constant 0 : index
    %c0_60 = arith.constant 0 : index
    %96 = vector.load %arg2[%c0_59, %c0_60] : memref<128x512xbf16, #tpu.memory_space<vmem>>, vector<128x512xbf16>
    %cst_61 = arith.constant dense<0.000000e+00> : vector<32x512xf32>
    %97 = tpu.matmul %88, %96, %cst_61 {dimension_numbers = #tpu.dot_dimension_numbers<[1], [0], [0], [1], [0, 0, 1, 1], [], []>} : vector<32x128xf32>, vector<128x512xbf16>, vector<32x512xf32> -> vector<32x512xf32>
    %c0_62 = arith.constant 0 : index
    %c0_63 = arith.constant 0 : index
    %98 = vector.load %arg3[%c0_62, %c0_63] : memref<1x512xf32, #tpu.memory_space<vmem>>, vector<1x512xf32>
    %99 = vector.broadcast %98 : vector<1x512xf32> to vector<32x512xf32>
    %100 = arith.addf %97, %99 : vector<32x512xf32>
    %101 = vector.extract_strided_slice %100 {offsets = [0, 0], sizes = [32, 128], strides = [1, 1]} : vector<32x512xf32> to vector<32x128xf32>
    %102 = vector.extract_strided_slice %100 {offsets = [0, 128], sizes = [32, 128], strides = [1, 1]} : vector<32x512xf32> to vector<32x128xf32>
    %103 = arith.maximumf %101, %102 : vector<32x128xf32>
    %104 = vector.extract_strided_slice %100 {offsets = [0, 256], sizes = [32, 128], strides = [1, 1]} : vector<32x512xf32> to vector<32x128xf32>
    %105 = arith.maximumf %103, %104 : vector<32x128xf32>
    %106 = vector.extract_strided_slice %100 {offsets = [0, 384], sizes = [32, 128], strides = [1, 1]} : vector<32x512xf32> to vector<32x128xf32>
    %107 = arith.maximumf %105, %106 : vector<32x128xf32>
    %c0_64 = arith.constant 0 : index
    %c0_65 = arith.constant 0 : index
    %108 = vector.load %arg16[%c0_64, %c0_65] : memref<192x32xf32, #tpu.memory_space<vmem>>, vector<192x32xf32>
    %cst_66 = arith.constant dense<0.000000e+00> : vector<192x512xf32>
    %109 = tpu.matmul %108, %95, %cst_66 {dimension_numbers = #tpu.dot_dimension_numbers<[1], [0], [0], [1], [0, 0, 1, 1], [], []>} : vector<192x32xf32>, vector<32x512xf32>, vector<192x512xf32> -> vector<192x512xf32>
    %c0_67 = arith.constant 0 : index
    %c0_68 = arith.constant 0 : index
    %110 = vector.load %arg17[%c0_67, %c0_68] : memref<192x1xf32, #tpu.memory_space<vmem>>, vector<192x1xf32>
    %111 = vector.broadcast %110 : vector<192x1xf32> to vector<192x512xf32>
    %112 = arith.addf %109, %111 : vector<192x512xf32>
    %113 = vector.extract_strided_slice %112 {offsets = [0, 0], sizes = [96, 128], strides = [1, 1]} : vector<192x512xf32> to vector<96x128xf32>
    %c0_69 = arith.constant 0 : index
    %c0_70 = arith.constant 0 : index
    %114 = vector.load %arg18[%c0_69, %c0_70] : memref<96x32xf32, #tpu.memory_space<vmem>>, vector<96x32xf32>
    %cst_71 = arith.constant dense<0.000000e+00> : vector<96x128xf32>
    %115 = tpu.matmul %114, %107, %cst_71 {dimension_numbers = #tpu.dot_dimension_numbers<[1], [0], [0], [1], [0, 0, 1, 1], [], []>} : vector<96x32xf32>, vector<32x128xf32>, vector<96x128xf32> -> vector<96x128xf32>
    %c0_72 = arith.constant 0 : index
    %c0_73 = arith.constant 0 : index
    %116 = vector.load %arg19[%c0_72, %c0_73] : memref<96x1xf32, #tpu.memory_space<vmem>>, vector<96x1xf32>
    %117 = vector.broadcast %116 : vector<96x1xf32> to vector<96x128xf32>
    %118 = arith.addf %115, %117 : vector<96x128xf32>
    %119 = vector.extract_strided_slice %113 {offsets = [0, 0], sizes = [64, 128], strides = [1, 1]} : vector<96x128xf32> to vector<64x128xf32>
    %120 = vector.extract_strided_slice %118 {offsets = [0, 0], sizes = [64, 128], strides = [1, 1]} : vector<96x128xf32> to vector<64x128xf32>
    %121 = arith.addf %119, %120 : vector<64x128xf32>
    %122 = arith.negf %121 : vector<64x128xf32>
    %123 = math.exp %122 : vector<64x128xf32>
    %cst_74 = arith.constant 1.000000e+00 : f32
    %124 = vector.broadcast %cst_74 : f32 to vector<64x128xf32>
    %125 = arith.addf %124, %123 : vector<64x128xf32>
    %126 = arith.divf %124, %125 : vector<64x128xf32>
    %127 = vector.extract_strided_slice %126 {offsets = [0, 0], sizes = [32, 128], strides = [1, 1]} : vector<64x128xf32> to vector<32x128xf32>
    %128 = vector.extract_strided_slice %126 {offsets = [32, 0], sizes = [32, 128], strides = [1, 1]} : vector<64x128xf32> to vector<32x128xf32>
    %129 = vector.extract_strided_slice %113 {offsets = [64, 0], sizes = [32, 128], strides = [1, 1]} : vector<96x128xf32> to vector<32x128xf32>
    %130 = vector.extract_strided_slice %118 {offsets = [64, 0], sizes = [32, 128], strides = [1, 1]} : vector<96x128xf32> to vector<32x128xf32>
    %131 = arith.mulf %127, %130 : vector<32x128xf32>
    %132 = arith.addf %129, %131 : vector<32x128xf32>
    %133 = math.tanh %132 : vector<32x128xf32>
    %cst_75 = arith.constant 1.000000e+00 : f32
    %134 = vector.broadcast %cst_75 : f32 to vector<32x128xf32>
    %135 = arith.subf %134, %128 : vector<32x128xf32>
    %136 = arith.mulf %135, %133 : vector<32x128xf32>
    %137 = arith.mulf %128, %107 : vector<32x128xf32>
    %138 = arith.addf %136, %137 : vector<32x128xf32>
    %139 = vector.extract_strided_slice %112 {offsets = [96, 384], sizes = [96, 128], strides = [1, 1]} : vector<192x512xf32> to vector<96x128xf32>
    %c0_76 = arith.constant 0 : index
    %c0_77 = arith.constant 0 : index
    %140 = vector.load %arg20[%c0_76, %c0_77] : memref<96x32xf32, #tpu.memory_space<vmem>>, vector<96x32xf32>
    %cst_78 = arith.constant dense<0.000000e+00> : vector<96x128xf32>
    %141 = tpu.matmul %140, %107, %cst_78 {dimension_numbers = #tpu.dot_dimension_numbers<[1], [0], [0], [1], [0, 0, 1, 1], [], []>} : vector<96x32xf32>, vector<32x128xf32>, vector<96x128xf32> -> vector<96x128xf32>
    %c0_79 = arith.constant 0 : index
    %c0_80 = arith.constant 0 : index
    %142 = vector.load %arg21[%c0_79, %c0_80] : memref<96x1xf32, #tpu.memory_space<vmem>>, vector<96x1xf32>
    %143 = vector.broadcast %142 : vector<96x1xf32> to vector<96x128xf32>
    %144 = arith.addf %141, %143 : vector<96x128xf32>
    %145 = vector.extract_strided_slice %139 {offsets = [0, 0], sizes = [64, 128], strides = [1, 1]} : vector<96x128xf32> to vector<64x128xf32>
    %146 = vector.extract_strided_slice %144 {offsets = [0, 0], sizes = [64, 128], strides = [1, 1]} : vector<96x128xf32> to vector<64x128xf32>
    %147 = arith.addf %145, %146 : vector<64x128xf32>
    %148 = arith.negf %147 : vector<64x128xf32>
    %149 = math.exp %148 : vector<64x128xf32>
    %cst_81 = arith.constant 1.000000e+00 : f32
    %150 = vector.broadcast %cst_81 : f32 to vector<64x128xf32>
    %151 = arith.addf %150, %149 : vector<64x128xf32>
    %152 = arith.divf %150, %151 : vector<64x128xf32>
    %153 = vector.extract_strided_slice %152 {offsets = [0, 0], sizes = [32, 128], strides = [1, 1]} : vector<64x128xf32> to vector<32x128xf32>
    %154 = vector.extract_strided_slice %152 {offsets = [32, 0], sizes = [32, 128], strides = [1, 1]} : vector<64x128xf32> to vector<32x128xf32>
    %155 = vector.extract_strided_slice %139 {offsets = [64, 0], sizes = [32, 128], strides = [1, 1]} : vector<96x128xf32> to vector<32x128xf32>
    %156 = vector.extract_strided_slice %144 {offsets = [64, 0], sizes = [32, 128], strides = [1, 1]} : vector<96x128xf32> to vector<32x128xf32>
    %157 = arith.mulf %153, %156 : vector<32x128xf32>
    %158 = arith.addf %155, %157 : vector<32x128xf32>
    %159 = math.tanh %158 : vector<32x128xf32>
    %cst_82 = arith.constant 1.000000e+00 : f32
    %160 = vector.broadcast %cst_82 : f32 to vector<32x128xf32>
    %161 = arith.subf %160, %154 : vector<32x128xf32>
    %162 = arith.mulf %161, %159 : vector<32x128xf32>
    %163 = arith.mulf %154, %107 : vector<32x128xf32>
    %164 = arith.addf %162, %163 : vector<32x128xf32>
    %c0_83 = arith.constant 0 : index
    %c0_84 = arith.constant 0 : index
    %165 = vector.load %arg25[%c0_83, %c0_84] : memref<64x512xf32, #tpu.memory_space<vmem>>, vector<32x128xf32>
    tpu.vector_store %arg25[%c0_83, %c0_84], %138 {strides = array<i32>} : memref<64x512xf32, #tpu.memory_space<vmem>>, vector<32x128xf32>,
    %c32 = arith.constant 32 : index
    %c384 = arith.constant 384 : index
    %166 = vector.load %arg25[%c32, %c384] : memref<64x512xf32, #tpu.memory_space<vmem>>, vector<32x128xf32>
    tpu.vector_store %arg25[%c32, %c384], %164 {strides = array<i32>} : memref<64x512xf32, #tpu.memory_space<vmem>>, vector<32x128xf32>,
    %167 = vector.extract_strided_slice %112 {offsets = [0, 128], sizes = [96, 128], strides = [1, 1]} : vector<192x512xf32> to vector<96x128xf32>
    %c0_85 = arith.constant 0 : index
    %c0_86 = arith.constant 0 : index
    %168 = vector.load %arg18[%c0_85, %c0_86] : memref<96x32xf32, #tpu.memory_space<vmem>>, vector<96x32xf32>
    %cst_87 = arith.constant dense<0.000000e+00> : vector<96x128xf32>
    %169 = tpu.matmul %168, %138, %cst_87 {dimension_numbers = #tpu.dot_dimension_numbers<[1], [0], [0], [1], [0, 0, 1, 1], [], []>} : vector<96x32xf32>, vector<32x128xf32>, vector<96x128xf32> -> vector<96x128xf32>
    %c0_88 = arith.constant 0 : index
    %c0_89 = arith.constant 0 : index
    %170 = vector.load %arg19[%c0_88, %c0_89] : memref<96x1xf32, #tpu.memory_space<vmem>>, vector<96x1xf32>
    %171 = vector.broadcast %170 : vector<96x1xf32> to vector<96x128xf32>
    %172 = arith.addf %169, %171 : vector<96x128xf32>
    %173 = vector.extract_strided_slice %167 {offsets = [0, 0], sizes = [64, 128], strides = [1, 1]} : vector<96x128xf32> to vector<64x128xf32>
    %174 = vector.extract_strided_slice %172 {offsets = [0, 0], sizes = [64, 128], strides = [1, 1]} : vector<96x128xf32> to vector<64x128xf32>
    %175 = arith.addf %173, %174 : vector<64x128xf32>
    %176 = arith.negf %175 : vector<64x128xf32>
    %177 = math.exp %176 : vector<64x128xf32>
    %cst_90 = arith.constant 1.000000e+00 : f32
    %178 = vector.broadcast %cst_90 : f32 to vector<64x128xf32>
    %179 = arith.addf %178, %177 : vector<64x128xf32>
    %180 = arith.divf %178, %179 : vector<64x128xf32>
    %181 = vector.extract_strided_slice %180 {offsets = [0, 0], sizes = [32, 128], strides = [1, 1]} : vector<64x128xf32> to vector<32x128xf32>
    %182 = vector.extract_strided_slice %180 {offsets = [32, 0], sizes = [32, 128], strides = [1, 1]} : vector<64x128xf32> to vector<32x128xf32>
    %183 = vector.extract_strided_slice %167 {offsets = [64, 0], sizes = [32, 128], strides = [1, 1]} : vector<96x128xf32> to vector<32x128xf32>
    %184 = vector.extract_strided_slice %172 {offsets = [64, 0], sizes = [32, 128], strides = [1, 1]} : vector<96x128xf32> to vector<32x128xf32>
    %185 = arith.mulf %181, %184 : vector<32x128xf32>
    %186 = arith.addf %183, %185 : vector<32x128xf32>
    %187 = math.tanh %186 : vector<32x128xf32>
    %cst_91 = arith.constant 1.000000e+00 : f32
    %188 = vector.broadcast %cst_91 : f32 to vector<32x128xf32>
    %189 = arith.subf %188, %182 : vector<32x128xf32>
    %190 = arith.mulf %189, %187 : vector<32x128xf32>
    %191 = arith.mulf %182, %138 : vector<32x128xf32>
    %192 = arith.addf %190, %191 : vector<32x128xf32>
    %193 = vector.extract_strided_slice %112 {offsets = [96, 256], sizes = [96, 128], strides = [1, 1]} : vector<192x512xf32> to vector<96x128xf32>
    %c0_92 = arith.constant 0 : index
    %c0_93 = arith.constant 0 : index
    %194 = vector.load %arg20[%c0_92, %c0_93] : memref<96x32xf32, #tpu.memory_space<vmem>>, vector<96x32xf32>
    %cst_94 = arith.constant dense<0.000000e+00> : vector<96x128xf32>
    %195 = tpu.matmul %194, %164, %cst_94 {dimension_numbers = #tpu.dot_dimension_numbers<[1], [0], [0], [1], [0, 0, 1, 1], [], []>} : vector<96x32xf32>, vector<32x128xf32>, vector<96x128xf32> -> vector<96x128xf32>
    %c0_95 = arith.constant 0 : index
    %c0_96 = arith.constant 0 : index
    %196 = vector.load %arg21[%c0_95, %c0_96] : memref<96x1xf32, #tpu.memory_space<vmem>>, vector<96x1xf32>
    %197 = vector.broadcast %196 : vector<96x1xf32> to vector<96x128xf32>
    %198 = arith.addf %195, %197 : vector<96x128xf32>
    %199 = vector.extract_strided_slice %193 {offsets = [0, 0], sizes = [64, 128], strides = [1, 1]} : vector<96x128xf32> to vector<64x128xf32>
    %200 = vector.extract_strided_slice %198 {offsets = [0, 0], sizes = [64, 128], strides = [1, 1]} : vector<96x128xf32> to vector<64x128xf32>
    %201 = arith.addf %199, %200 : vector<64x128xf32>
    %202 = arith.negf %201 : vector<64x128xf32>
    %203 = math.exp %202 : vector<64x128xf32>
    %cst_97 = arith.constant 1.000000e+00 : f32
    %204 = vector.broadcast %cst_97 : f32 to vector<64x128xf32>
    %205 = arith.addf %204, %203 : vector<64x128xf32>
    %206 = arith.divf %204, %205 : vector<64x128xf32>
    %207 = vector.extract_strided_slice %206 {offsets = [0, 0], sizes = [32, 128], strides = [1, 1]} : vector<64x128xf32> to vector<32x128xf32>
    %208 = vector.extract_strided_slice %206 {offsets = [32, 0], sizes = [32, 128], strides = [1, 1]} : vector<64x128xf32> to vector<32x128xf32>
    %209 = vector.extract_strided_slice %193 {offsets = [64, 0], sizes = [32, 128], strides = [1, 1]} : vector<96x128xf32> to vector<32x128xf32>
    %210 = vector.extract_strided_slice %198 {offsets = [64, 0], sizes = [32, 128], strides = [1, 1]} : vector<96x128xf32> to vector<32x128xf32>
    %211 = arith.mulf %207, %210 : vector<32x128xf32>
    %212 = arith.addf %209, %211 : vector<32x128xf32>
    %213 = math.tanh %212 : vector<32x128xf32>
    %cst_98 = arith.constant 1.000000e+00 : f32
    %214 = vector.broadcast %cst_98 : f32 to vector<32x128xf32>
    %215 = arith.subf %214, %208 : vector<32x128xf32>
    %216 = arith.mulf %215, %213 : vector<32x128xf32>
    %217 = arith.mulf %208, %164 : vector<32x128xf32>
    %218 = arith.addf %216, %217 : vector<32x128xf32>
    %c0_99 = arith.constant 0 : index
    %c128 = arith.constant 128 : index
    %219 = vector.load %arg25[%c0_99, %c128] : memref<64x512xf32, #tpu.memory_space<vmem>>, vector<32x128xf32>
    tpu.vector_store %arg25[%c0_99, %c128], %192 {strides = array<i32>} : memref<64x512xf32, #tpu.memory_space<vmem>>, vector<32x128xf32>,
    %c32_100 = arith.constant 32 : index
    %c256 = arith.constant 256 : index
    %220 = vector.load %arg25[%c32_100, %c256] : memref<64x512xf32, #tpu.memory_space<vmem>>, vector<32x128xf32>
    tpu.vector_store %arg25[%c32_100, %c256], %218 {strides = array<i32>} : memref<64x512xf32, #tpu.memory_space<vmem>>, vector<32x128xf32>,
    %221 = vector.extract_strided_slice %112 {offsets = [0, 256], sizes = [96, 128], strides = [1, 1]} : vector<192x512xf32> to vector<96x128xf32>
    %c0_101 = arith.constant 0 : index
    %c0_102 = arith.constant 0 : index
    %222 = vector.load %arg18[%c0_101, %c0_102] : memref<96x32xf32, #tpu.memory_space<vmem>>, vector<96x32xf32>
    %cst_103 = arith.constant dense<0.000000e+00> : vector<96x128xf32>
    %223 = tpu.matmul %222, %192, %cst_103 {dimension_numbers = #tpu.dot_dimension_numbers<[1], [0], [0], [1], [0, 0, 1, 1], [], []>} : vector<96x32xf32>, vector<32x128xf32>, vector<96x128xf32> -> vector<96x128xf32>
    %c0_104 = arith.constant 0 : index
    %c0_105 = arith.constant 0 : index
    %224 = vector.load %arg19[%c0_104, %c0_105] : memref<96x1xf32, #tpu.memory_space<vmem>>, vector<96x1xf32>
    %225 = vector.broadcast %224 : vector<96x1xf32> to vector<96x128xf32>
    %226 = arith.addf %223, %225 : vector<96x128xf32>
    %227 = vector.extract_strided_slice %221 {offsets = [0, 0], sizes = [64, 128], strides = [1, 1]} : vector<96x128xf32> to vector<64x128xf32>
    %228 = vector.extract_strided_slice %226 {offsets = [0, 0], sizes = [64, 128], strides = [1, 1]} : vector<96x128xf32> to vector<64x128xf32>
    %229 = arith.addf %227, %228 : vector<64x128xf32>
    %230 = arith.negf %229 : vector<64x128xf32>
    %231 = math.exp %230 : vector<64x128xf32>
    %cst_106 = arith.constant 1.000000e+00 : f32
    %232 = vector.broadcast %cst_106 : f32 to vector<64x128xf32>
    %233 = arith.addf %232, %231 : vector<64x128xf32>
    %234 = arith.divf %232, %233 : vector<64x128xf32>
    %235 = vector.extract_strided_slice %234 {offsets = [0, 0], sizes = [32, 128], strides = [1, 1]} : vector<64x128xf32> to vector<32x128xf32>
    %236 = vector.extract_strided_slice %234 {offsets = [32, 0], sizes = [32, 128], strides = [1, 1]} : vector<64x128xf32> to vector<32x128xf32>
    %237 = vector.extract_strided_slice %221 {offsets = [64, 0], sizes = [32, 128], strides = [1, 1]} : vector<96x128xf32> to vector<32x128xf32>
    %238 = vector.extract_strided_slice %226 {offsets = [64, 0], sizes = [32, 128], strides = [1, 1]} : vector<96x128xf32> to vector<32x128xf32>
    %239 = arith.mulf %235, %238 : vector<32x128xf32>
    %240 = arith.addf %237, %239 : vector<32x128xf32>
    %241 = math.tanh %240 : vector<32x128xf32>
    %cst_107 = arith.constant 1.000000e+00 : f32
    %242 = vector.broadcast %cst_107 : f32 to vector<32x128xf32>
    %243 = arith.subf %242, %236 : vector<32x128xf32>
    %244 = arith.mulf %243, %241 : vector<32x128xf32>
    %245 = arith.mulf %236, %192 : vector<32x128xf32>
    %246 = arith.addf %244, %245 : vector<32x128xf32>
    %247 = vector.extract_strided_slice %112 {offsets = [96, 128], sizes = [96, 128], strides = [1, 1]} : vector<192x512xf32> to vector<96x128xf32>
    %c0_108 = arith.constant 0 : index
    %c0_109 = arith.constant 0 : index
    %248 = vector.load %arg20[%c0_108, %c0_109] : memref<96x32xf32, #tpu.memory_space<vmem>>, vector<96x32xf32>
    %cst_110 = arith.constant dense<0.000000e+00> : vector<96x128xf32>
    %249 = tpu.matmul %248, %218, %cst_110 {dimension_numbers = #tpu.dot_dimension_numbers<[1], [0], [0], [1], [0, 0, 1, 1], [], []>} : vector<96x32xf32>, vector<32x128xf32>, vector<96x128xf32> -> vector<96x128xf32>
    %c0_111 = arith.constant 0 : index
    %c0_112 = arith.constant 0 : index
    %250 = vector.load %arg21[%c0_111, %c0_112] : memref<96x1xf32, #tpu.memory_space<vmem>>, vector<96x1xf32>
    %251 = vector.broadcast %250 : vector<96x1xf32> to vector<96x128xf32>
    %252 = arith.addf %249, %251 : vector<96x128xf32>
    %253 = vector.extract_strided_slice %247 {offsets = [0, 0], sizes = [64, 128], strides = [1, 1]} : vector<96x128xf32> to vector<64x128xf32>
    %254 = vector.extract_strided_slice %252 {offsets = [0, 0], sizes = [64, 128], strides = [1, 1]} : vector<96x128xf32> to vector<64x128xf32>
    %255 = arith.addf %253, %254 : vector<64x128xf32>
    %256 = arith.negf %255 : vector<64x128xf32>
    %257 = math.exp %256 : vector<64x128xf32>
    %cst_113 = arith.constant 1.000000e+00 : f32
    %258 = vector.broadcast %cst_113 : f32 to vector<64x128xf32>
    %259 = arith.addf %258, %257 : vector<64x128xf32>
    %260 = arith.divf %258, %259 : vector<64x128xf32>
    %261 = vector.extract_strided_slice %260 {offsets = [0, 0], sizes = [32, 128], strides = [1, 1]} : vector<64x128xf32> to vector<32x128xf32>
    %262 = vector.extract_strided_slice %260 {offsets = [32, 0], sizes = [32, 128], strides = [1, 1]} : vector<64x128xf32> to vector<32x128xf32>
    %263 = vector.extract_strided_slice %247 {offsets = [64, 0], sizes = [32, 128], strides = [1, 1]} : vector<96x128xf32> to vector<32x128xf32>
    %264 = vector.extract_strided_slice %252 {offsets = [64, 0], sizes = [32, 128], strides = [1, 1]} : vector<96x128xf32> to vector<32x128xf32>
    %265 = arith.mulf %261, %264 : vector<32x128xf32>
    %266 = arith.addf %263, %265 : vector<32x128xf32>
    %267 = math.tanh %266 : vector<32x128xf32>
    %cst_114 = arith.constant 1.000000e+00 : f32
    %268 = vector.broadcast %cst_114 : f32 to vector<32x128xf32>
    %269 = arith.subf %268, %262 : vector<32x128xf32>
    %270 = arith.mulf %269, %267 : vector<32x128xf32>
    %271 = arith.mulf %262, %218 : vector<32x128xf32>
    %272 = arith.addf %270, %271 : vector<32x128xf32>
    %c0_115 = arith.constant 0 : index
    %c256_116 = arith.constant 256 : index
    %273 = vector.load %arg25[%c0_115, %c256_116] : memref<64x512xf32, #tpu.memory_space<vmem>>, vector<32x128xf32>
    tpu.vector_store %arg25[%c0_115, %c256_116], %246 {strides = array<i32>} : memref<64x512xf32, #tpu.memory_space<vmem>>, vector<32x128xf32>,
    %c32_117 = arith.constant 32 : index
    %c128_118 = arith.constant 128 : index
    %274 = vector.load %arg25[%c32_117, %c128_118] : memref<64x512xf32, #tpu.memory_space<vmem>>, vector<32x128xf32>
    tpu.vector_store %arg25[%c32_117, %c128_118], %272 {strides = array<i32>} : memref<64x512xf32, #tpu.memory_space<vmem>>, vector<32x128xf32>,
    %275 = vector.extract_strided_slice %112 {offsets = [0, 384], sizes = [96, 128], strides = [1, 1]} : vector<192x512xf32> to vector<96x128xf32>
    %c0_119 = arith.constant 0 : index
    %c0_120 = arith.constant 0 : index
    %276 = vector.load %arg18[%c0_119, %c0_120] : memref<96x32xf32, #tpu.memory_space<vmem>>, vector<96x32xf32>
    %cst_121 = arith.constant dense<0.000000e+00> : vector<96x128xf32>
    %277 = tpu.matmul %276, %246, %cst_121 {dimension_numbers = #tpu.dot_dimension_numbers<[1], [0], [0], [1], [0, 0, 1, 1], [], []>} : vector<96x32xf32>, vector<32x128xf32>, vector<96x128xf32> -> vector<96x128xf32>
    %c0_122 = arith.constant 0 : index
    %c0_123 = arith.constant 0 : index
    %278 = vector.load %arg19[%c0_122, %c0_123] : memref<96x1xf32, #tpu.memory_space<vmem>>, vector<96x1xf32>
    %279 = vector.broadcast %278 : vector<96x1xf32> to vector<96x128xf32>
    %280 = arith.addf %277, %279 : vector<96x128xf32>
    %281 = vector.extract_strided_slice %275 {offsets = [0, 0], sizes = [64, 128], strides = [1, 1]} : vector<96x128xf32> to vector<64x128xf32>
    %282 = vector.extract_strided_slice %280 {offsets = [0, 0], sizes = [64, 128], strides = [1, 1]} : vector<96x128xf32> to vector<64x128xf32>
    %283 = arith.addf %281, %282 : vector<64x128xf32>
    %284 = arith.negf %283 : vector<64x128xf32>
    %285 = math.exp %284 : vector<64x128xf32>
    %cst_124 = arith.constant 1.000000e+00 : f32
    %286 = vector.broadcast %cst_124 : f32 to vector<64x128xf32>
    %287 = arith.addf %286, %285 : vector<64x128xf32>
    %288 = arith.divf %286, %287 : vector<64x128xf32>
    %289 = vector.extract_strided_slice %288 {offsets = [0, 0], sizes = [32, 128], strides = [1, 1]} : vector<64x128xf32> to vector<32x128xf32>
    %290 = vector.extract_strided_slice %288 {offsets = [32, 0], sizes = [32, 128], strides = [1, 1]} : vector<64x128xf32> to vector<32x128xf32>
    %291 = vector.extract_strided_slice %275 {offsets = [64, 0], sizes = [32, 128], strides = [1, 1]} : vector<96x128xf32> to vector<32x128xf32>
    %292 = vector.extract_strided_slice %280 {offsets = [64, 0], sizes = [32, 128], strides = [1, 1]} : vector<96x128xf32> to vector<32x128xf32>
    %293 = arith.mulf %289, %292 : vector<32x128xf32>
    %294 = arith.addf %291, %293 : vector<32x128xf32>
    %295 = math.tanh %294 : vector<32x128xf32>
    %cst_125 = arith.constant 1.000000e+00 : f32
    %296 = vector.broadcast %cst_125 : f32 to vector<32x128xf32>
    %297 = arith.subf %296, %290 : vector<32x128xf32>
    %298 = arith.mulf %297, %295 : vector<32x128xf32>
    %299 = arith.mulf %290, %246 : vector<32x128xf32>
    %300 = arith.addf %298, %299 : vector<32x128xf32>
    %301 = vector.extract_strided_slice %112 {offsets = [96, 0], sizes = [96, 128], strides = [1, 1]} : vector<192x512xf32> to vector<96x128xf32>
    %c0_126 = arith.constant 0 : index
    %c0_127 = arith.constant 0 : index
    %302 = vector.load %arg20[%c0_126, %c0_127] : memref<96x32xf32, #tpu.memory_space<vmem>>, vector<96x32xf32>
    %cst_128 = arith.constant dense<0.000000e+00> : vector<96x128xf32>
    %303 = tpu.matmul %302, %272, %cst_128 {dimension_numbers = #tpu.dot_dimension_numbers<[1], [0], [0], [1], [0, 0, 1, 1], [], []>} : vector<96x32xf32>, vector<32x128xf32>, vector<96x128xf32> -> vector<96x128xf32>
    %c0_129 = arith.constant 0 : index
    %c0_130 = arith.constant 0 : index
    %304 = vector.load %arg21[%c0_129, %c0_130] : memref<96x1xf32, #tpu.memory_space<vmem>>, vector<96x1xf32>
    %305 = vector.broadcast %304 : vector<96x1xf32> to vector<96x128xf32>
    %306 = arith.addf %303, %305 : vector<96x128xf32>
    %307 = vector.extract_strided_slice %301 {offsets = [0, 0], sizes = [64, 128], strides = [1, 1]} : vector<96x128xf32> to vector<64x128xf32>
    %308 = vector.extract_strided_slice %306 {offsets = [0, 0], sizes = [64, 128], strides = [1, 1]} : vector<96x128xf32> to vector<64x128xf32>
    %309 = arith.addf %307, %308 : vector<64x128xf32>
    %310 = arith.negf %309 : vector<64x128xf32>
    %311 = math.exp %310 : vector<64x128xf32>
    %cst_131 = arith.constant 1.000000e+00 : f32
    %312 = vector.broadcast %cst_131 : f32 to vector<64x128xf32>
    %313 = arith.addf %312, %311 : vector<64x128xf32>
    %314 = arith.divf %312, %313 : vector<64x128xf32>
    %315 = vector.extract_strided_slice %314 {offsets = [0, 0], sizes = [32, 128], strides = [1, 1]} : vector<64x128xf32> to vector<32x128xf32>
    %316 = vector.extract_strided_slice %314 {offsets = [32, 0], sizes = [32, 128], strides = [1, 1]} : vector<64x128xf32> to vector<32x128xf32>
    %317 = vector.extract_strided_slice %301 {offsets = [64, 0], sizes = [32, 128], strides = [1, 1]} : vector<96x128xf32> to vector<32x128xf32>
    %318 = vector.extract_strided_slice %306 {offsets = [64, 0], sizes = [32, 128], strides = [1, 1]} : vector<96x128xf32> to vector<32x128xf32>
    %319 = arith.mulf %315, %318 : vector<32x128xf32>
    %320 = arith.addf %317, %319 : vector<32x128xf32>
    %321 = math.tanh %320 : vector<32x128xf32>
    %cst_132 = arith.constant 1.000000e+00 : f32
    %322 = vector.broadcast %cst_132 : f32 to vector<32x128xf32>
    %323 = arith.subf %322, %316 : vector<32x128xf32>
    %324 = arith.mulf %323, %321 : vector<32x128xf32>
    %325 = arith.mulf %316, %272 : vector<32x128xf32>
    %326 = arith.addf %324, %325 : vector<32x128xf32>
    %c0_133 = arith.constant 0 : index
    %c384_134 = arith.constant 384 : index
    %327 = vector.load %arg25[%c0_133, %c384_134] : memref<64x512xf32, #tpu.memory_space<vmem>>, vector<32x128xf32>
    tpu.vector_store %arg25[%c0_133, %c384_134], %300 {strides = array<i32>} : memref<64x512xf32, #tpu.memory_space<vmem>>, vector<32x128xf32>,
    %c32_135 = arith.constant 32 : index
    %c0_136 = arith.constant 0 : index
    %328 = vector.load %arg25[%c32_135, %c0_136] : memref<64x512xf32, #tpu.memory_space<vmem>>, vector<32x128xf32>
    tpu.vector_store %arg25[%c32_135, %c0_136], %326 {strides = array<i32>} : memref<64x512xf32, #tpu.memory_space<vmem>>, vector<32x128xf32>,
    %c0_137 = arith.constant 0 : index
    %c0_138 = arith.constant 0 : index
    %329 = vector.load %arg22[%c0_137, %c0_138] : memref<32x64xf32, #tpu.memory_space<vmem>>, vector<32x64xf32>
    %c0_139 = arith.constant 0 : index
    %c0_140 = arith.constant 0 : index
    %330 = vector.load %arg25[%c0_139, %c0_140] : memref<64x512xf32, #tpu.memory_space<vmem>>, vector<64x512xf32>
    %cst_141 = arith.constant dense<0.000000e+00> : vector<32x512xf32>
    %331 = tpu.matmul %329, %330, %cst_141 {dimension_numbers = #tpu.dot_dimension_numbers<[1], [0], [0], [1], [0, 0, 1, 1], [], []>} : vector<32x64xf32>, vector<64x512xf32>, vector<32x512xf32> -> vector<32x512xf32>
    %c0_142 = arith.constant 0 : index
    %c0_143 = arith.constant 0 : index
    %332 = vector.load %arg23[%c0_142, %c0_143] : memref<32x1xf32, #tpu.memory_space<vmem>>, vector<32x1xf32>
    %333 = vector.broadcast %332 : vector<32x1xf32> to vector<32x512xf32>
    %334 = arith.addf %331, %333 : vector<32x512xf32>
    %cst_144 = arith.constant 0.000000e+00 : f32
    %335 = vector.broadcast %cst_144 : f32 to vector<32x512xf32>
    %336 = arith.maximumf %334, %335 : vector<32x512xf32>
    %c0_145 = arith.constant 0 : index
    %c0_146 = arith.constant 0 : index
    %337 = vector.load %arg4[%c0_145, %c0_146] : memref<512x128xf32, #tpu.memory_space<vmem>>, vector<512x128xf32>
    %cst_147 = arith.constant dense<0.000000e+00> : vector<32x128xf32>
    %338 = tpu.matmul %336, %337, %cst_147 {dimension_numbers = #tpu.dot_dimension_numbers<[1], [0], [0], [1], [0, 0, 1, 1], [], []>} : vector<32x512xf32>, vector<512x128xf32>, vector<32x128xf32> -> vector<32x128xf32>
    %c0_148 = arith.constant 0 : index
    %c0_149 = arith.constant 0 : index
    %339 = vector.load %arg24[%c0_148, %c0_149] : memref<32x128xf32, #tpu.memory_space<vmem>>, vector<32x128xf32>
    tpu.vector_store %arg24[%c0_148, %c0_149], %338 {strides = array<i32>} : memref<32x128xf32, #tpu.memory_space<vmem>>, vector<32x128xf32>,
    return
  }
}

</mosaic_0001>

<bundles_post_ra>
// kernel: tpu_custom_call.1
= control target key start
LH: loop header
LB: loop body
LE: loop exit
PB: predicated region body
PF: predicated region fallthrough
CT: control target
= control target key end

     0   :  { %s10856_s0 = inlined_call_operand.vmem [shape: bf16[128,256], index: 0, kind: input, shape index: {}]   ;;  %s10857_s1 = inlined_call_operand.vmem [shape: bf16[128,128], index: 1, kind: input, shape index: {}]   ;;  %s10858_s2 = inlined_call_operand.vmem [shape: bf16[128,512], index: 2, kind: input, shape index: {}]   ;;  %s10859_s3 = inlined_call_operand.vmem [shape: f32[1,512], index: 3, kind: input, shape index: {}]   ;;  %s10860_s4 = inlined_call_operand.hbm [shape: f32[512,128], index: 4, kind: input, shape index: {}]   ;;  %s10861_s5 = inlined_call_operand.vmem [shape: f32[16,128], index: 5, kind: input, shape index: {}]   ;;  %s10862_s6 = inlined_call_operand.vmem [shape: f32[24,128], index: 6, kind: input, shape index: {}]   ;;  %s10863_s7 = inlined_call_operand.vmem [shape: f32[32,16], index: 7, kind: input, shape index: {}]   ;;  %s10864_s8 = inlined_call_operand.vmem [shape: f32[32,1], index: 8, kind: input, shape index: {}]   ;;  %s10865_s9 = inlined_call_operand.vmem [shape: f32[32,24], index: 9, kind: input, shape index: {}]   ;;  %s10866_s10 = inlined_call_operand.vmem [shape: f32[32,1], index: 10, kind: input, shape index: {}]   ;;  %s10867_s11 = inlined_call_operand.vmem [shape: f32[2,32,32], index: 11, kind: input, shape index: {}]   ;;  %s10868_s12 = inlined_call_operand.vmem [shape: f32[2,32,1], index: 12, kind: input, shape index: {}]   ;;  %s10869_s13 = inlined_call_operand.vmem [shape: f32[32,96], index: 13, kind: input, shape index: {}]   ;;  %s10870_s14 = inlined_call_operand.vmem [shape: f32[32,1], index: 14, kind: input, shape index: {}]   ;;  %s10871_s15 = inlined_call_operand.vmem [shape: f32[32,1], index: 15, kind: input, shape index: {}]   ;;  %s10872_s16 = inlined_call_operand.vmem [shape: f32[192,32], index: 16, kind: input, shape index: {}]   ;;  %s10873_s17 = inlined_call_operand.vmem [shape: f32[192,1], index: 17, kind: input, shape index: {}]   ;;  %s10874_s18 = inlined_call_operand.vmem [shape: f32[96,32], index: 18, kind: input, shape index: {}]   ;;  %s10875_s19 = inlined_call_operand.vmem [shape: f32[96,1], index: 19, kind: input, shape index: {}]   ;;  %s10876_s20 = inlined_call_operand.vmem [shape: f32[96,32], index: 20, kind: input, shape index: {}]   ;;  %s10877_s21 = inlined_call_operand.vmem [shape: f32[96,1], index: 21, kind: input, shape index: {}]   ;;  %s10878_s22 = inlined_call_operand.vmem [shape: f32[32,64], index: 22, kind: input, shape index: {}]   ;;  %s10879_s23 = inlined_call_operand.vmem [shape: f32[32,1], index: 23, kind: input, shape index: {}]   ;;  %s10880_s24 = inlined_call_operand.hbm [shape: f32[32,128], index: 24, kind: output, shape index: {}]  }
   0x1   :  { %10973 = sst [smem:[#allocation101_spill]] %s10856_s0 }
   0x2   :  { %10974 = sst [smem:[#allocation102_spill]] %s10857_s1 }
   0x3   :  { %10975 = sst [smem:[#allocation103_spill]] %s10858_s2 }
   0x4   :  { %10976 = sst [smem:[#allocation104_spill]] %s10859_s3 }
   0x5   :  { %10977 = sst [smem:[#allocation105_spill]] %s10860_s4 }
   0x6   :  { %10978 = sst [smem:[#allocation106_spill]] %s10861_s5 }
   0x7   :  { %10979 = sst [smem:[#allocation107_spill]] %s10862_s6 }
   0x8   :  { %10980 = sst [smem:[#allocation108_spill]] %s10863_s7 }
   0x9   :  { %10981 = sst [smem:[#allocation109_spill]] %s10864_s8 }
   0xa   :  { %29 = vsyncpa [#allocation4], 0 }
   0xb   :  { %30 = vsyncpa [#allocation5], 0  ;;  %s10982_s27 = sld [smem:[#allocation105_spill]]  ;;  %s6259_s6 = smov [#allocation3]  }
   0xc   :  { %s45_s2 = sshll.u32 %s6259_s6, 4  ;;  %s6260_s29 = smov 128   ;;  %s46_s2 = int_to_ptr.vmem [resolvable:$true] %s45_s2 }
   0xd   :  { %s6261_s0 = smov 8  }
  0x11   :  { %s43_s28 = sshll.u32 %s10982_s27, 4  ;;  %s44_s28 = int_to_ptr.hbm [resolvable:$true] %s43_s28 }
  0x12   :  { %51 = dma.hbm_to_vmem [thread:$0]  %s44_s28, 8192, %s46_s2, [#allocation4], %s6260_s29, %s6260_s29, %s6261_s0  }
  0x13   :  { %6255 = dma.done.wait [#allocation4], 8192  }
  0x14   :  { %6256 = vsyncadd [#allocation4], 4294959104  ;;  %v6262_v0 = vmov 0   ;;  %v177_v1 = vld [vmem:[%s10866_s10] sm:$0xff]  ;;  %s10983_s8 = sld [smem:[#allocation106_spill]]  ;;  %vm124_vm0 = vcmask 130048  }
  0x15   :  { %5848 = vset.pattern.permute.xlu0 %v6262_v0  ;;  %5849 = vset.pattern.permute.xlu1 %v6262_v0  ;;  %s10984_s5 = sld [smem:[#allocation107_spill]]  ;;  %v179_v8 = vld [vmem:[%s10866_s10 + $0x10] sm:$0xff]  ;;  %v170_v9 = vld [vmem:[%s10865_s9] sm:$0xff]  ;;  %vm201_vm1 = vcmask 195584   ;;  %v178_v10 = vld [vmem:[%s10866_s10 + $0x8] sm:$0xff]  ;;  %s6264_s4 = smov 1  }
  0x16   :  { %5850 = vset.pattern.permute.xlu2 %v6262_v0  ;;  %183 = vperm.xlu0 %5848, %v177_v1   ;;  %s10985_s30 = sld [smem:[#allocation108_spill]]  ;;  %v180_v23 = vld [vmem:[%s10866_s10 + $0x18] sm:$0xff]  ;;  %v171_v29 = vld [vmem:[%s10865_s9 + $0x8] sm:$0xff]  ;;  %v172_v35 = vld [vmem:[%s10865_s9 + $0x10] sm:$0xff]  ;;  %vm523_vm4 = vcmask 261120   ;;  %vm873_vm5 = vcmask 785408  }
  0x17   :  { %193 = vperm.xlu1 %5849, %v179_v8   ;;  %s10986_s2 = sld [smem:[#allocation101_spill]]  ;;  %v173_v37 = vld [vmem:[%s10865_s9 + $0x18] sm:$0xff] }
  0x18   :  { %s10987_s27 = sld [smem:[#allocation109_spill]] }
  0x19   :  { %s10991_s25 = sld [smem:[#allocation103_spill]] }
  0x1a   :  { %v99_v2 = vld [vmem:[%s10983_s8 + $0x8] sm:$0xff]  ;;  %v98_v4 = vld [vmem:[%s10983_s8] sm:$0xff] }
  0x1b   :  { %v176_v3 = vld [vmem:[%s10984_s5 + $0x10] sm:$0xff]  ;;  %151 = vmatpush.msra.mxu0 %v99_v2  ;;  %v175_v5 = vld [vmem:[%s10984_s5 + $0x8] sm:$0xff]  ;;  %v174_v7 = vld [vmem:[%s10984_s5] sm:$0xff] }
  0x1c   :  { %v94_v6 = vld [vmem:[%s10985_s30] sm:$0xff]  ;;  %227 = vmatpush.msra.mxu1 %v176_v3  ;;  %v95_v21 = vld [vmem:[%s10985_s30 + $0x8] sm:$0xff]  ;;  %v96_v33 = vld [vmem:[%s10985_s30 + $0x10] sm:$0xff] }
  0x1d   :  { %152 = vmatpush.msra.mxu0 %v98_v4  ;;  %v5319_v11 = vld [vmem:[%s10986_s2 + $0x70] sm:$0xf]  ;;  %v5792_v12 = vld [vmem:[%s10986_s2 + $0x74] sm:$0xf0]  ;;  %v5791_v14 = vld [vmem:[%s10986_s2 + $0x74] sm:$0xf] }
  0x1e   :  { %228 = vmatpush.msra.mxu1 %v175_v5  ;;  %5253 = vmatmul.msk.f32.vlgmr.msra.gmra.mxu0 %vm124_vm0, %v94_v6  ;;  %v6435_v13 = vor.u32 %v5792_v12, %v5319_v11  ;;  %v5321_v15 = vld [vmem:[%s10986_s2 + $0x78] sm:$0xf0]  ;;  %v5311_v16 = vld [vmem:[%s10986_s2 + $0x60] sm:$0xf]  ;;  %v5790_v18 = vld [vmem:[%s10986_s2 + $0x64] sm:$0xf0] }
  0x1f   :  { %v6446_v17 = vor.u32 %v5791_v14, %v5321_v15  ;;  %v5789_v19 = vld [vmem:[%s10986_s2 + $0x64] sm:$0xf]  ;;  %v5313_v20 = vld [vmem:[%s10986_s2 + $0x68] sm:$0xf0]  ;;  %188 = vperm.xlu0 %5848, %v178_v10   ;;  %v6461_v22 = vor.u32 %v5790_v18, %v5311_v16  ;;  %v5303_v25 = vld [vmem:[%s10986_s2 + $0x50] sm:$0xf]  ;;  %198 = vperm.xlu1 %5849, %v180_v23  }
  0x20   :  { %229 = vmatpush.msra.mxu1 %v174_v7  ;;  %348 = vmatpush.bf16.msra.mxu2 %v6435_v13  ;;  %v6467_v24 = vor.u32 %v5789_v19, %v5313_v20  ;;  %v5788_v26 = vld [vmem:[%s10986_s2 + $0x54] sm:$0xf0]  ;;  %v5787_v27 = vld [vmem:[%s10986_s2 + $0x54] sm:$0xf]  ;;  %v5305_v28 = vld [vmem:[%s10986_s2 + $0x58] sm:$0xf0] }
  0x21   :  { %5257 = vmatmul.msk.f32.vlgmr.msra.gmra.mxu1 %vm201_vm1, %v170_v9  ;;  %369 = vmatpush.bf16.msra.mxu3 %v6446_v17  ;;  %v6486_v30 = vor.u32 %v5788_v26, %v5303_v25  ;;  %v102_v31 = vld [vmem:[%s10987_s27 + $0x10] sm:$0xff]  ;;  %v6492_v32 = vor.u32 %v5787_v27, %v5305_v28  ;;  %v103_v34 = vld [vmem:[%s10987_s27 + $0x18] sm:$0xff]  ;;  %v5295_v38 = vld [vmem:[%s10986_s2 + $0x40] sm:$0xf] }
  0x22   :  { %v97_v36 = vld [vmem:[%s10985_s30 + $0x18] sm:$0xff]  ;;  %v5786_v39 = vld [vmem:[%s10986_s2 + $0x44] sm:$0xf0]  ;;  %v5785_v40 = vld [vmem:[%s10986_s2 + $0x44] sm:$0xf]  ;;  %s10988_s30 = sld [smem:[#allocation102_spill]] }
  0x23   :  { %v6525_v41 = vor.u32 %v5786_v39, %v5295_v38  ;;  %v5297_v42 = vld [vmem:[%s10986_s2 + $0x48] sm:$0xf0]  ;;  %v5287_v43 = vld [vmem:[%s10986_s2 + $0x30] sm:$0xf]  ;;  %v5784_v44 = vld [vmem:[%s10986_s2 + $0x34] sm:$0xf0] }
  0x24   :  { %349 = vmatpush.bf16.msra.mxu2 %v6461_v22  ;;  %v6536_v45 = vor.u32 %v5785_v40, %v5297_v42  ;;  %v5783_v46 = vld [vmem:[%s10986_s2 + $0x34] sm:$0xf]  ;;  %v5289_v47 = vld [vmem:[%s10986_s2 + $0x38] sm:$0xf0]  ;;  %v6545_v48 = vor.u32 %v5784_v44, %v5287_v43  ;;  %v5279_v50 = vld [vmem:[%s10986_s2 + $0x20] sm:$0xf] }
  0x25   :  { %370 = vmatpush.bf16.msra.mxu3 %v6467_v24  ;;  %v6548_v49 = vor.u32 %v5783_v46, %v5289_v47  ;;  %v5782_v51 = vld [vmem:[%s10986_s2 + $0x24] sm:$0xf0]  ;;  %v5781_v52 = vld [vmem:[%s10986_s2 + $0x24] sm:$0xf]  ;;  %v5281_v54 = vld [vmem:[%s10986_s2 + $0x28] sm:$0xf0] }
  0x26   :  { %5254 = vmatmul.msk.f32.gmra.mxu0 %vm124_vm0, %v95_v21  ;;  %v6561_v53 = vor.u32 %v5782_v51, %v5279_v50  ;;  %v6566_v55 = vor.u32 %v5781_v52, %v5281_v54  ;;  %v5271_v56 = vld [vmem:[%s10986_s2 + $0x10] sm:$0xf]  ;;  %v5780_v57 = vld [vmem:[%s10986_s2 + $0x14] sm:$0xf0]  ;;  %v5779_v58 = vld [vmem:[%s10986_s2 + $0x14] sm:$0xf] }
  0x27   :  { %116 = vperm.xlu0 %5848, %v102_v31   ;;  %121 = vperm.xlu1 %5849, %v103_v34   ;;  %v6579_v59 = vor.u32 %v5780_v57, %v5271_v56  ;;  %v5273_v60 = vld [vmem:[%s10986_s2 + $0x18] sm:$0xf0]  ;;  %v5263_v62 = vld [vmem:[%s10986_s2] sm:$0xf]  ;;  %v5778_v63 = vld [vmem:[%s10986_s2 + $0x4] sm:$0xf0] }
  0x28   :  { %350 = vmatpush.bf16.msra.mxu2 %v6486_v30  ;;  %v6584_v61 = vor.u32 %v5779_v58, %v5273_v60  ;;  %v5777_v0 = vld [vmem:[%s10986_s2 + $0x4] sm:$0xf]  ;;  %v6597_v1 = vor.u32 %v5778_v63, %v5263_v62  ;;  %v5265_v2 = vld [vmem:[%s10986_s2 + $0x8] sm:$0xf0]  ;;  %v6656_v19 = vld [vmem:[%s10988_s30 + $0x30] sm:$0xff] }
  0x29   :  { %5258 = vmatmul.msk.f32.gmra.mxu1 %vm201_vm1, %v171_v29  ;;  %371 = vmatpush.bf16.msra.mxu3 %v6492_v32  ;;  %v6602_v3 = vor.u32 %v5777_v0, %v5265_v2  ;;  %v100_v4 = vld [vmem:[%s10987_s27] sm:$0xff]  ;;  %v101_v5 = vld [vmem:[%s10987_s27 + $0x8] sm:$0xff]  ;;  %s6263_s27 = smov 127   ;;  %v6701_v27 = vld [vmem:[%s10988_s30 + $0x18] sm:$0xff] }
  0x2a   :  { %106 = vperm.xlu2 %5850, %v100_v4   ;;  %v6669_v20 = vld [vmem:[%s10988_s30 + $0x28] sm:$0xff]  ;;  %v6691_v25 = vld [vmem:[%s10988_s30 + $0x20] sm:$0xff]  ;;  %v572_v28 = vld [vmem:[%s10868_s12 + $0x18] sm:$0xff] }
  0x2b   :  { %v569_v26 = vld [vmem:[%s10868_s12] sm:$0xff]  ;;  %v571_v29 = vld [vmem:[%s10868_s12 + $0x10] sm:$0xff]  ;;  %v570_v31 = vld [vmem:[%s10868_s12 + $0x8] sm:$0xff] }
  0x2c   :  { %351 = vmatpush.bf16.msra.mxu2 %v6525_v41 }
  0x2d   :  { %372 = vmatpush.bf16.msra.mxu3 %v6536_v45 }
  0x2e   :  { %5255 = vmatmul.msk.f32.gmra.mxu0 %vm124_vm0, %v96_v33  ;;  %v6733_v33 = vld [vmem:[%s10988_s30] sm:$0xff] }
  0x30   :  { %352 = vmatpush.bf16.msra.mxu2 %v6545_v48 }
  0x31   :  { %5259 = vmatmul.msk.f32.gmra.mxu1 %vm201_vm1, %v172_v35  ;;  %373 = vmatpush.bf16.msra.mxu3 %v6548_v49 }
  0x32   :  { %111 = vperm.xlu2 %5850, %v101_v5  }
  0x34   :  { %353 = vmatpush.bf16.msra.mxu2 %v6561_v53 }
  0x35   :  { %374 = vmatpush.bf16.msra.mxu3 %v6566_v55 }
  0x36   :  { %5256 = vmatmul.msk.f32.gmra.mxu0 %vm124_vm0, %v97_v36 }
  0x38   :  { %354 = vmatpush.bf16.msra.mxu2 %v6579_v59 }
  0x39   :  { %5260 = vmatmul.msk.f32.gmra.mxu1 %vm201_vm1, %v173_v37  ;;  %375 = vmatpush.bf16.msra.mxu3 %v6584_v61 }
  0x3c   :  { %355 = vmatpush.bf16.msra.mxu2 %v6597_v1 }
  0x3d   :  { %376 = vmatpush.bf16.msra.mxu3 %v6602_v3 }
  0x40   :  { %601 = vmatpush.bf16.msrb.mxu2 %v6435_v13 }
  0x41   :  { %622 = vmatpush.bf16.msrb.mxu3 %v6446_v17 }
  0x44   :  { %602 = vmatpush.bf16.msrb.mxu2 %v6461_v22 }
  0x45   :  { %623 = vmatpush.bf16.msrb.mxu3 %v6467_v24 }
  0x48   :  { %603 = vmatpush.bf16.msrb.mxu2 %v6486_v30 }
  0x49   :  { %624 = vmatpush.bf16.msrb.mxu3 %v6492_v32 }
  0x4c   :  { %604 = vmatpush.bf16.msrb.mxu2 %v6525_v41 }
  0x4d   :  { %625 = vmatpush.bf16.msrb.mxu3 %v6536_v45 }
  0x50   :  { %605 = vmatpush.bf16.msrb.mxu2 %v6545_v48 }
  0x51   :  { %626 = vmatpush.bf16.msrb.mxu3 %v6548_v49 }
  0x54   :  { %606 = vmatpush.bf16.msrb.mxu2 %v6561_v53 }
  0x55   :  { %627 = vmatpush.bf16.msrb.mxu3 %v6566_v55 }
  0x58   :  { %607 = vmatpush.bf16.msrb.mxu2 %v6579_v59 }
  0x59   :  { %628 = vmatpush.bf16.msrb.mxu3 %v6584_v61 }
  0x5c   :  { %608 = vmatpush.bf16.msrb.mxu2 %v6597_v1 }
  0x5d   :  { %629 = vmatpush.bf16.msrb.mxu3 %v6602_v3 }
  0x84   :  { %v107_v37 = vpop.permute.xlu2 %106 }
  0x88   :  { %v184_v6 = vpop.permute.xlu0 %183 }
  0x89   :  { %v194_v15 = vpop.permute.xlu1 %193 }
  0x8c   :  { %v112_v50 = vpop.permute.xlu2 %111 }
  0x91   :  { %v189_v10 = vpop.permute.xlu0 %188  ;;  %v199_v21 = vpop.permute.xlu1 %198 }
  0x99   :  { %v122_v42 = vpop.permute.xlu1 %121  ;;  %v117_v47 = vpop.permute.xlu0 %116 }
  0x9b   :  { %v154_v34 = vpop.f32.mrf.mxu0 }
  0x9c   :  { %v155_v38 = vadd.f32 %v154_v34, %v107_v37 }
  0x9e   :  { %v231_v7 = vpop.f32.mrf.mxu1  ;;  %v166_v43 = vmax.f32 %v155_v38, 0.0 }
  0x9f   :  { %v232_v8 = vadd.f32 %v231_v7, %v184_v6 }
  0xa1   :  { %v6628_v9 = vmax.f32 %v232_v8, 0.0 }
  0xa3   :  { %356 = vmatmul.f32.vlgmr.msra.gmra.mxu2 %v6628_v9  ;;  %377 = vmatmul.f32.vlgmr.msra.gmra.mxu3 %v6628_v9  ;;  %v157_v35 = vpop.f32.mrf.mxu0 }
  0xa4   :  { %791 = vmatpush.bf16.msra.mxu2 %v6435_v13  ;;  %812 = vmatpush.bf16.msra.mxu3 %v6446_v17  ;;  %v6646_v13 = vld [vmem:[%s10988_s30 + $0x38] sm:$0xff] }
  0xa5   :  { %470 = vmatpush.bf16.msrb.mxu0 %v6646_v13 }
  0xa6   :  { %v234_v11 = vpop.f32.mrf.mxu1 }
  0xa7   :  { %v235_v12 = vadd.f32 %v234_v11, %v189_v10 }
  0xa8   :  { %792 = vmatpush.bf16.msra.mxu2 %v6461_v22  ;;  %813 = vmatpush.bf16.msra.mxu3 %v6467_v24 }
  0xa9   :  { %v6636_v14 = vmax.f32 %v235_v12, 0.0  ;;  %471 = vmatpush.bf16.msrb.mxu0 %v6656_v19 }
  0xab   :  { %359 = vmatmul.f32.gmra.mxu2 %v6636_v14  ;;  %380 = vmatmul.f32.gmra.mxu3 %v6636_v14  ;;  %v160_v36 = vpop.f32.mrf.mxu0 }
  0xac   :  { %493 = vrot.lane.b32.xlu0 %v6636_v14, %s6263_s27  ;;  %793 = vmatpush.bf16.msra.mxu2 %v6486_v30  ;;  %v6718_v30 = vld [vmem:[%s10988_s30 + $0x10] sm:$0xff] }
  0xad   :  { %814 = vmatpush.bf16.msra.mxu3 %v6492_v32  ;;  %472 = vmatpush.bf16.msrb.mxu0 %v6669_v20  ;;  %v6727_v32 = vld [vmem:[%s10988_s30 + $0x8] sm:$0xff] }
  0xae   :  { %v237_v16 = vpop.f32.mrf.mxu1 }
  0xaf   :  { %v238_v17 = vadd.f32 %v237_v16, %v194_v15  ;;  %v247_v16 = vlaneseq }
  0xb0   :  { %794 = vmatpush.bf16.msra.mxu2 %v6525_v41 }
  0xb1   :  { %v6651_v18 = vmax.f32 %v238_v17, 0.0  ;;  %815 = vmatpush.bf16.msra.mxu3 %v6536_v45  ;;  %473 = vmatpush.bf16.msrb.mxu0 %v6691_v25 }
  0xb3   :  { %362 = vmatmul.f32.gmra.mxu2 %v6651_v18  ;;  %383 = vmatmul.f32.gmra.mxu3 %v6651_v18  ;;  %v163_v39 = vpop.f32.mrf.mxu0 }
  0xb4   :  { %495 = vrot.lane.b32.xlu1 %v6651_v18, %s6263_s27  ;;  %503 = vrot.lane.b32.xlu2 %v6651_v18, %s6264_s4  ;;  %v164_v46 = vadd.f32 %v163_v39, %v122_v42 }
  0xb5   :  { %795 = vmatpush.bf16.msra.mxu2 %v6545_v48  ;;  %816 = vmatpush.bf16.msra.mxu3 %v6548_v49  ;;  %v161_v49 = vadd.f32 %v160_v36, %v117_v47 }
  0xb6   :  { %v240_v22 = vpop.f32.mrf.mxu1  ;;  %474 = vmatpush.bf16.msrb.mxu0 %v6701_v27  ;;  %v169_v52 = vmax.f32 %v164_v46, 0.0 }
  0xb7   :  { %v241_v23 = vadd.f32 %v240_v22, %v199_v21  ;;  %v168_v54 = vmax.f32 %v161_v49, 0.0  ;;  %v6756_v21 = vand.u32 127, %v247_v16  ;;  %v917_v16 = vld [vmem:[%s10871_s15 + $0x10] sm:$0xff] }
  0xb9   :  { %v6673_v24 = vmax.f32 %v241_v23, 0.0  ;;  %796 = vmatpush.bf16.msra.mxu2 %v6561_v53  ;;  %817 = vmatpush.bf16.msra.mxu3 %v6566_v55  ;;  %v158_v53 = vadd.f32 %v157_v35, %v112_v50  ;;  %vm251_vm3 = vcmp.eq.s32.totalorder %v6756_v21, 0  ;;  %v519_v50 = vld [vmem:[%s10867_s11] sm:$0xff] }
  0xba   :  { %475 = vmatpush.bf16.msrb.mxu0 %v6718_v30 }
  0xbb   :  { %365 = vmatmul.f32.gmra.mxu2 %v6673_v24  ;;  %386 = vmatmul.f32.gmra.mxu3 %v6673_v24 }
  0xbc   :  { %501 = vrot.lane.b32.xlu1 %v6636_v14, %s6264_s4  ;;  %505 = vrot.lane.b32.xlu0 %v6673_v24, %s6264_s4 }
  0xbd   :  { %497 = vrot.lane.b32.xlu2 %v6673_v24, %s6263_s27  ;;  %797 = vmatpush.bf16.msra.mxu2 %v6579_v59  ;;  %v167_v59 = vmax.f32 %v158_v53, 0.0  ;;  %v521_v53 = vld [vmem:[%s10867_s11 + $0x10] sm:$0xff] }
  0xbe   :  { %818 = vmatpush.bf16.msra.mxu3 %v6584_v61  ;;  %476 = vmatpush.bf16.msrb.mxu0 %v6727_v32 }
  0xc1   :  { %798 = vmatpush.bf16.msra.mxu2 %v6597_v1 }
  0xc2   :  { %819 = vmatpush.bf16.msra.mxu3 %v6602_v3  ;;  %477 = vmatpush.bf16.msrb.mxu0 %v6733_v33 }
  0xc4   :  { %575 = vperm.xlu1 %5849, %v569_v26   ;;  %499 = vrot.lane.b32.xlu0 %v6628_v9, %s6264_s4 }
  0xc5   :  { %491 = vrot.lane.b32.xlu2 %v6628_v9, %s6263_s27 }
  0xc6   :  { %659 = vmatpush.bf16.msra.mxu0 %v6646_v13 }
  0xca   :  { %660 = vmatpush.bf16.msra.mxu0 %v6656_v19 }
  0xcc   :  { %590 = vperm.xlu1 %5849, %v572_v28   ;;  %585 = vperm.xlu0 %5848, %v571_v29   ;;  %v249_v28 = vand.u32 1, %v6756_v21  ;;  %v5362_v21 = vld [vmem:[%s10867_s11 + $0x28] sm:$0xff] }
  0xcd   :  { %580 = vperm.xlu2 %5850, %v570_v31   ;;  %v5361_v31 = vld [vmem:[%s10867_s11 + $0x20] sm:$0xff] }
  0xce   :  { %661 = vmatpush.bf16.msra.mxu0 %v6669_v20  ;;  %vm6759_vm2 = vcmp.eq.s32.totalorder %v249_v28, 1  ;;  %v852_v28 = vld [vmem:[%s10870_s14 + $0x18] sm:$0xff] }
  0xd2   :  { %662 = vmatpush.bf16.msra.mxu0 %v6691_v25 }
  0xd6   :  { %663 = vmatpush.bf16.msra.mxu0 %v6701_v27 }
  0xda   :  { %664 = vmatpush.bf16.msra.mxu0 %v6718_v30 }
  0xde   :  { %665 = vmatpush.bf16.msra.mxu0 %v6727_v32 }
  0xe2   :  { %666 = vmatpush.bf16.msra.mxu0 %v6733_v33 }
 0x10e   :  { %v504_v12 = vpop.permute.xlu2 %503 }
 0x117   :  { %v498_v26 = vpop.permute.xlu2 %497 }
 0x11e   :  { %v494_v15 = vpop.permute.xlu0 %493 }
 0x11f   :  { %v492_v42 = vpop.permute.xlu2 %491 }
 0x126   :  { %v357_v40 = vpop.f32.mrf.mxu2  ;;  %v378_v41 = vpop.f32.mrf.mxu3 }
 0x127   :  { %v390_v44 = vadd.f32 %v378_v41, %v357_v40  ;;  %v394_v45 = vmax.f32 %v357_v40, %v378_v41  ;;  %v496_v22 = vpop.permute.xlu1 %495 }
 0x128   :  { %v509_v36 = vsel %vm6759_vm2, %v496_v22, %v504_v12  ;;  %v915_v12 = vld [vmem:[%s10871_s15] sm:$0xff]  ;;  %v916_v22 = vld [vmem:[%s10871_s15 + $0x8] sm:$0xff] }
 0x129   :  { %v398_v48 = vmul.f32 %v394_v45, %v390_v44 }
 0x12b   :  { %v6744_v51 = vadd.f32 %v398_v48, %v166_v43 }
 0x12d   :  { %478 = vmatmul.f32.vlgmr.msrb.gmra.mxu0 %v6744_v51 }
 0x12e   :  { %890 = vmatpush.msrb.mxu0 %v169_v52  ;;  %v360_v55 = vpop.f32.mrf.mxu2  ;;  %v381_v56 = vpop.f32.mrf.mxu3 }
 0x12f   :  { %v391_v57 = vadd.f32 %v381_v56, %v360_v55  ;;  %v395_v58 = vmax.f32 %v360_v55, %v381_v56  ;;  %v506_v23 = vpop.permute.xlu0 %505  ;;  %v502_v35 = vpop.permute.xlu1 %501 }
 0x130   :  { %891 = vmatpush.msrb.mxu0 %v168_v54  ;;  %v510_v34 = vsel %vm6759_vm2, %v498_v26, %v506_v23  ;;  %v508_v40 = vsel %vm6759_vm2, %v494_v15, %v502_v35  ;;  %v581_v56 = vpop.permute.xlu2 %580  ;;  %v849_v15 = vld [vmem:[%s10870_s14] sm:$0xff]  ;;  %v1368_v23 = vld [vmem:[%s10873_s17 + $0x78] sm:$0xff] }
 0x131   :  { %v399_v60 = vmul.f32 %v395_v58, %v391_v57  ;;  %v514_v39 = vsel %vm251_vm3, %v6673_v24, %v510_v34  ;;  %v512_v46 = vsel %vm251_vm3, %v6636_v14, %v508_v40  ;;  %v918_v26 = vld [vmem:[%s10871_s15 + $0x18] sm:$0xff]  ;;  %v1367_v34 = vld [vmem:[%s10873_s17 + $0x70] sm:$0xff] }
 0x132   :  { %892 = vmatpush.msrb.mxu0 %v167_v59  ;;  %v6894_v35 = vld [vmem:[%s10877_s21 + $0x18] sm:$0xff] }
 0x133   :  { %v6747_v61 = vadd.f32 %v399_v60, %v167_v59  ;;  %v6918_v40 = vld [vmem:[%s10875_s19 + $0x18] sm:$0xff] }
 0x134   :  { %893 = vmatpush.msrb.mxu0 %v166_v43  ;;  %v513_v43 = vsel %vm251_vm3, %v6651_v18, %v509_v36  ;;  %v1356_v36 = vld [vmem:[%s10873_s17 + $0x18] sm:$0xff] }
 0x135   :  { %481 = vmatmul.f32.gmra.mxu0 %v6747_v61 }
 0x136   :  { %v363_v62 = vpop.f32.mrf.mxu2  ;;  %v384_v63 = vpop.f32.mrf.mxu3 }
 0x137   :  { %v392_v0 = vadd.f32 %v384_v63, %v363_v62  ;;  %v396_v1 = vmax.f32 %v363_v62, %v384_v63  ;;  %v500_v37 = vpop.permute.xlu0 %499 }
 0x138   :  { %v507_v44 = vsel %vm6759_vm2, %v492_v42, %v500_v37  ;;  %v6904_v37 = vld [vmem:[%s10877_s21 + $0x8] sm:$0xff]  ;;  %v1372_v42 = vld [vmem:[%s10873_s17 + $0x98] sm:$0xff] }
 0x139   :  { %v400_v2 = vmul.f32 %v396_v1, %v392_v0  ;;  %v511_v48 = vsel %vm251_vm3, %v6628_v9, %v507_v44  ;;  %v1355_v44 = vld [vmem:[%s10873_s17 + $0x10] sm:$0xff] }
 0x13b   :  { %v6750_v3 = vadd.f32 %v400_v2, %v168_v54 }
 0x13d   :  { %484 = vmatmul.f32.gmra.mxu0 %v6750_v3 }
 0x13e   :  { %v366_v4 = vpop.f32.mrf.mxu2  ;;  %v387_v5 = vpop.f32.mrf.mxu3 }
 0x13f   :  { %v393_v6 = vadd.f32 %v387_v5, %v366_v4  ;;  %v397_v7 = vmax.f32 %v366_v4, %v387_v5  ;;  %v586_v59 = vpop.permute.xlu0 %585  ;;  %v5369_v5 = vld [vmem:[%s10868_s12 + $0x20] sm:$0xff] }
 0x141   :  { %v401_v8 = vmul.f32 %v397_v7, %v393_v6  ;;  %v5372_v6 = vld [vmem:[%s10868_s12 + $0x38] sm:$0xff]  ;;  %v5371_v7 = vld [vmem:[%s10868_s12 + $0x30] sm:$0xff] }
 0x143   :  { %v6753_v10 = vadd.f32 %v401_v8, %v169_v52  ;;  %v520_v52 = vld [vmem:[%s10867_s11 + $0x8] sm:$0xff] }
 0x144   :  { %v5370_v8 = vld [vmem:[%s10868_s12 + $0x28] sm:$0xff]  ;;  %s5240_s12 = sshll.u32 %s10880_s24, 4  ;;  %s5241_s12 = int_to_ptr.hbm [resolvable:$true] %s5240_s12 }
 0x145   :  { %487 = vmatmul.f32.gmra.mxu0 %v6753_v10 }
 0x1aa   :  { %v479_v11 = vpop.f32.mrf.mxu0 }
 0x1ab   :  { %v515_v49 = vsub.f32 %v479_v11, %v511_v48  ;;  %v850_v11 = vld [vmem:[%s10870_s14 + $0x8] sm:$0xff]  ;;  %v1353_v48 = vld [vmem:[%s10873_s17] sm:$0xff] }
 0x1b2   :  { %v482_v17 = vpop.f32.mrf.mxu0 }
 0x1b3   :  { %v516_v47 = vsub.f32 %v482_v17, %v512_v46  ;;  %v851_v17 = vld [vmem:[%s10870_s14 + $0x10] sm:$0xff]  ;;  %v1354_v46 = vld [vmem:[%s10873_s17 + $0x8] sm:$0xff]  ;;  %s10992_s14 = sld [smem:[#allocation104_spill]] }
 0x1ba   :  { %v485_v29 = vpop.f32.mrf.mxu0 }
 0x1bb   :  { %v517_v45 = vsub.f32 %v485_v29, %v513_v43  ;;  %v6886_v29 = vld [vmem:[%s10877_s21 + $0x10] sm:$0xff] }
 0x1bc   :  { %v6931_v43 = vld [vmem:[%s10875_s19 + $0x10] sm:$0xff] }
 0x1c2   :  { %v488_v38 = vpop.f32.mrf.mxu0 }
 0x1c3   :  { %v518_v41 = vsub.f32 %v488_v38, %v514_v39  ;;  %v1366_v38 = vld [vmem:[%s10873_s17 + $0x68] sm:$0xff]  ;;  %v6913_v39 = vld [vmem:[%s10877_s21] sm:$0xff] }
 0x1c5   :  { %548 = vmatpush.msrb.mxu1 %v518_v41  ;;  %v1365_v41 = vld [vmem:[%s10873_s17 + $0x60] sm:$0xff] }
 0x1c7   :  { %549 = vmatpush.msrb.mxu1 %v517_v45  ;;  %v6940_v45 = vld [vmem:[%s10875_s19 + $0x8] sm:$0xff] }
 0x1c9   :  { %550 = vmatpush.msrb.mxu1 %v516_v47  ;;  %v6948_v47 = vld [vmem:[%s10877_s21 + $0x38] sm:$0xff] }
 0x1cb   :  { %551 = vmatpush.msrb.mxu1 %v515_v49  ;;  %v6958_v49 = vld [vmem:[%s10877_s21 + $0x30] sm:$0xff] }
 0x1cc   :  { %5357 = vmatmul.msk.f32.vlgmr.msrb.gmra.mxu1 %vm523_vm4, %v519_v50  ;;  %v1371_v50 = vld [vmem:[%s10873_s17 + $0x90] sm:$0xff] }
 0x1cd   :  { %5833 = vmatpush.bf16.msra.mxu1 %v6646_v13  ;;  %v522_v13 = vld [vmem:[%s10867_s11 + $0x18] sm:$0xff] }
 0x1d1   :  { %5834 = vmatpush.bf16.msra.mxu1 %v6656_v19 }
 0x1d4   :  { %5358 = vmatmul.msk.f32.gmra.mxu1 %vm523_vm4, %v520_v52  ;;  %v6967_v52 = vld [vmem:[%s10877_s21 + $0x28] sm:$0xff] }
 0x1d5   :  { %5835 = vmatpush.bf16.msra.mxu1 %v6669_v20 }
 0x1d9   :  { %5836 = vmatpush.bf16.msra.mxu1 %v6691_v25  ;;  %v576_v25 = vpop.permute.xlu1 %575 }
 0x1dc   :  { %5359 = vmatmul.msk.f32.gmra.mxu1 %vm523_vm4, %v521_v53  ;;  %v1370_v53 = vld [vmem:[%s10873_s17 + $0x88] sm:$0xff] }
 0x1dd   :  { %5837 = vmatpush.bf16.msra.mxu1 %v6701_v27 }
 0x1e1   :  { %5838 = vmatpush.bf16.msra.mxu1 %v6718_v30  ;;  %v591_v1 = vpop.permute.xlu1 %590 }
 0x1e4   :  { %5360 = vmatmul.msk.f32.gmra.mxu1 %vm523_vm4, %v522_v13  ;;  %v6975_v13 = vld [vmem:[%s10875_s19] sm:$0xff] }
 0x1e5   :  { %5839 = vmatpush.bf16.msra.mxu1 %v6727_v32 }
 0x1e9   :  { %5840 = vmatpush.bf16.msra.mxu1 %v6733_v33 }
 0x249   :  { %v553_v19 = vpop.f32.mrf.mxu1 }
 0x24a   :  { %v565_v20 = vadd.f32 %v553_v19, %v6628_v9  ;;  %v6982_v19 = vld [vmem:[%s10875_s19 + $0x38] sm:$0xff] }
 0x24c   :  { %v593_v54 = vadd.f32 %v576_v25, %v565_v20  ;;  %v1369_v20 = vld [vmem:[%s10873_s17 + $0x80] sm:$0xff]  ;;  %v1360_v25 = vld [vmem:[%s10873_s17 + $0x38] sm:$0xff] }
 0x24e   :  { %v6809_v55 = vmax.f32 %v593_v54, 0.0 }
 0x250   :  { %609 = vmatmul.f32.vlgmr.msrb.gmra.mxu2 %v6809_v55  ;;  %630 = vmatmul.f32.vlgmr.msrb.gmra.mxu3 %v6809_v55 }
 0x251   :  { %v556_v27 = vpop.f32.mrf.mxu1 }
 0x252   :  { %v566_v30 = vadd.f32 %v556_v27, %v6636_v14 }
 0x254   :  { %v594_v57 = vadd.f32 %v581_v56, %v566_v30 }
 0x256   :  { %v6814_v58 = vmax.f32 %v594_v57, 0.0  ;;  %v6994_v57 = vld [vmem:[%s10875_s19 + $0x30] sm:$0xff] }
 0x258   :  { %682 = vrot.lane.b32.xlu0 %v6814_v58, %s6263_s27  ;;  %612 = vmatmul.f32.gmra.mxu2 %v6814_v58 }
 0x259   :  { %633 = vmatmul.f32.gmra.mxu3 %v6814_v58  ;;  %v559_v32 = vpop.f32.mrf.mxu1 }
 0x25a   :  { %v567_v33 = vadd.f32 %v559_v32, %v6651_v18  ;;  %v1359_v32 = vld [vmem:[%s10873_s17 + $0x30] sm:$0xff] }
 0x25c   :  { %v595_v60 = vadd.f32 %v586_v59, %v567_v33  ;;  %v7002_v33 = vld [vmem:[%s10877_s21 + $0x20] sm:$0xff] }
 0x25e   :  { %v6821_v62 = vmax.f32 %v595_v60, 0.0 }
 0x260   :  { %692 = vrot.lane.b32.xlu2 %v6821_v62, %s6264_s4  ;;  %684 = vrot.lane.b32.xlu1 %v6821_v62, %s6263_s27 }
 0x261   :  { %615 = vmatmul.f32.gmra.mxu2 %v6821_v62  ;;  %636 = vmatmul.f32.gmra.mxu3 %v6821_v62  ;;  %v562_v63 = vpop.f32.mrf.mxu1 }
 0x262   :  { %v568_v0 = vadd.f32 %v562_v63, %v6673_v24 }
 0x264   :  { %v596_v2 = vadd.f32 %v591_v1, %v568_v0 }
 0x266   :  { %v6830_v4 = vmax.f32 %v596_v2, 0.0 }
 0x268   :  { %690 = vrot.lane.b32.xlu1 %v6814_v58, %s6264_s4  ;;  %694 = vrot.lane.b32.xlu0 %v6830_v4, %s6264_s4 }
 0x269   :  { %686 = vrot.lane.b32.xlu2 %v6830_v4, %s6263_s27  ;;  %618 = vmatmul.f32.gmra.mxu2 %v6830_v4 }
 0x26a   :  { %639 = vmatmul.f32.gmra.mxu3 %v6830_v4 }
 0x270   :  { %765 = vperm.xlu1 %5849, %v5369_v5   ;;  %688 = vrot.lane.b32.xlu0 %v6809_v55, %s6264_s4  ;;  %v1357_v5 = vld [vmem:[%s10873_s17 + $0x20] sm:$0xff] }
 0x271   :  { %680 = vrot.lane.b32.xlu2 %v6809_v55, %s6263_s27 }
 0x278   :  { %780 = vperm.xlu1 %5849, %v5372_v6   ;;  %775 = vperm.xlu0 %5848, %v5371_v7   ;;  %v7013_v6 = vld [vmem:[%s10875_s19 + $0x28] sm:$0xff] }
 0x279   :  { %770 = vperm.xlu2 %5850, %v5370_v8   ;;  %v1358_v7 = vld [vmem:[%s10873_s17 + $0x28] sm:$0xff] }
 0x280   :  { %860 = vperm.xlu1 %5849, %v850_v11   ;;  %921 = vperm.xlu0 %5848, %v915_v12  }
 0x281   :  { %855 = vperm.xlu2 %5850, %v849_v15  }
 0x288   :  { %931 = vperm.xlu1 %5849, %v917_v16   ;;  %865 = vperm.xlu0 %5848, %v851_v17   ;;  %v1376_v17 = vld [vmem:[%s10873_s17 + $0xb8] sm:$0xff] }
 0x289   :  { %926 = vperm.xlu2 %5850, %v916_v22   ;;  %v7026_v22 = vld [vmem:[%s10877_s21 + $0x58] sm:$0xff] }
 0x290   :  { %1454 = vperm.xlu1 %5849, %v1368_v23   ;;  %936 = vperm.xlu0 %5848, %v918_v26   ;;  %v7031_v23 = vld [vmem:[%s10875_s19 + $0x20] sm:$0xff] }
 0x291   :  { %870 = vperm.xlu2 %5850, %v852_v28  }
 0x298   :  { %2322 = vperm.xlu1 %5849, %v6886_v29   ;;  %1449 = vperm.xlu0 %5848, %v1367_v34  }
 0x299   :  { %2327 = vperm.xlu2 %5850, %v6894_v35  }
 0x2a0   :  { %1394 = vperm.xlu1 %5849, %v1356_v36   ;;  %2317 = vperm.xlu0 %5848, %v6904_v37   ;;  %v7039_v36 = vld [vmem:[%s10877_s21 + $0x48] sm:$0xff] }
 0x2a1   :  { %1444 = vperm.xlu2 %5850, %v1366_v38   ;;  %v1375_v38 = vld [vmem:[%s10873_s17 + $0xb0] sm:$0xff] }
 0x2a8   :  { %2312 = vperm.xlu1 %5849, %v6913_v39   ;;  %1966 = vperm.xlu0 %5848, %v6918_v40  }
 0x2a9   :  { %1439 = vperm.xlu2 %5850, %v1365_v41  }
 0x2b0   :  { %1474 = vperm.xlu1 %5849, %v1372_v42   ;;  %1961 = vperm.xlu0 %5848, %v6931_v43  }
 0x2b1   :  { %1389 = vperm.xlu2 %5850, %v1355_v44   ;;  %v7047_v44 = vld [vmem:[%s10877_s21 + $0x50] sm:$0xff] }
 0x2b8   :  { %1956 = vperm.xlu1 %5849, %v6940_v45   ;;  %1384 = vperm.xlu0 %5848, %v1354_v46  }
 0x2b9   :  { %2347 = vperm.xlu2 %5850, %v6948_v47  }
 0x2c0   :  { %1379 = vperm.xlu1 %5849, %v1353_v48   ;;  %2342 = vperm.xlu0 %5848, %v6958_v49   ;;  %v7055_v48 = vld [vmem:[%s10877_s21 + $0x40] sm:$0xff] }
 0x2c1   :  { %1469 = vperm.xlu2 %5850, %v1371_v50   ;;  %v7060_v50 = vld [vmem:[%s10875_s19 + $0x58] sm:$0xff] }
 0x2c8   :  { %2337 = vperm.xlu1 %5849, %v6967_v52   ;;  %1464 = vperm.xlu0 %5848, %v1370_v53   ;;  %v1374_v53 = vld [vmem:[%s10873_s17 + $0xa8] sm:$0xff] }
 0x2c9   :  { %1951 = vperm.xlu2 %5850, %v6975_v13  }
 0x2d0   :  { %1986 = vperm.xlu1 %5849, %v6982_v19   ;;  %1459 = vperm.xlu0 %5848, %v1369_v20   ;;  %v1373_v20 = vld [vmem:[%s10873_s17 + $0xa0] sm:$0xff] }
 0x2d1   :  { %1414 = vperm.xlu2 %5850, %v1360_v25   ;;  %v1364_v25 = vld [vmem:[%s10873_s17 + $0x58] sm:$0xff] }
 0x2d3   :  { %v610_v54 = vpop.f32.mrf.mxu2  ;;  %v631_v27 = vpop.f32.mrf.mxu3 }
 0x2d4   :  { %v643_v30 = vadd.f32 %v631_v27, %v610_v54  ;;  %v647_v56 = vmax.f32 %v610_v54, %v631_v27  ;;  %v1362_v54 = vld [vmem:[%s10873_s17 + $0x48] sm:$0xff] }
 0x2d5   :  { %v7085_v27 = vld [vmem:[%s10875_s19 + $0x48] sm:$0xff] }
 0x2d6   :  { %v651_v59 = vmul.f32 %v647_v56, %v643_v30  ;;  %v1363_v30 = vld [vmem:[%s10873_s17 + $0x50] sm:$0xff]  ;;  %v1361_v56 = vld [vmem:[%s10873_s17 + $0x40] sm:$0xff] }
 0x2d8   :  { %1981 = vperm.xlu1 %5849, %v6994_v57   ;;  %1409 = vperm.xlu0 %5848, %v1359_v32   ;;  %v655_v60 = vadd.f32 %v651_v59, %v6744_v51  ;;  %v7097_v32 = vld [vmem:[%s10875_s19 + $0x40] sm:$0xff] }
 0x2d9   :  { %2332 = vperm.xlu2 %5850, %v7002_v33  }
 0x2da   :  { %667 = vmatmul.f32.vlgmr.msra.gmra.mxu0 %v655_v60 }
 0x2db   :  { %v613_v63 = vpop.f32.mrf.mxu2 }
 0x2dc   :  { %v634_v0 = vpop.f32.mrf.mxu3 }
 0x2dd   :  { %v644_v1 = vadd.f32 %v634_v0, %v613_v63  ;;  %v648_v2 = vmax.f32 %v613_v63, %v634_v0  ;;  %v693_v63 = vpop.permute.xlu2 %692  ;;  %v685_v0 = vpop.permute.xlu1 %684 }
 0x2df   :  { %v652_v8 = vmul.f32 %v648_v2, %v644_v1 }
 0x2e0   :  { %1399 = vperm.xlu1 %5849, %v1357_v5   ;;  %1976 = vperm.xlu0 %5848, %v7013_v6  }
 0x2e1   :  { %1404 = vperm.xlu2 %5850, %v1358_v7   ;;  %v656_v51 = vadd.f32 %v652_v8, %v6747_v61 }
 0x2e3   :  { %670 = vmatmul.f32.gmra.mxu0 %v656_v51 }
 0x2e4   :  { %v616_v11 = vpop.f32.mrf.mxu2  ;;  %v637_v12 = vpop.f32.mrf.mxu3 }
 0x2e5   :  { %v645_v15 = vadd.f32 %v637_v12, %v616_v11  ;;  %v649_v16 = vmax.f32 %v616_v11, %v637_v12  ;;  %v687_v5 = vpop.permute.xlu2 %686  ;;  %v691_v8 = vpop.permute.xlu1 %690 }
 0x2e7   :  { %v653_v61 = vmul.f32 %v649_v16, %v645_v15 }
 0x2e8   :  { %1494 = vperm.xlu1 %5849, %v1376_v17   ;;  %2367 = vperm.xlu0 %5848, %v7026_v22  }
 0x2e9   :  { %1971 = vperm.xlu2 %5850, %v7031_v23   ;;  %v657_v26 = vadd.f32 %v653_v61, %v6750_v3 }
 0x2eb   :  { %673 = vmatmul.f32.gmra.mxu0 %v657_v26 }
 0x2ec   :  { %v619_v28 = vpop.f32.mrf.mxu2 }
 0x2ed   :  { %v640_v34 = vpop.f32.mrf.mxu3 }
 0x2ee   :  { %v646_v41 = vadd.f32 %v640_v34, %v619_v28  ;;  %v650_v42 = vmax.f32 %v619_v28, %v640_v34 }
 0x2f0   :  { %v654_v3 = vmul.f32 %v650_v42, %v646_v41  ;;  %2357 = vperm.xlu1 %5849, %v7039_v36   ;;  %1489 = vperm.xlu0 %5848, %v1375_v38  }
 0x2f1   :  { %2362 = vperm.xlu2 %5850, %v7047_v44  }
 0x2f2   :  { %v658_v46 = vadd.f32 %v654_v3, %v6753_v10  ;;  %v7070_v10 = vld [vmem:[%s10875_s19 + $0x50] sm:$0xff] }
 0x2f4   :  { %676 = vmatmul.f32.vlgmr.msra.gmra.mxu1 %v658_v46  ;;  %894 = vmatpush.msrb.mxu0 %v658_v46 }
 0x2f6   :  { %895 = vmatpush.msrb.mxu0 %v657_v26  ;;  %v681_v26 = vpop.permute.xlu2 %680 }
 0x2f8   :  { %896 = vmatpush.msrb.mxu0 %v656_v51  ;;  %2352 = vperm.xlu1 %5849, %v7055_v48   ;;  %v698_v51 = vsel %vm6759_vm2, %v685_v0, %v693_v63  ;;  %v5491_v0 = vld [vmem:[%s10991_s25 + $0xe0] sm:$0xf] }
 0x2f9   :  { %2006 = vperm.xlu0 %5848, %v7060_v50   ;;  %1484 = vperm.xlu2 %5850, %v1374_v53   ;;  %v702_v28 = vsel %vm251_vm3, %v6821_v62, %v698_v51  ;;  %v4881_v62 = vld [vmem:[%s10879_s23] sm:$0xff] }
 0x2fa   :  { %897 = vmatpush.msrb.mxu0 %v655_v60  ;;  %v683_v60 = vpop.permute.xlu0 %682 }
 0x2fb   :  { %v697_v17 = vsel %vm6759_vm2, %v683_v60, %v691_v8 }
 0x300   :  { %2001 = vperm.xlu1 %5849, %v7070_v10  }
 0x301   :  { %1479 = vperm.xlu0 %5848, %v1373_v20   ;;  %1434 = vperm.xlu2 %5850, %v1364_v25  }
 0x302   :  { %v695_v1 = vpop.permute.xlu0 %694 }
 0x303   :  { %v699_v7 = vsel %vm6759_vm2, %v687_v5, %v695_v1  ;;  %v5831_v1 = vld [vmem:[%s10991_s25 + $0xec] sm:$0xf0] }
 0x304   :  { %v703_v16 = vsel %vm251_vm3, %v6830_v4, %v699_v7  ;;  %v701_v4 = vsel %vm251_vm3, %v6814_v58, %v697_v17  ;;  %v5364_v58 = vld [vmem:[%s10867_s11 + $0x38] sm:$0xff]  ;;  %v7233_v51 = vor.u32 %v5831_v1, %v5491_v0 }
 0x308   :  { %1424 = vperm.xlu1 %5849, %v1362_v54  }
 0x309   :  { %1996 = vperm.xlu0 %5848, %v7085_v27   ;;  %1429 = vperm.xlu2 %5850, %v1363_v30  }
 0x30a   :  { %v689_v11 = vpop.permute.xlu0 %688 }
 0x30b   :  { %v696_v34 = vsel %vm6759_vm2, %v681_v26, %v689_v11  ;;  %v5493_v11 = vld [vmem:[%s10991_s25 + $0xf0] sm:$0xf0]  ;;  %v5501_v26 = vld [vmem:[%s10991_s25 + $0xf8] sm:$0xf0] }
 0x30c   :  { %v700_v42 = vsel %vm251_vm3, %v6809_v55, %v696_v34  ;;  %v5363_v55 = vld [vmem:[%s10867_s11 + $0x30] sm:$0xff] }
 0x310   :  { %3057 = vperm.xlu1 %5849, %v6894_v35  }
 0x311   :  { %1419 = vperm.xlu0 %5848, %v1361_v56   ;;  %1991 = vperm.xlu2 %5850, %v7097_v32  }
 0x318   :  { %3042 = vperm.xlu1 %5849, %v6913_v39  }
 0x319   :  { %3047 = vperm.xlu0 %5848, %v6904_v37   ;;  %3052 = vperm.xlu2 %5850, %v6886_v29  }
 0x320   :  { %2696 = vperm.xlu1 %5849, %v6918_v40  }
 0x321   :  { %3072 = vperm.xlu0 %5848, %v6958_v49   ;;  %3077 = vperm.xlu2 %5850, %v6948_v47  }
 0x328   :  { %3062 = vperm.xlu1 %5849, %v7002_v33  }
 0x329   :  { %2691 = vperm.xlu0 %5848, %v6931_v43   ;;  %3067 = vperm.xlu2 %5850, %v6967_v52  }
 0x330   :  { %2716 = vperm.xlu1 %5849, %v6982_v19  }
 0x331   :  { %2681 = vperm.xlu0 %5848, %v6975_v13   ;;  %2686 = vperm.xlu2 %5850, %v6940_v45  }
 0x338   :  { %2701 = vperm.xlu1 %5849, %v7031_v23  }
 0x339   :  { %2706 = vperm.xlu0 %5848, %v7013_v6   ;;  %2711 = vperm.xlu2 %5850, %v6994_v57  }
 0x340   :  { %3087 = vperm.xlu1 %5849, %v7039_v36  }
 0x341   :  { %3092 = vperm.xlu0 %5848, %v7047_v44   ;;  %3097 = vperm.xlu2 %5850, %v7026_v22  }
 0x348   :  { %2731 = vperm.xlu1 %5849, %v7070_v10  }
 0x349   :  { %2736 = vperm.xlu0 %5848, %v7060_v50   ;;  %3082 = vperm.xlu2 %5850, %v7055_v48  }
 0x350   :  { %3787 = vperm.xlu1 %5849, %v6894_v35  }
 0x351   :  { %2721 = vperm.xlu0 %5848, %v7097_v32   ;;  %2726 = vperm.xlu2 %5850, %v7085_v27  }
 0x357   :  { %v668_v59 = vpop.f32.mrf.mxu0 }
 0x358   :  { %3426 = vperm.xlu1 %5849, %v6918_v40   ;;  %v704_v3 = vsub.f32 %v668_v59, %v700_v42  ;;  %v5477_v42 = vld [vmem:[%s10991_s25 + $0xd0] sm:$0xf0] }
 0x359   :  { %3777 = vperm.xlu0 %5848, %v6904_v37   ;;  %3782 = vperm.xlu2 %5850, %v6886_v29  }
 0x360   :  { %3807 = vperm.xlu1 %5849, %v6948_v47   ;;  %v671_v2 = vpop.f32.mrf.mxu0 }
 0x361   :  { %3421 = vperm.xlu0 %5848, %v6931_v43   ;;  %3772 = vperm.xlu2 %5850, %v6913_v39   ;;  %v705_v41 = vsub.f32 %v671_v2, %v701_v4  ;;  %v5829_v2 = vld [vmem:[%s10991_s25 + $0xe4] sm:$0xf]  ;;  %v5827_v4 = vld [vmem:[%s10991_s25 + $0xcc] sm:$0xf0] }
 0x368   :  { %3411 = vperm.xlu1 %5849, %v6975_v13   ;;  %v674_v12 = vpop.f32.mrf.mxu0 }
 0x369   :  { %3802 = vperm.xlu0 %5848, %v6958_v49   ;;  %3416 = vperm.xlu2 %5850, %v6940_v45   ;;  %v706_v38 = vsub.f32 %v674_v12, %v702_v28  ;;  %v5499_v12 = vld [vmem:[%s10991_s25 + $0xe8] sm:$0xf]  ;;  %v5475_v28 = vld [vmem:[%s10991_s25 + $0xc0] sm:$0xf] }
 0x370   :  { %3792 = vperm.xlu1 %5849, %v7002_v33  }
 0x371   :  { %v677_v15 = vpop.f32.mrf.mxu1  ;;  %3446 = vperm.xlu0 %5848, %v6982_v19   ;;  %3797 = vperm.xlu2 %5850, %v6967_v52  }
 0x372   :  { %v707_v61 = vsub.f32 %v677_v15, %v703_v16  ;;  %v5832_v15 = vld [vmem:[%s10991_s25 + $0xf4] sm:$0xf0]  ;;  %v7244_v16 = vor.u32 %v5829_v2, %v5493_v11  ;;  %v5814_v2 = vld [vmem:[%s10991_s25 + $0x6c] sm:$0xf]  ;;  %v5419_v11 = vld [vmem:[%s10991_s25 + $0x48] sm:$0xf] }
 0x373   :  { %v7246_v17 = vor.u32 %v5832_v15, %v5499_v12  ;;  %v5812_v12 = vld [vmem:[%s10991_s25 + $0x54] sm:$0xf0] }
 0x374   :  { %737 = vmatpush.msrb.mxu1 %v707_v61  ;;  %v5830_v61 = vld [vmem:[%s10991_s25 + $0xec] sm:$0xf]  ;;  %1160 = vmatpush.bf16.msrb.mxu2 %v7244_v16 }
 0x375   :  { %1181 = vmatpush.bf16.msrb.mxu3 %v7246_v17 }
 0x376   :  { %738 = vmatpush.msrb.mxu1 %v706_v38  ;;  %v845_v38 = vld [vmem:[%s10869_s13] sm:$0xff] }
 0x378   :  { %739 = vmatpush.msrb.mxu1 %v705_v41  ;;  %3431 = vperm.xlu1 %5849, %v7031_v23   ;;  %v5825_v41 = vld [vmem:[%s10991_s25 + $0xc4] sm:$0xf] }
 0x379   :  { %3436 = vperm.xlu0 %5848, %v7013_v6   ;;  %3441 = vperm.xlu2 %5850, %v6994_v57  }
 0x37a   :  { %740 = vmatpush.msrb.mxu1 %v704_v3  ;;  %v7272_v3 = vor.u32 %v5827_v4, %v5475_v28  ;;  %v5421_v4 = vld [vmem:[%s10991_s25 + $0x58] sm:$0xf0] }
 0x37b   :  { %5365 = vmatmul.msk.f32.vlgmr.msrb.gmra.mxu1 %vm523_vm4, %v5361_v31  ;;  %v7274_v31 = vor.u32 %v5825_v41, %v5477_v42  ;;  %v848_v42 = vld [vmem:[%s10869_s13 + $0x18] sm:$0xff] }
 0x37c   :  { %1139 = vmatpush.bf16.msra.mxu1 %v7233_v51 }
 0x37d   :  { %1161 = vmatpush.bf16.msrb.mxu2 %v7274_v31 }
 0x380   :  { %3817 = vperm.xlu1 %5849, %v7039_v36   ;;  %1140 = vmatpush.bf16.msra.mxu1 %v7272_v3 }
 0x381   :  { %3822 = vperm.xlu0 %5848, %v7047_v44   ;;  %3827 = vperm.xlu2 %5850, %v7026_v22  }
 0x383   :  { %5366 = vmatmul.msk.f32.gmra.mxu1 %vm523_vm4, %v5362_v21  ;;  %v5483_v21 = vld [vmem:[%s10991_s25 + $0xc8] sm:$0xf] }
 0x388   :  { %3461 = vperm.xlu1 %5849, %v7070_v10  }
 0x389   :  { %3812 = vperm.xlu0 %5848, %v7055_v48   ;;  %3466 = vperm.xlu2 %5850, %v7060_v50  }
 0x38b   :  { %5367 = vmatmul.msk.f32.gmra.mxu1 %vm523_vm4, %v5363_v55  ;;  %v5828_v55 = vld [vmem:[%s10991_s25 + $0xd4] sm:$0xf0] }
 0x390   :  { %4517 = vperm.xlu1 %5849, %v6894_v35   ;;  %v4883_v35 = vld [vmem:[%s10879_s23 + $0x10] sm:$0xff] }
 0x391   :  { %3451 = vperm.xlu0 %5848, %v7097_v32   ;;  %3456 = vperm.xlu2 %5850, %v7085_v27  }
 0x393   :  { %5368 = vmatmul.msk.f32.gmra.mxu1 %vm523_vm4, %v5364_v58  ;;  %v5826_v58 = vld [vmem:[%s10991_s25 + $0xcc] sm:$0xf] }
 0x398   :  { %4502 = vperm.xlu1 %5849, %v6913_v39  }
 0x399   :  { %4507 = vperm.xlu0 %5848, %v6904_v37   ;;  %4512 = vperm.xlu2 %5850, %v6886_v29   ;;  %v4884_v29 = vld [vmem:[%s10879_s23 + $0x18] sm:$0xff]  ;;  %v4882_v37 = vld [vmem:[%s10879_s23 + $0x8] sm:$0xff] }
 0x3a0   :  { %4156 = vperm.xlu1 %5849, %v6918_v40  }
 0x3a1   :  { %4532 = vperm.xlu0 %5848, %v6958_v49   ;;  %4537 = vperm.xlu2 %5850, %v6948_v47  }
 0x3a8   :  { %4522 = vperm.xlu1 %5849, %v7002_v33  }
 0x3a9   :  { %4151 = vperm.xlu0 %5848, %v6931_v43   ;;  %4527 = vperm.xlu2 %5850, %v6967_v52   ;;  %v766_v43 = vpop.permute.xlu1 %765 }
 0x3b0   :  { %4176 = vperm.xlu1 %5849, %v6982_v19  }
 0x3b1   :  { %4141 = vperm.xlu0 %5848, %v6975_v13   ;;  %4146 = vperm.xlu2 %5850, %v6940_v45   ;;  %v771_v13 = vpop.permute.xlu2 %770  ;;  %v781_v46 = vpop.permute.xlu1 %780 }
 0x3b8   :  { %4161 = vperm.xlu1 %5849, %v7031_v23  }
 0x3b9   :  { %4166 = vperm.xlu0 %5848, %v7013_v6   ;;  %4171 = vperm.xlu2 %5850, %v6994_v57  }
 0x3c0   :  { %4547 = vperm.xlu1 %5849, %v7039_v36  }
 0x3c1   :  { %4552 = vperm.xlu0 %5848, %v7047_v44   ;;  %4557 = vperm.xlu2 %5850, %v7026_v22   ;;  %v776_v22 = vpop.permute.xlu0 %775 }
 0x3c8   :  { %4191 = vperm.xlu1 %5849, %v7070_v10  }
 0x3c9   :  { %4196 = vperm.xlu0 %5848, %v7060_v50   ;;  %4542 = vperm.xlu2 %5850, %v7055_v48  }
 0x3d0   :  { %4887 = vperm.xlu1 %5849, %v4881_v62  }
 0x3d1   :  { %4181 = vperm.xlu0 %5848, %v7097_v32   ;;  %4186 = vperm.xlu2 %5850, %v7085_v27  }
 0x3d8   :  { %4902 = vperm.xlu1 %5849, %v4884_v29   ;;  %v7285_v29 = vor.u32 %v5830_v61, %v5501_v26  ;;  %v847_v26 = vld [vmem:[%s10869_s13 + $0x10] sm:$0xff] }
 0x3d9   :  { %4897 = vperm.xlu0 %5848, %v4883_v35   ;;  %4892 = vperm.xlu2 %5850, %v4882_v37   ;;  %v7287_v35 = vor.u32 %v5828_v55, %v5483_v21  ;;  %v5485_v37 = vld [vmem:[%s10991_s25 + $0xd8] sm:$0xf0]  ;;  %v5395_v21 = vld [vmem:[%s10991_s25 + $0x20] sm:$0xf]  ;;  %v5807_v55 = vld [vmem:[%s10991_s25 + $0x2c] sm:$0xf0] }
 0x3db   :  { %1182 = vmatpush.bf16.msrb.mxu3 %v7287_v35 }
 0x3f8   :  { %v742_v39 = vpop.f32.mrf.mxu1 }
 0x3f9   :  { %v754_v40 = vadd.f32 %v742_v39, %v6628_v9  ;;  %v5459_v39 = vld [vmem:[%s10991_s25 + $0xa0] sm:$0xf] }
 0x3fb   :  { %v783_v45 = vadd.f32 %v766_v43, %v754_v40  ;;  %v5823_v40 = vld [vmem:[%s10991_s25 + $0xac] sm:$0xf0]  ;;  %v5821_v43 = vld [vmem:[%s10991_s25 + $0xa4] sm:$0xf] }
 0x3fd   :  { %v787_v47 = vmax.f32 %v783_v45, 0.0  ;;  %v5461_v45 = vld [vmem:[%s10991_s25 + $0xb0] sm:$0xf0] }
 0x3ff   :  { %799 = vmatmul.f32.vlgmr.msra.gmra.mxu2 %v787_v47  ;;  %820 = vmatmul.f32.vlgmr.msra.gmra.mxu3 %v787_v47  ;;  %v5467_v47 = vld [vmem:[%s10991_s25 + $0xa8] sm:$0xf] }
 0x400   :  { %v745_v49 = vpop.f32.mrf.mxu1 }
 0x401   :  { %v755_v52 = vadd.f32 %v745_v49, %v6636_v14  ;;  %v7308_v49 = vor.u32 %v5823_v40, %v5459_v39  ;;  %v5403_v39 = vld [vmem:[%s10991_s25 + $0x28] sm:$0xf]  ;;  %v5808_v40 = vld [vmem:[%s10991_s25 + $0x34] sm:$0xf0] }
 0x403   :  { %v784_v19 = vadd.f32 %v771_v13, %v755_v52  ;;  %v5824_v52 = vld [vmem:[%s10991_s25 + $0xb4] sm:$0xf0]  ;;  %v7315_v13 = vor.u32 %v5821_v43, %v5461_v45  ;;  %1141 = vmatpush.bf16.msra.mxu1 %v7308_v49  ;;  %v5404_v45 = vor.u32 %v5808_v40, %v5403_v39 }
 0x405   :  { %v788_v57 = vmax.f32 %v784_v19, 0.0  ;;  %v5443_v19 = vld [vmem:[%s10991_s25 + $0x80] sm:$0xf]  ;;  %1162 = vmatpush.bf16.msrb.mxu2 %v7315_v13 }
 0x407   :  { %802 = vmatmul.f32.gmra.mxu2 %v788_v57  ;;  %823 = vmatmul.f32.gmra.mxu3 %v788_v57  ;;  %v5819_v57 = vld [vmem:[%s10991_s25 + $0x8c] sm:$0xf0] }
 0x408   :  { %v748_v33 = vpop.f32.mrf.mxu1 }
 0x409   :  { %v756_v6 = vadd.f32 %v748_v33, %v6651_v18  ;;  %v7325_v33 = vor.u32 %v5826_v58, %v5485_v37  ;;  %v5805_v58 = vld [vmem:[%s10991_s25 + $0x24] sm:$0xf]  ;;  %v5397_v37 = vld [vmem:[%s10991_s25 + $0x30] sm:$0xf0] }
 0x40a   :  { %v5400_v43 = vor.u32 %v5805_v58, %v5397_v37  ;;  %v1330_v37 = vld [vmem:[%s10872_s16 + $0x8] sm:$0xff] }
 0x40b   :  { %v785_v23 = vadd.f32 %v776_v22, %v756_v6  ;;  %v7327_v6 = vor.u32 %v5824_v52, %v5467_v47  ;;  %v5822_v22 = vld [vmem:[%s10991_s25 + $0xac] sm:$0xf]  ;;  %v5405_v52 = vld [vmem:[%s10991_s25 + $0x38] sm:$0xf0] }
 0x40c   :  { %v5806_v47 = vld [vmem:[%s10991_s25 + $0x2c] sm:$0xf] }
 0x40d   :  { %v789_v36 = vmax.f32 %v785_v23, 0.0  ;;  %v5817_v23 = vld [vmem:[%s10991_s25 + $0x84] sm:$0xf]  ;;  %1183 = vmatpush.bf16.msrb.mxu3 %v7327_v6 }
 0x40f   :  { %805 = vmatmul.f32.gmra.mxu2 %v789_v36  ;;  %826 = vmatmul.f32.gmra.mxu3 %v789_v36  ;;  %v5445_v36 = vld [vmem:[%s10991_s25 + $0x90] sm:$0xf0] }
 0x410   :  { %v751_v9 = vpop.f32.mrf.mxu1 }
 0x411   :  { %v757_v44 = vadd.f32 %v751_v9, %v6673_v24  ;;  %v5469_v9 = vld [vmem:[%s10991_s25 + $0xb8] sm:$0xf0] }
 0x413   :  { %v786_v48 = vadd.f32 %v781_v46, %v757_v44  ;;  %v5451_v44 = vld [vmem:[%s10991_s25 + $0x88] sm:$0xf]  ;;  %v5820_v46 = vld [vmem:[%s10991_s25 + $0x94] sm:$0xf0] }
 0x415   :  { %v790_v50 = vmax.f32 %v786_v48, 0.0  ;;  %v7348_v48 = vor.u32 %v5819_v57, %v5443_v19  ;;  %v5408_v19 = vor.u32 %v5806_v47, %v5405_v52  ;;  %v5379_v57 = vld [vmem:[%s10991_s25] sm:$0xf]  ;;  %v1331_v47 = vld [vmem:[%s10872_s16 + $0x10] sm:$0xff] }
 0x417   :  { %808 = vmatmul.f32.gmra.mxu2 %v790_v50  ;;  %829 = vmatmul.f32.gmra.mxu3 %v790_v50  ;;  %v846_v50 = vld [vmem:[%s10869_s13 + $0x8] sm:$0xff] }
 0x418   :  { %1142 = vmatpush.bf16.msra.mxu1 %v7348_v48 }
 0x482   :  { %v800_v14 = vpop.f32.mrf.mxu2  ;;  %v821_v53 = vpop.f32.mrf.mxu3 }
 0x483   :  { %v833_v5 = vadd.f32 %v821_v53, %v800_v14  ;;  %v837_v7 = vmax.f32 %v800_v14, %v821_v53  ;;  %v7354_v14 = vor.u32 %v5817_v23, %v5445_v36  ;;  %v5427_v53 = vld [vmem:[%s10991_s25 + $0x60] sm:$0xf]  ;;  %v5801_v23 = vld [vmem:[%s10991_s25 + $0x4] sm:$0xf] }
 0x485   :  { %v841_v62 = vmul.f32 %v837_v7, %v833_v5  ;;  %1163 = vmatpush.bf16.msrb.mxu2 %v7354_v14  ;;  %v5809_v5 = vld [vmem:[%s10991_s25 + $0x44] sm:$0xf]  ;;  %v5413_v7 = vld [vmem:[%s10991_s25 + $0x50] sm:$0xf0] }
 0x486   :  { %v7427_v61 = vor.u32 %v5809_v5, %v5413_v7 }
 0x48a   :  { %v803_v10 = vpop.f32.mrf.mxu2  ;;  %v824_v20 = vpop.f32.mrf.mxu3 }
 0x48b   :  { %v834_v60 = vadd.f32 %v824_v20, %v803_v10  ;;  %v838_v63 = vmax.f32 %v803_v10, %v824_v20  ;;  %v5815_v10 = vld [vmem:[%s10991_s25 + $0x6c] sm:$0xf0]  ;;  %v7364_v20 = vor.u32 %v5822_v22, %v5469_v9  ;;  %v5381_v9 = vld [vmem:[%s10991_s25 + $0x10] sm:$0xf0] }
 0x48c   :  { %v5803_v22 = vld [vmem:[%s10991_s25 + $0xc] sm:$0xf0] }
 0x48d   :  { %v842_v34 = vmul.f32 %v838_v63, %v834_v60  ;;  %v5411_v63 = vld [vmem:[%s10991_s25 + $0x40] sm:$0xf]  ;;  %v5380_v36 = vor.u32 %v5803_v22, %v5379_v57 }
 0x492   :  { %v806_v25 = vpop.f32.mrf.mxu2  ;;  %v827_v54 = vpop.f32.mrf.mxu3 }
 0x493   :  { %v835_v30 = vadd.f32 %v827_v54, %v806_v25  ;;  %v839_v56 = vmax.f32 %v806_v25, %v827_v54  ;;  %v7366_v25 = vor.u32 %v5820_v46, %v5451_v44  ;;  %v5818_v54 = vld [vmem:[%s10991_s25 + $0x8c] sm:$0xf]  ;;  %v5387_v44 = vld [vmem:[%s10991_s25 + $0x8] sm:$0xf]  ;;  %v5804_v46 = vld [vmem:[%s10991_s25 + $0x14] sm:$0xf0] }
 0x495   :  { %v843_v8 = vmul.f32 %v839_v56, %v835_v30  ;;  %v5453_v30 = vld [vmem:[%s10991_s25 + $0x98] sm:$0xf0]  ;;  %v5435_v56 = vld [vmem:[%s10991_s25 + $0x68] sm:$0xf]  ;;  %1184 = vmatpush.bf16.msrb.mxu3 %v7366_v25 }
 0x496   :  { %v7401_v0 = vor.u32 %v5818_v54, %v5453_v30  ;;  %v5389_v54 = vld [vmem:[%s10991_s25 + $0x18] sm:$0xf0] }
 0x49a   :  { %v809_v18 = vpop.f32.mrf.mxu2  ;;  %v830_v27 = vpop.f32.mrf.mxu3 }
 0x49b   :  { %v836_v32 = vadd.f32 %v830_v27, %v809_v18  ;;  %v840_v59 = vmax.f32 %v809_v18, %v830_v27  ;;  %v5813_v18 = vld [vmem:[%s10991_s25 + $0x64] sm:$0xf]  ;;  %v5429_v27 = vld [vmem:[%s10991_s25 + $0x70] sm:$0xf0] }
 0x49c   :  { %v7391_v60 = vor.u32 %v5813_v18, %v5429_v27 }
 0x49d   :  { %v844_v24 = vmul.f32 %v840_v59, %v836_v32  ;;  %v5816_v32 = vld [vmem:[%s10991_s25 + $0x74] sm:$0xf0]  ;;  %v7387_v59 = vor.u32 %v5815_v10, %v5427_v53  ;;  %v5388_v53 = vor.u32 %v5804_v46, %v5387_v44  ;;  %v5802_v10 = vld [vmem:[%s10991_s25 + $0xc] sm:$0xf] }
 0x49e   :  { %v7403_v1 = vor.u32 %v5816_v32, %v5435_v56  ;;  %1164 = vmatpush.bf16.msrb.mxu2 %v7391_v60  ;;  %v5392_v18 = vor.u32 %v5802_v10, %v5389_v54 }
 0x49f   :  { %898 = vmatpush.msrb.mxu0 %v844_v24  ;;  %v5811_v24 = vld [vmem:[%s10991_s25 + $0x4c] sm:$0xf0]  ;;  %1143 = vmatpush.bf16.msra.mxu1 %v7387_v59 }
 0x4a0   :  { %v7424_v15 = vor.u32 %v5811_v24, %v5411_v63  ;;  %1185 = vmatpush.bf16.msrb.mxu3 %v7403_v1 }
 0x4a1   :  { %899 = vmatpush.msrb.mxu0 %v843_v8  ;;  %v5437_v8 = vld [vmem:[%s10991_s25 + $0x78] sm:$0xf0] }
 0x4a2   :  { %v7434_v28 = vor.u32 %v5814_v2, %v5437_v8  ;;  %1165 = vmatpush.bf16.msrb.mxu2 %v7427_v61 }
 0x4a3   :  { %900 = vmatpush.msrb.mxu0 %v842_v34  ;;  %v7436_v34 = vor.u32 %v5812_v12, %v5419_v11  ;;  %1144 = vmatpush.bf16.msra.mxu1 %v7424_v15 }
 0x4a5   :  { %901 = vmatpush.msrb.mxu0 %v841_v62  ;;  %1186 = vmatpush.bf16.msrb.mxu3 %v7436_v34  ;;  %v5396_v62 = vor.u32 %v5807_v55, %v5395_v21 }
 0x4a6   :  { %5373 = vmatmul.msk.f32.vlgmr.msrb.gmra.mxu0 %vm873_vm5, %v845_v38  ;;  %v5810_v38 = vld [vmem:[%s10991_s25 + $0x4c] sm:$0xf]  ;;  %1166 = vmatpush.bf16.msrb.mxu2 %v5400_v43 }
 0x4a7   :  { %1202 = vmatpush.bf16.msra.mxu0 %v7285_v29  ;;  %v5424_v41 = vor.u32 %v5810_v38, %v5421_v4  ;;  %1145 = vmatpush.bf16.msra.mxu1 %v5396_v62 }
 0x4a9   :  { %1187 = vmatpush.bf16.msrb.mxu3 %v5404_v45 }
 0x4ab   :  { %1203 = vmatpush.bf16.msra.mxu0 %v7325_v33  ;;  %1146 = vmatpush.bf16.msra.mxu1 %v5380_v36 }
 0x4ad   :  { %1188 = vmatpush.bf16.msrb.mxu3 %v5388_v53 }
 0x4ae   :  { %5374 = vmatmul.msk.f32.gmra.mxu0 %vm873_vm5, %v846_v50  ;;  %v5384_v50 = vor.u32 %v5801_v23, %v5381_v9  ;;  %v1332_v23 = vld [vmem:[%s10872_s16 + $0x18] sm:$0xff]  ;;  %v1223_v9 = vld [vmem:[%s10992_s14] sm:$0xf] }
 0x4af   :  { %1204 = vmatpush.bf16.msra.mxu0 %v7364_v20  ;;  %1233 = vmatpush.bf16.msrb.mxu1 %v7233_v51  ;;  %v856_v51 = vpop.permute.xlu2 %855  ;;  %v1226_v44 = vperm.slane %v1223_v9, 1  ;;  %v1225_v46 = vperm.slane %v1223_v9, 0 }
 0x4b0   :  { %1167 = vmatpush.bf16.msrb.mxu2 %v5384_v50 }
 0x4b1   :  { %1275 = vmatpush.bf16.msra.mxu3 %v7246_v17 }
 0x4b3   :  { %1205 = vmatpush.bf16.msra.mxu0 %v7401_v0  ;;  %1234 = vmatpush.bf16.msrb.mxu1 %v7272_v3  ;;  %v922_v3 = vpop.permute.xlu0 %921 }
 0x4b4   :  { %1254 = vmatpush.bf16.msra.mxu2 %v7244_v16 }
 0x4b5   :  { %1276 = vmatpush.bf16.msra.mxu3 %v7287_v35  ;;  %v861_v35 = vpop.permute.xlu1 %860 }
 0x4b6   :  { %5375 = vmatmul.msk.f32.gmra.mxu0 %vm873_vm5, %v847_v26 }
 0x4b7   :  { %1206 = vmatpush.bf16.msra.mxu0 %v7434_v28  ;;  %1235 = vmatpush.bf16.msrb.mxu1 %v7308_v49 }
 0x4b8   :  { %1255 = vmatpush.bf16.msra.mxu2 %v7274_v31 }
 0x4b9   :  { %1277 = vmatpush.bf16.msra.mxu3 %v7327_v6 }
 0x4bb   :  { %1207 = vmatpush.bf16.msra.mxu0 %v5424_v41  ;;  %1236 = vmatpush.bf16.msrb.mxu1 %v7348_v48 }
 0x4bc   :  { %1256 = vmatpush.bf16.msra.mxu2 %v7315_v13 }
 0x4bd   :  { %1278 = vmatpush.bf16.msra.mxu3 %v7366_v25  ;;  %v932_v27 = vpop.permute.xlu1 %931 }
 0x4be   :  { %5376 = vmatmul.msk.f32.gmra.mxu0 %vm873_vm5, %v848_v42  ;;  %v1329_v42 = vld [vmem:[%s10872_s16] sm:$0xff] }
 0x4bf   :  { %1208 = vmatpush.bf16.msra.mxu0 %v5408_v19  ;;  %1237 = vmatpush.bf16.msrb.mxu1 %v7387_v59 }
 0x4c0   :  { %1257 = vmatpush.bf16.msra.mxu2 %v7354_v14  ;;  %v866_v14 = vpop.permute.xlu0 %865 }
 0x4c1   :  { %1279 = vmatpush.bf16.msra.mxu3 %v7403_v1 }
 0x4c3   :  { %1209 = vmatpush.bf16.msra.mxu0 %v5392_v18  ;;  %1238 = vmatpush.bf16.msrb.mxu1 %v7424_v15 }
 0x4c4   :  { %1258 = vmatpush.bf16.msra.mxu2 %v7391_v60 }
 0x4c5   :  { %1280 = vmatpush.bf16.msra.mxu3 %v7436_v34 }
 0x4c7   :  { %1296 = vmatpush.bf16.msrb.mxu0 %v7285_v29  ;;  %1239 = vmatpush.bf16.msrb.mxu1 %v5396_v62 }
 0x4c8   :  { %1259 = vmatpush.bf16.msra.mxu2 %v7427_v61  ;;  %v937_v63 = vpop.permute.xlu0 %936 }
 0x4c9   :  { %1281 = vmatpush.bf16.msra.mxu3 %v5404_v45 }
 0x4cb   :  { %1297 = vmatpush.bf16.msrb.mxu0 %v7325_v33  ;;  %1240 = vmatpush.bf16.msrb.mxu1 %v5380_v36  ;;  %v927_v33 = vpop.permute.xlu2 %926 }
 0x4cc   :  { %1260 = vmatpush.bf16.msra.mxu2 %v5400_v43 }
 0x4cd   :  { %1282 = vmatpush.bf16.msra.mxu3 %v5388_v53 }
 0x4cf   :  { %1298 = vmatpush.bf16.msrb.mxu0 %v7364_v20 }
 0x4d0   :  { %1261 = vmatpush.bf16.msra.mxu2 %v5384_v50 }
 0x4d3   :  { %1299 = vmatpush.bf16.msrb.mxu0 %v7401_v0  ;;  %v871_v32 = vpop.permute.xlu2 %870 }
 0x4d7   :  { %1300 = vmatpush.bf16.msrb.mxu0 %v7434_v28 }
 0x4db   :  { %1301 = vmatpush.bf16.msrb.mxu0 %v5424_v41 }
 0x4df   :  { %1302 = vmatpush.bf16.msrb.mxu0 %v5408_v19 }
 0x4e3   :  { %1303 = vmatpush.bf16.msrb.mxu0 %v5392_v18 }
 0x523   :  { %v903_v16 = vpop.f32.mrf.mxu0 }
 0x524   :  { %v904_v17 = vadd.f32 %v903_v16, %v856_v51  ;;  %v1333_v51 = vld [vmem:[%s10872_s16 + $0x20] sm:$0xff]  ;;  %v1227_v16 = vperm.slane %v1223_v9, 2 }
 0x526   :  { %v939_v31 = vadd.f32 %v922_v3, %v904_v17 }
 0x528   :  { %v943_v29 = vmax.f32 %v939_v31, 0.0 }
 0x52a   :  { %1147 = vmatmul.f32.vlgmr.msra.gmra.mxu1 %v943_v29  ;;  %1168 = vmatmul.f32.vlgmr.msrb.gmra.mxu2 %v943_v29 }
 0x52b   :  { %1189 = vmatmul.f32.vlgmr.msrb.gmra.mxu3 %v943_v29  ;;  %1210 = vmatmul.f32.vlgmr.msra.gmra.mxu0 %v943_v29  ;;  %v906_v49 = vpop.f32.mrf.mxu0 }
 0x52c   :  { %v907_v13 = vadd.f32 %v906_v49, %v861_v35 }
 0x52e   :  { %v940_v6 = vadd.f32 %v927_v33, %v907_v13  ;;  %v1228_v33 = vperm.slane %v1223_v9, 3 }
 0x530   :  { %v944_v48 = vmax.f32 %v940_v6, 0.0 }
 0x532   :  { %1150 = vmatmul.f32.gmra.mxu1 %v944_v48  ;;  %1171 = vmatmul.f32.gmra.mxu2 %v944_v48 }
 0x533   :  { %1192 = vmatmul.f32.gmra.mxu3 %v944_v48  ;;  %1213 = vmatmul.f32.gmra.mxu0 %v944_v48  ;;  %v909_v20 = vpop.f32.mrf.mxu0 }
 0x534   :  { %v910_v25 = vadd.f32 %v909_v20, %v866_v14 }
 0x536   :  { %v941_v30 = vadd.f32 %v932_v27, %v910_v25 }
 0x538   :  { %v945_v56 = vmax.f32 %v941_v30, 0.0 }
 0x53a   :  { %1153 = vmatmul.f32.gmra.mxu1 %v945_v56  ;;  %1174 = vmatmul.f32.gmra.mxu2 %v945_v56 }
 0x53b   :  { %1195 = vmatmul.f32.gmra.mxu3 %v945_v56  ;;  %1216 = vmatmul.f32.gmra.mxu0 %v945_v56  ;;  %v912_v59 = vpop.f32.mrf.mxu0 }
 0x53c   :  { %v913_v60 = vadd.f32 %v912_v59, %v871_v32 }
 0x53e   :  { %v942_v24 = vadd.f32 %v937_v63, %v913_v60 }
 0x540   :  { %v946_v0 = vmax.f32 %v942_v24, 0.0 }
 0x542   :  { %1156 = vmatmul.f32.gmra.mxu1 %v946_v0  ;;  %1177 = vmatmul.f32.gmra.mxu2 %v946_v0 }
 0x543   :  { %1198 = vmatmul.f32.gmra.mxu3 %v946_v0  ;;  %1219 = vmatmul.f32.gmra.mxu0 %v946_v0 }
 0x54a   :  { %1241 = vmatmul.f32.vlgmr.msrb.gmra.mxu1 %v904_v17  ;;  %1262 = vmatmul.f32.vlgmr.msra.gmra.mxu2 %v904_v17 }
 0x54b   :  { %1283 = vmatmul.f32.vlgmr.msra.gmra.mxu3 %v904_v17  ;;  %1304 = vmatmul.f32.vlgmr.msrb.gmra.mxu0 %v904_v17 }
 0x552   :  { %1244 = vmatmul.f32.gmra.mxu1 %v907_v13  ;;  %1265 = vmatmul.f32.gmra.mxu2 %v907_v13 }
 0x553   :  { %1286 = vmatmul.f32.gmra.mxu3 %v907_v13  ;;  %1307 = vmatmul.f32.gmra.mxu0 %v907_v13 }
 0x55a   :  { %1247 = vmatmul.f32.gmra.mxu1 %v910_v25  ;;  %1268 = vmatmul.f32.gmra.mxu2 %v910_v25 }
 0x55b   :  { %1289 = vmatmul.f32.gmra.mxu3 %v910_v25  ;;  %1310 = vmatmul.f32.gmra.mxu0 %v910_v25 }
 0x562   :  { %1250 = vmatmul.f32.gmra.mxu1 %v913_v60  ;;  %1271 = vmatmul.f32.gmra.mxu2 %v913_v60 }
 0x563   :  { %1292 = vmatmul.f32.gmra.mxu3 %v913_v60  ;;  %1313 = vmatmul.f32.gmra.mxu0 %v913_v60 }
 0x5a7   :  { %v1148_v1 = vpop.f32.mrf.mxu1 }
 0x5a8   :  { %v1211_v2 = vpop.f32.mrf.mxu0 }
 0x5ad   :  { %v1169_v5 = vpop.f32.mrf.mxu2 }
 0x5ae   :  { %v1190_v7 = vpop.f32.mrf.mxu3 }
 0x5af   :  { %v1151_v8 = vpop.f32.mrf.mxu1 }
 0x5b0   :  { %v1214_v11 = vpop.f32.mrf.mxu0 }
 0x5b5   :  { %v1172_v12 = vpop.f32.mrf.mxu2 }
 0x5b6   :  { %v1193_v15 = vpop.f32.mrf.mxu3 }
 0x5b7   :  { %v1154_v61 = vpop.f32.mrf.mxu1 }
 0x5b8   :  { %v1217_v26 = vpop.f32.mrf.mxu0 }
 0x5bd   :  { %v1175_v28 = vpop.f32.mrf.mxu2 }
 0x5be   :  { %v1196_v34 = vpop.f32.mrf.mxu3 }
 0x5bf   :  { %v1157_v38 = vpop.f32.mrf.mxu1 }
 0x5c0   :  { %v1220_v4 = vpop.f32.mrf.mxu0  ;;  %1581 = vmatpush.msra.mxu1 %v1157_v38  ;;  %v1340_v38 = vld [vmem:[%s10872_s16 + $0x58] sm:$0xff] }
 0x5c1   :  { %1848 = vmatpush.msra.mxu0 %v1220_v4  ;;  %v1341_v4 = vld [vmem:[%s10872_s16 + $0x60] sm:$0xff] }
 0x5c2   :  { %1582 = vmatpush.msra.mxu1 %v1154_v61  ;;  %v1336_v61 = vld [vmem:[%s10872_s16 + $0x38] sm:$0xff] }
 0x5c3   :  { %1849 = vmatpush.msra.mxu0 %v1217_v26  ;;  %v1337_v26 = vld [vmem:[%s10872_s16 + $0x40] sm:$0xff] }
 0x5c4   :  { %1583 = vmatpush.msra.mxu1 %v1151_v8 }
 0x5c5   :  { %1850 = vmatpush.msra.mxu0 %v1214_v11  ;;  %v1178_v41 = vpop.f32.mrf.mxu2 }
 0x5c6   :  { %v1199_v21 = vpop.f32.mrf.mxu3  ;;  %1584 = vmatpush.msra.mxu1 %v1148_v1  ;;  %1670 = vmatpush.msrb.mxu2 %v1178_v41  ;;  %v1334_v1 = vld [vmem:[%s10872_s16 + $0x28] sm:$0xff] }
 0x5c7   :  { %1759 = vmatpush.msrb.mxu3 %v1199_v21  ;;  %1851 = vmatpush.msra.mxu0 %v1211_v2  ;;  %v1242_v55 = vpop.f32.mrf.mxu1  ;;  %v1342_v41 = vld [vmem:[%s10872_s16 + $0x68] sm:$0xff]  ;;  %v1344_v21 = vld [vmem:[%s10872_s16 + $0x78] sm:$0xff] }
 0x5c8   :  { %5505 = vmatmul.msk.f32.vlgmr.msra.gmra.mxu1 %vm523_vm4, %v1329_v42  ;;  %5577 = vmatmul.msk.f32.vlgmr.msra.gmra.mxu0 %vm523_vm4, %v1329_v42  ;;  %v7529_v58 = vpop.f32.mrf.mxu0  ;;  %v1243_v14 = vadd.f32 %v1242_v55, %v1225_v46 }
 0x5c9   :  { %1671 = vmatpush.msrb.mxu2 %v1175_v28  ;;  %1760 = vmatpush.msrb.mxu3 %v1196_v34  ;;  %v1306_v8 = vadd.f32 %v7529_v58, %v1228_v33  ;;  %v1338_v28 = vld [vmem:[%s10872_s16 + $0x48] sm:$0xff]  ;;  %v1339_v34 = vld [vmem:[%s10872_s16 + $0x50] sm:$0xff]  ;;  %v1345_v58 = vld [vmem:[%s10872_s16 + $0x80] sm:$0xff] }
 0x5cb   :  { %1672 = vmatpush.msrb.mxu2 %v1172_v12  ;;  %1761 = vmatpush.msrb.mxu3 %v1193_v15  ;;  %v1335_v15 = vld [vmem:[%s10872_s16 + $0x30] sm:$0xff] }
 0x5cd   :  { %1673 = vmatpush.msrb.mxu2 %v1169_v5  ;;  %1762 = vmatpush.msrb.mxu3 %v1190_v7  ;;  %v1263_v62 = vpop.f32.mrf.mxu2 }
 0x5ce   :  { %v1284_v39 = vpop.f32.mrf.mxu3  ;;  %5529 = vmatmul.msk.f32.vlgmr.msrb.gmra.mxu2 %vm523_vm4, %v1329_v42  ;;  %5553 = vmatmul.msk.f32.vlgmr.msrb.gmra.mxu3 %vm523_vm4, %v1329_v42  ;;  %v1264_v29 = vadd.f32 %v1263_v62, %v1226_v44  ;;  %v1343_v42 = vld [vmem:[%s10872_s16 + $0x70] sm:$0xff] }
 0x5cf   :  { %v1245_v40 = vpop.f32.mrf.mxu1  ;;  %v1285_v63 = vadd.f32 %v1284_v39, %v1227_v16  ;;  %v1346_v39 = vld [vmem:[%s10872_s16 + $0x88] sm:$0xff] }
 0x5d0   :  { %5506 = vmatmul.msk.f32.gmra.mxu1 %vm523_vm4, %v1330_v37  ;;  %5578 = vmatmul.msk.f32.gmra.mxu0 %vm523_vm4, %v1330_v37  ;;  %v1308_v43 = vpop.f32.mrf.mxu0  ;;  %v1246_v35 = vadd.f32 %v1245_v40, %v1225_v46  ;;  %v1317_v56 = vmax.f32 %v1243_v14, %v1264_v29 }
 0x5d1   :  { %v1309_v5 = vadd.f32 %v1308_v43, %v1228_v33 }
 0x5d2   :  { %v1321_v2 = vmax.f32 %v1317_v56, %v1285_v63  ;;  %v2287_v56 = vld [vmem:[%s10876_s20 + $0x8] sm:$0xff] }
 0x5d4   :  { %v7580_v12 = vmax.f32 %v1321_v2, %v1306_v8 }
 0x5d5   :  { %v1266_v45 = vpop.f32.mrf.mxu2 }
 0x5d6   :  { %v1287_v52 = vpop.f32.mrf.mxu3  ;;  %5530 = vmatmul.msk.f32.gmra.mxu2 %vm523_vm4, %v1330_v37  ;;  %5554 = vmatmul.msk.f32.gmra.mxu3 %vm523_vm4, %v1330_v37  ;;  %v1267_v10 = vadd.f32 %v1266_v45, %v1226_v44  ;;  %10996 = vst [vmem:[#allocation12_spill] sm:$0xff] %v7580_v12 }
 0x5d7   :  { %v1248_v19 = vpop.f32.mrf.mxu1  ;;  %v1288_v32 = vadd.f32 %v1287_v52, %v1227_v16 }
 0x5d8   :  { %5507 = vmatmul.msk.f32.gmra.mxu1 %vm523_vm4, %v1331_v47  ;;  %5579 = vmatmul.msk.f32.gmra.mxu0 %vm523_vm4, %v1331_v47  ;;  %v1311_v57 = vpop.f32.mrf.mxu0  ;;  %v1249_v54 = vadd.f32 %v1248_v19, %v1225_v46  ;;  %v1318_v20 = vmax.f32 %v1246_v35, %v1267_v10 }
 0x5d9   :  { %v1312_v0 = vadd.f32 %v1311_v57, %v1228_v33 }
 0x5da   :  { %v1322_v24 = vmax.f32 %v1318_v20, %v1288_v32  ;;  %v1926_v20 = vld [vmem:[%s10874_s18 + $0x8] sm:$0xff] }
 0x5dc   :  { %v7576_v11 = vmax.f32 %v1322_v24, %v1309_v5 }
 0x5dd   :  { %v1269_v22 = vpop.f32.mrf.mxu2 }
 0x5de   :  { %v1290_v36 = vpop.f32.mrf.mxu3  ;;  %5531 = vmatmul.msk.f32.gmra.mxu2 %vm523_vm4, %v1331_v47  ;;  %5555 = vmatmul.msk.f32.gmra.mxu3 %vm523_vm4, %v1331_v47  ;;  %v1270_v50 = vadd.f32 %v1269_v22, %v1226_v44  ;;  %10995 = vst [vmem:[#allocation11_spill] sm:$0xff] %v7576_v11  ;;  %v1347_v47 = vld [vmem:[%s10872_s16 + $0x90] sm:$0xff]  ;;  %v1348_v22 = vld [vmem:[%s10872_s16 + $0x98] sm:$0xff] }
 0x5df   :  { %v1251_v53 = vpop.f32.mrf.mxu1  ;;  %v1291_v25 = vadd.f32 %v1290_v36, %v1227_v16 }
 0x5e0   :  { %5508 = vmatmul.msk.f32.gmra.mxu1 %vm523_vm4, %v1332_v23  ;;  %5580 = vmatmul.msk.f32.gmra.mxu0 %vm523_vm4, %v1332_v23  ;;  %v1252_v17 = vadd.f32 %v1251_v53, %v1225_v46  ;;  %v1319_v49 = vmax.f32 %v1249_v54, %v1270_v50  ;;  %v1314_v13 = vpop.f32.mrf.mxu0  ;;  %v1350_v53 = vld [vmem:[%s10872_s16 + $0xa8] sm:$0xff] }
 0x5e1   :  { %v1315_v27 = vadd.f32 %v1314_v13, %v1228_v33  ;;  %v1925_v13 = vld [vmem:[%s10874_s18] sm:$0xff] }
 0x5e2   :  { %v1323_v59 = vmax.f32 %v1319_v49, %v1291_v25 }
 0x5e4   :  { %v7569_v7 = vmax.f32 %v1323_v59, %v1312_v0  ;;  %v1927_v59 = vld [vmem:[%s10874_s18 + $0x10] sm:$0xff]  ;;  %v7798_v0 = vpop.permute.xlu2 %2327 }
 0x5e5   :  { %v1272_v18 = vpop.f32.mrf.mxu2 }
 0x5e6   :  { %v1273_v3 = vadd.f32 %v1272_v18, %v1226_v44  ;;  %v1293_v31 = vpop.f32.mrf.mxu3  ;;  %5532 = vmatmul.msk.f32.gmra.mxu2 %vm523_vm4, %v1332_v23  ;;  %5556 = vmatmul.msk.f32.gmra.mxu3 %vm523_vm4, %v1332_v23  ;;  %10994 = vst [vmem:[#allocation10_spill] sm:$0xff] %v7569_v7  ;;  %v1349_v44 = vld [vmem:[%s10872_s16 + $0xa0] sm:$0xff] }
 0x5e7   :  { %v1294_v48 = vadd.f32 %v1293_v31, %v1227_v16  ;;  %v1352_v31 = vld [vmem:[%s10872_s16 + $0xb8] sm:$0xff] }
 0x5e8   :  { %v1320_v6 = vmax.f32 %v1252_v17, %v1273_v3  ;;  %5509 = vmatmul.msk.f32.gmra.mxu1 %vm523_vm4, %v1333_v51  ;;  %5581 = vmatmul.msk.f32.gmra.mxu0 %vm523_vm4, %v1333_v51 }
 0x5ea   :  { %v1324_v30 = vmax.f32 %v1320_v6, %v1294_v48  ;;  %v2286_v6 = vld [vmem:[%s10876_s20] sm:$0xff] }
 0x5ec   :  { %v7562_v60 = vmax.f32 %v1324_v30, %v1315_v27  ;;  %v7780_v27 = vpop.permute.xlu1 %1454  ;;  %v7782_v30 = vpop.permute.xlu0 %1449 }
 0x5ed   :  { %11014 = vst [vmem:[#allocation30_spill] sm:$0xff] %v7780_v27 }
 0x5ee   :  { %10993 = vst [vmem:[#allocation9_spill] sm:$0xff] %v7562_v60  ;;  %5533 = vmatmul.msk.f32.gmra.mxu2 %vm523_vm4, %v1333_v51  ;;  %5557 = vmatmul.msk.f32.gmra.mxu3 %vm523_vm4, %v1333_v51  ;;  %v1351_v51 = vld [vmem:[%s10872_s16 + $0xb0] sm:$0xff] }
 0x5ef   :  { %2057 = vmatpush.msrb.mxu1 %v7562_v60  ;;  %2418 = vmatpush.msra.mxu2 %v7562_v60  ;;  %11015 = vst [vmem:[#allocation31_spill] sm:$0xff] %v7782_v30 }
 0x5f0   :  { %5510 = vmatmul.msk.f32.gmra.mxu1 %vm523_vm4, %v1334_v1  ;;  %5582 = vmatmul.msk.f32.gmra.mxu0 %vm523_vm4, %v1334_v1 }
 0x5f1   :  { %2058 = vmatpush.msrb.mxu1 %v7569_v7  ;;  %2419 = vmatpush.msra.mxu2 %v7569_v7 }
 0x5f3   :  { %2059 = vmatpush.msrb.mxu1 %v7576_v11  ;;  %2420 = vmatpush.msra.mxu2 %v7576_v11 }
 0x5f4   :  { %v7803_v2 = vpop.permute.xlu1 %2322  ;;  %v7805_v5 = vpop.permute.xlu0 %2317 }
 0x5f5   :  { %2060 = vmatpush.msrb.mxu1 %v7580_v12  ;;  %2421 = vmatpush.msra.mxu2 %v7580_v12 }
 0x5f6   :  { %5534 = vmatmul.msk.f32.gmra.mxu2 %vm523_vm4, %v1334_v1  ;;  %5558 = vmatmul.msk.f32.gmra.mxu3 %vm523_vm4, %v1334_v1  ;;  %v2288_v1 = vld [vmem:[%s10876_s20 + $0x10] sm:$0xff] }
 0x5f8   :  { %5511 = vmatmul.msk.f32.gmra.mxu1 %vm523_vm4, %v1335_v15  ;;  %5583 = vmatmul.msk.f32.gmra.mxu0 %vm523_vm4, %v1335_v15 }
 0x5fe   :  { %5535 = vmatmul.msk.f32.gmra.mxu2 %vm523_vm4, %v1335_v15  ;;  %5559 = vmatmul.msk.f32.gmra.mxu3 %vm523_vm4, %v1335_v15  ;;  %v1928_v15 = vld [vmem:[%s10874_s18 + $0x18] sm:$0xff] }
 0x600   :  { %5512 = vmatmul.msk.f32.gmra.mxu1 %vm523_vm4, %v1336_v61  ;;  %5584 = vmatmul.msk.f32.gmra.mxu0 %vm523_vm4, %v1336_v61 }
 0x606   :  { %5536 = vmatmul.msk.f32.gmra.mxu2 %vm523_vm4, %v1336_v61  ;;  %5560 = vmatmul.msk.f32.gmra.mxu3 %vm523_vm4, %v1336_v61 }
 0x608   :  { %5513 = vmatmul.msk.f32.gmra.mxu1 %vm523_vm4, %v1337_v26  ;;  %5585 = vmatmul.msk.f32.gmra.mxu0 %vm523_vm4, %v1337_v26 }
 0x60e   :  { %5537 = vmatmul.msk.f32.gmra.mxu2 %vm523_vm4, %v1337_v26  ;;  %5561 = vmatmul.msk.f32.gmra.mxu3 %vm523_vm4, %v1337_v26 }
 0x610   :  { %5514 = vmatmul.msk.f32.gmra.mxu1 %vm523_vm4, %v1338_v28  ;;  %5586 = vmatmul.msk.f32.gmra.mxu0 %vm523_vm4, %v1338_v28 }
 0x616   :  { %5538 = vmatmul.msk.f32.gmra.mxu2 %vm523_vm4, %v1338_v28  ;;  %5562 = vmatmul.msk.f32.gmra.mxu3 %vm523_vm4, %v1338_v28  ;;  %v2289_v28 = vld [vmem:[%s10876_s20 + $0x18] sm:$0xff] }
 0x618   :  { %5515 = vmatmul.msk.f32.gmra.mxu1 %vm523_vm4, %v1339_v34  ;;  %5587 = vmatmul.msk.f32.gmra.mxu0 %vm523_vm4, %v1339_v34 }
 0x61e   :  { %5539 = vmatmul.msk.f32.gmra.mxu2 %vm523_vm4, %v1339_v34  ;;  %5563 = vmatmul.msk.f32.gmra.mxu3 %vm523_vm4, %v1339_v34  ;;  %v7821_v34 = vpop.permute.xlu2 %1444 }
 0x61f   :  { %11020 = vst [vmem:[#allocation36_spill] sm:$0xff] %v7821_v34 }
 0x620   :  { %5516 = vmatmul.msk.f32.gmra.mxu1 %vm523_vm4, %v1340_v38  ;;  %5588 = vmatmul.msk.f32.gmra.mxu0 %vm523_vm4, %v1340_v38 }
 0x626   :  { %5540 = vmatmul.msk.f32.gmra.mxu2 %vm523_vm4, %v1340_v38  ;;  %5564 = vmatmul.msk.f32.gmra.mxu3 %vm523_vm4, %v1340_v38 }
 0x628   :  { %5517 = vmatmul.msk.f32.gmra.mxu1 %vm523_vm4, %v1341_v4  ;;  %5589 = vmatmul.msk.f32.gmra.mxu0 %vm523_vm4, %v1341_v4 }
 0x62e   :  { %5541 = vmatmul.msk.f32.gmra.mxu2 %vm523_vm4, %v1341_v4  ;;  %5565 = vmatmul.msk.f32.gmra.mxu3 %vm523_vm4, %v1341_v4  ;;  %v1929_v4 = vld [vmem:[%s10874_s18 + $0x20] sm:$0xff] }
 0x630   :  { %5518 = vmatmul.msk.f32.gmra.mxu1 %vm523_vm4, %v1342_v41  ;;  %5590 = vmatmul.msk.f32.gmra.mxu0 %vm523_vm4, %v1342_v41 }
 0x636   :  { %5542 = vmatmul.msk.f32.gmra.mxu2 %vm523_vm4, %v1342_v41  ;;  %5566 = vmatmul.msk.f32.gmra.mxu3 %vm523_vm4, %v1342_v41  ;;  %v7828_v41 = vpop.permute.xlu1 %1394 }
 0x637   :  { %11022 = vst [vmem:[#allocation38_spill] sm:$0xff] %v7828_v41 }
 0x638   :  { %5519 = vmatmul.msk.f32.gmra.mxu1 %vm523_vm4, %v1343_v42  ;;  %5591 = vmatmul.msk.f32.gmra.mxu0 %vm523_vm4, %v1343_v42 }
 0x63e   :  { %5543 = vmatmul.msk.f32.gmra.mxu2 %vm523_vm4, %v1343_v42  ;;  %5567 = vmatmul.msk.f32.gmra.mxu3 %vm523_vm4, %v1343_v42  ;;  %v7830_v42 = vpop.permute.xlu0 %1966 }
 0x640   :  { %5520 = vmatmul.msk.f32.gmra.mxu1 %vm523_vm4, %v1344_v21  ;;  %5592 = vmatmul.msk.f32.gmra.mxu0 %vm523_vm4, %v1344_v21 }
 0x645   :  { %v7656_v55 = vpop.f32.mrf.mxu1  ;;  %v7661_v62 = vpop.f32.mrf.mxu0 }
 0x646   :  { %10997 = vst [vmem:[#allocation13_spill] sm:$0xff] %v7661_v62  ;;  %5544 = vmatmul.msk.f32.gmra.mxu2 %vm523_vm4, %v1344_v21  ;;  %5568 = vmatmul.msk.f32.gmra.mxu3 %vm523_vm4, %v1344_v21  ;;  %v2296_v62 = vld [vmem:[%s10876_s20 + $0x50] sm:$0xff] }
 0x648   :  { %5521 = vmatmul.msk.f32.gmra.mxu1 %vm523_vm4, %v1345_v58  ;;  %5593 = vmatmul.msk.f32.gmra.mxu0 %vm523_vm4, %v1345_v58 }
 0x64d   :  { %v7667_v37 = vpop.f32.mrf.mxu1  ;;  %v7674_v40 = vpop.f32.mrf.mxu0 }
 0x64e   :  { %5545 = vmatmul.msk.f32.gmra.mxu2 %vm523_vm4, %v1345_v58  ;;  %5569 = vmatmul.msk.f32.gmra.mxu3 %vm523_vm4, %v1345_v58  ;;  %10998 = vst [vmem:[#allocation14_spill] sm:$0xff] %v7674_v40 }
 0x650   :  { %5522 = vmatmul.msk.f32.gmra.mxu1 %vm523_vm4, %v1346_v39  ;;  %5594 = vmatmul.msk.f32.gmra.mxu0 %vm523_vm4, %v1346_v39 }
 0x651   :  { %v7678_v43 = vpop.f32.mrf.mxu2  ;;  %v8022_v11 = vpop.f32.mrf.mxu3 }
 0x652   :  { %10999 = vst [vmem:[#allocation15_spill] sm:$0xff] %v7678_v43 }
 0x653   :  { %11068 = vst [vmem:[#allocation84_spill] sm:$0xff] %v8022_v11 }
 0x655   :  { %v7680_v45 = vpop.f32.mrf.mxu1  ;;  %v7691_v19 = vpop.f32.mrf.mxu0 }
 0x656   :  { %5546 = vmatmul.msk.f32.gmra.mxu2 %vm523_vm4, %v1346_v39  ;;  %5570 = vmatmul.msk.f32.gmra.mxu3 %vm523_vm4, %v1346_v39  ;;  %11001 = vst [vmem:[#allocation17_spill] sm:$0xff] %v7691_v19  ;;  %v2290_v39 = vld [vmem:[%s10876_s20 + $0x20] sm:$0xff] }
 0x658   :  { %5523 = vmatmul.msk.f32.gmra.mxu1 %vm523_vm4, %v1347_v47  ;;  %5595 = vmatmul.msk.f32.gmra.mxu0 %vm523_vm4, %v1347_v47 }
 0x659   :  { %v7689_v52 = vpop.f32.mrf.mxu2 }
 0x65a   :  { %11000 = vst [vmem:[#allocation16_spill] sm:$0xff] %v7689_v52 }
 0x65d   :  { %v7693_v57 = vpop.f32.mrf.mxu1  ;;  %v7704_v36 = vpop.f32.mrf.mxu0 }
 0x65e   :  { %5547 = vmatmul.msk.f32.gmra.mxu2 %vm523_vm4, %v1347_v47  ;;  %5571 = vmatmul.msk.f32.gmra.mxu3 %vm523_vm4, %v1347_v47  ;;  %11003 = vst [vmem:[#allocation19_spill] sm:$0xff] %v7704_v36 }
 0x660   :  { %5524 = vmatmul.msk.f32.gmra.mxu1 %vm523_vm4, %v1348_v22  ;;  %5596 = vmatmul.msk.f32.gmra.mxu0 %vm523_vm4, %v1348_v22 }
 0x661   :  { %v7702_v23 = vpop.f32.mrf.mxu2 }
 0x662   :  { %11002 = vst [vmem:[#allocation18_spill] sm:$0xff] %v7702_v23 }
 0x665   :  { %v7706_v9 = vpop.f32.mrf.mxu1  ;;  %v7722_v10 = vpop.f32.mrf.mxu0 }
 0x666   :  { %5548 = vmatmul.msk.f32.gmra.mxu2 %vm523_vm4, %v1348_v22  ;;  %5572 = vmatmul.msk.f32.gmra.mxu3 %vm523_vm4, %v1348_v22  ;;  %11005 = vst [vmem:[#allocation21_spill] sm:$0xff] %v7722_v10  ;;  %v1930_v22 = vld [vmem:[%s10874_s18 + $0x28] sm:$0xff] }
 0x668   :  { %5525 = vmatmul.msk.f32.gmra.mxu1 %vm523_vm4, %v1349_v44  ;;  %5597 = vmatmul.msk.f32.gmra.mxu0 %vm523_vm4, %v1349_v44 }
 0x669   :  { %v7715_v46 = vpop.f32.mrf.mxu2 }
 0x66a   :  { %11004 = vst [vmem:[#allocation20_spill] sm:$0xff] %v7715_v46 }
 0x66d   :  { %v7717_v50 = vpop.f32.mrf.mxu1  ;;  %v7737_v16 = vpop.f32.mrf.mxu0 }
 0x66e   :  { %5549 = vmatmul.msk.f32.gmra.mxu2 %vm523_vm4, %v1349_v44  ;;  %5573 = vmatmul.msk.f32.gmra.mxu3 %vm523_vm4, %v1349_v44  ;;  %11007 = vst [vmem:[#allocation23_spill] sm:$0xff] %v7737_v16  ;;  %v7847_v44 = vpop.permute.xlu2 %1439  ;;  %v2294_v16 = vld [vmem:[%s10876_s20 + $0x40] sm:$0xff] }
 0x66f   :  { %11026 = vst [vmem:[#allocation42_spill] sm:$0xff] %v7847_v44 }
 0x670   :  { %5526 = vmatmul.msk.f32.gmra.mxu1 %vm523_vm4, %v1350_v53  ;;  %5598 = vmatmul.msk.f32.gmra.mxu0 %vm523_vm4, %v1350_v53 }
 0x671   :  { %v7728_v54 = vpop.f32.mrf.mxu2 }
 0x672   :  { %11006 = vst [vmem:[#allocation22_spill] sm:$0xff] %v7728_v54 }
 0x675   :  { %v7730_v18 = vpop.f32.mrf.mxu1  ;;  %v7754_v35 = vpop.f32.mrf.mxu0 }
 0x676   :  { %5550 = vmatmul.msk.f32.gmra.mxu2 %vm523_vm4, %v1350_v53  ;;  %5574 = vmatmul.msk.f32.gmra.mxu3 %vm523_vm4, %v1350_v53  ;;  %11010 = vst [vmem:[#allocation26_spill] sm:$0xff] %v7754_v35  ;;  %v7849_v53 = vpop.permute.xlu1 %2312 }
 0x678   :  { %5527 = vmatmul.msk.f32.gmra.mxu1 %vm523_vm4, %v1351_v51  ;;  %5599 = vmatmul.msk.f32.gmra.mxu0 %vm523_vm4, %v1351_v51 }
 0x679   :  { %v7741_v17 = vpop.f32.mrf.mxu2 }
 0x67a   :  { %11008 = vst [vmem:[#allocation24_spill] sm:$0xff] %v7741_v17 }
 0x67d   :  { %v7743_v3 = vpop.f32.mrf.mxu1  ;;  %v7769_v48 = vpop.f32.mrf.mxu0 }
 0x67e   :  { %5551 = vmatmul.msk.f32.gmra.mxu2 %vm523_vm4, %v1351_v51  ;;  %5575 = vmatmul.msk.f32.gmra.mxu3 %vm523_vm4, %v1351_v51  ;;  %11012 = vst [vmem:[#allocation28_spill] sm:$0xff] %v7769_v48  ;;  %v7851_v51 = vpop.permute.xlu0 %1961 }
 0x680   :  { %5528 = vmatmul.msk.f32.gmra.mxu1 %vm523_vm4, %v1352_v31  ;;  %5600 = vmatmul.msk.f32.gmra.mxu0 %vm523_vm4, %v1352_v31 }
 0x681   :  { %v7752_v29 = vpop.f32.mrf.mxu2 }
 0x682   :  { %11009 = vst [vmem:[#allocation25_spill] sm:$0xff] %v7752_v29 }
 0x685   :  { %v7756_v49 = vpop.f32.mrf.mxu1  ;;  %v7792_v63 = vpop.f32.mrf.mxu0 }
 0x686   :  { %5552 = vmatmul.msk.f32.gmra.mxu2 %vm523_vm4, %v1352_v31  ;;  %5576 = vmatmul.msk.f32.gmra.mxu3 %vm523_vm4, %v1352_v31  ;;  %11016 = vst [vmem:[#allocation32_spill] sm:$0xff] %v7792_v63 }
 0x688   :  { %5601 = vmatmul.msk.f32.vlgmr.msrb.gmra.mxu1 %vm523_vm4, %v1925_v13  ;;  %v2291_v13 = vld [vmem:[%s10876_s20 + $0x28] sm:$0xff] }
 0x689   :  { %v7764_v33 = vpop.f32.mrf.mxu2 }
 0x68a   :  { %11011 = vst [vmem:[#allocation27_spill] sm:$0xff] %v7764_v33 }
 0x68d   :  { %v7771_v14 = vpop.f32.mrf.mxu1  ;;  %v7813_v61 = vpop.f32.mrf.mxu0 }
 0x68e   :  { %5621 = vmatmul.msk.f32.vlgmr.msra.gmra.mxu2 %vm523_vm4, %v2286_v6  ;;  %11018 = vst [vmem:[#allocation34_spill] sm:$0xff] %v7813_v61 }
 0x690   :  { %5602 = vmatmul.msk.f32.gmra.mxu1 %vm523_vm4, %v1926_v20 }
 0x691   :  { %v7778_v25 = vpop.f32.mrf.mxu2 }
 0x692   :  { %11013 = vst [vmem:[#allocation29_spill] sm:$0xff] %v7778_v25 }
 0x695   :  { %v7787_v32 = vpop.f32.mrf.mxu1  ;;  %v7836_v58 = vpop.f32.mrf.mxu0 }
 0x696   :  { %5622 = vmatmul.msk.f32.gmra.mxu2 %vm523_vm4, %v2287_v56  ;;  %11024 = vst [vmem:[#allocation40_spill] sm:$0xff] %v7836_v58  ;;  %v1931_v56 = vld [vmem:[%s10874_s18 + $0x30] sm:$0xff]  ;;  %v2293_v58 = vld [vmem:[%s10876_s20 + $0x38] sm:$0xff] }
 0x698   :  { %5603 = vmatmul.msk.f32.gmra.mxu1 %vm523_vm4, %v1927_v59  ;;  %v7868_v59 = vpop.permute.xlu2 %1389 }
 0x699   :  { %v7796_v24 = vpop.f32.mrf.mxu2  ;;  %11030 = vst [vmem:[#allocation46_spill] sm:$0xff] %v7868_v59 }
 0x69a   :  { %11017 = vst [vmem:[#allocation33_spill] sm:$0xff] %v7796_v24 }
 0x69d   :  { %v7807_v8 = vpop.f32.mrf.mxu1  ;;  %v7859_v6 = vpop.f32.mrf.mxu0 }
 0x69e   :  { %5623 = vmatmul.msk.f32.gmra.mxu2 %vm523_vm4, %v2288_v1  ;;  %11028 = vst [vmem:[#allocation44_spill] sm:$0xff] %v7859_v6 }
 0x6a0   :  { %5604 = vmatmul.msk.f32.gmra.mxu1 %vm523_vm4, %v1928_v15  ;;  %v7872_v15 = vpop.permute.xlu1 %1474  ;;  %v7890_v6 = vpop.permute.xlu2 %2347 }
 0x6a1   :  { %v7816_v26 = vpop.f32.mrf.mxu2  ;;  %11032 = vst [vmem:[#allocation48_spill] sm:$0xff] %v7872_v15 }
 0x6a2   :  { %11019 = vst [vmem:[#allocation35_spill] sm:$0xff] %v7816_v26 }
 0x6a3   :  { %11036 = vst [vmem:[#allocation52_spill] sm:$0xff] %v7890_v6 }
 0x6a5   :  { %v7823_v38 = vpop.f32.mrf.mxu1 }
 0x6a6   :  { %11021 = vst [vmem:[#allocation37_spill] sm:$0xff] %v7823_v38  ;;  %5624 = vmatmul.msk.f32.gmra.mxu2 %vm523_vm4, %v2289_v28  ;;  %v7874_v28 = vpop.permute.xlu0 %1384 }
 0x6a7   :  { %11033 = vst [vmem:[#allocation49_spill] sm:$0xff] %v7874_v28 }
 0x6a8   :  { %5605 = vmatmul.msk.f32.gmra.mxu1 %vm523_vm4, %v1929_v4  ;;  %v2292_v4 = vld [vmem:[%s10876_s20 + $0x30] sm:$0xff]  ;;  %v7895_v61 = vpop.permute.xlu1 %1956  ;;  %v7913_v10 = vpop.permute.xlu2 %1469 }
 0x6a9   :  { %v7834_v21 = vpop.f32.mrf.mxu2  ;;  %11040 = vst [vmem:[#allocation56_spill] sm:$0xff] %v7913_v10 }
 0x6aa   :  { %11023 = vst [vmem:[#allocation39_spill] sm:$0xff] %v7834_v21 }
 0x6ad   :  { %v7841_v47 = vpop.f32.mrf.mxu1 }
 0x6ae   :  { %11025 = vst [vmem:[#allocation41_spill] sm:$0xff] %v7841_v47  ;;  %5625 = vmatmul.msk.f32.gmra.mxu2 %vm523_vm4, %v2290_v39  ;;  %v7897_v63 = vpop.permute.xlu0 %2342  ;;  %v1935_v47 = vld [vmem:[%s10874_s18 + $0x50] sm:$0xff] }
 0x6af   :  { %11037 = vst [vmem:[#allocation53_spill] sm:$0xff] %v7897_v63  ;;  %v1590_v63 = vadd.f32 %v7667_v37, %v7874_v28  ;;  %v8038_v28 = vpop.f32.mrf.mxu3 }
 0x6b0   :  { %5606 = vmatmul.msk.f32.gmra.mxu1 %vm523_vm4, %v1930_v22  ;;  %v1932_v22 = vld [vmem:[%s10874_s18 + $0x38] sm:$0xff]  ;;  %v7920_v36 = vpop.permute.xlu1 %1379  ;;  %v1952_v40 = vpop.permute.xlu2 %1951  ;;  %11071 = vst [vmem:[#allocation87_spill] sm:$0xff] %v8038_v28 }
 0x6b1   :  { %v7854_v31 = vpop.f32.mrf.mxu2  ;;  %11042 = vst [vmem:[#allocation58_spill] sm:$0xff] %v7920_v36  ;;  %v1587_v43 = vadd.f32 %v7656_v55, %v7920_v36 }
 0x6b2   :  { %11027 = vst [vmem:[#allocation43_spill] sm:$0xff] %v7854_v31 }
 0x6b5   :  { %v7861_v20 = vpop.f32.mrf.mxu1 }
 0x6b6   :  { %11029 = vst [vmem:[#allocation45_spill] sm:$0xff] %v7861_v20  ;;  %5626 = vmatmul.msk.f32.gmra.mxu2 %vm523_vm4, %v2291_v13  ;;  %v7884_v13 = vpop.f32.mrf.mxu0 }
 0x6b8   :  { %5607 = vmatmul.msk.f32.gmra.mxu1 %vm523_vm4, %v1931_v56 }
 0x6b9   :  { %v7870_v1 = vpop.f32.mrf.mxu2 }
 0x6ba   :  { %11031 = vst [vmem:[#allocation47_spill] sm:$0xff] %v7870_v1 }
 0x6bd   :  { %v7879_v39 = vpop.f32.mrf.mxu1 }
 0x6be   :  { %11034 = vst [vmem:[#allocation50_spill] sm:$0xff] %v7879_v39  ;;  %5627 = vmatmul.msk.f32.gmra.mxu2 %vm523_vm4, %v2292_v4  ;;  %v1933_v4 = vld [vmem:[%s10874_s18 + $0x40] sm:$0xff] }
 0x6c0   :  { %5608 = vmatmul.msk.f32.gmra.mxu1 %vm523_vm4, %v1932_v22  ;;  %v7905_v22 = vpop.f32.mrf.mxu0 }
 0x6c1   :  { %v7888_v56 = vpop.f32.mrf.mxu2 }
 0x6c2   :  { %11035 = vst [vmem:[#allocation51_spill] sm:$0xff] %v7888_v56 }
 0x6c5   :  { %v7899_v48 = vpop.f32.mrf.mxu1 }
 0x6c6   :  { %11038 = vst [vmem:[#allocation54_spill] sm:$0xff] %v7899_v48  ;;  %5628 = vmatmul.msk.f32.gmra.mxu2 %vm523_vm4, %v2293_v58  ;;  %v1934_v48 = vld [vmem:[%s10874_s18 + $0x48] sm:$0xff]  ;;  %v7922_v58 = vpop.permute.xlu0 %1464 }
 0x6c7   :  { %11043 = vst [vmem:[#allocation59_spill] sm:$0xff] %v7922_v58 }
 0x6c8   :  { %5609 = vmatmul.msk.f32.gmra.mxu1 %vm523_vm4, %v1933_v4  ;;  %v7928_v20 = vpop.f32.mrf.mxu0 }
 0x6c9   :  { %v7908_v35 = vpop.f32.mrf.mxu2 }
 0x6ca   :  { %11039 = vst [vmem:[#allocation55_spill] sm:$0xff] %v7908_v35  ;;  %v7958_v35 = vpop.permute.xlu2 %1414 }
 0x6cb   :  { %11049 = vst [vmem:[#allocation65_spill] sm:$0xff] %v7958_v35 }
 0x6cd   :  { %v7915_v39 = vpop.f32.mrf.mxu1 }
 0x6ce   :  { %11041 = vst [vmem:[#allocation57_spill] sm:$0xff] %v7915_v39  ;;  %5629 = vmatmul.msk.f32.gmra.mxu2 %vm523_vm4, %v2294_v16  ;;  %v2295_v39 = vld [vmem:[%s10876_s20 + $0x48] sm:$0xff]  ;;  %v7939_v16 = vpop.permute.xlu1 %2337 }
 0x6d0   :  { %5610 = vmatmul.msk.f32.gmra.mxu1 %vm523_vm4, %v1934_v48  ;;  %v7941_v48 = vpop.permute.xlu0 %1459 }
 0x6d1   :  { %v7926_v4 = vpop.f32.mrf.mxu2  ;;  %11046 = vst [vmem:[#allocation62_spill] sm:$0xff] %v7941_v48 }
 0x6d2   :  { %11044 = vst [vmem:[#allocation60_spill] sm:$0xff] %v7926_v4 }
 0x6d5   :  { %v7933_v19 = vpop.f32.mrf.mxu1 }
 0x6d6   :  { %11045 = vst [vmem:[#allocation61_spill] sm:$0xff] %v7933_v19  ;;  %5630 = vmatmul.msk.f32.gmra.mxu2 %vm523_vm4, %v2295_v39  ;;  %v7949_v19 = vpop.f32.mrf.mxu0  ;;  %v1936_v39 = vld [vmem:[%s10874_s18 + $0x58] sm:$0xff] }
 0x6d8   :  { %5611 = vmatmul.msk.f32.gmra.mxu1 %vm523_vm4, %v1935_v47  ;;  %v7964_v56 = vpop.permute.xlu0 %1409 }
 0x6d9   :  { %v7944_v38 = vpop.f32.mrf.mxu2  ;;  %11052 = vst [vmem:[#allocation68_spill] sm:$0xff] %v7964_v56 }
 0x6da   :  { %11047 = vst [vmem:[#allocation63_spill] sm:$0xff] %v7944_v38  ;;  %v7962_v38 = vpop.permute.xlu1 %1986 }
 0x6db   :  { %11051 = vst [vmem:[#allocation67_spill] sm:$0xff] %v7962_v38 }
 0x6dd   :  { %v7951_v4 = vpop.f32.mrf.mxu1 }
 0x6de   :  { %11048 = vst [vmem:[#allocation64_spill] sm:$0xff] %v7951_v4  ;;  %5631 = vmatmul.msk.f32.gmra.mxu2 %vm523_vm4, %v2296_v62  ;;  %v2297_v4 = vld [vmem:[%s10876_s20 + $0x58] sm:$0xff]  ;;  %v7971_v31 = vpop.f32.mrf.mxu0 }
 0x6e0   :  { %5612 = vmatmul.msk.f32.gmra.mxu1 %vm523_vm4, %v1936_v39  ;;  %v7976_v39 = vpop.permute.xlu2 %2332 }
 0x6e1   :  { %v7960_v47 = vpop.f32.mrf.mxu2 }
 0x6e2   :  { %11050 = vst [vmem:[#allocation66_spill] sm:$0xff] %v7960_v47  ;;  %v7978_v21 = vpop.permute.xlu1 %1981  ;;  %v7980_v47 = vpop.permute.xlu0 %1976 }
 0x6e5   :  { %v7969_v1 = vpop.f32.mrf.mxu1 }
 0x6e6   :  { %11053 = vst [vmem:[#allocation69_spill] sm:$0xff] %v7969_v1  ;;  %5632 = vmatmul.msk.f32.gmra.mxu2 %vm523_vm4, %v2297_v4  ;;  %v7984_v24 = vpop.f32.mrf.mxu0 }
 0x6e8   :  { %v7988_v33 = vpop.permute.xlu2 %1404 }
 0x6e9   :  { %v7974_v62 = vpop.f32.mrf.mxu2  ;;  %11057 = vst [vmem:[#allocation73_spill] sm:$0xff] %v7988_v33 }
 0x6ea   :  { %11054 = vst [vmem:[#allocation70_spill] sm:$0xff] %v7974_v62  ;;  %v7992_v29 = vpop.permute.xlu1 %1399  ;;  %v7994_v4 = vpop.permute.xlu0 %2367 }
 0x6eb   :  { %11059 = vst [vmem:[#allocation75_spill] sm:$0xff] %v7992_v29 }
 0x6ec   :  { %11060 = vst [vmem:[#allocation76_spill] sm:$0xff] %v7994_v4 }
 0x6ed   :  { %v7982_v26 = vpop.f32.mrf.mxu1 }
 0x6ee   :  { %11055 = vst [vmem:[#allocation71_spill] sm:$0xff] %v7982_v26  ;;  %v7998_v17 = vpop.f32.mrf.mxu0 }
 0x6f0   :  { %v8002_v46 = vpop.permute.xlu2 %1971 }
 0x6f1   :  { %v7986_v25 = vpop.f32.mrf.mxu2 }
 0x6f2   :  { %11056 = vst [vmem:[#allocation72_spill] sm:$0xff] %v7986_v25  ;;  %v8004_v26 = vpop.permute.xlu1 %1494  ;;  %v8006_v23 = vpop.permute.xlu0 %1489 }
 0x6f3   :  { %11063 = vst [vmem:[#allocation79_spill] sm:$0xff] %v8004_v26 }
 0x6f4   :  { %11064 = vst [vmem:[#allocation80_spill] sm:$0xff] %v8006_v23 }
 0x6f5   :  { %v7990_v1 = vpop.f32.mrf.mxu1 }
 0x6f6   :  { %11058 = vst [vmem:[#allocation74_spill] sm:$0xff] %v7990_v1  ;;  %v8010_v52 = vpop.f32.mrf.mxu0 }
 0x6f8   :  { %v8014_v60 = vpop.permute.xlu2 %2362 }
 0x6f9   :  { %v7996_v62 = vpop.f32.mrf.mxu2  ;;  %11066 = vst [vmem:[#allocation82_spill] sm:$0xff] %v8014_v60 }
 0x6fa   :  { %11061 = vst [vmem:[#allocation77_spill] sm:$0xff] %v7996_v62  ;;  %v8020_v7 = vpop.permute.xlu0 %2006 }
 0x6fd   :  { %v8000_v54 = vpop.f32.mrf.mxu1 }
 0x6fe   :  { %11062 = vst [vmem:[#allocation78_spill] sm:$0xff] %v8000_v54  ;;  %v8018_v54 = vpop.permute.xlu1 %2357  ;;  %v8026_v38 = vpop.f32.mrf.mxu0 }
 0x700   :  { %v8032_v36 = vpop.permute.xlu2 %1484 }
 0x701   :  { %v8008_v25 = vpop.f32.mrf.mxu2  ;;  %11069 = vst [vmem:[#allocation85_spill] sm:$0xff] %v8032_v36 }
 0x702   :  { %11065 = vst [vmem:[#allocation81_spill] sm:$0xff] %v8008_v25  ;;  %v8036_v11 = vpop.permute.xlu0 %1479 }
 0x703   :  { %11070 = vst [vmem:[#allocation86_spill] sm:$0xff] %v8036_v11 }
 0x705   :  { %v2062_v1 = vpop.f32.mrf.mxu1 }
 0x706   :  { %v2063_v4 = vadd.f32 %v2062_v1, %v1952_v40  ;;  %v1890_v1 = vadd.f32 %v7884_v13, %v7847_v44  ;;  %v8043_v13 = vpop.f32.mrf.mxu0 }
 0x708   :  { %v2098_v62 = vadd.f32 %v2063_v4, %v1587_v43 }
 0x709   :  { %v8016_v12 = vpop.f32.mrf.mxu2 }
 0x70a   :  { %11067 = vst [vmem:[#allocation83_spill] sm:$0xff] %v8016_v12  ;;  %v5613_v6 = vmul.f32 -1.442695, %v2098_v62  ;;  %v8034_v62 = vpop.permute.xlu1 %2352 }
 0x70c   :  { %5851 = vpow2.f32 %v5613_v6 }
 0x70d   :  { %v2065_v25 = vpop.f32.mrf.mxu1 }
 0x70e   :  { %v2066_v55 = vadd.f32 %v2065_v25, %v7895_v61 }
 0x710   :  { %v2099_v40 = vadd.f32 %v2066_v55, %v1590_v63  ;;  %v1593_v63 = vadd.f32 %v7680_v45, %v7868_v59  ;;  %v8050_v45 = vpop.permute.xlu2 %1434 }
 0x711   :  { %v2423_v43 = vpop.f32.mrf.mxu2  ;;  %11072 = vst [vmem:[#allocation88_spill] sm:$0xff] %v8050_v45 }
 0x712   :  { %v5614_v4 = vmul.f32 -1.442695, %v2099_v40  ;;  %v2424_v12 = vadd.f32 %v2423_v43, %v7849_v53  ;;  %v5852_v25 = vpop.eup %5851 }
 0x713   :  { %v8045_v55 = vadd.f32 1.0, %v5852_v25 }
 0x714   :  { %v2459_v37 = vadd.f32 %v2424_v12, %v1890_v1  ;;  %5853 = vpow2.f32 %v5614_v4  ;;  %v1893_v12 = vadd.f32 %v7905_v22, %v7821_v34  ;;  %v8055_v4 = vpop.permute.xlu0 %1996 }
 0x715   :  { %v2068_v60 = vpop.f32.mrf.mxu1  ;;  %vm2143_vm6 = vweird.f32 %v8045_v55 }
 0x716   :  { %v5633_v61 = vmul.f32 -1.442695, %v2459_v37  ;;  %v2069_v6 = vadd.f32 %v2068_v60, %v7851_v51  ;;  %v8053_v51 = vpop.permute.xlu1 %2001  ;;  %v1596_v37 = vadd.f32 %v7693_v57, %v7828_v41 }
 0x718   :  { %v2100_v53 = vadd.f32 %v2069_v6, %v1593_v63  ;;  %5855 = vpow2.f32 %v5633_v61  ;;  %v8060_v63 = vpop.f32.mrf.mxu3 }
 0x719   :  { %v2426_v40 = vpop.f32.mrf.mxu2  ;;  %5857 = vrcp.f32 %v8045_v55  ;;  %11073 = vst [vmem:[#allocation89_spill] sm:$0xff] %v8060_v63 }
 0x71a   :  { %v5615_v43 = vmul.f32 -1.442695, %v2100_v53  ;;  %v2427_v1 = vadd.f32 %v2426_v40, %v7805_v5  ;;  %v5854_v28 = vpop.eup %5853  ;;  %v1896_v40 = vadd.f32 %v7928_v20, %v7782_v30  ;;  %v8074_v20 = vpop.permute.xlu2 %1429 }
 0x71b   :  { %v8062_v5 = vadd.f32 1.0, %v5854_v28  ;;  %11074 = vst [vmem:[#allocation90_spill] sm:$0xff] %v8074_v20 }
 0x71c   :  { %v2460_v44 = vadd.f32 %v2427_v1, %v1893_v12  ;;  %5859 = vpow2.f32 %v5615_v43  ;;  %v1919_v12 = vpop.f32.mrf.mxu0 }
 0x71d   :  { %v2071_v60 = vpop.f32.mrf.mxu1  ;;  %vm2158_vm9 = vweird.f32 %v8062_v5 }
 0x71e   :  { %v5634_v22 = vmul.f32 -1.442695, %v2460_v44  ;;  %v2072_v25 = vadd.f32 %v2071_v60, %v7830_v42  ;;  %v5856_v61 = vpop.eup %5855 }
 0x71f   :  { %v8067_v57 = vpop.eup %5857  ;;  %v8070_v42 = vadd.f32 1.0, %v5856_v61  ;;  %v8081_v61 = vpop.permute.xlu1 %1424 }
 0x720   :  { %5861 = vpow2.f32 %v5634_v22  ;;  %v2101_v6 = vadd.f32 %v2072_v25, %v1596_v37  ;;  %v2139_v22 = vmul.f32 %v8067_v57, %v8045_v55  ;;  %11075 = vst [vmem:[#allocation91_spill] sm:$0xff] %v8081_v61  ;;  %vm2144_vm7 = vweird.f32 %v8067_v57 }
 0x721   :  { %v2429_v53 = vpop.f32.mrf.mxu2  ;;  %5863 = vrcp.f32 %v8062_v5  ;;  %vm8191_vm10 = vmor %vm2143_vm6, %vm2144_vm7  ;;  %vm2504_vm12 = vweird.f32 %v8070_v42 }
 0x722   :  { %v5616_v1 = vmul.f32 -1.442695, %v2101_v6  ;;  %v2430_v59 = vadd.f32 %v2429_v53, %v7803_v2  ;;  %v5860_v44 = vpop.eup %5859  ;;  %v1599_v2 = vadd.f32 %v7706_v9, %v7992_v29  ;;  %v8083_v6 = vpop.permute.xlu0 %1419  ;;  %v8089_v53 = vadd.f32 %v7730_v18, %v7964_v56 }
 0x723   :  { %v8079_v25 = vadd.f32 1.0, %v5860_v44  ;;  %11076 = vst [vmem:[#allocation92_spill] sm:$0xff] %v8083_v6  ;;  %v8095_v9 = vpop.f32.mrf.mxu3  ;;  %v8099_v44 = vadd.f32 %v7743_v3, %v7958_v35  ;;  %v8111_v18 = vadd.f32 %v7787_v32, %v8074_v20  ;;  %v2140_v63 = vsub.f32 1.0, %v2139_v22 }
 0x724   :  { %v2461_v28 = vadd.f32 %v2430_v59, %v1896_v40  ;;  %5865 = vpow2.f32 %v5616_v1  ;;  %v1602_v59 = vadd.f32 %v7717_v50, %v7988_v33  ;;  %11077 = vst [vmem:[#allocation93_spill] sm:$0xff] %v8095_v9  ;;  %v8107_v50 = vadd.f32 %v7771_v14, %v8081_v61 }
 0x725   :  { %v2074_v43 = vpop.f32.mrf.mxu1  ;;  %5867 = vrcp.f32 %v8070_v42  ;;  %v8123_v14 = vadd.f32 %v7971_v31, %v7941_v48  ;;  %v8127_v32 = vadd.f32 %v7984_v24, %v7922_v58  ;;  %v8141_v24 = vadd.f32 %v8010_v52, %v7872_v15 }
 0x726   :  { %v5862_v60 = vpop.eup %5861  ;;  %v5635_v37 = vmul.f32 -1.442695, %v2461_v28  ;;  %v8103_v28 = vadd.f32 %v7756_v49, %v8083_v6  ;;  %v2075_v9 = vadd.f32 %v2074_v43, %v8002_v46  ;;  %v8119_v49 = vadd.f32 %v7807_v8, %v8050_v45 }
 0x727   :  { %v8091_v40 = vadd.f32 1.0, %v5862_v60  ;;  %v8093_v1 = vpop.eup %5863  ;;  %v8132_v46 = vadd.f32 %v7998_v17, %v7913_v10  ;;  %v8145_v22 = vadd.f32 %v8026_v38, %v8036_v11  ;;  %v8149_v17 = vadd.f32 %v8043_v13, %v8032_v36 }
 0x728   :  { %5869 = vpow2.f32 %v5635_v37  ;;  %v1899_v37 = vadd.f32 %v7949_v19, %v7780_v27  ;;  %v2154_v43 = vmul.f32 %v8093_v1, %v8062_v5  ;;  %v2102_v10 = vadd.f32 %v2075_v9, %v1599_v2 }
 0x729   :  { %v2432_v60 = vpop.f32.mrf.mxu2  ;;  %5871 = vrcp.f32 %v8079_v25  ;;  %v2141_v45 = vmul.f32 %v8067_v57, %v2140_v63  ;;  %v8155_v52 = vadd.f32 %v1919_v12, %v8006_v23  ;;  %v2149_v13 = vand.u32 2147483648, %v8045_v55 }
 0x72a   :  { %v2433_v3 = vadd.f32 %v2432_v60, %v7798_v0  ;;  %v5866_v19 = vpop.eup %5865  ;;  %v1922_v0 = vpop.f32.mrf.mxu0  ;;  %5873 = vrcp.f32 %v8091_v40  ;;  %v2155_v15 = vsub.f32 1.0, %v2154_v43  ;;  %v2179_v6 = vand.u32 2147483648, %v8079_v25 }
 0x72b   :  { %v8137_v31 = vpop.eup %5867  ;;  %v8158_v38 = vadd.f32 %v1922_v0, %v8004_v26  ;;  %v8160_v11 = vadd.f32 1.0, %v5866_v19  ;;  %v2162_v0 = vand.u32 2147483647, %v8062_v5  ;;  %v2150_v43 = vor.u32 1.1754944e-38, %v2149_v13 }
 0x72c   :  { %v2462_v8 = vadd.f32 %v2433_v3, %v1899_v37  ;;  %v2147_v37 = vand.u32 2147483647, %v8045_v55  ;;  %v2500_v2 = vmul.f32 %v8137_v31, %v8070_v42  ;;  %v2508_v13 = vand.u32 2147483647, %v8070_v42 }
 0x72d   :  { %v2077_v60 = vpop.f32.mrf.mxu1  ;;  %vm8205_vm11 = vcmp.eq.f32.partialorder %v2162_v0, 8.507059e+37  ;;  %vm2159_vm13 = vweird.f32 %v8093_v1  ;;  %vm2505_vm14 = vweird.f32 %v8137_v31  ;;  %vm2173_vm1 = vweird.f32 %v8079_v25 }
 0x72e   :  { %v5870_v3 = vpop.eup %5869  ;;  %v5636_v58 = vmul.f32 -1.442695, %v2462_v8  ;;  %v2078_v48 = vadd.f32 %v2077_v60, %v7980_v47  ;;  %vm8171_vm8 = vcmp.eq.f32.partialorder %v2147_v37, 8.507059e+37  ;;  %v8179_v8 = vpop.f32.mrf.mxu3  ;;  %v2164_v60 = vand.u32 2147483648, %v8062_v5  ;;  %vm8240_vm0 = vmor %vm2158_vm9, %vm2159_vm13 }
 0x72f   :  { %v8165_v9 = vpop.eup %5871  ;;  %v8167_v47 = vadd.f32 1.0, %v5870_v3  ;;  %11080 = vst [vmem:[#allocation94_spill] sm:$0xff] %v8179_v8  ;;  %v2510_v37 = vand.u32 2147483648, %v8070_v42  ;;  %v2156_v3 = vmul.f32 %v8093_v1, %v2155_v15  ;;  %vm8227_vm15 = vcmp.eq.f32.partialorder %v2508_v13, 8.507059e+37  ;;  %vm8275_vm2 = vmor %vm2504_vm12, %vm2505_vm14 }
 0x730   :  { %5875 = vpow2.f32 %v5636_v58  ;;  %v2103_v36 = vadd.f32 %v2078_v48, %v1602_v59  ;;  %v8175_v19 = vpop.eup %5873  ;;  %v5617_v58 = vmul.f32 -1.442695, %v2102_v10  ;;  %v2142_v59 = vadd.f32 %v8067_v57, %v2141_v45 }
 0x731   :  { %v2435_v63 = vpop.f32.mrf.mxu2  ;;  %5877 = vrcp.f32 %v8160_v11  ;;  %v2501_v10 = vsub.f32 1.0, %v2500_v2  ;;  %v2515_v15 = vmul.f32 %v8175_v19, %v8091_v40  ;;  %v2165_v20 = vor.u32 1.1754944e-38, %v2164_v60 }
 0x732   :  { %v5618_v48 = vmul.f32 -1.442695, %v2103_v36  ;;  %v2436_v8 = vadd.f32 %v2435_v63, %v7976_v39  ;;  %v2146_v55 = vsel %vm8191_vm10, %v8067_v57, %v2142_v59  ;;  %v8210_v61 = vor.u32 1.1754944e-38, %v2510_v37 }
 0x733   :  { %v2157_v39 = vadd.f32 %v8093_v1, %v2156_v3  ;;  %v8223_v0 = vsel %vm8171_vm8, %v2150_v43, %v2146_v55  ;;  %v2516_v37 = vsub.f32 1.0, %v2515_v15  ;;  %v2525_v43 = vand.u32 2147483648, %v8091_v40 }
 0x734   :  { %5879 = vpow2.f32 %v5618_v48  ;;  %v2169_v48 = vmul.f32 %v8165_v9, %v8079_v25  ;;  %vm2174_vm3 = vweird.f32 %v8165_v9  ;;  %vm2519_vm6 = vweird.f32 %v8091_v40 }
 0x735   :  { %5881 = vrcp.f32 %v8167_v47  ;;  %v2080_v36 = vpop.f32.mrf.mxu1  ;;  %vm2520_vm8 = vweird.f32 %v8175_v19  ;;  %vm2188_vm9 = vweird.f32 %v8160_v11  ;;  %vm8316_vm10 = vmor %vm2173_vm1, %vm2174_vm3  ;;  %vm2534_vm13 = vweird.f32 %v8167_v47 }
 0x736   :  { %v5876_v2 = vpop.eup %5875  ;;  %5883 = vpow2.f32 %v5617_v58  ;;  %v2081_v26 = vadd.f32 %v2080_v36, %v7978_v21  ;;  %v2502_v21 = vmul.f32 %v8137_v31, %v2501_v10  ;;  %v2170_v60 = vsub.f32 1.0, %v2169_v48  ;;  %v8255_v55 = vpop.f32.mrf.mxu3 }
 0x737   :  { %v8217_v57 = vpop.eup %5877  ;;  %v8219_v63 = vadd.f32 1.0, %v5876_v2  ;;  %v2177_v10 = vand.u32 2147483647, %v8079_v25  ;;  %v2161_v48 = vsel %vm8240_vm0, %v8093_v1, %v2157_v39  ;;  %11089 = vst [vmem:[#allocation95_spill] sm:$0xff] %v8255_v55  ;;  %v11090_v1 = vld [vmem:[#allocation67_spill] sm:$0xff] }
 0x738   :  { %v2104_v58 = vadd.f32 %v2081_v26, %v8089_v53  ;;  %v2463_v26 = vadd.f32 %v2436_v8, %v8123_v14  ;;  %v8245_v14 = vor.u32 1.1754944e-38, %v2179_v6  ;;  %v2523_v8 = vand.u32 2147483647, %v8091_v40 }
 0x739   :  { %v2438_v59 = vpop.f32.mrf.mxu2  ;;  %v2503_v5 = vadd.f32 %v8137_v31, %v2502_v21  ;;  %v2184_v15 = vmul.f32 %v8217_v57, %v8160_v11  ;;  %v8269_v55 = vsel %vm8205_vm11, %v2165_v20, %v2161_v48  ;;  %vm8280_vm5 = vcmp.eq.f32.partialorder %v2177_v10, 8.507059e+37  ;;  %vm8330_vm11 = vmor %vm2519_vm6, %vm2520_vm8 }
 0x73a   :  { %v5880_v36 = vpop.eup %5879  ;;  %v5619_v53 = vmul.f32 -1.442695, %v2104_v58  ;;  %v2439_v6 = vadd.f32 %v2438_v59, %v7939_v16  ;;  %v5637_v12 = vmul.f32 -1.442695, %v2463_v26  ;;  %vm8289_vm7 = vcmp.eq.f32.partialorder %v2523_v8, 8.507059e+37 }
 0x73b   :  { %v8232_v45 = vpop.eup %5881  ;;  %v8234_v2 = vadd.f32 1.0, %v5880_v36  ;;  %v2171_v36 = vmul.f32 %v8165_v9, %v2170_v60  ;;  %v2507_v20 = vsel %vm8275_vm2, %v8137_v31, %v2503_v5  ;;  %v2526_v60 = vor.u32 1.1754944e-38, %v2525_v43 }
 0x73c   :  { %v5884_v13 = vpop.eup %5883  ;;  %5885 = vpow2.f32 %v5619_v53  ;;  %v2517_v53 = vmul.f32 %v8175_v19, %v2516_v37  ;;  %v2530_v21 = vmul.f32 %v8232_v45, %v8167_v47  ;;  %v2185_v37 = vsub.f32 1.0, %v2184_v15 }
 0x73d   :  { %5887 = vrcp.f32 %v8219_v63  ;;  %v2083_v58 = vpop.f32.mrf.mxu1  ;;  %v8265_v35 = vadd.f32 1.0, %v5884_v13  ;;  %v2464_v26 = vadd.f32 %v2439_v6, %v8127_v32  ;;  %v2172_v13 = vadd.f32 %v8165_v9, %v2171_v36 }
 0x73e   :  { %5889 = vrcp.f32 %v8234_v2  ;;  %v2084_v39 = vadd.f32 %v2083_v58, %v11090_v1  ;;  %v2518_v48 = vadd.f32 %v8175_v19, %v2517_v53  ;;  %v11097_v1 = vld [vmem:[#allocation53_spill] sm:$0xff]  ;;  %v2531_v8 = vsub.f32 1.0, %v2530_v21 }
 0x73f   :  { %5891 = vpow2.f32 %v5637_v12  ;;  %v8306_v32 = vsel %vm8227_vm15, %v8210_v61, %v2507_v20  ;;  %v2186_v53 = vmul.f32 %v8217_v57, %v2185_v37  ;;  %v2192_v61 = vand.u32 2147483647, %v8160_v11  ;;  %v8341_v20 = vpop.f32.mrf.mxu3 }
 0x740   :  { %v2105_v23 = vadd.f32 %v2084_v39, %v8099_v44  ;;  %5893 = vrcp.f32 %v8265_v35  ;;  %v5638_v3 = vmul.f32 -1.442695, %v2464_v26  ;;  %v2194_v39 = vand.u32 2147483648, %v8160_v11  ;;  %11102 = vst [vmem:[#allocation67_spill] sm:$0xff] %v8341_v20 }
 0x741   :  { %v2441_v10 = vpop.f32.mrf.mxu2  ;;  %v2522_v16 = vsel %vm8330_vm11, %v8175_v19, %v2518_v48  ;;  %vm2189_vm12 = vweird.f32 %v8217_v57  ;;  %v2538_v40 = vand.u32 2147483647, %v8167_v47  ;;  %vm8354_vm14 = vcmp.eq.f32.partialorder %v2192_v61, 8.507059e+37 }
 0x742   :  { %v5886_v44 = vpop.eup %5885  ;;  %v5620_v58 = vmul.f32 -1.442695, %v2105_v23  ;;  %v2442_v31 = vadd.f32 %v2441_v10, %v11097_v1  ;;  %v2532_v23 = vmul.f32 %v8232_v45, %v2531_v8  ;;  %v2187_v10 = vadd.f32 %v8217_v57, %v2186_v53  ;;  %vm8378_vm0 = vmor %vm2188_vm9, %vm2189_vm12 }
 0x743   :  { %v8298_v5 = vpop.eup %5887  ;;  %v8301_v43 = vadd.f32 1.0, %v5886_v44  ;;  %v2195_v1 = vor.u32 1.1754944e-38, %v2194_v39  ;;  %vm2535_vm15 = vweird.f32 %v8232_v45  ;;  %vm8382_vm1 = vcmp.eq.f32.partialorder %v2538_v40, 8.507059e+37 }
 0x744   :  { %v8309_v15 = vpop.eup %5889  ;;  %5895 = vpow2.f32 %v5620_v58  ;;  %v2465_v6 = vadd.f32 %v2442_v31, %v8132_v46  ;;  %v2176_v46 = vsel %vm8316_vm10, %v8165_v9, %v2172_v13  ;;  %v2545_v9 = vmul.f32 %v8298_v5, %v8219_v63  ;;  %vm8395_vm3 = vmor %vm2534_vm13, %vm2535_vm15 }
 0x745   :  { %5897 = vrcp.f32 %v8301_v43  ;;  %v2086_v12 = vpop.f32.mrf.mxu1  ;;  %v2214_v37 = vmul.f32 %v8309_v15, %v8234_v2  ;;  %v5892_v26 = vpop.eup %5891  ;;  %v8351_v19 = vsel %vm8280_vm5, %v8245_v14, %v2176_v46  ;;  %v8362_v58 = vsel %vm8289_vm7, %v2526_v60, %v2522_v16  ;;  %v11105_v14 = vld [vmem:[#allocation52_spill] sm:$0xff] }
 0x746   :  { %v5639_v21 = vmul.f32 -1.442695, %v2465_v6  ;;  %v8358_v48 = vpop.eup %5893  ;;  %v2540_v31 = vand.u32 2147483648, %v8167_v47  ;;  %v2533_v6 = vadd.f32 %v8232_v45, %v2532_v23  ;;  %v2546_v36 = vsub.f32 1.0, %v2545_v9 }
 0x747   :  { %v8370_v61 = vadd.f32 1.0, %v5892_v26  ;;  %v2215_v46 = vsub.f32 1.0, %v2214_v37  ;;  %v2191_v39 = vsel %vm8378_vm0, %v8217_v57, %v2187_v10  ;;  %vm2549_vm2 = vweird.f32 %v8219_v63 }
 0x748   :  { %5899 = vpow2.f32 %v5639_v21  ;;  %v2555_v21 = vand.u32 2147483648, %v8219_v63  ;;  %v2541_v23 = vor.u32 1.1754944e-38, %v2540_v31  ;;  %v2199_v9 = vmul.f32 %v8358_v48, %v8265_v35 }
 0x749   :  { %5901 = vpow2.f32 %v5638_v3  ;;  %v2444_v44 = vpop.f32.mrf.mxu2  ;;  %v2537_v37 = vsel %vm8395_vm3, %v8232_v45, %v2533_v6  ;;  %v2547_v26 = vmul.f32 %v8298_v5, %v2546_v36  ;;  %v8411_v31 = vsel %vm8354_vm14, %v2195_v1, %v2191_v39  ;;  %v8416_v6 = vpop.f32.mrf.mxu3 }
 0x74a   :  { %v5896_v59 = vpop.eup %5895  ;;  %v2445_v8 = vadd.f32 %v2444_v44, %v11105_v14  ;;  %v1992_v44 = vpop.permute.xlu2 %1991  ;;  %v2222_v14 = vand.u32 2147483647, %v8234_v2  ;;  %v2556_v45 = vor.u32 1.1754944e-38, %v2555_v21  ;;  %vm2218_vm5 = vweird.f32 %v8234_v2  ;;  %11112 = vst [vmem:[#allocation53_spill] sm:$0xff] %v8416_v6 }
 0x74b   :  { %v8368_v53 = vpop.eup %5897  ;;  %v8372_v3 = vadd.f32 1.0, %v5896_v59  ;;  %v2216_v59 = vmul.f32 %v8309_v15, %v2215_v46  ;;  %v2239_v13 = vand.u32 2147483648, %v8301_v43  ;;  %v2200_v1 = vsub.f32 1.0, %v2199_v9 }
 0x74c   :  { %v2466_v25 = vadd.f32 %v2445_v8, %v8141_v24  ;;  %v2553_v24 = vand.u32 2147483647, %v8219_v63  ;;  %v2229_v47 = vmul.f32 %v8368_v53, %v8301_v43  ;;  %v2087_v8 = vadd.f32 %v2086_v12, %v1992_v44 }
 0x74d   :  { %5903 = vrcp.f32 %v8372_v3  ;;  %v2089_v11 = vpop.f32.mrf.mxu1  ;;  %v2548_v12 = vadd.f32 %v8298_v5, %v2547_v26  ;;  %vm2550_vm6 = vweird.f32 %v8298_v5  ;;  %v2217_v60 = vadd.f32 %v8309_v15, %v2216_v59 }
 0x74e   :  { %v5900_v57 = vpop.eup %5899  ;;  %v5640_v40 = vmul.f32 -1.442695, %v2466_v25  ;;  %5905 = vrcp.f32 %v8370_v61  ;;  %v8422_v25 = vsel %vm8382_vm1, %v2541_v23, %v2537_v37  ;;  %vm8429_vm7 = vcmp.eq.f32.partialorder %v2553_v24, 8.507059e+37  ;;  %vm8454_vm11 = vmor %vm2549_vm2, %vm2550_vm6 }
 0x74f   :  { %v5902_v10 = vpop.eup %5901  ;;  %v8418_v36 = vadd.f32 1.0, %v5900_v57  ;;  %v2230_v21 = vsub.f32 1.0, %v2229_v47  ;;  %vm2219_vm8 = vweird.f32 %v8309_v15  ;;  %vm8437_vm9 = vcmp.eq.f32.partialorder %v2222_v14, 8.507059e+37 }
 0x750   :  { %5907 = vpow2.f32 %v5640_v40  ;;  %v8425_v46 = vadd.f32 1.0, %v5902_v10  ;;  %v2224_v9 = vand.u32 2147483648, %v8234_v2  ;;  %v2258_v24 = vmul.f32 %v8223_v0, %v2087_v8  ;;  %vm8470_vm13 = vmor %vm2218_vm5, %vm2219_vm8 }
 0x751   :  { %v2447_v42 = vpop.f32.mrf.mxu2  ;;  %v2237_v40 = vand.u32 2147483647, %v8301_v43  ;;  %vm2203_vm10 = vweird.f32 %v8265_v35  ;;  %5909 = vrcp.f32 %v8418_v36  ;;  %vm2233_vm12 = vweird.f32 %v8301_v43 }
 0x752   :  { %v2240_v0 = vor.u32 1.1754944e-38, %v2239_v13  ;;  %v2201_v10 = vmul.f32 %v8358_v48, %v2200_v1  ;;  %5911 = vrcp.f32 %v8425_v46  ;;  %v2552_v14 = vsel %vm8454_vm11, %v8298_v5, %v2548_v12 }
 0x753   :  { %v8433_v16 = vpop.eup %5903  ;;  %v2231_v63 = vmul.f32 %v8368_v53, %v2230_v21  ;;  %v2090_v6 = vadd.f32 %v2089_v11, %v8055_v4  ;;  %v2262_v5 = vadd.f32 %v2258_v24, %v8103_v28  ;;  %v2254_v12 = vand.u32 2147483648, %v8372_v3 }
 0x754   :  { %v2244_v57 = vmul.f32 %v8433_v16, %v8372_v3  ;;  %v8447_v37 = vpop.eup %5905  ;;  %vm8482_vm14 = vcmp.eq.f32.partialorder %v2237_v40, 8.507059e+37  ;;  %v2225_v2 = vor.u32 1.1754944e-38, %v2224_v9  ;;  %vm2204_vm15 = vweird.f32 %v8358_v48  ;;  %v8500_v40 = vpop.f32.mrf.mxu3 }
 0x755   :  { %v2092_v26 = vpop.f32.mrf.mxu1  ;;  %v2252_v4 = vand.u32 2147483647, %v8372_v3  ;;  %v2202_v11 = vadd.f32 %v8358_v48, %v2201_v10  ;;  %vm2234_vm0 = vweird.f32 %v8368_v53  ;;  %11123 = vst [vmem:[#allocation52_spill] sm:$0xff] %v8500_v40  ;;  %v8505_v47 = vsel %vm8429_vm7, %v2556_v45, %v2552_v14  ;;  %vm8517_vm2 = vmor %vm2203_vm10, %vm2204_vm15 }
 0x756   :  { %v5908_v44 = vpop.eup %5907  ;;  %v2093_v59 = vadd.f32 %v2092_v26, %v8053_v51  ;;  %v2245_v13 = vsub.f32 1.0, %v2244_v57  ;;  %v2221_v51 = vsel %vm8470_vm13, %v8309_v15, %v2217_v60  ;;  %v2207_v15 = vand.u32 2147483647, %v8265_v35  ;;  %vm8529_vm5 = vmor %vm2233_vm12, %vm2234_vm0 }
 0x757   :  { %v8474_v1 = vadd.f32 1.0, %v5908_v44  ;;  %v2232_v60 = vadd.f32 %v8368_v53, %v2231_v63  ;;  %v8496_v9 = vsel %vm8437_vm9, %v2225_v2, %v2221_v51  ;;  %v8498_v24 = vpop.eup %5909  ;;  %v2259_v26 = vmul.f32 %v8269_v55, %v2090_v6 }
 0x758   :  { %v2260_v28 = vmul.f32 %v8351_v19, %v2093_v59  ;;  %v2246_v19 = vmul.f32 %v8433_v16, %v2245_v13  ;;  %v2209_v10 = vand.u32 2147483648, %v8265_v35  ;;  %v8509_v44 = vpop.eup %5911  ;;  %v2448_v23 = vadd.f32 %v2447_v42, %v8034_v62  ;;  %v11130_v35 = vld [vmem:[#allocation11_spill] sm:$0xff] }
 0x759   :  { %5913 = vrcp.f32 %v8474_v1  ;;  %v2450_v57 = vpop.f32.mrf.mxu2  ;;  %vm2248_vm1 = vweird.f32 %v8372_v3  ;;  %v2255_v59 = vor.u32 1.1754944e-38, %v2254_v12  ;;  %vm8521_vm3 = vcmp.eq.f32.partialorder %v2252_v4, 8.507059e+37 }
 0x75a   :  { %5915 = vtanh.f32 %v2262_v5  ;;  %v2271_v42 = vsub.f32 1.0, %v8496_v9  ;;  %v8536_v39 = vmul.f32 %v8496_v9, %v11130_v35  ;;  %v2206_v14 = vsel %vm8517_vm2, %v8358_v48, %v2202_v11 }
 0x75b   :  { %vm8541_vm6 = vcmp.eq.f32.partialorder %v2207_v15, 8.507059e+37  ;;  %v2264_v43 = vadd.f32 %v2260_v28, %v8111_v18  ;;  %v2236_v13 = vsel %vm8529_vm5, %v8368_v53, %v2232_v60  ;;  %v2590_v51 = vmul.f32 %v8498_v24, %v8418_v36 }
 0x75c   :  { %v2263_v12 = vadd.f32 %v2259_v26, %v8107_v50  ;;  %v2247_v48 = vadd.f32 %v8433_v16, %v2246_v19  ;;  %vm2249_vm7 = vweird.f32 %v8433_v16  ;;  %v2210_v2 = vor.u32 1.1754944e-38, %v2209_v10  ;;  %v11133_v19 = vld [vmem:[#allocation82_spill] sm:$0xff]  ;;  %v8591_v55 = vpop.f32.mrf.mxu3 }
 0x75d   :  { %v2095_v45 = vpop.f32.mrf.mxu1  ;;  %v2600_v53 = vand.u32 2147483648, %v8418_v36  ;;  %v2451_v11 = vadd.f32 %v2450_v57, %v8018_v54  ;;  %v2241_v50 = vsel %vm8482_vm14, %v2240_v0, %v2236_v13  ;;  %v2575_v60 = vmul.f32 %v8509_v44, %v8425_v46  ;;  %vm8575_vm8 = vmor %vm2248_vm1, %vm2249_vm7  ;;  %11136 = vst [vmem:[#allocation11_spill] sm:$0xff] %v8591_v55  ;;  %v11180_v55 = vld [vmem:[#allocation88_spill] sm:$0xff] }
 0x75e   :  { %v2096_v8 = vadd.f32 %v2095_v45, %v8020_v7  ;;  %v2619_v7 = vmul.f32 %v8306_v32, %v2448_v23  ;;  %v2211_v28 = vsel %vm8541_vm6, %v2210_v2, %v2206_v14  ;;  %5917 = vtanh.f32 %v2264_v43  ;;  %v11137_v43 = vld [vmem:[#allocation10_spill] sm:$0xff] }
 0x75f   :  { %v8552_v5 = vpop.eup %5913  ;;  %v2591_v0 = vsub.f32 1.0, %v2590_v51  ;;  %5919 = vtanh.f32 %v2263_v12  ;;  %v2251_v57 = vsel %vm8575_vm8, %v8433_v16, %v2247_v48  ;;  %vm2594_vm9 = vweird.f32 %v8418_v36  ;;  %v11138_v12 = vld [vmem:[#allocation12_spill] sm:$0xff] }
 0x760   :  { %v2605_v18 = vmul.f32 %v8552_v5, %v8474_v1  ;;  %v2261_v4 = vmul.f32 %v8411_v31, %v2096_v8  ;;  %v5916_v26 = vpop.eup %5915  ;;  %v8585_v10 = vadd.f32 %v2619_v7, %v8145_v22  ;;  %v2598_v3 = vand.u32 2147483647, %v8418_v36 }
 0x761   :  { %v2453_v15 = vpop.f32.mrf.mxu2  ;;  %v8589_v23 = vor.u32 1.1754944e-38, %v2600_v53  ;;  %v2620_v45 = vmul.f32 %v8362_v58, %v2451_v11  ;;  %v2272_v62 = vsub.f32 1.0, %v2241_v50  ;;  %v2270_v14 = vsub.f32 1.0, %v2211_v28  ;;  %v11139_v11 = vld [vmem:[#allocation9_spill] sm:$0xff] }
 0x762   :  { %v2265_v32 = vadd.f32 %v2261_v4, %v8119_v49  ;;  %v2454_v31 = vadd.f32 %v2453_v15, %v11133_v19  ;;  %v2606_v21 = vsub.f32 1.0, %v2605_v18  ;;  %v2560_v49 = vmul.f32 %v8447_v37, %v8370_v61 }
 0x763   :  { %v2576_v16 = vsub.f32 1.0, %v2575_v60  ;;  %v2256_v22 = vsel %vm8521_vm3, %v2255_v59, %v2251_v57  ;;  %v2280_v8 = vmul.f32 %v2241_v50, %v11137_v43  ;;  %v2592_v13 = vmul.f32 %v8498_v24, %v2591_v0 }
 0x764   :  { %5921 = vtanh.f32 %v2265_v32  ;;  %v2621_v63 = vmul.f32 %v8422_v25, %v2454_v31  ;;  %v2274_v51 = vmul.f32 %v5916_v26, %v2270_v14  ;;  %v2278_v48 = vmul.f32 %v2211_v28, %v11138_v12  ;;  %v5918_v7 = vpop.eup %5917  ;;  %v11142_v32 = vld [vmem:[#allocation76_spill] sm:$0xff]  ;;  %v8648_v14 = vpop.f32.mrf.mxu3 }
 0x765   :  { %v2607_v2 = vmul.f32 %v8552_v5, %v2606_v21  ;;  %v2561_v18 = vsub.f32 1.0, %v2560_v49  ;;  %vm2609_vm10 = vweird.f32 %v8474_v1  ;;  %v2613_v58 = vand.u32 2147483647, %v8474_v1  ;;  %v5920_v59 = vpop.eup %5919  ;;  %11148 = vst [vmem:[#allocation10_spill] sm:$0xff] %v8648_v14 }
 0x766   :  { %v2615_v25 = vand.u32 2147483648, %v8474_v1  ;;  %vm2595_vm11 = vweird.f32 %v8498_v24  ;;  %v2624_v6 = vadd.f32 %v2620_v45, %v8149_v17  ;;  %v2273_v53 = vsub.f32 1.0, %v2256_v22 }
 0x767   :  { %v2281_v15 = vmul.f32 %v2256_v22, %v11139_v11  ;;  %vm8607_vm12 = vcmp.eq.f32.partialorder %v2598_v3, 8.507059e+37  ;;  %v2577_v28 = vmul.f32 %v8509_v44, %v2576_v16  ;;  %v2625_v26 = vadd.f32 %v2621_v63, %v8155_v52  ;;  %vm8629_vm0 = vmor %vm2594_vm9, %vm2595_vm11  ;;  %v2658_v3 = vld [vmem:[%s10874_s18 + $0x18] sm:$0xff] }
 0x768   :  { %vm2610_vm13 = vweird.f32 %v8552_v5  ;;  %v2593_v31 = vadd.f32 %v8498_v24, %v2592_v13  ;;  %v2276_v54 = vmul.f32 %v5918_v7, %v2272_v62  ;;  %v2608_v0 = vadd.f32 %v8552_v5, %v2607_v2 }
 0x769   :  { %v2456_v4 = vpop.f32.mrf.mxu2  ;;  %v2562_v21 = vmul.f32 %v8447_v37, %v2561_v18  ;;  %v2275_v49 = vmul.f32 %v5920_v59, %v2271_v42  ;;  %vm2579_vm14 = vweird.f32 %v8425_v46  ;;  %vm2580_vm15 = vweird.f32 %v8509_v44  ;;  %vm8640_vm1 = vmor %vm2609_vm10, %vm2610_vm13 }
 0x76a   :  { %v5922_v60 = vpop.eup %5921  ;;  %v2457_v19 = vadd.f32 %v2456_v4, %v11142_v32  ;;  %5923 = vtanh.f32 %v2624_v6  ;;  %v2583_v9 = vand.u32 2147483647, %v8425_v46  ;;  %v2597_v36 = vsel %vm8629_vm0, %v8498_v24, %v2593_v31  ;;  %vm8662_vm5 = vmor %vm2579_vm14, %vm2580_vm15  ;;  %v6171_v4 = vld [vmem:[%s10874_s18] sm:$0xff]  ;;  %v3021_v24 = vld [vmem:[%s10876_s20 + $0x28] sm:$0xff] }
 0x76b   :  { %v2277_v17 = vmul.f32 %v5922_v60, %v2273_v53  ;;  %5925 = vtanh.f32 %v2625_v26  ;;  %v2585_v62 = vand.u32 2147483648, %v8425_v46  ;;  %v8651_v16 = vadd.f32 %v2280_v8, %v2276_v54 }
 0x76c   :  { %v2622_v57 = vmul.f32 %v8505_v47, %v2457_v19  ;;  %v2578_v47 = vadd.f32 %v8509_v44, %v2577_v28  ;;  %v2563_v1 = vadd.f32 %v8447_v37, %v2562_v21  ;;  %vm2565_vm2 = vweird.f32 %v8447_v37  ;;  %v8698_v28 = vpop.f32.mrf.mxu3 }
 0x76d   :  { %v8623_v52 = vadd.f32 %v2281_v15, %v2277_v17  ;;  %11149 = vst [vmem:[#allocation12_spill] sm:$0xff] %v8651_v16  ;;  %vm2614_vm3 = vcmp.eq.f32.partialorder %v2613_v58, 8.507059e+37  ;;  %v2616_v63 = vor.u32 1.1754944e-38, %v2615_v25  ;;  %v2570_v22 = vand.u32 2147483648, %v8370_v61  ;;  %v2656_v17 = vld [vmem:[%s10874_s18 + $0x8] sm:$0xff] }
 0x76e   :  { %v2626_v42 = vadd.f32 %v2622_v57, %v8158_v38  ;;  %v2612_v38 = vsel %vm8640_vm1, %v8552_v5, %v2608_v0  ;;  %v8669_v5 = vadd.f32 %v8536_v39, %v2275_v49  ;;  %v2582_v8 = vsel %vm8662_vm5, %v8509_v44, %v2578_v47  ;;  %11156 = vst [vmem:[#allocation96_spill] sm:$0xff] %v8698_v28  ;;  %v3016_v57 = vld [vmem:[%s10876_s20] sm:$0xff]  ;;  %v3017_v49 = vld [vmem:[%s10876_s20 + $0x8] sm:$0xff] }
 0x76f   :  { %11143 = vst [vmem:[#allocation82_spill] sm:$0xff] %v8623_v52  ;;  %2787 = vmatpush.msra.mxu3 %v8623_v52  ;;  %vm2564_vm6 = vweird.f32 %v8370_v61  ;;  %v2568_v13 = vand.u32 2147483647, %v8370_v61  ;;  %v2617_v46 = vsel %vm2614_vm3, %v2616_v63, %v2612_v38  ;;  %v2602_v2 = vsel %vm8607_vm12, %v8589_v23, %v2597_v36  ;;  %v3019_v36 = vld [vmem:[%s10876_s20 + $0x18] sm:$0xff]  ;;  %v3020_v38 = vld [vmem:[%s10876_s20 + $0x20] sm:$0xff]  ;;  %v2661_v63 = vld [vmem:[%s10874_s18 + $0x30] sm:$0xff] }
 0x770   :  { %5927 = vtanh.f32 %v2626_v42  ;;  %11152 = vst [vmem:[#allocation9_spill] sm:$0xff] %v8669_v5  ;;  %v2586_v18 = vor.u32 1.1754944e-38, %v2585_v62  ;;  %vm8682_vm7 = vmor %vm2564_vm6, %vm2565_vm2  ;;  %v5924_v7 = vpop.eup %5923  ;;  %v8687_v44 = vadd.f32 %v2278_v48, %v2274_v51  ;;  %vm2584_vm8 = vcmp.eq.f32.partialorder %v2583_v9, 8.507059e+37  ;;  %v3018_v9 = vld [vmem:[%s10876_s20 + $0x10] sm:$0xff]  ;;  %v2659_v42 = vld [vmem:[%s10874_s18 + $0x20] sm:$0xff] }
 0x771   :  { %2788 = vmatpush.msra.mxu3 %v8651_v16  ;;  %5929 = vtanh.f32 %v8585_v10  ;;  %v2567_v61 = vsel %vm8682_vm7, %v8447_v37, %v2563_v1  ;;  %v5926_v10 = vpop.eup %5925  ;;  %v2571_v23 = vor.u32 1.1754944e-38, %v2570_v22  ;;  %v2634_v25 = vsub.f32 1.0, %v2617_v46  ;;  %v2660_v62 = vld [vmem:[%s10874_s18 + $0x28] sm:$0xff] }
 0x772   :  { %11155 = vst [vmem:[#allocation76_spill] sm:$0xff] %v8687_v44  ;;  %v2587_v58 = vsel %vm2584_vm8, %v2586_v18, %v2582_v8  ;;  %v2633_v59 = vsub.f32 1.0, %v2602_v2  ;;  %vm2569_vm9 = vcmp.eq.f32.partialorder %v2568_v13, 8.507059e+37  ;;  %v2642_v53 = vmul.f32 %v2617_v46, %v11139_v11  ;;  %v2662_v8 = vld [vmem:[%s10874_s18 + $0x38] sm:$0xff]  ;;  %v3022_v13 = vld [vmem:[%s10876_s20 + $0x30] sm:$0xff]  ;;  %v6173_v39 = vld [vmem:[%s10874_s18 + $0x48] sm:$0xff] }
 0x773   :  { %2789 = vmatpush.msra.mxu3 %v8669_v5  ;;  %v2572_v51 = vsel %vm2569_vm9, %v2571_v23, %v2567_v61  ;;  %v2632_v15 = vsub.f32 1.0, %v2587_v58  ;;  %v2641_v26 = vmul.f32 %v2602_v2, %v11137_v43  ;;  %v2640_v11 = vmul.f32 %v2587_v58, %v11130_v35  ;;  %v6172_v2 = vld [vmem:[%s10874_s18 + $0x40] sm:$0xff]  ;;  %v3023_v18 = vld [vmem:[%s10876_s20 + $0x38] sm:$0xff]  ;;  %v6176_v23 = vld [vmem:[%s10876_s20 + $0x48] sm:$0xff] }
 0x774   :  { %v2637_v37 = vmul.f32 %v5926_v10, %v2633_v59  ;;  %v2631_v19 = vsub.f32 1.0, %v2572_v51  ;;  %v2639_v21 = vmul.f32 %v2572_v51, %v11138_v12  ;;  %v8723_v35 = vpop.f32.mrf.mxu3  ;;  %v2657_v12 = vld [vmem:[%s10874_s18 + $0x10] sm:$0xff]  ;;  %v6174_v61 = vld [vmem:[%s10876_s20 + $0x40] sm:$0xff]  ;;  %v3048_v51 = vpop.permute.xlu0 %3047  ;;  %v11178_v28 = vld [vmem:[#allocation90_spill] sm:$0xff] }
 0x775   :  { %2790 = vmatpush.msra.mxu3 %v8687_v44  ;;  %v2636_v32 = vmul.f32 %v5924_v7, %v2632_v15  ;;  %v6175_v10 = vld [vmem:[%s10874_s18 + $0x50] sm:$0xff]  ;;  %v8829_v15 = vpop.permute.xlu1 %3057 }
 0x776   :  { %v5928_v6 = vpop.eup %5927  ;;  %5641 = vmatmul.msk.f32.vlgmr.msra.gmra.mxu3 %vm523_vm4, %v6171_v4  ;;  %v8704_v31 = vadd.f32 %v2641_v26, %v2637_v37  ;;  %v6178_v59 = vld [vmem:[%s10876_s20 + $0x50] sm:$0xff]  ;;  %v6179_v4 = vld [vmem:[%s10876_s20 + $0x58] sm:$0xff] }
 0x777   :  { %v2638_v48 = vmul.f32 %v5928_v6, %v2634_v25  ;;  %v5930_v50 = vpop.eup %5929  ;;  %v8711_v0 = vadd.f32 %v2640_v11, %v2636_v32  ;;  %v6177_v25 = vld [vmem:[%s10874_s18 + $0x58] sm:$0xff] }
 0x778   :  { %11158 = vst [vmem:[#allocation98_spill] sm:$0xff] %v8704_v31  ;;  %v2635_v54 = vmul.f32 %v5930_v50, %v2631_v19 }
 0x779   :  { %v8700_v60 = vadd.f32 %v2642_v53, %v2638_v48  ;;  %11159 = vst [vmem:[#allocation99_spill] sm:$0xff] %v8711_v0  ;;  %v3053_v53 = vpop.permute.xlu2 %3052 }
 0x77a   :  { %v8716_v43 = vadd.f32 %v2639_v21, %v2635_v54 }
 0x77b   :  { %11157 = vst [vmem:[#allocation97_spill] sm:$0xff] %v8700_v60  ;;  %3148 = vmatpush.msrb.mxu0 %v8700_v60 }
 0x77c   :  { %11160 = vst [vmem:[#allocation100_spill] sm:$0xff] %v8716_v43  ;;  %v8736_v47 = vpop.f32.mrf.mxu3  ;;  %v8827_v37 = vpop.permute.xlu0 %3072 }
 0x77d   :  { %3149 = vmatpush.msrb.mxu0 %v8704_v31  ;;  %v3043_v19 = vpop.permute.xlu1 %3042 }
 0x77e   :  { %5642 = vmatmul.msk.f32.gmra.mxu3 %vm523_vm4, %v2656_v17 }
 0x77f   :  { %3150 = vmatpush.msrb.mxu0 %v8711_v0 }
 0x781   :  { %3151 = vmatpush.msrb.mxu0 %v8716_v43  ;;  %v8833_v26 = vpop.permute.xlu2 %3077 }
 0x782   :  { %5661 = vmatmul.msk.f32.vlgmr.msrb.gmra.mxu0 %vm523_vm4, %v3016_v57  ;;  %v11161_v57 = vld [vmem:[#allocation58_spill] sm:$0xff] }
 0x784   :  { %v8747_v45 = vpop.f32.mrf.mxu3  ;;  %v2692_v32 = vpop.permute.xlu0 %2691 }
 0x786   :  { %5643 = vmatmul.msk.f32.gmra.mxu3 %vm523_vm4, %v2657_v12  ;;  %v11162_v12 = vld [vmem:[#allocation15_spill] sm:$0xff] }
 0x789   :  { %v8837_v11 = vpop.permute.xlu2 %3067 }
 0x78a   :  { %5662 = vmatmul.msk.f32.gmra.mxu0 %vm523_vm4, %v3017_v49  ;;  %v1676_v49 = vadd.f32 %v11162_v12, %v11161_v57 }
 0x78c   :  { %v8760_v1 = vpop.f32.mrf.mxu3  ;;  %v2682_v54 = vpop.permute.xlu0 %2681 }
 0x78e   :  { %5644 = vmatmul.msk.f32.gmra.mxu3 %vm523_vm4, %v2658_v3 }
 0x792   :  { %5663 = vmatmul.msk.f32.gmra.mxu0 %vm523_vm4, %v3018_v9  ;;  %v2697_v9 = vpop.permute.xlu1 %2696 }
 0x794   :  { %v8771_v22 = vpop.f32.mrf.mxu3 }
 0x796   :  { %5645 = vmatmul.msk.f32.gmra.mxu3 %vm523_vm4, %v2659_v42 }
 0x79a   :  { %5664 = vmatmul.msk.f32.gmra.mxu0 %vm523_vm4, %v3019_v36 }
 0x79c   :  { %v8781_v46 = vpop.f32.mrf.mxu3 }
 0x79e   :  { %5646 = vmatmul.msk.f32.gmra.mxu3 %vm523_vm4, %v2660_v62  ;;  %v11163_v62 = vld [vmem:[#allocation42_spill] sm:$0xff] }
 0x7a2   :  { %5665 = vmatmul.msk.f32.gmra.mxu0 %vm523_vm4, %v3020_v38  ;;  %v1801_v38 = vadd.f32 %v8723_v35, %v11163_v62 }
 0x7a4   :  { %v8795_v7 = vpop.f32.mrf.mxu3 }
 0x7a6   :  { %5647 = vmatmul.msk.f32.gmra.mxu3 %vm523_vm4, %v2661_v63 }
 0x7aa   :  { %5666 = vmatmul.msk.f32.gmra.mxu0 %vm523_vm4, %v3021_v24 }
 0x7ac   :  { %v8805_v58 = vpop.f32.mrf.mxu3 }
 0x7ae   :  { %5648 = vmatmul.msk.f32.gmra.mxu3 %vm523_vm4, %v2662_v8  ;;  %v2687_v8 = vpop.permute.xlu2 %2686 }
 0x7b2   :  { %5667 = vmatmul.msk.f32.gmra.mxu0 %vm523_vm4, %v3022_v13 }
 0x7b4   :  { %v8819_v6 = vpop.f32.mrf.mxu3 }
 0x7b6   :  { %5649 = vmatmul.msk.f32.gmra.mxu3 %vm523_vm4, %v6172_v2  ;;  %v11164_v2 = vld [vmem:[#allocation49_spill] sm:$0xff] }
 0x7ba   :  { %5668 = vmatmul.msk.f32.gmra.mxu0 %vm523_vm4, %v3023_v18  ;;  %v11165_v18 = vld [vmem:[#allocation16_spill] sm:$0xff] }
 0x7bc   :  { %v8825_v48 = vpop.f32.mrf.mxu3 }
 0x7be   :  { %5650 = vmatmul.msk.f32.gmra.mxu3 %vm523_vm4, %v6173_v39  ;;  %v1679_v39 = vadd.f32 %v11165_v18, %v11164_v2 }
 0x7c2   :  { %5669 = vmatmul.msk.f32.gmra.mxu0 %vm523_vm4, %v6174_v61 }
 0x7c4   :  { %v8831_v50 = vpop.f32.mrf.mxu3 }
 0x7c6   :  { %5651 = vmatmul.msk.f32.gmra.mxu3 %vm523_vm4, %v6175_v10 }
 0x7ca   :  { %5670 = vmatmul.msk.f32.gmra.mxu0 %vm523_vm4, %v6176_v23 }
 0x7cc   :  { %v8835_v17 = vpop.f32.mrf.mxu3 }
 0x7ce   :  { %5652 = vmatmul.msk.f32.gmra.mxu3 %vm523_vm4, %v6177_v25  ;;  %v8845_v25 = vpop.permute.xlu1 %3062 }
 0x7d2   :  { %5671 = vmatmul.msk.f32.gmra.mxu0 %vm523_vm4, %v6178_v59 }
 0x7da   :  { %5672 = vmatmul.msk.f32.gmra.mxu0 %vm523_vm4, %v6179_v4 }
 0x7f9   :  { %v2792_v21 = vpop.f32.mrf.mxu3 }
 0x7fa   :  { %v2793_v3 = vadd.f32 %v2792_v21, %v2682_v54  ;;  %v1804_v54 = vadd.f32 %v8736_v47, %v7821_v34  ;;  %v1807_v47 = vadd.f32 %v8747_v45, %v7782_v30 }
 0x7fc   :  { %v2828_v42 = vadd.f32 %v2793_v3, %v1676_v49  ;;  %v11166_v49 = vld [vmem:[#allocation46_spill] sm:$0xff] }
 0x7fd   :  { %v11167_v3 = vld [vmem:[#allocation18_spill] sm:$0xff] }
 0x7fe   :  { %v5653_v63 = vmul.f32 -1.442695, %v2828_v42  ;;  %v1682_v42 = vadd.f32 %v11167_v3, %v11166_v49 }
 0x7ff   :  { %v3153_v36 = vpop.f32.mrf.mxu0 }
 0x800   :  { %v3154_v24 = vadd.f32 %v3153_v36, %v3043_v19  ;;  %5931 = vpow2.f32 %v5653_v63 }
 0x801   :  { %v2795_v13 = vpop.f32.mrf.mxu3 }
 0x802   :  { %v3189_v61 = vadd.f32 %v3154_v24, %v1801_v38  ;;  %v2796_v10 = vadd.f32 %v2795_v13, %v2687_v8  ;;  %v8853_v13 = vpop.permute.xlu1 %2716 }
 0x804   :  { %v2829_v23 = vadd.f32 %v2796_v10, %v1679_v39  ;;  %v5673_v59 = vmul.f32 -1.442695, %v3189_v61 }
 0x806   :  { %v5654_v21 = vmul.f32 -1.442695, %v2829_v23  ;;  %v5932_v19 = vpop.eup %5931  ;;  %5933 = vpow2.f32 %v5673_v59 }
 0x807   :  { %v3156_v4 = vpop.f32.mrf.mxu0  ;;  %v8851_v8 = vadd.f32 1.0, %v5932_v19 }
 0x808   :  { %v3157_v35 = vadd.f32 %v3156_v4, %v3048_v51  ;;  %5935 = vpow2.f32 %v5654_v21 }
 0x809   :  { %v2798_v12 = vpop.f32.mrf.mxu3  ;;  %vm2873_vm10 = vweird.f32 %v8851_v8 }
 0x80a   :  { %v3190_v36 = vadd.f32 %v3157_v35, %v1804_v54  ;;  %v2799_v38 = vadd.f32 %v2798_v12, %v2692_v32  ;;  %v11168_v32 = vld [vmem:[#allocation20_spill] sm:$0xff] }
 0x80b   :  { %v1685_v59 = vadd.f32 %v11168_v32, %v7828_v41  ;;  %v11174_v32 = vld [vmem:[#allocation92_spill] sm:$0xff] }
 0x80c   :  { %v5674_v63 = vmul.f32 -1.442695, %v3190_v36  ;;  %v2830_v24 = vadd.f32 %v2799_v38, %v1682_v42  ;;  %v5934_v39 = vpop.eup %5933  ;;  %v11170_v38 = vld [vmem:[#allocation24_spill] sm:$0xff] }
 0x80d   :  { %v8860_v21 = vadd.f32 1.0, %v5934_v39  ;;  %v1810_v39 = vadd.f32 %v8760_v1, %v7780_v27 }
 0x80e   :  { %5937 = vpow2.f32 %v5674_v63  ;;  %v5655_v51 = vmul.f32 -1.442695, %v2830_v24  ;;  %v5936_v23 = vpop.eup %5935  ;;  %v8870_v63 = vadd.f32 %v11170_v38, %v7988_v33  ;;  %v11171_v24 = vld [vmem:[#allocation25_spill] sm:$0xff]  ;;  %v2707_v38 = vpop.permute.xlu0 %2706 }
 0x80f   :  { %v3159_v18 = vpop.f32.mrf.mxu0  ;;  %5939 = vrcp.f32 %v8851_v8  ;;  %v8862_v19 = vadd.f32 1.0, %v5936_v23  ;;  %vm3234_vm13 = vweird.f32 %v8860_v21 }
 0x810   :  { %v3160_v61 = vadd.f32 %v3159_v18, %v3053_v53  ;;  %5941 = vpow2.f32 %v5655_v51  ;;  %v11169_v53 = vld [vmem:[#allocation22_spill] sm:$0xff]  ;;  %v8875_v18 = vadd.f32 %v11171_v24, %v7964_v56  ;;  %v2702_v51 = vpop.permute.xlu1 %2701  ;;  %v11177_v24 = vld [vmem:[#allocation33_spill] sm:$0xff] }
 0x811   :  { %v2801_v10 = vpop.f32.mrf.mxu3  ;;  %v1688_v36 = vadd.f32 %v11169_v53, %v7992_v29  ;;  %5943 = vrcp.f32 %v8860_v21  ;;  %vm2888_vm2 = vweird.f32 %v8862_v19 }
 0x812   :  { %v3191_v4 = vadd.f32 %v3160_v61, %v1807_v47  ;;  %v2802_v54 = vadd.f32 %v2801_v10, %v2697_v9  ;;  %v11172_v61 = vld [vmem:[#allocation65_spill] sm:$0xff]  ;;  %v11173_v10 = vld [vmem:[#allocation27_spill] sm:$0xff] }
 0x813   :  { %v8882_v23 = vadd.f32 %v11173_v10, %v11172_v61 }
 0x814   :  { %v5675_v35 = vmul.f32 -1.442695, %v3191_v4  ;;  %v2831_v12 = vadd.f32 %v2802_v54, %v1685_v59  ;;  %v5938_v45 = vpop.eup %5937  ;;  %v11175_v59 = vld [vmem:[#allocation29_spill] sm:$0xff] }
 0x815   :  { %v8864_v42 = vpop.eup %5939  ;;  %v8886_v4 = vadd.f32 %v11175_v59, %v11174_v32  ;;  %v8889_v54 = vadd.f32 1.0, %v5938_v45  ;;  %v11179_v59 = vld [vmem:[#allocation35_spill] sm:$0xff]  ;;  %v11182_v32 = vld [vmem:[#allocation62_spill] sm:$0xff] }
 0x816   :  { %v5656_v3 = vmul.f32 -1.442695, %v2831_v12  ;;  %5945 = vpow2.f32 %v5675_v35  ;;  %v5942_v53 = vpop.eup %5941  ;;  %v8899_v14 = vadd.f32 %v11179_v59, %v11178_v28  ;;  %v11181_v45 = vld [vmem:[#allocation39_spill] sm:$0xff]  ;;  %v11185_v28 = vld [vmem:[#allocation48_spill] sm:$0xff]  ;;  %vm2874_vm12 = vweird.f32 %v8864_v42 }
 0x817   :  { %v3162_v9 = vpop.f32.mrf.mxu0  ;;  %5947 = vrcp.f32 %v8862_v19  ;;  %v8903_v40 = vadd.f32 %v11181_v45, %v11180_v55  ;;  %v8919_v45 = vadd.f32 %v8805_v58, %v11185_v28  ;;  %v11186_v55 = vld [vmem:[#allocation86_spill] sm:$0xff]  ;;  %v11188_v58 = vld [vmem:[#allocation80_spill] sm:$0xff]  ;;  %vm8976_vm14 = vmor %vm2873_vm10, %vm2874_vm12  ;;  %vm3249_vm3 = vweird.f32 %v8889_v54 }
 0x818   :  { %v3163_v47 = vadd.f32 %v3162_v9, %v8829_v15  ;;  %5949 = vpow2.f32 %v5656_v3  ;;  %v2869_v15 = vmul.f32 %v8864_v42, %v8851_v8  ;;  %v11176_v9 = vld [vmem:[#allocation91_spill] sm:$0xff]  ;;  %v1813_v3 = vadd.f32 %v8771_v22, %v11182_v32 }
 0x819   :  { %v2804_v12 = vpop.f32.mrf.mxu3  ;;  %v8895_v10 = vadd.f32 %v11177_v24, %v11176_v9  ;;  %v8911_v24 = vpop.eup %5943  ;;  %v11184_v9 = vld [vmem:[#allocation56_spill] sm:$0xff]  ;;  %v8923_v22 = vadd.f32 %v8819_v6, %v11186_v55  ;;  %v8925_v32 = vadd.f32 1.0, %v5942_v53  ;;  %5951 = vrcp.f32 %v8889_v54  ;;  %v11189_v6 = vld [vmem:[#allocation79_spill] sm:$0xff] }
 0x81a   :  { %v3192_v1 = vadd.f32 %v3163_v47, %v1810_v39  ;;  %v2805_v35 = vadd.f32 %v2804_v12, %v2702_v51  ;;  %v11183_v39 = vld [vmem:[#allocation59_spill] sm:$0xff]  ;;  %v2870_v61 = vsub.f32 1.0, %v2869_v15  ;;  %v8915_v59 = vadd.f32 %v8795_v7, %v11184_v9 }
 0x81b   :  { %v8909_v47 = vadd.f32 %v8781_v46, %v11183_v39  ;;  %v2877_v7 = vand.u32 2147483647, %v8851_v8  ;;  %v8937_v28 = vadd.f32 %v8831_v50, %v11188_v58  ;;  %v8941_v53 = vadd.f32 %v8835_v17, %v11189_v6  ;;  %v2712_v6 = vpop.permute.xlu2 %2711 }
 0x81c   :  { %v5676_v51 = vmul.f32 -1.442695, %v3192_v1  ;;  %v2832_v12 = vadd.f32 %v2805_v35, %v1688_v36  ;;  %v5946_v46 = vpop.eup %5945  ;;  %v11187_v1 = vld [vmem:[#allocation85_spill] sm:$0xff]  ;;  %v2879_v9 = vand.u32 2147483648, %v8851_v8  ;;  %v3230_v39 = vmul.f32 %v8911_v24, %v8860_v21 }
 0x81d   :  { %v8929_v36 = vadd.f32 %v8825_v48, %v11187_v1  ;;  %v8933_v15 = vpop.eup %5947  ;;  %v2871_v48 = vmul.f32 %v8864_v42, %v2870_v61  ;;  %v8949_v50 = vadd.f32 1.0, %v5946_v46  ;;  %v3240_v17 = vand.u32 2147483648, %v8860_v21 }
 0x81e   :  { %v5657_v35 = vmul.f32 -1.442695, %v2832_v12  ;;  %5953 = vpow2.f32 %v5676_v51  ;;  %v5950_v1 = vpop.eup %5949  ;;  %vm8953_vm11 = vcmp.eq.f32.partialorder %v2877_v7, 8.507059e+37  ;;  %v2884_v56 = vmul.f32 %v8933_v15, %v8862_v19 }
 0x81f   :  { %v3165_v55 = vpop.f32.mrf.mxu0  ;;  %v8958_v20 = vadd.f32 1.0, %v5950_v1  ;;  %v2872_v46 = vadd.f32 %v8864_v42, %v2871_v48  ;;  %v8964_v33 = vpop.eup %5951  ;;  %v2880_v7 = vor.u32 1.1754944e-38, %v2879_v9  ;;  %v3241_v1 = vor.u32 1.1754944e-38, %v3240_v17 }
 0x820   :  { %5955 = vpow2.f32 %v5657_v35  ;;  %v3166_v12 = vadd.f32 %v3165_v55, %v8845_v25  ;;  %v3231_v55 = vsub.f32 1.0, %v3230_v39  ;;  %v3238_v25 = vand.u32 2147483647, %v8860_v21 }
 0x821   :  { %5957 = vrcp.f32 %v8925_v32  ;;  %v2807_v58 = vpop.f32.mrf.mxu3  ;;  %v2885_v48 = vsub.f32 1.0, %v2884_v56  ;;  %v2894_v17 = vand.u32 2147483648, %v8862_v19  ;;  %v2876_v8 = vsel %vm8976_vm14, %v8864_v42, %v2872_v46 }
 0x822   :  { %v3193_v51 = vadd.f32 %v3166_v12, %v1813_v3  ;;  %v2808_v61 = vadd.f32 %v2807_v58, %v2707_v38  ;;  %v3232_v39 = vmul.f32 %v8911_v24, %v3231_v55  ;;  %v8968_v12 = vpop.permute.xlu0 %3092  ;;  %5959 = vrcp.f32 %v8949_v50 }
 0x823   :  { %vm8980_vm15 = vcmp.eq.f32.partialorder %v3238_v25, 8.507059e+37  ;;  %vm3235_vm0 = vweird.f32 %v8911_v24  ;;  %v3253_v55 = vand.u32 2147483647, %v8889_v54  ;;  %v3255_v42 = vand.u32 2147483648, %v8889_v54 }
 0x824   :  { %v5677_v38 = vmul.f32 -1.442695, %v3193_v51  ;;  %v2833_v3 = vadd.f32 %v2808_v61, %v8870_v63  ;;  %v5954_v58 = vpop.eup %5953  ;;  %v2892_v51 = vand.u32 2147483647, %v8862_v19  ;;  %v2886_v63 = vmul.f32 %v8933_v15, %v2885_v48  ;;  %vm9017_vm1 = vmor %vm3234_vm13, %vm3235_vm0  ;;  %v9031_v48 = vpop.permute.xlu2 %3097 }
 0x825   :  { %v8998_v30 = vadd.f32 1.0, %v5954_v58  ;;  %v9011_v58 = vsel %vm8953_vm11, %v2880_v7, %v2876_v8  ;;  %vm2889_vm5 = vweird.f32 %v8933_v15  ;;  %vm9041_vm7 = vcmp.eq.f32.partialorder %v3253_v55, 8.507059e+37 }
 0x826   :  { %v5956_v27 = vpop.eup %5955  ;;  %5961 = vpow2.f32 %v5677_v38  ;;  %v5658_v29 = vmul.f32 -1.442695, %v2833_v3  ;;  %v3233_v38 = vadd.f32 %v8911_v24, %v3232_v39  ;;  %v3245_v3 = vmul.f32 %v8964_v33, %v8889_v54  ;;  %vm9061_vm10 = vmor %vm2888_vm2, %vm2889_vm5 }
 0x827   :  { %v8986_v56 = vpop.eup %5957  ;;  %5963 = vrcp.f32 %v8958_v20  ;;  %v3168_v61 = vpop.f32.mrf.mxu0  ;;  %v9000_v41 = vadd.f32 1.0, %v5956_v27  ;;  %vm9035_vm6 = vcmp.eq.f32.partialorder %v2892_v51, 8.507059e+37  ;;  %vm2903_vm8 = vweird.f32 %v8925_v32 }
 0x828   :  { %5965 = vpow2.f32 %v5658_v29  ;;  %v3169_v25 = vadd.f32 %v3168_v61, %v8837_v11  ;;  %v3246_v29 = vsub.f32 1.0, %v3245_v3  ;;  %v2899_v11 = vmul.f32 %v8986_v56, %v8925_v32  ;;  %v9007_v39 = vpop.eup %5959 }
 0x829   :  { %v2810_v34 = vpop.f32.mrf.mxu3  ;;  %v3237_v35 = vsel %vm9017_vm1, %v8911_v24, %v3233_v38  ;;  %5967 = vrcp.f32 %v8998_v30  ;;  %v3256_v3 = vor.u32 1.1754944e-38, %v3255_v42  ;;  %vm3250_vm9 = vweird.f32 %v8964_v33 }
 0x82a   :  { %v3194_v46 = vadd.f32 %v3169_v25, %v8909_v47  ;;  %v2811_v49 = vadd.f32 %v2810_v34, %v2712_v6  ;;  %v2895_v34 = vor.u32 1.1754944e-38, %v2894_v17  ;;  %v3247_v21 = vmul.f32 %v8964_v33, %v3246_v29  ;;  %vm9088_vm13 = vmor %vm3249_vm3, %vm3250_vm9 }
 0x82b   :  { %v2887_v17 = vadd.f32 %v8933_v15, %v2886_v63  ;;  %5969 = vrcp.f32 %v9000_v41  ;;  %v9046_v63 = vpop.permute.xlu0 %2736  ;;  %vm2904_vm11 = vweird.f32 %v8986_v56  ;;  %v2909_v19 = vand.u32 2147483648, %v8925_v32 }
 0x82c   :  { %v5962_v47 = vpop.eup %5961  ;;  %v2834_v6 = vadd.f32 %v2811_v49, %v8875_v18  ;;  %v2900_v49 = vsub.f32 1.0, %v2899_v11  ;;  %v2907_v18 = vand.u32 2147483647, %v8925_v32  ;;  %v5678_v8 = vmul.f32 -1.442695, %v3194_v46 }
 0x82d   :  { %v9029_v7 = vpop.eup %5963  ;;  %v9048_v51 = vadd.f32 1.0, %v5962_v47  ;;  %v9052_v11 = vsel %vm8980_vm15, %v3241_v1, %v3237_v35  ;;  %v3248_v27 = vadd.f32 %v8964_v33, %v3247_v21  ;;  %v3260_v1 = vmul.f32 %v9007_v39, %v8949_v50  ;;  %vm9120_vm15 = vmor %vm2903_vm8, %vm2904_vm11 }
 0x82e   :  { %v5966_v24 = vpop.eup %5965  ;;  %v5659_v25 = vmul.f32 -1.442695, %v2834_v6  ;;  %v2901_v46 = vmul.f32 %v8986_v56, %v2900_v49  ;;  %vm9077_vm12 = vcmp.eq.f32.partialorder %v2907_v18, 8.507059e+37  ;;  %vm3264_vm14 = vweird.f32 %v8949_v50 }
 0x82f   :  { %v3171_v29 = vpop.f32.mrf.mxu0  ;;  %v9068_v9 = vadd.f32 1.0, %v5966_v24  ;;  %v3261_v49 = vsub.f32 1.0, %v3260_v1  ;;  %v9081_v24 = vpop.eup %5967  ;;  %v3252_v54 = vsel %vm9088_vm13, %v8964_v33, %v3248_v27  ;;  %vm3265_vm0 = vweird.f32 %v9007_v39 }
 0x830   :  { %5971 = vpow2.f32 %v5659_v25  ;;  %v3172_v55 = vadd.f32 %v3171_v29, %v8827_v37  ;;  %v2891_v37 = vsel %vm9061_vm10, %v8933_v15, %v2887_v17  ;;  %v2914_v17 = vmul.f32 %v9029_v7, %v8958_v20  ;;  %vm9158_vm5 = vmor %vm3264_vm14, %vm3265_vm0 }
 0x831   :  { %v2813_v47 = vpop.f32.mrf.mxu3  ;;  %5973 = vpow2.f32 %v5678_v8  ;;  %v9096_v18 = vpop.eup %5969  ;;  %v2902_v29 = vadd.f32 %v8986_v56, %v2901_v46  ;;  %v9114_v27 = vsel %vm9041_vm7, %v3256_v3, %v3252_v54  ;;  %vm2919_vm2 = vweird.f32 %v9029_v7 }
 0x832   :  { %v3195_v6 = vadd.f32 %v3172_v55, %v8915_v59  ;;  %v2814_v35 = vadd.f32 %v2813_v47, %v8853_v13  ;;  %5975 = vrcp.f32 %v9048_v51  ;;  %v3268_v59 = vand.u32 2147483647, %v8949_v50 }
 0x833   :  { %v3270_v13 = vand.u32 2147483648, %v8949_v50  ;;  %5977 = vrcp.f32 %v9068_v9  ;;  %v3262_v55 = vmul.f32 %v9007_v39, %v3261_v49  ;;  %v2915_v42 = vsub.f32 1.0, %v2914_v17  ;;  %v2722_v49 = vpop.permute.xlu0 %2721 }
 0x834   :  { %v5679_v8 = vmul.f32 -1.442695, %v3195_v6  ;;  %v2835_v25 = vadd.f32 %v2814_v35, %v8882_v23  ;;  %v9108_v6 = vsel %vm9035_vm6, %v2895_v34, %v2891_v37  ;;  %v2910_v23 = vor.u32 1.1754944e-38, %v2909_v19  ;;  %v3083_v35 = vpop.permute.xlu2 %3082 }
 0x835   :  { %v2916_v34 = vmul.f32 %v9029_v7, %v2915_v42  ;;  %v2906_v38 = vsel %vm9120_vm15, %v8986_v56, %v2902_v29  ;;  %vm9130_vm1 = vcmp.eq.f32.partialorder %v3268_v59, 8.507059e+37  ;;  %v3271_v32 = vor.u32 1.1754944e-38, %v3270_v13 }
 0x836   :  { %v5972_v1 = vpop.eup %5971  ;;  %5979 = vpow2.f32 %v5679_v8  ;;  %v5660_v47 = vmul.f32 -1.442695, %v2835_v25  ;;  %v3263_v8 = vadd.f32 %v9007_v39, %v3262_v55  ;;  %v2924_v25 = vand.u32 2147483648, %v8958_v20 }
 0x837   :  { %v9110_v15 = vadd.f32 1.0, %v5972_v1  ;;  %v3174_v33 = vpop.f32.mrf.mxu0  ;;  %v5974_v61 = vpop.eup %5973  ;;  %v2917_v13 = vadd.f32 %v9029_v7, %v2916_v34  ;;  %v9150_v55 = vsel %vm9077_vm12, %v2910_v23, %v2906_v38  ;;  %vm2918_vm3 = vweird.f32 %v8958_v20 }
 0x838   :  { %5981 = vpow2.f32 %v5660_v47  ;;  %v3175_v37 = vadd.f32 %v3174_v33, %v8833_v26  ;;  %v9134_v19 = vpop.eup %5975  ;;  %v3275_v26 = vmul.f32 %v9081_v24, %v8998_v30  ;;  %v9146_v29 = vadd.f32 1.0, %v5974_v61  ;;  %vm9169_vm7 = vmor %vm2918_vm3, %vm2919_vm2  ;;  %v3088_v38 = vpop.permute.xlu1 %3087 }
 0x839   :  { %v2816_v17 = vpop.f32.mrf.mxu3  ;;  %5983 = vrcp.f32 %v9110_v15  ;;  %v9144_v54 = vpop.eup %5977  ;;  %v2922_v46 = vand.u32 2147483647, %v8958_v20  ;;  %vm3279_vm6 = vweird.f32 %v8998_v30  ;;  %v3267_v21 = vsel %vm9158_vm5, %v9007_v39, %v3263_v8 }
 0x83a   :  { %v3196_v56 = vadd.f32 %v3175_v37, %v8919_v45  ;;  %v2817_v59 = vadd.f32 %v2816_v17, %v2722_v49  ;;  %v3276_v42 = vsub.f32 1.0, %v3275_v26  ;;  %v2925_v23 = vor.u32 1.1754944e-38, %v2924_v25 }
 0x83b   :  { %v3283_v34 = vand.u32 2147483647, %v8998_v30  ;;  %v2921_v39 = vsel %vm9169_vm7, %v9029_v7, %v2917_v13  ;;  %vm3280_vm8 = vweird.f32 %v9081_v24  ;;  %v3285_v25 = vand.u32 2147483648, %v8998_v30 }
 0x83c   :  { %v5980_v1 = vpop.eup %5979  ;;  %v5680_v47 = vmul.f32 -1.442695, %v3196_v56  ;;  %v2988_v33 = vmul.f32 %v9011_v58, %v2817_v59  ;;  %v3277_v50 = vmul.f32 %v9081_v24, %v3276_v42  ;;  %vm2923_vm9 = vcmp.eq.f32.partialorder %v2922_v46, 8.507059e+37  ;;  %v2727_v56 = vpop.permute.xlu2 %2726  ;;  %vm9204_vm10 = vmor %vm3279_vm6, %vm3280_vm8 }
 0x83d   :  { %v9175_v37 = vadd.f32 1.0, %v5980_v1  ;;  %v2929_v7 = vmul.f32 %v9096_v18, %v9000_v41  ;;  %v9195_v42 = vsel %vm9130_vm1, %v3271_v32, %v3267_v21  ;;  %v9197_v1 = vsel %vm2923_vm9, %v2925_v23, %v2921_v39 }
 0x83e   :  { %v5982_v61 = vpop.eup %5981  ;;  %5985 = vpow2.f32 %v5680_v47  ;;  %v2992_v20 = vadd.f32 %v2988_v33, %v8886_v4  ;;  %v3278_v8 = vadd.f32 %v9081_v24, %v3277_v50  ;;  %v2954_v4 = vand.u32 2147483648, %v9068_v9 }
 0x83f   :  { %v9181_v49 = vadd.f32 1.0, %v5982_v61  ;;  %v3177_v17 = vpop.f32.mrf.mxu0  ;;  %v9186_v26 = vpop.eup %5983  ;;  %5987 = vrcp.f32 %v9146_v29  ;;  %vm9208_vm11 = vcmp.eq.f32.partialorder %v3283_v34, 8.507059e+37  ;;  %v2952_v3 = vand.u32 2147483647, %v9068_v9 }
 0x840   :  { %v3178_v59 = vadd.f32 %v3177_v17, %v3083_v35  ;;  %v3282_v32 = vsel %vm9204_vm10, %v9081_v24, %v3278_v8  ;;  %v3286_v45 = vor.u32 1.1754944e-38, %v3285_v25  ;;  %v2959_v46 = vmul.f32 %v9186_v26, %v9110_v15 }
 0x841   :  { %5989 = vrcp.f32 %v9181_v49  ;;  %v2819_v13 = vpop.f32.mrf.mxu3  ;;  %vm2948_vm12 = vweird.f32 %v9068_v9  ;;  %v2982_v58 = vand.u32 2147483647, %v9181_v49  ;;  %v2955_v23 = vor.u32 1.1754944e-38, %v2954_v4 }
 0x842   :  { %5991 = vrcp.f32 %v9175_v37  ;;  %v2820_v47 = vadd.f32 %v2819_v13, %v2727_v56  ;;  %v2930_v50 = vsub.f32 1.0, %v2929_v7  ;;  %v3349_v61 = vmul.f32 %v9052_v11, %v3178_v59 }
 0x843   :  { %5993 = vtanh.f32 %v2992_v20  ;;  %v2960_v20 = vsub.f32 1.0, %v2959_v46  ;;  %v2944_v24 = vmul.f32 %v9144_v54, %v9068_v9  ;;  %v9231_v8 = vsel %vm9208_vm11, %v3286_v45, %v3282_v32 }
 0x844   :  { %v5986_v30 = vpop.eup %5985  ;;  %v2989_v21 = vmul.f32 %v9108_v6, %v2820_v47  ;;  %vm2964_vm13 = vweird.f32 %v9186_v26  ;;  %v2967_v6 = vand.u32 2147483647, %v9110_v15  ;;  %vm9235_vm14 = vcmp.eq.f32.partialorder %v2952_v3, 8.507059e+37  ;;  %v2732_v3 = vpop.permute.xlu1 %2731 }
 0x845   :  { %v9221_v34 = vadd.f32 1.0, %v5986_v30  ;;  %v9226_v39 = vpop.eup %5987  ;;  %v2961_v7 = vmul.f32 %v9186_v26, %v2960_v20  ;;  %v2945_v56 = vsub.f32 1.0, %v2944_v24  ;;  %vm2978_vm15 = vweird.f32 %v9181_v49 }
 0x846   :  { %v2993_v17 = vadd.f32 %v2989_v21, %v8895_v10  ;;  %v2969_v10 = vand.u32 2147483648, %v9110_v15  ;;  %v2984_v33 = vand.u32 2147483648, %v9181_v49  ;;  %vm2963_vm0 = vweird.f32 %v9110_v15 }
 0x847   :  { %v9239_v11 = vpop.eup %5989  ;;  %5995 = vrcp.f32 %v9221_v34  ;;  %v3180_v4 = vpop.f32.mrf.mxu0  ;;  %v2962_v45 = vadd.f32 %v9186_v26, %v2961_v7  ;;  %v2946_v46 = vmul.f32 %v9144_v54, %v2945_v56  ;;  %vm2949_vm1 = vweird.f32 %v9144_v54  ;;  %vm9259_vm2 = vmor %vm2963_vm0, %vm2964_vm13 }
 0x848   :  { %v9244_v59 = vpop.eup %5991  ;;  %v2974_v13 = vmul.f32 %v9239_v11, %v9181_v49  ;;  %v3181_v47 = vadd.f32 %v3180_v4, %v3088_v38  ;;  %v2931_v30 = vmul.f32 %v9096_v18, %v2930_v50  ;;  %5997 = vtanh.f32 %v2993_v17  ;;  %vm9280_vm6 = vmor %vm2948_vm12, %vm2949_vm1 }
 0x849   :  { %v9251_v35 = vpop.eup %5993  ;;  %v2822_v32 = vpop.f32.mrf.mxu3  ;;  %vm9263_vm3 = vcmp.eq.f32.partialorder %v2967_v6, 8.507059e+37  ;;  %v2966_v4 = vsel %vm9259_vm2, %v9186_v26, %v2962_v45  ;;  %v2970_v50 = vor.u32 1.1754944e-38, %v2969_v10  ;;  %v2947_v17 = vadd.f32 %v9144_v54, %v2946_v46 }
 0x84a   :  { %v2975_v21 = vsub.f32 1.0, %v2974_v13  ;;  %v2823_v38 = vadd.f32 %v2822_v32, %v2732_v3  ;;  %v3350_v24 = vmul.f32 %v9114_v27, %v3181_v47  ;;  %vm9274_vm5 = vcmp.eq.f32.partialorder %v2982_v58, 8.507059e+37 }
 0x84b   :  { %v2932_v27 = vadd.f32 %v9096_v18, %v2931_v30  ;;  %vm2934_vm7 = vweird.f32 %v9096_v18  ;;  %vm2979_vm8 = vweird.f32 %v9239_v11  ;;  %vm2933_vm9 = vweird.f32 %v9000_v41 }
 0x84c   :  { %v2990_v7 = vmul.f32 %v9150_v55, %v2823_v38  ;;  %v2976_v56 = vmul.f32 %v9239_v11, %v2975_v21  ;;  %v2951_v55 = vsel %vm9280_vm6, %v9144_v54, %v2947_v17  ;;  %v2937_v9 = vand.u32 2147483647, %v9000_v41  ;;  %vm9306_vm10 = vmor %vm2933_vm9, %vm2934_vm7 }
 0x84d   :  { %v9286_v26 = vpop.eup %5995  ;;  %v2971_v3 = vsel %vm9263_vm3, %v2970_v50, %v2966_v4  ;;  %v9301_v32 = vadd.f32 %v3349_v61, %v8923_v22  ;;  %v3354_v45 = vadd.f32 %v3350_v24, %v8929_v36  ;;  %v2956_v46 = vsel %vm9235_vm14, %v2955_v23, %v2951_v55  ;;  %vm9319_vm11 = vmor %vm2978_vm15, %vm2979_vm8 }
 0x84e   :  { %v3335_v58 = vmul.f32 %v9286_v26, %v9221_v34  ;;  %v2994_v10 = vadd.f32 %v2990_v7, %v8899_v14  ;;  %v2977_v47 = vadd.f32 %v9239_v11, %v2976_v56  ;;  %v2939_v14 = vand.u32 2147483648, %v9000_v41  ;;  %v5998_v21 = vpop.eup %5997 }
 0x84f   :  { %v3183_v54 = vpop.f32.mrf.mxu0  ;;  %v2936_v22 = vsel %vm9306_vm10, %v9096_v18, %v2932_v27  ;;  %v2985_v61 = vor.u32 1.1754944e-38, %v2984_v33  ;;  %v3002_v41 = vsub.f32 1.0, %v2971_v3  ;;  %v3001_v25 = vsub.f32 1.0, %v2956_v46 }
 0x850   :  { %v3336_v38 = vsub.f32 1.0, %v3335_v58  ;;  %5999 = vtanh.f32 %v2994_v10  ;;  %v3184_v20 = vadd.f32 %v3183_v54, %v8968_v12  ;;  %v2940_v15 = vor.u32 1.1754944e-38, %v2939_v14 }
 0x851   :  { %v2825_v36 = vpop.f32.mrf.mxu3  ;;  %v2981_v18 = vsel %vm9319_vm11, %v9239_v11, %v2977_v47  ;;  %vm2938_vm12 = vcmp.eq.f32.partialorder %v2937_v9, 8.507059e+37  ;;  %v3005_v4 = vmul.f32 %v5998_v21, %v3001_v25  ;;  %v3009_v49 = vmul.f32 %v2956_v46, %v8669_v5  ;;  %v11275_v5 = vld [vmem:[#allocation59_spill] sm:$0xff] }
 0x852   :  { %v3351_v24 = vmul.f32 %v9195_v42, %v3184_v20  ;;  %v2826_v12 = vadd.f32 %v2825_v36, %v9046_v63  ;;  %v2941_v50 = vsel %vm2938_vm12, %v2940_v15, %v2936_v22  ;;  %v3337_v17 = vmul.f32 %v9286_v26, %v3336_v38  ;;  %v6182_v36 = vld [vmem:[%s10876_s20 + $0x8] sm:$0xff] }
 0x853   :  { %6001 = vtanh.f32 %v3354_v45  ;;  %v3010_v7 = vmul.f32 %v2971_v3, %v8651_v16  ;;  %v3000_v56 = vsub.f32 1.0, %v2941_v50  ;;  %v2986_v63 = vsel %vm9274_vm5, %v2985_v61, %v2981_v18  ;;  %v11276_v16 = vld [vmem:[#allocation63_spill] sm:$0xff] }
 0x854   :  { %v2991_v33 = vmul.f32 %v9197_v1, %v2826_v12  ;;  %v3355_v42 = vadd.f32 %v3351_v24, %v8937_v28  ;;  %v9335_v6 = vadd.f32 %v3009_v49, %v3005_v4  ;;  %vm3339_vm13 = vweird.f32 %v9221_v34 }
 0x855   :  { %v3004_v55 = vmul.f32 %v9251_v35, %v3000_v56  ;;  %v3008_v9 = vmul.f32 %v2941_v50, %v8687_v44  ;;  %v3320_v1 = vmul.f32 %v9244_v59, %v9175_v37  ;;  %v3338_v28 = vadd.f32 %v9286_v26, %v3337_v17  ;;  %v11274_v44 = vld [vmem:[#allocation60_spill] sm:$0xff] }
 0x856   :  { %v6000_v11 = vpop.eup %5999  ;;  %v2995_v27 = vadd.f32 %v2991_v33, %v8903_v40  ;;  %vm3340_vm14 = vweird.f32 %v9286_v26  ;;  %v3343_v13 = vand.u32 2147483647, %v9221_v34  ;;  %v3003_v35 = vsub.f32 1.0, %v2986_v63 }
 0x857   :  { %v3186_v58 = vpop.f32.mrf.mxu0  ;;  %v3006_v10 = vmul.f32 %v6000_v11, %v3002_v41  ;;  %v9347_v3 = vadd.f32 %v3008_v9, %v3004_v55  ;;  %v3321_v40 = vsub.f32 1.0, %v3320_v1  ;;  %v3011_v45 = vmul.f32 %v2986_v63, %v8623_v52  ;;  %vm9358_vm15 = vmor %vm3339_vm13, %vm3340_vm14 }
 0x858   :  { %6003 = vtanh.f32 %v2995_v27  ;;  %v3187_v47 = vadd.f32 %v3186_v58, %v9031_v48  ;;  %v3345_v46 = vand.u32 2147483648, %v9221_v34  ;;  %vm3325_vm0 = vweird.f32 %v9244_v59 }
 0x859   :  { %v9350_v54 = vadd.f32 %v3010_v7, %v3006_v10  ;;  %v9353_v30 = vpop.eup %6001  ;;  %6005 = vtanh.f32 %v3355_v42  ;;  %v3322_v48 = vmul.f32 %v9244_v59, %v3321_v40  ;;  %v3342_v38 = vsel %vm9358_vm15, %v9286_v26, %v3338_v28  ;;  %v6185_v26 = vld [vmem:[%s10874_s18 + $0x18] sm:$0xff] }
 0x85a   :  { %v3352_v14 = vmul.f32 %v9231_v8, %v3187_v47  ;;  %v3328_v20 = vand.u32 2147483647, %v9175_v37  ;;  %v3330_v22 = vand.u32 2147483648, %v9175_v37  ;;  %v3305_v8 = vmul.f32 %v9226_v39, %v9146_v29 }
 0x85b   :  { %vm9372_vm1 = vcmp.eq.f32.partialorder %v3343_v13, 8.507059e+37  ;;  %v3323_v23 = vadd.f32 %v9244_v59, %v3322_v48  ;;  %vm3324_vm2 = vweird.f32 %v9175_v37  ;;  %v3346_v61 = vor.u32 1.1754944e-38, %v3345_v46 }
 0x85c   :  { %v3356_v34 = vadd.f32 %v3352_v14, %v8941_v53  ;;  %vm9378_vm3 = vmor %vm3324_vm2, %vm3325_vm0  ;;  %v3306_v41 = vsub.f32 1.0, %v3305_v8  ;;  %vm3310_vm5 = vweird.f32 %v9226_v39  ;;  %v3315_v25 = vand.u32 2147483648, %v9146_v29  ;;  %v6180_v8 = vld [vmem:[%s10876_s20] sm:$0xff] }
 0x85d   :  { %v3327_v53 = vsel %vm9378_vm3, %v9244_v59, %v3323_v23  ;;  %v3331_v24 = vor.u32 1.1754944e-38, %v3330_v22  ;;  %v3290_v37 = vmul.f32 %v9134_v19, %v9048_v51  ;;  %vm3329_vm6 = vcmp.eq.f32.partialorder %v3328_v20, 8.507059e+37  ;;  %v6183_v23 = vld [vmem:[%s10874_s18 + $0x10] sm:$0xff] }
 0x85e   :  { %v6004_v15 = vpop.eup %6003  ;;  %6007 = vtanh.f32 %v3356_v34  ;;  %v3307_v18 = vmul.f32 %v9226_v39, %v3306_v41  ;;  %v3313_v4 = vand.u32 2147483647, %v9146_v29  ;;  %v3347_v50 = vsel %vm9372_vm1, %v3346_v61, %v3342_v38  ;;  %v6181_v34 = vld [vmem:[%s10874_s18 + $0x8] sm:$0xff]  ;;  %v6184_v61 = vld [vmem:[%s10876_s20 + $0x10] sm:$0xff]  ;;  %v6186_v41 = vld [vmem:[%s10876_s20 + $0x18] sm:$0xff] }
 0x85f   :  { %v3007_v12 = vmul.f32 %v6004_v15, %v3003_v35  ;;  %v6006_v49 = vpop.eup %6005  ;;  %6009 = vtanh.f32 %v9301_v32  ;;  %v3332_v17 = vsel %vm3329_vm6, %v3331_v24, %v3327_v53  ;;  %v3291_v33 = vsub.f32 1.0, %v3290_v37  ;;  %v6188_v15 = vld [vmem:[%s10876_s20 + $0x20] sm:$0xff]  ;;  %v6189_v53 = vld [vmem:[%s10874_s18 + $0x28] sm:$0xff]  ;;  %v6191_v37 = vld [vmem:[%s10874_s18 + $0x30] sm:$0xff] }
 0x860   :  { %v3308_v59 = vadd.f32 %v9226_v39, %v3307_v18  ;;  %vm3309_vm7 = vweird.f32 %v9146_v29  ;;  %v3316_v56 = vor.u32 1.1754944e-38, %v3315_v25  ;;  %vm3295_vm9 = vweird.f32 %v9134_v19  ;;  %v6187_v25 = vld [vmem:[%s10874_s18 + $0x20] sm:$0xff]  ;;  %v6190_v24 = vld [vmem:[%s10876_s20 + $0x28] sm:$0xff]  ;;  %v6193_v18 = vld [vmem:[%s10874_s18 + $0x38] sm:$0xff] }
 0x861   :  { %v9394_v7 = vadd.f32 %v3011_v45, %v3007_v12  ;;  %vm3311_vm8 = vmor %vm3309_vm7, %vm3310_vm5  ;;  %v3292_v42 = vmul.f32 %v9134_v19, %v3291_v33  ;;  %v3298_v32 = vand.u32 2147483647, %v9048_v51  ;;  %v3300_v63 = vand.u32 2147483648, %v9048_v51  ;;  %v6192_v12 = vld [vmem:[%s10876_s20 + $0x30] sm:$0xff]  ;;  %v3755_v33 = vld [vmem:[%s10876_s20 + $0x48] sm:$0xff] }
 0x862   :  { %v3364_v11 = vsub.f32 1.0, %v3347_v50  ;;  %v3363_v27 = vsub.f32 1.0, %v3332_v17  ;;  %v3312_v55 = vsel %vm3311_vm8, %v9226_v39, %v3308_v59  ;;  %vm3314_vm10 = vcmp.eq.f32.partialorder %v3313_v4, 8.507059e+37  ;;  %v3393_v4 = vld [vmem:[%s10874_s18 + $0x40] sm:$0xff]  ;;  %v3395_v59 = vld [vmem:[%s10874_s18 + $0x50] sm:$0xff] }
 0x863   :  { %3517 = vmatpush.msra.mxu1 %v9394_v7  ;;  %v3372_v9 = vmul.f32 %v3347_v50, %v8700_v60  ;;  %v3317_v1 = vsel %vm3314_vm10, %v3316_v56, %v3312_v55  ;;  %v3293_v58 = vadd.f32 %v9134_v19, %v3292_v42  ;;  %vm3294_vm11 = vweird.f32 %v9048_v51  ;;  %v9419_v51 = vld [vmem:[%s10874_s18] sm:$0xff]  ;;  %v3756_v56 = vld [vmem:[%s10876_s20 + $0x50] sm:$0xff]  ;;  %v3396_v42 = vld [vmem:[%s10874_s18 + $0x58] sm:$0xff] }
 0x864   :  { %v6008_v29 = vpop.eup %6007  ;;  %v3367_v28 = vmul.f32 %v6006_v49, %v3363_v27  ;;  %v3362_v13 = vsub.f32 1.0, %v3317_v1  ;;  %vm3296_vm12 = vmor %vm3294_vm11, %vm3295_vm9  ;;  %v3301_v47 = vor.u32 1.1754944e-38, %v3300_v63  ;;  %vm3299_vm13 = vcmp.eq.f32.partialorder %v3298_v32, 8.507059e+37  ;;  %11240 = vst [vmem:[#allocation15_spill] sm:$0xff] %v9419_v51  ;;  %v6194_v49 = vld [vmem:[%s10876_s20 + $0x38] sm:$0xff]  ;;  %v3754_v50 = vld [vmem:[%s10876_s20 + $0x40] sm:$0xff]  ;;  %v9530_v63 = vpop.permute.xlu1 %3787 }
 0x865   :  { %3518 = vmatpush.msra.mxu1 %v9350_v54  ;;  %v3368_v10 = vmul.f32 %v6008_v29, %v3364_v11  ;;  %v6010_v40 = vpop.eup %6009  ;;  %v3297_v39 = vsel %vm3296_vm12, %v9134_v19, %v3293_v58  ;;  %v3371_v45 = vmul.f32 %v3332_v17, %v8704_v31  ;;  %v3370_v48 = vmul.f32 %v3317_v1, %v8711_v0  ;;  %v3394_v17 = vld [vmem:[%s10874_s18 + $0x48] sm:$0xff]  ;;  %v3757_v32 = vld [vmem:[%s10876_s20 + $0x58] sm:$0xff]  ;;  %v3778_v27 = vpop.permute.xlu0 %3777 }
 0x866   :  { %v3366_v46 = vmul.f32 %v9353_v30, %v3362_v13  ;;  %v3302_v14 = vsel %vm3299_vm13, %v3301_v47, %v3297_v39  ;;  %v3783_v29 = vpop.permute.xlu2 %3782  ;;  %v11244_v13 = vld [vmem:[#allocation84_spill] sm:$0xff]  ;;  %v9603_v52 = vadd.f32 %v11276_v16, %v11275_v5 }
 0x867   :  { %3519 = vmatpush.msra.mxu1 %v9335_v6  ;;  %v9414_v35 = vadd.f32 %v3372_v9, %v3368_v10  ;;  %v3361_v21 = vsub.f32 1.0, %v3302_v14  ;;  %v9425_v19 = vadd.f32 %v3371_v45, %v3367_v28  ;;  %v3369_v30 = vmul.f32 %v3302_v14, %v8716_v43  ;;  %v11282_v16 = vld [vmem:[#allocation72_spill] sm:$0xff] }
 0x868   :  { %v9431_v20 = vadd.f32 %v3370_v48, %v3366_v46  ;;  %v1765_v47 = vadd.f32 %v11244_v13, %v11161_v57 }
 0x869   :  { %3520 = vmatpush.msra.mxu1 %v9347_v3  ;;  %3878 = vmatpush.msrb.mxu2 %v9414_v35  ;;  %11241 = vst [vmem:[#allocation16_spill] sm:$0xff] %v9425_v19  ;;  %v3365_v38 = vmul.f32 %v6010_v40, %v3361_v21 }
 0x86a   :  { %5681 = vmatmul.msk.f32.vlgmr.msra.gmra.mxu1 %vm523_vm4, %v9419_v51  ;;  %11242 = vst [vmem:[#allocation18_spill] sm:$0xff] %v9431_v20 }
 0x86b   :  { %3879 = vmatpush.msrb.mxu2 %v9425_v19  ;;  %v9435_v22 = vadd.f32 %v3369_v30, %v3365_v38  ;;  %v11245_v30 = vld [vmem:[#allocation87_spill] sm:$0xff] }
 0x86c   :  { %v3427_v11 = vpop.permute.xlu1 %3426 }
 0x86d   :  { %3880 = vmatpush.msrb.mxu2 %v9431_v20  ;;  %11243 = vst [vmem:[#allocation20_spill] sm:$0xff] %v9435_v22  ;;  %v3422_v1 = vpop.permute.xlu0 %3421 }
 0x86e   :  { %v3773_v10 = vpop.permute.xlu2 %3772 }
 0x86f   :  { %3881 = vmatpush.msrb.mxu2 %v9435_v22 }
 0x870   :  { %5701 = vmatmul.msk.f32.vlgmr.msrb.gmra.mxu2 %vm523_vm4, %v6180_v8  ;;  %v1768_v8 = vadd.f32 %v11245_v30, %v11164_v2 }
 0x872   :  { %5682 = vmatmul.msk.f32.gmra.mxu1 %vm523_vm4, %v6181_v34 }
 0x874   :  { %v9532_v55 = vpop.permute.xlu1 %3807 }
 0x875   :  { %v9536_v14 = vpop.permute.xlu0 %3802 }
 0x876   :  { %v3417_v21 = vpop.permute.xlu2 %3416 }
 0x878   :  { %5702 = vmatmul.msk.f32.gmra.mxu2 %vm523_vm4, %v6182_v36 }
 0x87a   :  { %5683 = vmatmul.msk.f32.gmra.mxu1 %vm523_vm4, %v6183_v23 }
 0x87c   :  { %v3412_v58 = vpop.permute.xlu1 %3411 }
 0x880   :  { %5703 = vmatmul.msk.f32.gmra.mxu2 %vm523_vm4, %v6184_v61 }
 0x882   :  { %5684 = vmatmul.msk.f32.gmra.mxu1 %vm523_vm4, %v6185_v26  ;;  %v11246_v26 = vld [vmem:[#allocation43_spill] sm:$0xff] }
 0x888   :  { %5704 = vmatmul.msk.f32.gmra.mxu2 %vm523_vm4, %v6186_v41  ;;  %v1712_v41 = vadd.f32 %v11246_v26, %v11163_v62 }
 0x88a   :  { %5685 = vmatmul.msk.f32.gmra.mxu1 %vm523_vm4, %v6187_v25 }
 0x890   :  { %5705 = vmatmul.msk.f32.gmra.mxu2 %vm523_vm4, %v6188_v15  ;;  %v9542_v15 = vpop.permute.xlu1 %3792 }
 0x892   :  { %5686 = vmatmul.msk.f32.gmra.mxu1 %vm523_vm4, %v6189_v53  ;;  %v11247_v53 = vld [vmem:[#allocation46_spill] sm:$0xff] }
 0x898   :  { %5706 = vmatmul.msk.f32.gmra.mxu2 %vm523_vm4, %v6190_v24  ;;  %v11248_v24 = vld [vmem:[#allocation89_spill] sm:$0xff]  ;;  %v3432_v30 = vpop.permute.xlu1 %3431 }
 0x89a   :  { %5687 = vmatmul.msk.f32.gmra.mxu1 %vm523_vm4, %v6191_v37  ;;  %v1771_v37 = vadd.f32 %v11248_v24, %v11247_v53 }
 0x8a0   :  { %5707 = vmatmul.msk.f32.gmra.mxu2 %vm523_vm4, %v6192_v12 }
 0x8a2   :  { %5688 = vmatmul.msk.f32.gmra.mxu1 %vm523_vm4, %v6193_v18  ;;  %v11249_v18 = vld [vmem:[#allocation36_spill] sm:$0xff] }
 0x8a8   :  { %5708 = vmatmul.msk.f32.gmra.mxu2 %vm523_vm4, %v6194_v49 }
 0x8aa   :  { %5689 = vmatmul.msk.f32.gmra.mxu1 %vm523_vm4, %v3393_v4  ;;  %v11250_v4 = vld [vmem:[#allocation47_spill] sm:$0xff] }
 0x8ab   :  { %v1715_v49 = vadd.f32 %v11250_v4, %v11249_v18  ;;  %v11257_v4 = vld [vmem:[#allocation30_spill] sm:$0xff] }
 0x8b0   :  { %5709 = vmatmul.msk.f32.gmra.mxu2 %vm523_vm4, %v3754_v50 }
 0x8b2   :  { %5690 = vmatmul.msk.f32.gmra.mxu1 %vm523_vm4, %v3394_v17  ;;  %v9548_v17 = vpop.permute.xlu0 %3446 }
 0x8b8   :  { %5710 = vmatmul.msk.f32.gmra.mxu2 %vm523_vm4, %v3755_v33 }
 0x8ba   :  { %5691 = vmatmul.msk.f32.gmra.mxu1 %vm523_vm4, %v3395_v59 }
 0x8c0   :  { %5711 = vmatmul.msk.f32.gmra.mxu2 %vm523_vm4, %v3756_v56 }
 0x8c2   :  { %5692 = vmatmul.msk.f32.gmra.mxu1 %vm523_vm4, %v3396_v42  ;;  %v11251_v42 = vld [vmem:[#allocation38_spill] sm:$0xff] }
 0x8c8   :  { %5712 = vmatmul.msk.f32.gmra.mxu2 %vm523_vm4, %v3757_v32  ;;  %v11252_v32 = vld [vmem:[#allocation93_spill] sm:$0xff] }
 0x8e7   :  { %v3522_v9 = vpop.f32.mrf.mxu1 }
 0x8e8   :  { %v3523_v28 = vadd.f32 %v3522_v9, %v3412_v58  ;;  %v1774_v9 = vadd.f32 %v11252_v32, %v11251_v42 }
 0x8ea   :  { %v3558_v39 = vadd.f32 %v3523_v28, %v1765_v47 }
 0x8ec   :  { %v5693_v46 = vmul.f32 -1.442695, %v3558_v39 }
 0x8ee   :  { %6011 = vpow2.f32 %v5693_v46  ;;  %v11254_v46 = vld [vmem:[#allocation51_spill] sm:$0xff] }
 0x8ef   :  { %v3525_v40 = vpop.f32.mrf.mxu1 }
 0x8f0   :  { %v3526_v48 = vadd.f32 %v3525_v40, %v3417_v21 }
 0x8f2   :  { %v3559_v36 = vadd.f32 %v3526_v48, %v1768_v8  ;;  %v9557_v48 = vpop.permute.xlu2 %3797 }
 0x8f3   :  { %v3883_v45 = vpop.f32.mrf.mxu2 }
 0x8f4   :  { %v3884_v34 = vadd.f32 %v3883_v45, %v3773_v10  ;;  %v6012_v12 = vpop.eup %6011  ;;  %v5694_v33 = vmul.f32 -1.442695, %v3559_v36  ;;  %v11253_v45 = vld [vmem:[#allocation31_spill] sm:$0xff]  ;;  %v11256_v36 = vld [vmem:[#allocation94_spill] sm:$0xff] }
 0x8f5   :  { %v9552_v58 = vadd.f32 1.0, %v6012_v12  ;;  %v1718_v21 = vadd.f32 %v11254_v46, %v11253_v45 }
 0x8f6   :  { %v3919_v50 = vadd.f32 %v3884_v34, %v1712_v41  ;;  %6013 = vpow2.f32 %v5694_v33  ;;  %v11255_v34 = vld [vmem:[#allocation75_spill] sm:$0xff] }
 0x8f7   :  { %v3528_v38 = vpop.f32.mrf.mxu1  ;;  %6015 = vrcp.f32 %v9552_v58  ;;  %vm3603_vm15 = vweird.f32 %v9552_v58 }
 0x8f8   :  { %v3529_v23 = vadd.f32 %v3528_v38, %v3422_v1  ;;  %v5713_v10 = vmul.f32 -1.442695, %v3919_v50 }
 0x8fa   :  { %v3560_v59 = vadd.f32 %v3529_v23, %v1771_v37  ;;  %6017 = vpow2.f32 %v5713_v10  ;;  %v1777_v23 = vadd.f32 %v11256_v36, %v11255_v34  ;;  %v11261_v10 = vld [vmem:[#allocation68_spill] sm:$0xff] }
 0x8fb   :  { %v3886_v61 = vpop.f32.mrf.mxu2 }
 0x8fc   :  { %v3887_v25 = vadd.f32 %v3886_v61, %v3778_v27  ;;  %v5695_v13 = vmul.f32 -1.442695, %v3560_v59  ;;  %v6014_v26 = vpop.eup %6013 }
 0x8fd   :  { %v9565_v33 = vadd.f32 1.0, %v6014_v26 }
 0x8fe   :  { %v3920_v1 = vadd.f32 %v3887_v25, %v1715_v49  ;;  %6019 = vpow2.f32 %v5695_v13  ;;  %v9561_v25 = vpop.eup %6015  ;;  %v11258_v49 = vld [vmem:[#allocation55_spill] sm:$0xff] }
 0x8ff   :  { %v3531_v56 = vpop.f32.mrf.mxu1  ;;  %v1721_v50 = vadd.f32 %v11258_v49, %v11257_v4  ;;  %vm3604_vm14 = vweird.f32 %v9561_v25  ;;  %vm3618_vm2 = vweird.f32 %v9565_v33 }
 0x900   :  { %v3532_v27 = vadd.f32 %v3531_v56, %v3427_v11  ;;  %v5714_v40 = vmul.f32 -1.442695, %v3920_v1  ;;  %v6018_v12 = vpop.eup %6017  ;;  %v11260_v1 = vld [vmem:[#allocation95_spill] sm:$0xff]  ;;  %vm9667_vm1 = vmor %vm3603_vm15, %vm3604_vm14 }
 0x902   :  { %v3561_v28 = vadd.f32 %v3532_v27, %v1774_v9  ;;  %6021 = vpow2.f32 %v5714_v40  ;;  %v11259_v9 = vld [vmem:[#allocation73_spill] sm:$0xff] }
 0x903   :  { %v3889_v47 = vpop.f32.mrf.mxu2  ;;  %v1780_v27 = vadd.f32 %v11260_v1, %v11259_v9  ;;  %v11264_v40 = vld [vmem:[#allocation53_spill] sm:$0xff]  ;;  %v9594_v1 = vadd.f32 1.0, %v6018_v12  ;;  %v11277_v12 = vld [vmem:[#allocation56_spill] sm:$0xff] }
 0x904   :  { %v3890_v39 = vadd.f32 %v3889_v47, %v3783_v29  ;;  %v5696_v38 = vmul.f32 -1.442695, %v3561_v28  ;;  %v3437_v29 = vpop.permute.xlu0 %3436  ;;  %v6020_v32 = vpop.eup %6019  ;;  %v11262_v28 = vld [vmem:[#allocation67_spill] sm:$0xff]  ;;  %v11263_v47 = vld [vmem:[#allocation65_spill] sm:$0xff] }
 0x905   :  { %v9572_v13 = vadd.f32 %v11262_v28, %v11261_v10  ;;  %vm3964_vm3 = vweird.f32 %v9594_v1 }
 0x906   :  { %v3921_v11 = vadd.f32 %v3890_v39, %v1718_v21  ;;  %6023 = vpow2.f32 %v5696_v38  ;;  %v9576_v39 = vadd.f32 %v11264_v40, %v11263_v47  ;;  %v11265_v21 = vld [vmem:[#allocation92_spill] sm:$0xff]  ;;  %v11284_v47 = vld [vmem:[#allocation77_spill] sm:$0xff] }
 0x907   :  { %v3534_v8 = vpop.f32.mrf.mxu1  ;;  %v11266_v38 = vld [vmem:[#allocation52_spill] sm:$0xff] }
 0x908   :  { %v3535_v61 = vadd.f32 %v3534_v8, %v3432_v30  ;;  %v5715_v24 = vmul.f32 -1.442695, %v3921_v11  ;;  %v6022_v46 = vpop.eup %6021  ;;  %v9580_v30 = vadd.f32 %v11266_v38, %v11265_v21  ;;  %v11267_v11 = vld [vmem:[#allocation91_spill] sm:$0xff]  ;;  %v9597_v38 = vadd.f32 1.0, %v6020_v32  ;;  %v11279_v32 = vld [vmem:[#allocation48_spill] sm:$0xff] }
 0x909   :  { %v11268_v8 = vld [vmem:[#allocation11_spill] sm:$0xff] }
 0x90a   :  { %v3562_v41 = vadd.f32 %v3535_v61, %v1777_v23  ;;  %v11269_v23 = vld [vmem:[#allocation90_spill] sm:$0xff]  ;;  %vm3633_vm9 = vweird.f32 %v9597_v38 }
 0x90b   :  { %v3892_v37 = vpop.f32.mrf.mxu2  ;;  %v11270_v61 = vld [vmem:[#allocation10_spill] sm:$0xff] }
 0x90c   :  { %v5697_v59 = vmul.f32 -1.442695, %v3562_v41  ;;  %v3893_v56 = vadd.f32 %v3892_v37, %v9530_v63  ;;  %v9584_v63 = vadd.f32 %v11268_v8, %v11267_v11  ;;  %v9588_v26 = vadd.f32 %v11270_v61, %v11269_v23  ;;  %v11271_v41 = vld [vmem:[#allocation88_spill] sm:$0xff]  ;;  %v6024_v40 = vpop.eup %6023 }
 0x90d   :  { %v11272_v37 = vld [vmem:[#allocation96_spill] sm:$0xff] }
 0x90e   :  { %6025 = vpow2.f32 %v5697_v59  ;;  %v3922_v36 = vadd.f32 %v3893_v56, %v1721_v50  ;;  %v9592_v49 = vadd.f32 %v11272_v37, %v11271_v41  ;;  %v3442_v50 = vpop.permute.xlu2 %3441  ;;  %v11273_v56 = vld [vmem:[#allocation62_spill] sm:$0xff]  ;;  %v9605_v37 = vadd.f32 1.0, %v6022_v46 }
 0x90f   :  { %6027 = vpow2.f32 %v5715_v24  ;;  %v3537_v28 = vpop.f32.mrf.mxu1  ;;  %v1724_v61 = vadd.f32 %v11274_v44, %v11273_v56  ;;  %v3599_v24 = vmul.f32 %v9561_v25, %v9552_v58  ;;  %v11278_v41 = vld [vmem:[#allocation66_spill] sm:$0xff]  ;;  %v9617_v44 = vpop.permute.xlu0 %3822  ;;  %v9624_v46 = vadd.f32 1.0, %v6024_v40 }
 0x910   :  { %6029 = vrcp.f32 %v9565_v33  ;;  %v5716_v8 = vmul.f32 -1.442695, %v3922_v36  ;;  %v3538_v59 = vadd.f32 %v3537_v28, %v3437_v29  ;;  %v9611_v23 = vadd.f32 %v11278_v41, %v11277_v12  ;;  %v11280_v36 = vld [vmem:[#allocation70_spill] sm:$0xff]  ;;  %v11283_v12 = vld [vmem:[#allocation85_spill] sm:$0xff] }
 0x911   :  { %v9615_v29 = vadd.f32 %v11280_v36, %v11279_v32  ;;  %v11281_v56 = vld [vmem:[#allocation86_spill] sm:$0xff]  ;;  %v3600_v21 = vsub.f32 1.0, %v3599_v24  ;;  %v9628_v10 = vadd.f32 %v11284_v47, %v11283_v12  ;;  %v11286_v32 = vld [vmem:[#allocation81_spill] sm:$0xff]  ;;  %vm3979_vm12 = vweird.f32 %v9605_v37 }
 0x912   :  { %6031 = vpow2.f32 %v5716_v8  ;;  %v3563_v28 = vadd.f32 %v3538_v59, %v1780_v27  ;;  %v9621_v5 = vadd.f32 %v11282_v16, %v11281_v56  ;;  %v3607_v16 = vand.u32 2147483647, %v9552_v58  ;;  %v11285_v56 = vld [vmem:[#allocation80_spill] sm:$0xff] }
 0x913   :  { %6033 = vrcp.f32 %v9594_v1  ;;  %v3895_v11 = vpop.f32.mrf.mxu2  ;;  %v3601_v40 = vmul.f32 %v9561_v25, %v3600_v21  ;;  %v9641_v47 = vadd.f32 %v11286_v32, %v11285_v56 }
 0x914   :  { %v6026_v41 = vpop.eup %6025  ;;  %6035 = vrcp.f32 %v9597_v38  ;;  %v5698_v27 = vmul.f32 -1.442695, %v3563_v28  ;;  %v3896_v8 = vadd.f32 %v3895_v11, %v9542_v15  ;;  %v3609_v28 = vand.u32 2147483648, %v9552_v58  ;;  %v11287_v15 = vld [vmem:[#allocation79_spill] sm:$0xff] }
 0x915   :  { %v6028_v59 = vpop.eup %6027  ;;  %6037 = vrcp.f32 %v9605_v37  ;;  %v9633_v36 = vadd.f32 1.0, %v6026_v41  ;;  %v11288_v11 = vld [vmem:[#allocation83_spill] sm:$0xff]  ;;  %v3602_v21 = vadd.f32 %v9561_v25, %v3601_v40  ;;  %vm9658_vm0 = vcmp.eq.f32.partialorder %v3607_v16, 8.507059e+37 }
 0x916   :  { %v9637_v24 = vpop.eup %6029  ;;  %6039 = vpow2.f32 %v5698_v27  ;;  %v3923_v12 = vadd.f32 %v3896_v8, %v1724_v61  ;;  %v9646_v9 = vadd.f32 %v11288_v11, %v11287_v15  ;;  %v9651_v4 = vadd.f32 1.0, %v6028_v59  ;;  %v9674_v16 = vpop.permute.xlu2 %3827 }
 0x917   :  { %6041 = vrcp.f32 %v9624_v46  ;;  %v3540_v41 = vpop.f32.mrf.mxu1  ;;  %v3624_v61 = vand.u32 2147483648, %v9565_v33  ;;  %v3614_v40 = vmul.f32 %v9637_v24, %v9565_v33  ;;  %v3610_v59 = vor.u32 1.1754944e-38, %v3609_v28  ;;  %v9689_v2 = vpop.permute.xlu0 %3812 }
 0x918   :  { %v6032_v34 = vpop.eup %6031  ;;  %v5717_v32 = vmul.f32 -1.442695, %v3923_v12  ;;  %v3541_v56 = vadd.f32 %v3540_v41, %v3442_v50  ;;  %6043 = vrcp.f32 %v9633_v36  ;;  %v3622_v41 = vand.u32 2147483647, %v9565_v33 }
 0x919   :  { %v9654_v27 = vpop.eup %6033  ;;  %v9676_v15 = vadd.f32 1.0, %v6032_v34  ;;  %v3615_v45 = vsub.f32 1.0, %v3614_v40  ;;  %v9685_v18 = vor.u32 1.1754944e-38, %v3624_v61  ;;  %v3968_v40 = vand.u32 2147483647, %v9594_v1 }
 0x91a   :  { %v9664_v11 = vpop.eup %6035  ;;  %6045 = vpow2.f32 %v5717_v32  ;;  %v3564_v50 = vadd.f32 %v3541_v56, %v9572_v13  ;;  %v3606_v32 = vsel %vm9667_vm1, %v9561_v25, %v3602_v21  ;;  %v3970_v13 = vand.u32 2147483648, %v9594_v1 }
 0x91b   :  { %v9672_v58 = vpop.eup %6037  ;;  %v3898_v42 = vpop.f32.mrf.mxu2  ;;  %6047 = vrcp.f32 %v9651_v4  ;;  %v3616_v25 = vmul.f32 %v9637_v24, %v3615_v45  ;;  %v3960_v21 = vmul.f32 %v9654_v27, %v9594_v1  ;;  %vm3619_vm5 = vweird.f32 %v9637_v24 }
 0x91c   :  { %v6040_v56 = vpop.eup %6039  ;;  %v5699_v28 = vmul.f32 -1.442695, %v3564_v50  ;;  %v3899_v53 = vadd.f32 %v3898_v42, %v9557_v48  ;;  %v9701_v48 = vsel %vm9658_vm0, %v3610_v59, %v3606_v32  ;;  %vm9707_vm6 = vcmp.eq.f32.partialorder %v3622_v41, 8.507059e+37  ;;  %vm9740_vm10 = vmor %vm3618_vm2, %vm3619_vm5 }
 0x91d   :  { %v9687_v34 = vpop.eup %6041  ;;  %v9691_v62 = vadd.f32 1.0, %v6040_v56  ;;  %v3961_v12 = vsub.f32 1.0, %v3960_v21  ;;  %v3971_v56 = vor.u32 1.1754944e-38, %v3970_v13  ;;  %v3637_v59 = vand.u32 2147483647, %v9597_v38 }
 0x91e   :  { %6049 = vpow2.f32 %v5699_v28  ;;  %v3924_v42 = vadd.f32 %v3899_v53, %v9603_v52  ;;  %v9704_v61 = vpop.eup %6043  ;;  %v3639_v28 = vand.u32 2147483648, %v9597_v38  ;;  %v3617_v57 = vadd.f32 %v9637_v24, %v3616_v25 }
 0x91f   :  { %6051 = vrcp.f32 %v9676_v15  ;;  %v3543_v45 = vpop.f32.mrf.mxu1  ;;  %v3962_v41 = vmul.f32 %v9654_v27, %v3961_v12  ;;  %vm9719_vm7 = vcmp.eq.f32.partialorder %v3968_v40, 8.507059e+37  ;;  %v3629_v13 = vmul.f32 %v9664_v11, %v9597_v38 }
 0x920   :  { %v6046_v52 = vpop.eup %6045  ;;  %6053 = vrcp.f32 %v9691_v62  ;;  %v5718_v53 = vmul.f32 -1.442695, %v3924_v42  ;;  %v3544_v8 = vadd.f32 %v3543_v45, %v9548_v17  ;;  %vm3965_vm8 = vweird.f32 %v9654_v27 }
 0x921   :  { %v9715_v32 = vadd.f32 1.0, %v6046_v52  ;;  %v9725_v21 = vpop.eup %6047  ;;  %v9732_v25 = vmul.f32 %v9704_v61, %v9633_v36  ;;  %v3963_v42 = vadd.f32 %v9654_v27, %v3962_v41  ;;  %v3630_v45 = vsub.f32 1.0, %v3629_v13  ;;  %vm9770_vm13 = vmor %vm3964_vm3, %vm3965_vm8 }
 0x922   :  { %6055 = vpow2.f32 %v5718_v53  ;;  %v3565_v17 = vadd.f32 %v3544_v8, %v9576_v39  ;;  %v3640_v12 = vor.u32 1.1754944e-38, %v3639_v28  ;;  %v3975_v53 = vmul.f32 %v9672_v58, %v9605_v37  ;;  %v9749_v28 = vpop.permute.xlu2 %3466 }
 0x923   :  { %v3901_v40 = vpop.f32.mrf.mxu2  ;;  %v3983_v8 = vand.u32 2147483647, %v9605_v37  ;;  %6057 = vrcp.f32 %v9715_v32  ;;  %v3621_v33 = vsel %vm9740_vm10, %v9637_v24, %v3617_v57  ;;  %v3631_v13 = vmul.f32 %v9664_v11, %v3630_v45  ;;  %v3452_v24 = vpop.permute.xlu0 %3451 }
 0x924   :  { %v6050_v52 = vpop.eup %6049  ;;  %v5700_v0 = vmul.f32 -1.442695, %v3565_v17  ;;  %v3902_v31 = vadd.f32 %v3901_v40, %v9536_v14  ;;  %vm9758_vm11 = vcmp.eq.f32.partialorder %v3637_v59, 8.507059e+37  ;;  %vm3634_vm14 = vweird.f32 %v9664_v11 }
 0x925   :  { %v9747_v41 = vpop.eup %6051  ;;  %v9752_v14 = vadd.f32 1.0, %v6050_v52  ;;  %v3985_v57 = vand.u32 2147483648, %v9605_v37  ;;  %v3626_v22 = vsel %vm9707_vm6, %v9685_v18, %v3621_v33  ;;  %v3644_v20 = vmul.f32 %v9687_v34, %v9624_v46  ;;  %vm9803_vm0 = vmor %vm3633_vm9, %vm3634_vm14 }
 0x926   :  { %v9763_v40 = vpop.eup %6053  ;;  %6059 = vpow2.f32 %v5700_v0  ;;  %v3925_v60 = vadd.f32 %v3902_v31, %v9611_v23  ;;  %v3967_v31 = vsel %vm9770_vm13, %v9654_v27, %v3963_v42  ;;  %v3632_v0 = vadd.f32 %v9664_v11, %v3631_v13 }
 0x927   :  { %6061 = vrcp.f32 %v9752_v14  ;;  %v3546_v59 = vpop.f32.mrf.mxu1  ;;  %v3976_v23 = vsub.f32 1.0, %v3975_v53  ;;  %v9788_v19 = vmul.f32 %v9763_v40, %v9691_v62  ;;  %vm3980_vm15 = vweird.f32 %v9672_v58 }
 0x928   :  { %v6056_v1 = vpop.eup %6055  ;;  %v5719_v45 = vmul.f32 -1.442695, %v3925_v60  ;;  %v3547_v39 = vadd.f32 %v3546_v59, %v3452_v24  ;;  %v9797_v50 = vsel %vm9719_vm7, %v3971_v56, %v3967_v31  ;;  %v3986_v42 = vor.u32 1.1754944e-38, %v3985_v57  ;;  %v9825_v59 = vpop.permute.xlu1 %3817  ;;  %vm9843_vm5 = vmor %vm3979_vm12, %vm3980_vm15 }
 0x929   :  { %v9790_v51 = vadd.f32 1.0, %v6056_v1  ;;  %v3977_v27 = vmul.f32 %v9672_v58, %v3976_v23  ;;  %v9807_v53 = vpop.eup %6057  ;;  %vm9813_vm1 = vcmp.eq.f32.partialorder %v3983_v8, 8.507059e+37  ;;  %v3645_v13 = vsub.f32 1.0, %v3644_v20 }
 0x92a   :  { %6063 = vpow2.f32 %v5719_v45  ;;  %v3718_v60 = vmul.f32 %v9701_v48, %v3547_v39  ;;  %v3636_v48 = vsel %vm9803_vm0, %v9664_v11, %v3632_v0  ;;  %vm3648_vm2 = vweird.f32 %v9624_v46  ;;  %v3457_v45 = vpop.permute.xlu2 %3456 }
 0x92b   :  { %v3904_v33 = vpop.f32.mrf.mxu2  ;;  %v3978_v43 = vadd.f32 %v9672_v58, %v3977_v27  ;;  %6065 = vrcp.f32 %v9790_v51  ;;  %v3652_v57 = vand.u32 2147483647, %v9624_v46  ;;  %v3990_v24 = vmul.f32 %v9725_v21, %v9651_v4 }
 0x92c   :  { %v6060_v38 = vpop.eup %6059  ;;  %v3905_v52 = vadd.f32 %v3904_v33, %v9532_v55  ;;  %v3722_v20 = vadd.f32 %v3718_v60, %v9580_v30  ;;  %v3646_v31 = vmul.f32 %v9687_v34, %v3645_v13  ;;  %vm3649_vm3 = vweird.f32 %v9687_v34 }
 0x92d   :  { %v9823_v11 = vpop.eup %6061  ;;  %v9827_v8 = vadd.f32 1.0, %v6060_v38  ;;  %v9834_v55 = vmul.f32 %v9807_v53, %v9715_v32  ;;  %v3641_v23 = vsel %vm9758_vm11, %v3640_v12, %v3636_v48  ;;  %v3654_v30 = vand.u32 2147483648, %v9624_v46  ;;  %vm9867_vm7 = vmor %vm3648_vm2, %vm3649_vm3 }
 0x92e   :  { %v3926_v0 = vadd.f32 %v3905_v52, %v9615_v29  ;;  %v3982_v29 = vsel %vm9843_vm5, %v9672_v58, %v3978_v43  ;;  %v3647_v12 = vadd.f32 %v9687_v34, %v3646_v31  ;;  %v3991_v17 = vsub.f32 1.0, %v3990_v24 }
 0x92f   :  { %6067 = vrcp.f32 %v9827_v8  ;;  %v3549_v39 = vpop.f32.mrf.mxu1  ;;  %v9855_v37 = vmul.f32 %v9823_v11, %v9752_v14  ;;  %vm9857_vm6 = vcmp.eq.f32.partialorder %v3652_v57, 8.507059e+37  ;;  %vm3995_vm8 = vweird.f32 %v9725_v21 }
 0x930   :  { %v6064_v27 = vpop.eup %6063  ;;  %v5720_v60 = vmul.f32 -1.442695, %v3926_v0  ;;  %v3550_v18 = vadd.f32 %v3549_v39, %v3457_v45  ;;  %6069 = vtanh.f32 %v3722_v20  ;;  %v3992_v43 = vmul.f32 %v9725_v21, %v3991_v17 }
 0x931   :  { %v9861_v48 = vadd.f32 1.0, %v6064_v27  ;;  %v9873_v13 = vpop.eup %6065  ;;  %v3651_v52 = vsel %vm9867_vm7, %v9687_v34, %v3647_v12  ;;  %v3655_v57 = vor.u32 1.1754944e-38, %v3654_v30  ;;  %vm3994_vm9 = vweird.f32 %v9651_v4  ;;  %v3462_v27 = vpop.permute.xlu1 %3461 }
 0x932   :  { %6071 = vpow2.f32 %v5720_v60  ;;  %v3719_v38 = vmul.f32 %v3626_v22, %v3550_v18  ;;  %v3993_v46 = vadd.f32 %v9725_v21, %v3992_v43  ;;  %v3998_v20 = vand.u32 2147483647, %v9651_v4  ;;  %vm9886_vm10 = vmor %vm3994_vm9, %vm3995_vm8 }
 0x933   :  { %v3907_v24 = vpop.f32.mrf.mxu2  ;;  %v4000_v31 = vand.u32 2147483648, %v9651_v4  ;;  %6073 = vrcp.f32 %v9861_v48  ;;  %v3987_v22 = vsel %vm9813_vm1, %v3986_v42, %v3982_v29  ;;  %v4005_v34 = vmul.f32 %v9747_v41, %v9676_v15 }
 0x934   :  { %v3908_v0 = vadd.f32 %v3907_v24, %v9689_v2  ;;  %v9896_v45 = vmul.f32 %v9873_v13, %v9790_v51  ;;  %v3723_v4 = vadd.f32 %v3719_v38, %v9584_v63  ;;  %v9901_v2 = vsel %vm9857_vm6, %v3655_v57, %v3651_v52 }
 0x935   :  { %v9892_v30 = vpop.eup %6067  ;;  %v3997_v42 = vsel %vm9886_vm10, %v9725_v21, %v3993_v46  ;;  %v4006_v29 = vsub.f32 1.0, %v4005_v34  ;;  %v4013_v12 = vand.u32 2147483647, %v9676_v15  ;;  %vm3999_vm11 = vcmp.eq.f32.partialorder %v3998_v20, 8.507059e+37 }
 0x936   :  { %v3704_v56 = vmul.f32 %v9892_v30, %v9827_v8  ;;  %v4079_v39 = vmul.f32 %v9797_v50, %v3908_v0  ;;  %v9910_v17 = vpop.eup %6069  ;;  %v4001_v60 = vor.u32 1.1754944e-38, %v4000_v31  ;;  %vm4009_vm12 = vweird.f32 %v9676_v15 }
 0x937   :  { %v3552_v63 = vpop.f32.mrf.mxu1  ;;  %v4015_v18 = vand.u32 2147483648, %v9676_v15  ;;  %v4007_v43 = vmul.f32 %v9747_v41, %v4006_v29  ;;  %vm4010_vm13 = vweird.f32 %v9747_v41  ;;  %6075 = vtanh.f32 %v3723_v4 }
 0x938   :  { %v6072_v33 = vpop.eup %6071  ;;  %v3705_v21 = vsub.f32 1.0, %v3704_v56  ;;  %v3553_v58 = vadd.f32 %v3552_v63, %v3462_v27  ;;  %v4083_v38 = vadd.f32 %v4079_v39, %v9621_v5  ;;  %v4002_v52 = vsel %vm3999_vm11, %v4001_v60, %v3997_v42  ;;  %vm9942_vm1 = vmor %vm4009_vm12, %vm4010_vm13 }
 0x939   :  { %v9916_v50 = vadd.f32 1.0, %v6072_v33  ;;  %v9919_v57 = vpop.eup %6073  ;;  %v4008_v46 = vadd.f32 %v9747_v41, %v4007_v43  ;;  %vm9922_vm14 = vcmp.eq.f32.partialorder %v4013_v12, 8.507059e+37  ;;  %vm3708_vm15 = vweird.f32 %v9827_v8 }
 0x93a   :  { %v3720_v24 = vmul.f32 %v3641_v23, %v3553_v58  ;;  %v4016_v0 = vor.u32 1.1754944e-38, %v4015_v18  ;;  %v3706_v1 = vmul.f32 %v9892_v30, %v3705_v21  ;;  %vm3709_vm0 = vweird.f32 %v9892_v30 }
 0x93b   :  { %6077 = vrcp.f32 %v9916_v50  ;;  %v3910_v31 = vpop.f32.mrf.mxu2  ;;  %v3712_v34 = vand.u32 2147483647, %v9827_v8  ;;  %v3690_v4 = vsub.f32 1.0, %v9855_v37  ;;  %v9936_v42 = vmul.f32 %v9919_v57, %v9861_v48  ;;  %vm9963_vm3 = vmor %vm3708_vm15, %vm3709_vm0 }
 0x93c   :  { %v3724_v5 = vadd.f32 %v3720_v24, %v9588_v26  ;;  %v3911_v23 = vadd.f32 %v3910_v31, %v9825_v59  ;;  %6079 = vtanh.f32 %v4083_v38  ;;  %v3707_v26 = vadd.f32 %v9892_v30, %v3706_v1 }
 0x93d   :  { %v3714_v59 = vand.u32 2147483648, %v9827_v8  ;;  %v4012_v37 = vsel %vm9942_vm1, %v9747_v41, %v4008_v46  ;;  %v3691_v39 = vmul.f32 %v9823_v11, %v3690_v4  ;;  %vm3694_vm2 = vweird.f32 %v9823_v11  ;;  %v9953_v29 = vpop.eup %6075 }
 0x93e   :  { %6081 = vtanh.f32 %v3724_v5  ;;  %v4080_v15 = vmul.f32 %v3987_v22, %v3911_v23  ;;  %v3697_v27 = vand.u32 2147483647, %v9752_v14  ;;  %v3699_v63 = vand.u32 2147483648, %v9752_v14 }
 0x93f   :  { %v3555_v12 = vpop.f32.mrf.mxu1  ;;  %v3675_v60 = vsub.f32 1.0, %v9788_v19  ;;  %vm9967_vm5 = vcmp.eq.f32.partialorder %v3712_v34, 8.507059e+37  ;;  %v3692_v22 = vadd.f32 %v9823_v11, %v3691_v39  ;;  %vm3693_vm6 = vweird.f32 %v9752_v14 }
 0x940   :  { %v3556_v18 = vadd.f32 %v3555_v12, %v9749_v28  ;;  %v4017_v19 = vsel %vm9922_vm14, %v4016_v0, %v4012_v37  ;;  %v3711_v28 = vsel %vm9963_vm3, %v9892_v30, %v3707_v26  ;;  %v3715_v8 = vor.u32 1.1754944e-38, %v3714_v59  ;;  %vm3695_vm7 = vmor %vm3693_vm6, %vm3694_vm2 }
 0x941   :  { %v9973_v21 = vpop.eup %6077  ;;  %v3700_v58 = vor.u32 1.1754944e-38, %v3699_v63  ;;  %v3696_v14 = vsel %vm3695_vm7, %v9823_v11, %v3692_v22  ;;  %vm3698_vm8 = vcmp.eq.f32.partialorder %v3697_v27, 8.507059e+37  ;;  %v4084_v46 = vadd.f32 %v4080_v15, %v9628_v10 }
 0x942   :  { %v4065_v43 = vmul.f32 %v9973_v21, %v9916_v50  ;;  %v3721_v38 = vmul.f32 %v9901_v2, %v3556_v18  ;;  %v9986_v24 = vpop.eup %6079  ;;  %v3676_v30 = vmul.f32 %v9763_v40, %v3675_v60  ;;  %vm3679_vm9 = vweird.f32 %v9763_v40 }
 0x943   :  { %v3913_v20 = vpop.f32.mrf.mxu2  ;;  %v3701_v31 = vsel %vm3698_vm8, %v3700_v58, %v3696_v14  ;;  %v3716_v2 = vsel %vm9967_vm5, %v3715_v8, %v3711_v28  ;;  %vm3678_vm10 = vweird.f32 %v9691_v62  ;;  %v3682_v10 = vand.u32 2147483647, %v9691_v62 }
 0x944   :  { %v6082_v0 = vpop.eup %6081  ;;  %v3725_v1 = vadd.f32 %v3721_v38, %v9592_v49  ;;  %v3914_v5 = vadd.f32 %v3913_v20, %v9617_v44  ;;  %v4066_v11 = vsub.f32 1.0, %v4065_v43  ;;  %v3677_v23 = vadd.f32 %v9763_v40, %v3676_v30  ;;  %vm3680_vm11 = vmor %vm3678_vm10, %vm3679_vm9 }
 0x945   :  { %v3684_v34 = vand.u32 2147483648, %v9691_v62  ;;  %v3732_v56 = vsub.f32 1.0, %v3701_v31  ;;  %v3660_v49 = vsub.f32 1.0, %v9732_v25  ;;  %v3733_v26 = vsub.f32 1.0, %v3716_v2 }
 0x946   :  { %6083 = vtanh.f32 %v3725_v1  ;;  %v4081_v4 = vmul.f32 %v4002_v52, %v3914_v5  ;;  %v3741_v44 = vmul.f32 %v3716_v2, %v9394_v7  ;;  %v3681_v59 = vsel %vm3680_vm11, %v9763_v40, %v3677_v23 }
 0x947   :  { %v3685_v37 = vor.u32 1.1754944e-38, %v3684_v34  ;;  %v3736_v39 = vmul.f32 %v6082_v0, %v3732_v56  ;;  %vm3683_vm12 = vcmp.eq.f32.partialorder %v3682_v10, 8.507059e+37  ;;  %v3661_v15 = vmul.f32 %v9704_v61, %v3660_v49 }
 0x948   :  { %vm3664_vm13 = vweird.f32 %v9704_v61  ;;  %v3667_v62 = vand.u32 2147483647, %v9633_v36  ;;  %v3669_v52 = vand.u32 2147483648, %v9633_v36  ;;  %v4067_v27 = vmul.f32 %v9973_v21, %v4066_v11 }
 0x949   :  { %v3686_v12 = vsel %vm3683_vm12, %v3685_v37, %v3681_v59  ;;  %v4085_v25 = vadd.f32 %v4081_v4, %v9641_v47  ;;  %v3662_v60 = vadd.f32 %v9704_v61, %v3661_v15  ;;  %vm3663_vm14 = vweird.f32 %v9633_v36 }
 0x94a   :  { %v3731_v63 = vsub.f32 1.0, %v3686_v12  ;;  %vm3665_vm15 = vmor %vm3663_vm14, %vm3664_vm13  ;;  %vm3668_vm0 = vcmp.eq.f32.partialorder %v3667_v62, 8.507059e+37  ;;  %v3670_v18 = vor.u32 1.1754944e-38, %v3669_v52  ;;  %v4068_v41 = vadd.f32 %v9973_v21, %v4067_v27 }
 0x94b   :  { %v3916_v40 = vpop.f32.mrf.mxu2  ;;  %vm4069_vm1 = vweird.f32 %v9916_v50  ;;  %v3666_v47 = vsel %vm3665_vm15, %v9704_v61, %v3662_v60  ;;  %vm4070_vm2 = vweird.f32 %v9973_v21  ;;  %v4073_v36 = vand.u32 2147483647, %v9916_v50 }
 0x94c   :  { %v6084_v33 = vpop.eup %6083  ;;  %v3917_v22 = vadd.f32 %v3916_v40, %v9674_v16  ;;  %v3735_v28 = vmul.f32 %v9953_v29, %v3731_v63  ;;  %v3671_v58 = vsel %vm3668_vm0, %v3670_v18, %v3666_v47  ;;  %v4075_v43 = vand.u32 2147483648, %v9916_v50  ;;  %vm4071_vm3 = vmor %vm4069_vm1, %vm4070_vm2  ;;  %v4116_v47 = vld [vmem:[%s10874_s18 + $0x8] sm:$0xff] }
 0x94d   :  { %v3737_v8 = vmul.f32 %v6084_v33, %v3733_v26  ;;  %6085 = vtanh.f32 %v4084_v46  ;;  %v3740_v14 = vmul.f32 %v3701_v31, %v9350_v54  ;;  %v3730_v20 = vsub.f32 1.0, %v3671_v58 }
 0x94e   :  { %v4082_v38 = vmul.f32 %v4017_v19, %v3917_v22  ;;  %v3739_v16 = vmul.f32 %v3686_v12, %v9335_v6  ;;  %v4072_v61 = vsel %vm4071_vm3, %v9973_v21, %v4068_v41  ;;  %v4076_v29 = vor.u32 1.1754944e-38, %v4075_v43  ;;  %v11327_v22 = vld [vmem:[#allocation18_spill] sm:$0xff]  ;;  %v11329_v43 = vld [vmem:[#allocation20_spill] sm:$0xff] }
 0x94f   :  { %v10019_v30 = vadd.f32 %v3741_v44, %v3737_v8  ;;  %v3734_v1 = vmul.f32 %v9910_v17, %v3730_v20  ;;  %vm4074_vm5 = vcmp.eq.f32.partialorder %v4073_v36, 8.507059e+37  ;;  %v4051_v50 = vsub.f32 1.0, %v9936_v42 }
 0x950   :  { %v4086_v0 = vadd.f32 %v4082_v38, %v9646_v9  ;;  %6087 = vtanh.f32 %v4085_v25  ;;  %v10027_v19 = vadd.f32 %v3740_v14, %v3736_v39  ;;  %v10029_v46 = vadd.f32 %v3739_v16, %v3735_v28  ;;  %v11325_v25 = vld [vmem:[#allocation16_spill] sm:$0xff]  ;;  %v4476_v16 = vld [vmem:[%s10876_s20] sm:$0xff] }
 0x951   :  { %4247 = vmatpush.msrb.mxu3 %v10019_v30  ;;  %v4077_v31 = vsel %vm4074_vm5, %v4076_v29, %v4072_v61  ;;  %v3738_v5 = vmul.f32 %v3671_v58, %v9347_v3  ;;  %v4058_v21 = vand.u32 2147483647, %v9861_v48  ;;  %v4060_v9 = vand.u32 2147483648, %v9861_v48  ;;  %v4117_v61 = vld [vmem:[%s10874_s18 + $0x10] sm:$0xff]  ;;  %v11333_v29 = vld [vmem:[#allocation98_spill] sm:$0xff] }
 0x952   :  { %6089 = vtanh.f32 %v4086_v0  ;;  %v4052_v17 = vmul.f32 %v9919_v57, %v4051_v50  ;;  %vm4054_vm6 = vweird.f32 %v9861_v48  ;;  %vm4055_vm7 = vweird.f32 %v9919_v57  ;;  %v11334_v0 = vld [vmem:[#allocation99_spill] sm:$0xff]  ;;  %v11335_v50 = vld [vmem:[#allocation100_spill] sm:$0xff] }
 0x953   :  { %4248 = vmatpush.msrb.mxu3 %v10027_v19  ;;  %v4036_v42 = vsub.f32 1.0, %v9896_v45  ;;  %v6086_v2 = vpop.eup %6085  ;;  %v10039_v11 = vadd.f32 %v3738_v5, %v3734_v1  ;;  %v4094_v23 = vsub.f32 1.0, %v4077_v31  ;;  %vm4040_vm8 = vweird.f32 %v9873_v13  ;;  %vm4056_vm9 = vmor %vm4054_vm6, %vm4055_vm7  ;;  %v4845_v1 = vld [vmem:[%s10878_s22] sm:$0xff]  ;;  %v4479_v5 = vld [vmem:[%s10876_s20 + $0x18] sm:$0xff] }
 0x954   :  { %v4045_v10 = vand.u32 2147483648, %v9790_v51  ;;  %v4053_v34 = vadd.f32 %v9919_v57, %v4052_v17  ;;  %v4043_v48 = vand.u32 2147483647, %v9790_v51  ;;  %v4021_v56 = vsub.f32 1.0, %v9834_v55  ;;  %v11324_v55 = vld [vmem:[#allocation15_spill] sm:$0xff]  ;;  %v4480_v17 = vld [vmem:[%s10876_s20 + $0x20] sm:$0xff] }
 0x955   :  { %11323 = vst [vmem:[#allocation22_spill] sm:$0xff] %v10039_v11  ;;  %4249 = vmatpush.msrb.mxu3 %v10029_v46  ;;  %v4037_v4 = vmul.f32 %v9873_v13, %v4036_v42  ;;  %v4102_v45 = vmul.f32 %v4077_v31, %v9414_v35  ;;  %vm4059_vm10 = vcmp.eq.f32.partialorder %v4058_v21, 8.507059e+37  ;;  %v4061_v49 = vor.u32 1.1754944e-38, %v4060_v9  ;;  %v4846_v31 = vld [vmem:[%s10878_s22 + $0x8] sm:$0xff]  ;;  %v4847_v21 = vld [vmem:[%s10878_s22 + $0x10] sm:$0xff]  ;;  %v4848_v42 = vld [vmem:[%s10878_s22 + $0x18] sm:$0xff] }
 0x956   :  { %vm4039_vm11 = vweird.f32 %v9790_v51  ;;  %v6088_v26 = vpop.eup %6087  ;;  %v4057_v44 = vsel %vm4056_vm9, %v9919_v57, %v4053_v34  ;;  %v4022_v37 = vmul.f32 %v9807_v53, %v4021_v56  ;;  %v4030_v39 = vand.u32 2147483648, %v9715_v32  ;;  %v4120_v9 = vld [vmem:[%s10874_s18 + $0x28] sm:$0xff]  ;;  %v4482_v34 = vld [vmem:[%s10876_s20 + $0x30] sm:$0xff]  ;;  %v10183_v56 = vpop.permute.xlu1 %4517 }
 0x957   :  { %4250 = vmatpush.msrb.mxu3 %v10039_v11  ;;  %v4038_v59 = vadd.f32 %v9873_v13, %v4037_v4  ;;  %v4062_v12 = vsel %vm4059_vm10, %v4061_v49, %v4057_v44  ;;  %vm4041_vm12 = vmor %vm4039_vm11, %vm4040_vm8  ;;  %v4046_v51 = vor.u32 1.1754944e-38, %v4045_v10  ;;  %vm4025_vm13 = vweird.f32 %v9807_v53  ;;  %v4122_v10 = vld [vmem:[%s10874_s18 + $0x38] sm:$0xff]  ;;  %v6195_v4 = vld [vmem:[%s10874_s18 + $0x40] sm:$0xff] }
 0x958   :  { %v6090_v15 = vpop.eup %6089  ;;  %5721 = vmatmul.msk.f32.vlgmr.msrb.gmra.mxu3 %vm523_vm4, %v11324_v55  ;;  %v4028_v62 = vand.u32 2147483647, %v9715_v32  ;;  %v4093_v52 = vsub.f32 1.0, %v4062_v12  ;;  %vm4044_vm14 = vcmp.eq.f32.partialorder %v4043_v48, 8.507059e+37  ;;  %v4101_v63 = vmul.f32 %v4062_v12, %v11325_v25  ;;  %v4483_v48 = vld [vmem:[%s10876_s20 + $0x38] sm:$0xff]  ;;  %v6197_v49 = vld [vmem:[%s10876_s20 + $0x40] sm:$0xff] }
 0x959   :  { %4984 = vmatpush.msra.mxu3 %v9414_v35  ;;  %v4098_v57 = vmul.f32 %v6090_v15, %v4094_v23  ;;  %v4042_v27 = vsel %vm4041_vm12, %v9873_v13, %v4038_v59  ;;  %v4023_v40 = vadd.f32 %v9807_v53, %v4022_v37  ;;  %vm4024_vm15 = vweird.f32 %v9715_v32  ;;  %v4481_v23 = vld [vmem:[%s10876_s20 + $0x28] sm:$0xff]  ;;  %v6198_v44 = vld [vmem:[%s10874_s18 + $0x50] sm:$0xff]  ;;  %v6200_v15 = vld [vmem:[%s10874_s18 + $0x58] sm:$0xff] }
 0x95a   :  { %v4047_v60 = vsel %vm4044_vm14, %v4046_v51, %v4042_v27  ;;  %v4097_v41 = vmul.f32 %v6088_v26, %v4093_v52  ;;  %vm4026_vm0 = vmor %vm4024_vm15, %vm4025_vm13  ;;  %v4031_v35 = vor.u32 1.1754944e-38, %v4030_v39  ;;  %vm4029_vm1 = vcmp.eq.f32.partialorder %v4028_v62, 8.507059e+37  ;;  %v10193_v26 = vpop.permute.xlu2 %4512  ;;  %v6199_v37 = vld [vmem:[%s10876_s20 + $0x48] sm:$0xff]  ;;  %v10205_v39 = vpop.permute.xlu0 %4507  ;;  %v5081_v55 = vld [vmem:[#allocation3 + $0xf8] sm:$0xff] }
 0x95b   :  { %4985 = vmatpush.msra.mxu3 %v11325_v25  ;;  %v10067_v18 = vadd.f32 %v4102_v45, %v4098_v57  ;;  %v4092_v33 = vsub.f32 1.0, %v4047_v60  ;;  %v4100_v13 = vmul.f32 %v4047_v60, %v11327_v22  ;;  %v4027_v28 = vsel %vm4026_vm0, %v9807_v53, %v4023_v40  ;;  %v6196_v45 = vld [vmem:[%s10874_s18 + $0x48] sm:$0xff]  ;;  %v5080_v12 = vld [vmem:[#allocation3 + $0xf0] sm:$0xff] }
 0x95c   :  { %v10075_v32 = vadd.f32 %v4101_v63, %v4097_v41  ;;  %v4032_v58 = vsel %vm4029_vm1, %v4031_v35, %v4027_v28  ;;  %vm4905_vm2 = vcmask 523264   ;;  %v5079_v62 = vld [vmem:[#allocation3 + $0xe8] sm:$0xff]  ;;  %v6201_v52 = vld [vmem:[%s10876_s20 + $0x50] sm:$0xff]  ;;  %v6202_v63 = vld [vmem:[%s10876_s20 + $0x58] sm:$0xff] }
 0x95d   :  { %11326 = vst [vmem:[#allocation24_spill] sm:$0xff] %v10067_v18  ;;  %4986 = vmatpush.msra.mxu3 %v11327_v22  ;;  %4608 = vmatpush.msra.mxu0 %v10067_v18  ;;  %v4096_v8 = vmul.f32 %v6086_v2, %v4092_v33  ;;  %v4091_v36 = vsub.f32 1.0, %v4032_v58  ;;  %v4099_v14 = vmul.f32 %v4032_v58, %v11329_v43  ;;  %v4121_v2 = vld [vmem:[%s10874_s18 + $0x30] sm:$0xff]  ;;  %v5078_v35 = vld [vmem:[#allocation3 + $0xe0] sm:$0xff]  ;;  %v5077_v22 = vld [vmem:[#allocation3 + $0xd8] sm:$0xff] }
 0x95e   :  { %11328 = vst [vmem:[#allocation25_spill] sm:$0xff] %v10075_v32  ;;  %4955 = vmatpush.msra.mxu2 %v10067_v18  ;;  %v10199_v59 = vpop.permute.xlu1 %4502  ;;  %v5075_v58 = vld [vmem:[#allocation3 + $0xc8] sm:$0xff] }
 0x95f   :  { %4987 = vmatpush.msra.mxu3 %v11329_v43  ;;  %4609 = vmatpush.msra.mxu0 %v10075_v32  ;;  %v10083_v53 = vadd.f32 %v4100_v13, %v4096_v8  ;;  %v4095_v38 = vmul.f32 %v9986_v24, %v4091_v36  ;;  %v11332_v24 = vld [vmem:[#allocation97_spill] sm:$0xff]  ;;  %v5076_v13 = vld [vmem:[#allocation3 + $0xd0] sm:$0xff]  ;;  %v5073_v43 = vld [vmem:[#allocation3 + $0xb8] sm:$0xff] }
 0x960   :  { %4956 = vmatpush.msra.mxu2 %v10075_v32  ;;  %5722 = vmatmul.msk.f32.gmra.mxu3 %vm523_vm4, %v4116_v47  ;;  %v5074_v36 = vld [vmem:[#allocation3 + $0xc0] sm:$0xff] }
 0x961   :  { %11330 = vst [vmem:[#allocation27_spill] sm:$0xff] %v10083_v53  ;;  %4988 = vmatpush.msra.mxu3 %v10019_v30  ;;  %4610 = vmatpush.msra.mxu0 %v10083_v53  ;;  %v10092_v20 = vadd.f32 %v4099_v14, %v4095_v38  ;;  %v5072_v38 = vld [vmem:[#allocation3 + $0xb0] sm:$0xff] }
 0x962   :  { %4957 = vmatpush.msra.mxu2 %v10083_v53  ;;  %v10211_v51 = vpop.permute.xlu2 %4537  ;;  %v10220_v27 = vpop.permute.xlu0 %4532 }
 0x963   :  { %11331 = vst [vmem:[#allocation29_spill] sm:$0xff] %v10092_v20  ;;  %4989 = vmatpush.msra.mxu3 %v10027_v19  ;;  %4611 = vmatpush.msra.mxu0 %v10092_v20 }
 0x964   :  { %4958 = vmatpush.msra.mxu2 %v10092_v20  ;;  %5741 = vmatmul.msk.f32.vlgmr.msra.gmra.mxu0 %vm523_vm4, %v4476_v16 }
 0x965   :  { %4990 = vmatpush.msra.mxu3 %v10029_v46  ;;  %5013 = vmatpush.msrb.mxu0 %v11332_v24  ;;  %v5071_v24 = vld [vmem:[#allocation3 + $0xa8] sm:$0xff] }
 0x966   :  { %4959 = vmatpush.msra.mxu2 %v9394_v7  ;;  %v4477_v7 = vld [vmem:[%s10876_s20 + $0x8] sm:$0xff]  ;;  %v10213_v57 = vpop.permute.xlu1 %4156 }
 0x967   :  { %4991 = vmatpush.msra.mxu3 %v10039_v11  ;;  %5014 = vmatpush.msrb.mxu0 %v11333_v29 }
 0x968   :  { %4960 = vmatpush.msra.mxu2 %v9350_v54  ;;  %5723 = vmatmul.msk.f32.gmra.mxu3 %vm523_vm4, %v4117_v61  ;;  %v4478_v54 = vld [vmem:[%s10876_s20 + $0x10] sm:$0xff] }
 0x969   :  { %5015 = vmatpush.msrb.mxu0 %v11334_v0 }
 0x96a   :  { %4961 = vmatpush.msra.mxu2 %v9335_v6  ;;  %v4118_v6 = vld [vmem:[%s10874_s18 + $0x18] sm:$0xff]  ;;  %v10222_v25 = vpop.permute.xlu2 %4527  ;;  %v4152_v40 = vpop.permute.xlu0 %4151 }
 0x96b   :  { %5016 = vmatpush.msrb.mxu0 %v11335_v50  ;;  %v5068_v50 = vld [vmem:[#allocation3 + $0x90] sm:$0xff] }
 0x96c   :  { %4962 = vmatpush.msra.mxu2 %v9347_v3  ;;  %5742 = vmatmul.msk.f32.gmra.mxu0 %vm523_vm4, %v4477_v7  ;;  %v4119_v3 = vld [vmem:[%s10874_s18 + $0x20] sm:$0xff] }
 0x96d   :  { %5765 = vmatmul.msk.f32.vlgmr.msra.gmra.mxu2 %vm4905_vm2, %v4845_v1  ;;  %v5070_v7 = vld [vmem:[#allocation3 + $0xa0] sm:$0xff] }
 0x96e   :  { %5143 = vmatpush.msrb.mxu2 %v5081_v55  ;;  %v10228_v60 = vpop.permute.xlu1 %4522  ;;  %v11340_v55 = vld [vmem:[#allocation49_spill] sm:$0xff] }
 0x970   :  { %5724 = vmatmul.msk.f32.gmra.mxu3 %vm523_vm4, %v4118_v6  ;;  %5144 = vmatpush.msrb.mxu2 %v5080_v12  ;;  %v11341_v12 = vld [vmem:[#allocation14_spill] sm:$0xff] }
 0x972   :  { %5145 = vmatpush.msrb.mxu2 %v5079_v62  ;;  %v4147_v41 = vpop.permute.xlu2 %4146  ;;  %v4142_v28 = vpop.permute.xlu0 %4141  ;;  %v1857_v62 = vadd.f32 %v11341_v12, %v11340_v55 }
 0x974   :  { %5743 = vmatmul.msk.f32.gmra.mxu0 %vm523_vm4, %v4478_v54  ;;  %5146 = vmatpush.msrb.mxu2 %v5078_v35 }
 0x975   :  { %5766 = vmatmul.msk.f32.gmra.mxu2 %vm4905_vm2, %v4846_v31 }
 0x976   :  { %v10231_v33 = vpop.permute.xlu1 %4176  ;;  %5147 = vmatpush.msrb.mxu2 %v5077_v22 }
 0x978   :  { %5725 = vmatmul.msk.f32.gmra.mxu3 %vm523_vm4, %v4119_v3  ;;  %5148 = vmatpush.msrb.mxu2 %v5076_v13  ;;  %v11342_v13 = vld [vmem:[#allocation36_spill] sm:$0xff] }
 0x97a   :  { %v10234_v47 = vpop.permute.xlu2 %4171  ;;  %5149 = vmatpush.msrb.mxu2 %v5075_v58  ;;  %v10239_v14 = vpop.permute.xlu0 %4166  ;;  %v11344_v58 = vld [vmem:[#allocation46_spill] sm:$0xff] }
 0x97c   :  { %5744 = vmatmul.msk.f32.gmra.mxu0 %vm523_vm4, %v4479_v5  ;;  %5150 = vmatpush.msrb.mxu2 %v5074_v36  ;;  %v11345_v36 = vld [vmem:[#allocation17_spill] sm:$0xff] }
 0x97d   :  { %5767 = vmatmul.msk.f32.gmra.mxu2 %vm4905_vm2, %v4847_v21 }
 0x97e   :  { %v10237_v8 = vpop.permute.xlu1 %4161  ;;  %5151 = vmatpush.msrb.mxu2 %v5073_v43  ;;  %v1860_v43 = vadd.f32 %v11345_v36, %v11344_v58  ;;  %v11353_v36 = vld [vmem:[#allocation75_spill] sm:$0xff] }
 0x980   :  { %5726 = vmatmul.msk.f32.gmra.mxu3 %vm523_vm4, %v4120_v9  ;;  %5152 = vmatpush.msrb.mxu2 %v5072_v38 }
 0x982   :  { %v10241_v16 = vpop.permute.xlu2 %4557  ;;  %5153 = vmatpush.msrb.mxu2 %v5071_v24  ;;  %v10245_v6 = vpop.permute.xlu0 %4552 }
 0x984   :  { %5745 = vmatmul.msk.f32.gmra.mxu0 %vm523_vm4, %v4480_v17  ;;  %5154 = vmatpush.msrb.mxu2 %v5070_v7  ;;  %v11336_v17 = vld [vmem:[#allocation58_spill] sm:$0xff] }
 0x985   :  { %5768 = vmatmul.msk.f32.gmra.mxu2 %vm4905_vm2, %v4848_v42 }
 0x986   :  { %v10243_v29 = vpop.permute.xlu1 %4547 }
 0x988   :  { %5727 = vmatmul.msk.f32.gmra.mxu3 %vm523_vm4, %v4121_v2 }
 0x98a   :  { %v10247_v5 = vpop.permute.xlu2 %4542 }
 0x98c   :  { %5746 = vmatmul.msk.f32.gmra.mxu0 %vm523_vm4, %v4481_v23 }
 0x98e   :  { %v10249_v9 = vpop.permute.xlu1 %4191 }
 0x990   :  { %5728 = vmatmul.msk.f32.gmra.mxu3 %vm523_vm4, %v4122_v10 }
 0x992   :  { %v10261_v22 = vpop.permute.xlu2 %4186 }
 0x994   :  { %5747 = vmatmul.msk.f32.gmra.mxu0 %vm523_vm4, %v4482_v34 }
 0x996   :  { %v10267_v38 = vpop.permute.xlu1 %4887 }
 0x998   :  { %5729 = vmatmul.msk.f32.gmra.mxu3 %vm523_vm4, %v6195_v4  ;;  %v11338_v4 = vld [vmem:[#allocation42_spill] sm:$0xff] }
 0x99a   :  { %v10278_v55 = vpop.permute.xlu2 %4892 }
 0x99b   :  { %11350 = vst [vmem:[#allocation33_spill] sm:$0xff] %v10278_v55 }
 0x99c   :  { %5748 = vmatmul.msk.f32.gmra.mxu0 %vm523_vm4, %v4483_v48  ;;  %v11339_v48 = vld [vmem:[#allocation37_spill] sm:$0xff] }
 0x9a0   :  { %5730 = vmatmul.msk.f32.gmra.mxu3 %vm523_vm4, %v6196_v45  ;;  %v1623_v45 = vadd.f32 %v11339_v48, %v11338_v4 }
 0x9a4   :  { %5749 = vmatmul.msk.f32.gmra.mxu0 %vm523_vm4, %v6197_v49 }
 0x9a8   :  { %5731 = vmatmul.msk.f32.gmra.mxu3 %vm523_vm4, %v6198_v44  ;;  %v10256_v44 = vpop.permute.xlu0 %4196 }
 0x9ac   :  { %5750 = vmatmul.msk.f32.gmra.mxu0 %vm523_vm4, %v6199_v37 }
 0x9b0   :  { %5732 = vmatmul.msk.f32.gmra.mxu3 %vm523_vm4, %v6200_v15 }
 0x9b4   :  { %5751 = vmatmul.msk.f32.gmra.mxu0 %vm523_vm4, %v6201_v52 }
 0x9b8   :  { %5769 = vmatmul.msk.f32.vlgmr.msra.gmra.mxu3 %vm4905_vm2, %v4845_v1  ;;  %v5069_v1 = vld [vmem:[#allocation3 + $0x98] sm:$0xff] }
 0x9b9   :  { %5155 = vmatpush.msrb.mxu2 %v5069_v1 }
 0x9bb   :  { %5156 = vmatpush.msrb.mxu2 %v5068_v50  ;;  %v11347_v50 = vld [vmem:[#allocation45_spill] sm:$0xff] }
 0x9bc   :  { %5752 = vmatmul.msk.f32.gmra.mxu0 %vm523_vm4, %v6202_v63 }
 0x9c0   :  { %5770 = vmatmul.msk.f32.gmra.mxu3 %vm4905_vm2, %v4846_v31  ;;  %v5067_v31 = vld [vmem:[#allocation3 + $0x88] sm:$0xff] }
 0x9c1   :  { %5157 = vmatpush.msrb.mxu2 %v5067_v31 }
 0x9c8   :  { %5771 = vmatmul.msk.f32.gmra.mxu3 %vm4905_vm2, %v4847_v21  ;;  %v5066_v21 = vld [vmem:[#allocation3 + $0x80] sm:$0xff] }
 0x9c9   :  { %5158 = vmatpush.msrb.mxu2 %v5066_v21 }
 0x9d0   :  { %5772 = vmatmul.msk.f32.gmra.mxu3 %vm4905_vm2, %v4848_v42  ;;  %v11337_v42 = vld [vmem:[#allocation13_spill] sm:$0xff] }
 0x9d1   :  { %v1854_v2 = vadd.f32 %v11337_v42, %v11336_v17  ;;  %v11348_v17 = vld [vmem:[#allocation38_spill] sm:$0xff]  ;;  %v11349_v42 = vld [vmem:[#allocation19_spill] sm:$0xff] }
 0x9db   :  { %v4252_v61 = vpop.f32.mrf.mxu3 }
 0x9dc   :  { %v4253_v0 = vadd.f32 %v4252_v61, %v4142_v28 }
 0x9de   :  { %v4288_v23 = vadd.f32 %v4253_v0, %v1854_v2  ;;  %v1863_v2 = vadd.f32 %v11349_v42, %v11348_v17  ;;  %v11361_v42 = vld [vmem:[#allocation92_spill] sm:$0xff] }
 0x9e0   :  { %v5733_v52 = vmul.f32 -1.442695, %v4288_v23 }
 0x9e1   :  { %v4613_v54 = vpop.f32.mrf.mxu0 }
 0x9e2   :  { %v4614_v10 = vadd.f32 %v4613_v54, %v10199_v59  ;;  %v11343_v59 = vld [vmem:[#allocation41_spill] sm:$0xff]  ;;  %6091 = vpow2.f32 %v5733_v52 }
 0x9e3   :  { %v4255_v3 = vpop.f32.mrf.mxu3  ;;  %v1626_v28 = vadd.f32 %v11343_v59, %v11342_v13  ;;  %v11352_v13 = vld [vmem:[#allocation50_spill] sm:$0xff] }
 0x9e4   :  { %v4256_v49 = vadd.f32 %v4255_v3, %v4147_v41  ;;  %v4649_v63 = vadd.f32 %v4614_v10, %v1623_v45  ;;  %v10276_v45 = vpop.permute.xlu0 %4181 }
 0x9e6   :  { %v4289_v41 = vadd.f32 %v4256_v49, %v1857_v62  ;;  %v5753_v61 = vmul.f32 -1.442695, %v4649_v63 }
 0x9e8   :  { %v5734_v31 = vmul.f32 -1.442695, %v4289_v41  ;;  %6093 = vpow2.f32 %v5753_v61  ;;  %v6092_v49 = vpop.eup %6091 }
 0x9e9   :  { %v4616_v34 = vpop.f32.mrf.mxu0  ;;  %v10281_v52 = vadd.f32 1.0, %v6092_v49 }
 0x9ea   :  { %v4617_v37 = vadd.f32 %v4616_v34, %v10205_v39  ;;  %6095 = vpow2.f32 %v5734_v31  ;;  %v11360_v31 = vld [vmem:[#allocation28_spill] sm:$0xff] }
 0x9eb   :  { %v4258_v15 = vpop.f32.mrf.mxu3  ;;  %vm4333_vm4 = vweird.f32 %v10281_v52 }
 0x9ec   :  { %v4259_v35 = vadd.f32 %v4258_v15, %v4152_v40  ;;  %v4650_v24 = vadd.f32 %v4617_v37, %v1626_v28  ;;  %v11346_v40 = vld [vmem:[#allocation31_spill] sm:$0xff] }
 0x9ed   :  { %v1629_v54 = vadd.f32 %v11347_v50, %v11346_v40  ;;  %v11358_v40 = vld [vmem:[#allocation26_spill] sm:$0xff] }
 0x9ee   :  { %v4290_v0 = vadd.f32 %v4259_v35, %v1860_v43  ;;  %v5754_v23 = vmul.f32 -1.442695, %v4650_v24  ;;  %v11351_v35 = vld [vmem:[#allocation30_spill] sm:$0xff]  ;;  %v11354_v43 = vld [vmem:[#allocation21_spill] sm:$0xff] }
 0x9ef   :  { %v1632_v59 = vadd.f32 %v11352_v13, %v11351_v35  ;;  %v1866_v41 = vadd.f32 %v11354_v43, %v11353_v36  ;;  %v11355_v24 = vld [vmem:[#allocation73_spill] sm:$0xff]  ;;  %v11372_v43 = vld [vmem:[#allocation59_spill] sm:$0xff] }
 0x9f0   :  { %v4964_v39 = vpop.f32.mrf.mxu2  ;;  %v5735_v34 = vmul.f32 -1.442695, %v4290_v0  ;;  %6097 = vpow2.f32 %v5754_v23 }
 0x9f1   :  { %v4965_v7 = vadd.f32 %v4964_v39, %v10267_v38  ;;  %v4619_v1 = vpop.f32.mrf.mxu0  ;;  %v11356_v39 = vld [vmem:[#allocation23_spill] sm:$0xff] }
 0x9f2   :  { %v4620_v21 = vadd.f32 %v4619_v1, %v10193_v26  ;;  %6099 = vpow2.f32 %v5735_v34  ;;  %v1869_v61 = vadd.f32 %v11356_v39, %v11355_v24  ;;  %v11357_v1 = vld [vmem:[#allocation68_spill] sm:$0xff]  ;;  %v11364_v34 = vld [vmem:[#allocation34_spill] sm:$0xff] }
 0x9f3   :  { %v5035_v3 = vmax.f32 %v4965_v7, 0.0  ;;  %v4261_v10 = vpop.f32.mrf.mxu3  ;;  %v10292_v50 = vadd.f32 %v11358_v40, %v11357_v1  ;;  %v11374_v39 = vld [vmem:[#allocation56_spill] sm:$0xff] }
 0x9f4   :  { %v4651_v4 = vadd.f32 %v4620_v21, %v1629_v54  ;;  %v4262_v48 = vadd.f32 %v4261_v10, %v10213_v57  ;;  %v6094_v57 = vpop.eup %6093  ;;  %v11359_v54 = vld [vmem:[#allocation65_spill] sm:$0xff]  ;;  %v11363_v10 = vld [vmem:[#allocation91_spill] sm:$0xff] }
 0x9f5   :  { %5159 = vmatmul.f32.vlgmr.msrb.gmra.mxu2 %v5035_v3  ;;  %v6096_v7 = vpop.eup %6095  ;;  %v10296_v3 = vadd.f32 %v11360_v31, %v11359_v54 }
 0x9f6   :  { %v5755_v37 = vmul.f32 -1.442695, %v4651_v4  ;;  %v4291_v15 = vadd.f32 %v4262_v48, %v1863_v2  ;;  %v11362_v2 = vld [vmem:[#allocation32_spill] sm:$0xff]  ;;  %v10305_v4 = vadd.f32 %v11364_v34, %v11363_v10  ;;  %v10308_v48 = vadd.f32 1.0, %v6094_v57  ;;  %v11373_v57 = vld [vmem:[#allocation57_spill] sm:$0xff]  ;;  %v11378_v34 = vld [vmem:[#allocation86_spill] sm:$0xff] }
 0x9f7   :  { %v10301_v23 = vadd.f32 %v11362_v2, %v11361_v42  ;;  %v10324_v24 = vadd.f32 %v11373_v57, %v11372_v43  ;;  %v10330_v40 = vadd.f32 1.0, %v6096_v7  ;;  %v11376_v42 = vld [vmem:[#allocation48_spill] sm:$0xff] }
 0x9f8   :  { %v4967_v26 = vpop.f32.mrf.mxu2  ;;  %v5736_v12 = vmul.f32 -1.442695, %v4291_v15  ;;  %6101 = vpow2.f32 %v5755_v37  ;;  %v11365_v37 = vld [vmem:[#allocation90_spill] sm:$0xff]  ;;  %v11366_v15 = vld [vmem:[#allocation40_spill] sm:$0xff]  ;;  %vm4694_vm6 = vweird.f32 %v10308_v48 }
 0x9f9   :  { %v4968_v62 = vadd.f32 %v4967_v26, %v10278_v55  ;;  %v4622_v63 = vpop.f32.mrf.mxu0  ;;  %v10312_v26 = vadd.f32 %v11366_v15, %v11365_v37  ;;  %v11377_v2 = vld [vmem:[#allocation64_spill] sm:$0xff]  ;;  %v11379_v37 = vld [vmem:[#allocation69_spill] sm:$0xff]  ;;  %v4354_v20 = vand.u32 2147483648, %v10330_v40  ;;  %vm4348_vm9 = vweird.f32 %v10330_v40 }
 0x9fa   :  { %6103 = vpow2.f32 %v5736_v12  ;;  %v4623_v58 = vadd.f32 %v4622_v63, %v10183_v56  ;;  %v6098_v56 = vpop.eup %6097  ;;  %v11368_v12 = vld [vmem:[#allocation44_spill] sm:$0xff]  ;;  %v10337_v10 = vadd.f32 %v11377_v2, %v11376_v42  ;;  %v10341_v15 = vadd.f32 %v11379_v37, %v11378_v34  ;;  %v11385_v42 = vld [vmem:[#allocation78_spill] sm:$0xff] }
 0x9fb   :  { %v5039_v28 = vmax.f32 %v4968_v62, 0.0  ;;  %v4264_v0 = vpop.f32.mrf.mxu3  ;;  %6105 = vrcp.f32 %v10281_v52  ;;  %v6100_v49 = vpop.eup %6099 }
 0x9fc   :  { %v4652_v21 = vadd.f32 %v4623_v58, %v1632_v59  ;;  %v4265_v17 = vadd.f32 %v4264_v0, %v10237_v8  ;;  %v11367_v8 = vld [vmem:[#allocation88_spill] sm:$0xff]  ;;  %v10318_v59 = vpop.permute.xlu0 %4897  ;;  %v11371_v58 = vld [vmem:[#allocation54_spill] sm:$0xff]  ;;  %v11375_v0 = vld [vmem:[#allocation61_spill] sm:$0xff]  ;;  %v10344_v7 = vadd.f32 1.0, %v6100_v49  ;;  %v4337_v49 = vand.u32 2147483647, %v10281_v52 }
 0x9fd   :  { %5162 = vmatmul.f32.gmra.mxu2 %v5039_v28  ;;  %v10316_v62 = vadd.f32 %v11368_v12, %v11367_v8  ;;  %11369 = vst [vmem:[#allocation35_spill] sm:$0xff] %v10318_v59  ;;  %v11370_v28 = vld [vmem:[#allocation62_spill] sm:$0xff]  ;;  %v10328_v1 = vadd.f32 %v11375_v0, %v11374_v39  ;;  %v11382_v0 = vld [vmem:[#allocation80_spill] sm:$0xff] }
 0x9fe   :  { %v5756_v63 = vmul.f32 -1.442695, %v4652_v21  ;;  %v4292_v35 = vadd.f32 %v4265_v17, %v1866_v41  ;;  %v6102_v13 = vpop.eup %6101  ;;  %v1635_v36 = vadd.f32 %v11371_v58, %v11370_v28  ;;  %v10332_v21 = vadd.f32 1.0, %v6098_v56  ;;  %v11380_v28 = vld [vmem:[#allocation85_spill] sm:$0xff]  ;;  %v11381_v58 = vld [vmem:[#allocation71_spill] sm:$0xff] }
 0x9ff   :  { %v10346_v12 = vadd.f32 1.0, %v6102_v13  ;;  %v10353_v43 = vadd.f32 %v11381_v58, %v11380_v28  ;;  %v11383_v13 = vld [vmem:[#allocation74_spill] sm:$0xff]  ;;  %vm10380_vm3 = vcmp.eq.f32.partialorder %v4337_v49, 8.507059e+37  ;;  %v4698_v58 = vand.u32 2147483647, %v10308_v48 }
 0xa00   :  { %v4970_v54 = vpop.f32.mrf.mxu2  ;;  %v6104_v31 = vpop.eup %6103  ;;  %6107 = vpow2.f32 %v5756_v63  ;;  %v5737_v41 = vmul.f32 -1.442695, %v4292_v35  ;;  %vm4709_vm13 = vweird.f32 %v10332_v21 }
 0xa01   :  { %v4971_v17 = vadd.f32 %v4970_v54, %v10318_v59  ;;  %6109 = vrcp.f32 %v10308_v48  ;;  %v4625_v8 = vpop.f32.mrf.mxu0  ;;  %v10349_v35 = vpop.eup %6105  ;;  %v10356_v57 = vadd.f32 1.0, %v6104_v31  ;;  %v10361_v54 = vadd.f32 %v11383_v13, %v11382_v0 }
 0xa02   :  { %6111 = vpow2.f32 %v5737_v41  ;;  %v4626_v63 = vadd.f32 %v4625_v8, %v10228_v60  ;;  %v4339_v31 = vand.u32 2147483648, %v10281_v52  ;;  %vm4334_vm5 = vweird.f32 %v10349_v35 }
 0xa03   :  { %v5043_v56 = vmax.f32 %v4971_v17, 0.0  ;;  %6113 = vrcp.f32 %v10330_v40  ;;  %v4267_v39 = vpop.f32.mrf.mxu3  ;;  %v11384_v17 = vld [vmem:[#allocation79_spill] sm:$0xff]  ;;  %vm10410_vm7 = vcmp.eq.f32.partialorder %v4698_v58, 8.507059e+37  ;;  %vm10421_vm8 = vmor %vm4333_vm4, %vm4334_vm5  ;;  %v4715_v58 = vand.u32 2147483648, %v10332_v21 }
 0xa04   :  { %6115 = vrcp.f32 %v10332_v21  ;;  %v4653_v60 = vadd.f32 %v4626_v63, %v1635_v36  ;;  %v4268_v41 = vadd.f32 %v4267_v39, %v10239_v14  ;;  %v10367_v2 = vadd.f32 %v11385_v42, %v11384_v17 }
 0xa05   :  { %5165 = vmatmul.f32.gmra.mxu2 %v5043_v56  ;;  %6117 = vrcp.f32 %v10344_v7  ;;  %v4329_v36 = vmul.f32 %v10349_v35, %v10281_v52  ;;  %v10377_v56 = vpop.permute.xlu1 %4902  ;;  %v4700_v39 = vand.u32 2147483648, %v10308_v48  ;;  %vm4363_vm4 = vweird.f32 %v10344_v7 }
 0xa06   :  { %v6108_v34 = vpop.eup %6107  ;;  %6119 = vrcp.f32 %v10346_v12  ;;  %v5757_v37 = vmul.f32 -1.442695, %v4653_v60  ;;  %v4293_v8 = vadd.f32 %v4268_v41, %v1869_v61  ;;  %11386 = vst [vmem:[#allocation39_spill] sm:$0xff] %v10377_v56 }
 0xa07   :  { %v10375_v14 = vpop.eup %6109  ;;  %6121 = vrcp.f32 %v10356_v57  ;;  %v4330_v60 = vsub.f32 1.0, %v4329_v36  ;;  %v10389_v17 = vadd.f32 1.0, %v6108_v34 }
 0xa08   :  { %v4973_v63 = vpop.f32.mrf.mxu2  ;;  %v6112_v0 = vpop.eup %6111  ;;  %6123 = vpow2.f32 %v5757_v37  ;;  %v5738_v61 = vmul.f32 -1.442695, %v4293_v8  ;;  %vm4695_vm10 = vweird.f32 %v10375_v14 }
 0xa09   :  { %v4974_v13 = vadd.f32 %v4973_v63, %v10377_v56  ;;  %v10387_v41 = vpop.eup %6113  ;;  %v10391_v42 = vadd.f32 1.0, %v6112_v0  ;;  %v4628_v49 = vpop.f32.mrf.mxu0  ;;  %v4331_v8 = vmul.f32 %v10349_v35, %v4330_v60  ;;  %v4340_v63 = vor.u32 1.1754944e-38, %v4339_v31  ;;  %vm4696_vm14 = vmor %vm4694_vm6, %vm4695_vm10 }
 0xa0a   :  { %v10395_v53 = vpop.eup %6115  ;;  %6125 = vpow2.f32 %v5738_v61  ;;  %v4629_v37 = vadd.f32 %v4628_v49, %v10222_v25  ;;  %v4701_v0 = vor.u32 1.1754944e-38, %v4700_v39  ;;  %v4344_v11 = vmul.f32 %v10387_v41, %v10330_v40 }
 0xa0b   :  { %v5047_v59 = vmax.f32 %v4974_v13, 0.0  ;;  %v10399_v36 = vpop.eup %6117  ;;  %6127 = vrcp.f32 %v10391_v42  ;;  %v4270_v34 = vpop.f32.mrf.mxu3  ;;  %v4332_v25 = vadd.f32 %v10349_v35, %v4331_v8  ;;  %v4690_v13 = vmul.f32 %v10375_v14, %v10308_v48 }
 0xa0c   :  { %v10403_v56 = vpop.eup %6119  ;;  %v4654_v32 = vadd.f32 %v4629_v37, %v10324_v24  ;;  %v4271_v61 = vadd.f32 %v4270_v34, %v10234_v47  ;;  %6129 = vrcp.f32 %v10389_v17  ;;  %v10427_v24 = vor.u32 1.1754944e-38, %v4354_v20 }
 0xa0d   :  { %5168 = vmatmul.f32.gmra.mxu2 %v5047_v59  ;;  %v10414_v31 = vpop.eup %6121  ;;  %v4352_v59 = vand.u32 2147483647, %v10330_v40  ;;  %v4336_v52 = vsel %vm10421_vm8, %v10349_v35, %v4332_v25  ;;  %v4691_v8 = vsub.f32 1.0, %v4690_v13  ;;  %v4713_v20 = vand.u32 2147483647, %v10332_v21 }
 0xa0e   :  { %v6124_v39 = vpop.eup %6123  ;;  %v5758_v49 = vmul.f32 -1.442695, %v4654_v32  ;;  %v4294_v37 = vadd.f32 %v4271_v61, %v10292_v50  ;;  %v10442_v32 = vsel %vm10380_vm3, %v4340_v63, %v4336_v52  ;;  %v4345_v13 = vsub.f32 1.0, %v4344_v11 }
 0xa0f   :  { %v10434_v34 = vadd.f32 1.0, %v6124_v39  ;;  %v4692_v50 = vmul.f32 %v10375_v14, %v4691_v8  ;;  %vm4349_vm11 = vweird.f32 %v10387_v41  ;;  %vm10451_vm12 = vcmp.eq.f32.partialorder %v4352_v59, 8.507059e+37  ;;  %v5097_v39 = vld [vmem:[#allocation3 + $0x178] sm:$0xff] }
 0xa10   :  { %v6126_v55 = vpop.eup %6125  ;;  %6131 = vpow2.f32 %v5758_v49  ;;  %v5739_v18 = vmul.f32 -1.442695, %v4294_v37  ;;  %v5096_v49 = vld [vmem:[#allocation3 + $0x170] sm:$0xff]  ;;  %v10458_v37 = vor.u32 1.1754944e-38, %v4715_v58  ;;  %5172 = vmatpush.msrb.mxu3 %v5097_v39  ;;  %vm10477_vm15 = vcmp.eq.f32.partialorder %v4713_v20, 8.507059e+37  ;;  %vm10494_vm1 = vmor %vm4348_vm9, %vm4349_vm11 }
 0xa11   :  { %v10445_v35 = vpop.eup %6127  ;;  %6133 = vrcp.f32 %v10434_v34  ;;  %v10448_v61 = vadd.f32 1.0, %v6126_v55  ;;  %v4631_v25 = vpop.f32.mrf.mxu0  ;;  %v4693_v63 = vadd.f32 %v10375_v14, %v4692_v50  ;;  %v5095_v50 = vld [vmem:[#allocation3 + $0x168] sm:$0xff]  ;;  %v4359_v48 = vmul.f32 %v10399_v36, %v10344_v7 }
 0xa12   :  { %6135 = vpow2.f32 %v5739_v18  ;;  %v4632_v28 = vadd.f32 %v4631_v25, %v10220_v27  ;;  %v10460_v55 = vpop.eup %6129  ;;  %v10464_v11 = vmul.f32 %v10445_v35, %v10391_v42  ;;  %v4346_v18 = vmul.f32 %v10387_v41, %v4345_v13  ;;  %5173 = vmatpush.msrb.mxu3 %v5096_v49 }
 0xa13   :  { %6137 = vrcp.f32 %v10448_v61  ;;  %v4273_v59 = vpop.f32.mrf.mxu3  ;;  %v4705_v27 = vmul.f32 %v10395_v53, %v10332_v21  ;;  %v4697_v8 = vsel %vm4696_vm14, %v10375_v14, %v4693_v63  ;;  %vm4710_vm0 = vweird.f32 %v10395_v53 }
 0xa14   :  { %v4655_v58 = vadd.f32 %v4632_v28, %v10328_v1  ;;  %v4274_v52 = vadd.f32 %v4273_v59, %v10231_v33  ;;  %v10485_v13 = vsel %vm10410_vm7, %v4701_v0, %v4697_v8  ;;  %v4347_v39 = vadd.f32 %v10387_v41, %v4346_v18  ;;  %v5094_v0 = vld [vmem:[#allocation3 + $0x160] sm:$0xff]  ;;  %5174 = vmatpush.msrb.mxu3 %v5095_v50  ;;  %vm4711_vm5 = vmor %vm4709_vm13, %vm4710_vm0 }
 0xa15   :  { %v4706_v1 = vsub.f32 1.0, %v4705_v27  ;;  %v4360_v60 = vsub.f32 1.0, %v4359_v48  ;;  %vm4364_vm3 = vweird.f32 %v10399_v36  ;;  %vm4724_vm8 = vweird.f32 %v10346_v12 }
 0xa16   :  { %v6132_v33 = vpop.eup %6131  ;;  %v5759_v14 = vmul.f32 -1.442695, %v4655_v58  ;;  %v4295_v20 = vadd.f32 %v4274_v52, %v10296_v3  ;;  %v4351_v3 = vsel %vm10494_vm1, %v10387_v41, %v4347_v39  ;;  %v5093_v58 = vld [vmem:[#allocation3 + $0x158] sm:$0xff]  ;;  %v4367_v52 = vand.u32 2147483647, %v10344_v7  ;;  %5175 = vmatpush.msrb.mxu3 %v5094_v0  ;;  %vm10544_vm6 = vmor %vm4363_vm4, %vm4364_vm3 }
 0xa17   :  { %v10499_v63 = vpop.eup %6133  ;;  %v10501_v49 = vadd.f32 1.0, %v6132_v33  ;;  %v4707_v59 = vmul.f32 %v10395_v53, %v4706_v1  ;;  %v4361_v39 = vmul.f32 %v10399_v36, %v4360_v60  ;;  %vm4725_vm9 = vweird.f32 %v10403_v56 }
 0xa18   :  { %v6136_v40 = vpop.eup %6135  ;;  %v10510_v18 = vmul.f32 %v10499_v63, %v10434_v34  ;;  %6139 = vpow2.f32 %v5759_v14  ;;  %v5740_v27 = vmul.f32 -1.442695, %v4295_v20  ;;  %v10528_v14 = vsel %vm10451_vm12, %v10427_v24, %v4351_v3  ;;  %v5092_v20 = vld [vmem:[#allocation3 + $0x150] sm:$0xff]  ;;  %5176 = vmatpush.msrb.mxu3 %v5093_v58  ;;  %vm10603_vm11 = vmor %vm4724_vm8, %vm4725_vm9 }
 0xa19   :  { %v10513_v8 = vpop.eup %6137  ;;  %6141 = vrcp.f32 %v10501_v49  ;;  %v10516_v41 = vadd.f32 1.0, %v6136_v40  ;;  %v4634_v50 = vpop.f32.mrf.mxu0  ;;  %v4708_v48 = vadd.f32 %v10395_v53, %v4707_v59  ;;  %v4362_v60 = vadd.f32 %v10399_v36, %v4361_v39 }
 0xa1a   :  { %v10522_v1 = vmul.f32 %v10513_v8, %v10448_v61  ;;  %6143 = vpow2.f32 %v5740_v27  ;;  %v4635_v33 = vadd.f32 %v4634_v50, %v10211_v51  ;;  %v4369_v51 = vand.u32 2147483648, %v10344_v7  ;;  %5177 = vmatpush.msrb.mxu3 %v5092_v20 }
 0xa1b   :  { %6145 = vrcp.f32 %v10516_v41  ;;  %v4276_v28 = vpop.f32.mrf.mxu3  ;;  %v4712_v0 = vsel %vm4711_vm5, %v10395_v53, %v4708_v48  ;;  %vm10548_vm7 = vcmp.eq.f32.partialorder %v4367_v52, 8.507059e+37  ;;  %v5091_v53 = vld [vmem:[#allocation3 + $0x148] sm:$0xff]  ;;  %v4720_v59 = vmul.f32 %v10403_v56, %v10346_v12  ;;  %v5090_v52 = vld [vmem:[#allocation3 + $0x140] sm:$0xff] }
 0xa1c   :  { %v4656_v47 = vadd.f32 %v4635_v33, %v10337_v10  ;;  %v4277_v24 = vadd.f32 %v4276_v28, %v10276_v45  ;;  %v10557_v45 = vsel %vm10477_vm15, %v10458_v37, %v4712_v0  ;;  %v4366_v10 = vsel %vm10544_vm6, %v10399_v36, %v4362_v60  ;;  %5178 = vmatpush.msrb.mxu3 %v5091_v53  ;;  %v5089_v0 = vld [vmem:[#allocation3 + $0x138] sm:$0xff] }
 0xa1d   :  { %v4370_v7 = vor.u32 1.1754944e-38, %v4369_v51  ;;  %v4721_v50 = vsub.f32 1.0, %v4720_v59  ;;  %v4728_v48 = vand.u32 2147483647, %v10346_v12  ;;  %v4730_v36 = vand.u32 2147483648, %v10346_v12  ;;  %v5088_v59 = vld [vmem:[#allocation3 + $0x130] sm:$0xff] }
 0xa1e   :  { %v6140_v40 = vpop.eup %6139  ;;  %v5760_v27 = vmul.f32 -1.442695, %v4656_v47  ;;  %v4448_v58 = vmul.f32 %v10442_v32, %v4277_v24  ;;  %v4374_v25 = vmul.f32 %v10414_v31, %v10356_v57  ;;  %5179 = vmatpush.msrb.mxu3 %v5090_v52  ;;  %vm4378_vm12 = vweird.f32 %v10356_v57 }
 0xa1f   :  { %v10565_v39 = vpop.eup %6141  ;;  %v10567_v37 = vadd.f32 1.0, %v6140_v40  ;;  %v10576_v20 = vsel %vm10548_vm7, %v4370_v7, %v4366_v10  ;;  %v4722_v28 = vmul.f32 %v10403_v56, %v4721_v50  ;;  %vm10588_vm10 = vcmp.eq.f32.partialorder %v4728_v48, 8.507059e+37  ;;  %v5087_v48 = vld [vmem:[#allocation3 + $0x128] sm:$0xff] }
 0xa20   :  { %v6144_v33 = vpop.eup %6143  ;;  %6147 = vpow2.f32 %v5760_v27  ;;  %v4452_v32 = vadd.f32 %v4448_v58, %v10301_v23  ;;  %v10583_v51 = vmul.f32 %v10565_v39, %v10501_v49  ;;  %v4731_v53 = vor.u32 1.1754944e-38, %v4730_v36  ;;  %5180 = vmatpush.msrb.mxu3 %v5089_v0  ;;  %v5082_v23 = vld [vmem:[#allocation3 + $0x100] sm:$0xff] }
 0xa21   :  { %v10579_v60 = vpop.eup %6145  ;;  %6149 = vrcp.f32 %v10567_v37  ;;  %v10586_v47 = vadd.f32 1.0, %v6144_v33  ;;  %v4637_v24 = vpop.f32.mrf.mxu0  ;;  %v4723_v3 = vadd.f32 %v10403_v56, %v4722_v28  ;;  %v4382_v50 = vand.u32 2147483647, %v10356_v57  ;;  %v5086_v28 = vld [vmem:[#allocation3 + $0x120] sm:$0xff] }
 0xa22   :  { %6151 = vtanh.f32 %v4452_v32  ;;  %v4638_v21 = vadd.f32 %v4637_v24, %v10247_v5  ;;  %v10596_v10 = vmul.f32 %v10579_v60, %v10516_v41  ;;  %v4375_v5 = vsub.f32 1.0, %v4374_v25  ;;  %5181 = vmatpush.msrb.mxu3 %v5088_v59  ;;  %v5085_v59 = vld [vmem:[#allocation3 + $0x118] sm:$0xff] }
 0xa23   :  { %6153 = vrcp.f32 %v10586_v47  ;;  %v4279_v7 = vpop.f32.mrf.mxu3  ;;  %v4727_v52 = vsel %vm10603_vm11, %v10403_v56, %v4723_v3  ;;  %vm4379_vm13 = vweird.f32 %v10414_v31  ;;  %v4384_v36 = vand.u32 2147483648, %v10356_v57 }
 0xa24   :  { %v4809_v27 = vmul.f32 %v10485_v13, %v4638_v21  ;;  %v4280_v58 = vadd.f32 %v4279_v7, %v10261_v22  ;;  %v4376_v12 = vmul.f32 %v10414_v31, %v4375_v5  ;;  %v4735_v25 = vmul.f32 %v10460_v55, %v10389_v17  ;;  %5182 = vmatpush.msrb.mxu3 %v5087_v48  ;;  %vm10642_vm0 = vmor %vm4378_vm12, %vm4379_vm13 }
 0xa25   :  { %v10623_v56 = vsel %vm10588_vm10, %v4731_v53, %v4727_v52  ;;  %vm10625_vm14 = vcmp.eq.f32.partialorder %v4382_v50, 8.507059e+37  ;;  %vm4739_vm15 = vweird.f32 %v10389_v17  ;;  %v4385_v53 = vor.u32 1.1754944e-38, %v4384_v36  ;;  %v5084_v50 = vld [vmem:[#allocation3 + $0x110] sm:$0xff] }
 0xa26   :  { %v6148_v13 = vpop.eup %6147  ;;  %v4813_v22 = vadd.f32 %v4809_v27, %v10341_v15  ;;  %v4449_v33 = vmul.f32 %v10528_v14, %v4280_v58  ;;  %v4377_v21 = vadd.f32 %v10414_v31, %v4376_v12  ;;  %v4736_v3 = vsub.f32 1.0, %v4735_v25  ;;  %5183 = vmatpush.msrb.mxu3 %v5086_v28 }
 0xa27   :  { %v10629_v0 = vpop.eup %6149  ;;  %v10631_v24 = vadd.f32 1.0, %v6148_v13  ;;  %vm4740_vm1 = vweird.f32 %v10460_v55  ;;  %v4743_v57 = vand.u32 2147483647, %v10389_v17  ;;  %v4745_v25 = vand.u32 2147483648, %v10389_v17 }
 0xa28   :  { %v10635_v15 = vpop.eup %6151  ;;  %6155 = vtanh.f32 %v4813_v22  ;;  %v4453_v14 = vadd.f32 %v4449_v33, %v10305_v4  ;;  %v4381_v4 = vsel %vm10642_vm0, %v10414_v31, %v4377_v21  ;;  %v4737_v5 = vmul.f32 %v10460_v55, %v4736_v3  ;;  %5184 = vmatpush.msrb.mxu3 %v5085_v59  ;;  %vm10673_vm3 = vmor %vm4739_vm15, %vm4740_vm1  ;;  %v5083_v33 = vld [vmem:[#allocation3 + $0x108] sm:$0xff] }
 0xa29   :  { %v6154_v7 = vpop.eup %6153  ;;  %6157 = vrcp.f32 %v10631_v24  ;;  %v4640_v40 = vpop.f32.mrf.mxu0  ;;  %v10655_v27 = vmul.f32 %v10629_v0, %v10567_v37  ;;  %v4386_v12 = vsel %vm10625_vm14, %v4385_v53, %v4381_v4  ;;  %vm10662_vm4 = vcmp.eq.f32.partialorder %v4743_v57, 8.507059e+37 }
 0xa2a   :  { %v4434_v58 = vmul.f32 %v6154_v7, %v10586_v47  ;;  %6159 = vtanh.f32 %v4453_v14  ;;  %v4641_v52 = vadd.f32 %v4640_v40, %v10243_v29  ;;  %v4738_v31 = vadd.f32 %v10460_v55, %v4737_v5  ;;  %5185 = vmatpush.msrb.mxu3 %v5084_v50 }
 0xa2b   :  { %v4282_v48 = vpop.f32.mrf.mxu3  ;;  %vm4439_vm5 = vweird.f32 %v6154_v7  ;;  %v4746_v21 = vor.u32 1.1754944e-38, %v4745_v25  ;;  %v4420_v59 = vsub.f32 1.0, %v10596_v10  ;;  %vm4438_vm6 = vweird.f32 %v10586_v47 }
 0xa2c   :  { %v4810_v13 = vmul.f32 %v10557_v45, %v4641_v52  ;;  %v4283_v22 = vadd.f32 %v4282_v48, %v10249_v9  ;;  %v4435_v32 = vsub.f32 1.0, %v4434_v58  ;;  %v4742_v28 = vsel %vm10673_vm3, %v10460_v55, %v4738_v31  ;;  %5186 = vmatpush.msrb.mxu3 %v5083_v33  ;;  %vm4440_vm8 = vmor %vm4438_vm6, %vm4439_vm5 }
 0xa2d   :  { %v4442_v45 = vand.u32 2147483647, %v10586_v47  ;;  %v4444_v9 = vand.u32 2147483648, %v10586_v47  ;;  %v10691_v55 = vsel %vm10662_vm4, %v4746_v21, %v4742_v28  ;;  %v4421_v47 = vmul.f32 %v10579_v60, %v4420_v59 }
 0xa2e   :  { %v10682_v3 = vpop.eup %6155  ;;  %v4814_v17 = vadd.f32 %v4810_v13, %v10353_v43  ;;  %v4450_v14 = vmul.f32 %v10576_v20, %v4283_v22  ;;  %v4436_v53 = vmul.f32 %v6154_v7, %v4435_v32  ;;  %5187 = vmatpush.msrb.mxu3 %v5082_v23  ;;  %vm4424_vm9 = vweird.f32 %v10579_v60 }
 0xa2f   :  { %v10687_v40 = vpop.eup %6157  ;;  %vm10694_vm7 = vcmp.eq.f32.partialorder %v4442_v45, 8.507059e+37  ;;  %v4445_v43 = vor.u32 1.1754944e-38, %v4444_v9  ;;  %v4427_v52 = vand.u32 2147483647, %v10516_v41  ;;  %v4429_v50 = vand.u32 2147483648, %v10516_v41 }
 0xa30   :  { %v10698_v5 = vpop.eup %6159  ;;  %v4795_v20 = vmul.f32 %v10687_v40, %v10631_v24  ;;  %6161 = vtanh.f32 %v4814_v17  ;;  %v4454_v10 = vadd.f32 %v4450_v14, %v10312_v26  ;;  %v4437_v57 = vadd.f32 %v6154_v7, %v4436_v53 }
 0xa31   :  { %v4643_v58 = vpop.f32.mrf.mxu0  ;;  %vm4423_vm10 = vweird.f32 %v10516_v41  ;;  %v4422_v13 = vadd.f32 %v10579_v60, %v4421_v47  ;;  %vm4428_vm11 = vcmp.eq.f32.partialorder %v4427_v52, 8.507059e+37  ;;  %v4405_v32 = vsub.f32 1.0, %v10522_v1 }
 0xa32   :  { %6163 = vtanh.f32 %v4454_v10  ;;  %v4644_v48 = vadd.f32 %v4643_v58, %v10245_v6  ;;  %v4441_v31 = vsel %vm4440_vm8, %v6154_v7, %v4437_v57  ;;  %v4796_v26 = vsub.f32 1.0, %v4795_v20  ;;  %vm4425_vm12 = vmor %vm4423_vm10, %vm4424_vm9 }
 0xa33   :  { %v4285_v36 = vpop.f32.mrf.mxu3  ;;  %v10712_v25 = vsel %vm10694_vm7, %v4445_v43, %v4441_v31  ;;  %v4430_v6 = vor.u32 1.1754944e-38, %v4429_v50  ;;  %v4426_v7 = vsel %vm4425_vm12, %v10579_v60, %v4422_v13  ;;  %vm4408_vm13 = vweird.f32 %v10448_v61 }
 0xa34   :  { %v4811_v22 = vmul.f32 %v10623_v56, %v4644_v48  ;;  %v4286_v29 = vadd.f32 %v4285_v36, %v10256_v44  ;;  %v4463_v33 = vsub.f32 1.0, %v10712_v25  ;;  %v10722_v41 = vmul.f32 %v10712_v25, %v10019_v30 }
 0xa35   :  { %v4431_v21 = vsel %vm4428_vm11, %v4430_v6, %v4426_v7  ;;  %vm4409_vm14 = vweird.f32 %v10513_v8  ;;  %v4406_v9 = vmul.f32 %v10513_v8, %v4405_v32  ;;  %v4412_v30 = vand.u32 2147483647, %v10448_v61  ;;  %v11419_v6 = vld [vmem:[#allocation24_spill] sm:$0xff] }
 0xa36   :  { %v10727_v28 = vpop.eup %6161  ;;  %v4815_v44 = vadd.f32 %v4811_v22, %v10361_v54  ;;  %v4451_v56 = vmul.f32 %v4386_v12, %v4286_v29  ;;  %v4462_v45 = vsub.f32 1.0, %v4431_v21  ;;  %v4414_v17 = vand.u32 2147483648, %v10448_v61  ;;  %vm4410_vm0 = vmor %vm4408_vm13, %vm4409_vm14 }
 0xa37   :  { %v4470_v14 = vmul.f32 %v4431_v21, %v10027_v19  ;;  %v4797_v23 = vmul.f32 %v10687_v40, %v4796_v26  ;;  %v4407_v53 = vadd.f32 %v10513_v8, %v4406_v9  ;;  %vm4799_vm15 = vweird.f32 %v10631_v24  ;;  %v11420_v9 = vld [vmem:[#allocation33_spill] sm:$0xff] }
 0xa38   :  { %v6164_v60 = vpop.eup %6163  ;;  %6165 = vtanh.f32 %v4815_v44  ;;  %v4455_v1 = vadd.f32 %v4451_v56, %v10316_v62  ;;  %v4415_v59 = vor.u32 1.1754944e-38, %v4414_v17  ;;  %vm4800_vm1 = vweird.f32 %v10687_v40 }
 0xa39   :  { %v4646_v54 = vpop.f32.mrf.mxu0  ;;  %v4466_v12 = vmul.f32 %v6164_v60, %v4462_v45  ;;  %v4798_v62 = vadd.f32 %v10687_v40, %v4797_v23  ;;  %v4411_v43 = vsel %vm4410_vm0, %v10513_v8, %v4407_v53  ;;  %vm4413_vm4 = vcmp.eq.f32.partialorder %v4412_v30, 8.507059e+37  ;;  %vm10747_vm3 = vmor %vm4799_vm15, %vm4800_vm1 }
 0xa3a   :  { %6167 = vtanh.f32 %v4455_v1  ;;  %v4647_v4 = vadd.f32 %v4646_v54, %v10241_v16  ;;  %v4803_v10 = vand.u32 2147483647, %v10631_v24  ;;  %v4805_v16 = vand.u32 2147483648, %v10631_v24 }
 0xa3b   :  { %v4993_v19 = vpop.f32.mrf.mxu3  ;;  %v4416_v58 = vsel %vm4413_vm4, %v4415_v59, %v4411_v43  ;;  %v4802_v47 = vsel %vm10747_vm3, %v10687_v40, %v4798_v62  ;;  %v4474_v52 = vadd.f32 %v4470_v14, %v4466_v12  ;;  %v4390_v24 = vsub.f32 1.0, %v10464_v11  ;;  %v11423_v12 = vld [vmem:[#allocation22_spill] sm:$0xff] }
 0xa3c   :  { %v4812_v57 = vmul.f32 %v10691_v55, %v4647_v4  ;;  %v4994_v61 = vadd.f32 %v4993_v19, %v10267_v38  ;;  %v4461_v8 = vsub.f32 1.0, %v4416_v58  ;;  %v4469_v50 = vmul.f32 %v4416_v58, %v10029_v46  ;;  %v11424_v58 = vld [vmem:[#allocation25_spill] sm:$0xff] }
 0xa3d   :  { %v4806_v48 = vor.u32 1.1754944e-38, %v4805_v16  ;;  %vm4804_vm5 = vcmp.eq.f32.partialorder %v4803_v10, 8.507059e+37  ;;  %vm4393_vm6 = vweird.f32 %v10391_v42  ;;  %v4397_v40 = vand.u32 2147483647, %v10391_v42 }
 0xa3e   :  { %v10759_v31 = vpop.eup %6165  ;;  %v4816_v26 = vadd.f32 %v4812_v57, %v10367_v2  ;;  %v5036_v36 = vmax.f32 %v4994_v61, 0.0  ;;  %v4465_v55 = vmul.f32 %v10698_v5, %v4461_v8  ;;  %v4391_v22 = vmul.f32 %v10445_v35, %v4390_v24  ;;  %v11425_v8 = vld [vmem:[#allocation35_spill] sm:$0xff] }
 0xa3f   :  { %v4807_v25 = vsel %vm4804_vm5, %v4806_v48, %v4802_v47  ;;  %vm4394_vm7 = vweird.f32 %v10445_v35  ;;  %v4399_v11 = vand.u32 2147483648, %v10391_v42  ;;  %vm4398_vm8 = vcmp.eq.f32.partialorder %v4397_v40, 8.507059e+37  ;;  %v5111_v42 = vld [vmem:[#allocation3 + $0x1e8] sm:$0xff] }
 0xa40   :  { %v6168_v13 = vpop.eup %6167  ;;  %6169 = vtanh.f32 %v4816_v26  ;;  %5188 = vmatmul.f32.vlgmr.msrb.gmra.mxu3 %v5036_v36  ;;  %v4824_v46 = vsub.f32 1.0, %v4807_v25  ;;  %v4473_v29 = vadd.f32 %v4469_v50, %v4465_v55  ;;  %v4832_v7 = vmul.f32 %v4807_v25, %v11419_v6  ;;  %vm4395_vm10 = vmor %vm4393_vm6, %vm4394_vm7  ;;  %v6203_v36 = vld [vmem:[%s10878_s22] sm:$0xff] }
 0xa41   :  { %v4467_v2 = vmul.f32 %v6168_v13, %v4463_v33  ;;  %v4392_v5 = vadd.f32 %v10445_v35, %v4391_v22  ;;  %v4781_v32 = vsub.f32 1.0, %v10655_v27  ;;  %vm4785_vm9 = vweird.f32 %v10629_v0  ;;  %v11426_v13 = vld [vmem:[#allocation27_spill] sm:$0xff] }
 0xa42   :  { %v4400_v21 = vor.u32 1.1754944e-38, %v4399_v11  ;;  %v4788_v33 = vand.u32 2147483647, %v10567_v37  ;;  %v4790_v45 = vand.u32 2147483648, %v10567_v37  ;;  %v4766_v27 = vsub.f32 1.0, %v10583_v51 }
 0xa43   :  { %v4996_v44 = vpop.f32.mrf.mxu3  ;;  %v4475_v56 = vadd.f32 %v10722_v41, %v4467_v2  ;;  %v4396_v17 = vsel %vm4395_vm10, %v10445_v35, %v4392_v5  ;;  %v4782_v60 = vmul.f32 %v10629_v0, %v4781_v32  ;;  %vm4784_vm11 = vweird.f32 %v10567_v37  ;;  %v11427_v5 = vld [vmem:[#allocation29_spill] sm:$0xff] }
 0xa44   :  { %v4997_v30 = vadd.f32 %v4996_v44, %v11420_v9  ;;  %v4401_v1 = vsel %vm4398_vm8, %v4400_v21, %v4396_v17  ;;  %vm10783_vm12 = vcmp.eq.f32.partialorder %v4788_v33, 8.507059e+37  ;;  %v4791_v41 = vor.u32 1.1754944e-38, %v4790_v45  ;;  %vm4786_vm13 = vmor %vm4784_vm11, %vm4785_vm9  ;;  %v11428_v44 = vld [vmem:[#allocation39_spill] sm:$0xff]  ;;  %v11429_v33 = vld [vmem:[#allocation82_spill] sm:$0xff] }
 0xa45   :  { %5017 = vmatpush.msrb.mxu0 %v4475_v56  ;;  %v4460_v54 = vsub.f32 1.0, %v4401_v1  ;;  %v4468_v53 = vmul.f32 %v4401_v1, %v11423_v12  ;;  %v4783_v35 = vadd.f32 %v10629_v0, %v4782_v60  ;;  %v4767_v51 = vmul.f32 %v10565_v39, %v4766_v27  ;;  %v11430_v45 = vld [vmem:[#allocation12_spill] sm:$0xff]  ;;  %v5112_v1 = vld [vmem:[#allocation3 + $0x1f0] sm:$0xff] }
 0xa46   :  { %v6170_v14 = vpop.eup %6169  ;;  %v5040_v23 = vmax.f32 %v4997_v30, 0.0  ;;  %vm4770_vm14 = vweird.f32 %v10565_v39  ;;  %v4773_v37 = vand.u32 2147483647, %v10501_v49  ;;  %v4775_v19 = vand.u32 2147483648, %v10501_v49  ;;  %v11431_v30 = vld [vmem:[#allocation9_spill] sm:$0xff]  ;;  %v11432_v17 = vld [vmem:[#allocation76_spill] sm:$0xff] }
 0xa47   :  { %5018 = vmatpush.msrb.mxu0 %v4474_v52  ;;  %v4828_v59 = vmul.f32 %v6170_v14, %v4824_v46  ;;  %v4464_v4 = vmul.f32 %v10635_v15, %v4460_v54  ;;  %v4787_v62 = vsel %vm4786_vm13, %v10629_v0, %v4783_v35  ;;  %v4751_v43 = vsub.f32 1.0, %v10510_v18  ;;  %v6206_v60 = vld [vmem:[%s10878_s22 + $0x18] sm:$0xff]  ;;  %v5064_v14 = vld [vmem:[#allocation3 + $0x70] sm:$0xff]  ;;  %v5063_v54 = vld [vmem:[#allocation3 + $0x68] sm:$0xff] }
 0xa48   :  { %5191 = vmatmul.f32.gmra.mxu3 %v5040_v23  ;;  %v4792_v10 = vsel %vm10783_vm12, %v4791_v41, %v4787_v62  ;;  %v4768_v16 = vadd.f32 %v10565_v39, %v4767_v51  ;;  %vm4769_vm15 = vweird.f32 %v10501_v49  ;;  %vm4774_vm1 = vcmp.eq.f32.partialorder %v4773_v37, 8.507059e+37  ;;  %v5113_v27 = vld [vmem:[#allocation3 + $0x1f8] sm:$0xff]  ;;  %v5110_v23 = vld [vmem:[#allocation3 + $0x1e0] sm:$0xff]  ;;  %v5108_v35 = vld [vmem:[#allocation3 + $0x1d0] sm:$0xff] }
 0xa49   :  { %5019 = vmatpush.msrb.mxu0 %v4473_v29  ;;  %v4836_v20 = vadd.f32 %v4832_v7, %v4828_v59  ;;  %v4472_v57 = vadd.f32 %v4468_v53, %v4464_v4  ;;  %v4823_v61 = vsub.f32 1.0, %v4792_v10  ;;  %vm4771_vm0 = vmor %vm4769_vm15, %vm4770_vm14  ;;  %v4776_v15 = vor.u32 1.1754944e-38, %v4775_v19  ;;  %v5065_v41 = vld [vmem:[#allocation3 + $0x78] sm:$0xff]  ;;  %v5062_v53 = vld [vmem:[#allocation3 + $0x60] sm:$0xff] }
 0xa4a   :  { %v4831_v47 = vmul.f32 %v4792_v10, %v11424_v58  ;;  %v4772_v18 = vsel %vm4771_vm0, %v10565_v39, %v4768_v16  ;;  %v4752_v52 = vmul.f32 %v10499_v63, %v4751_v43  ;;  %vm4755_vm4 = vweird.f32 %v10499_v63  ;;  %v5109_v12 = vld [vmem:[#allocation3 + $0x1d8] sm:$0xff]  ;;  %v5107_v59 = vld [vmem:[#allocation3 + $0x1c8] sm:$0xff]  ;;  %v5106_v51 = vld [vmem:[#allocation3 + $0x1c0] sm:$0xff] }
 0xa4b   :  { %4926 = vmatpush.msrb.mxu1 %v4836_v20  ;;  %v4999_v0 = vpop.f32.mrf.mxu3  ;;  %5020 = vmatpush.msrb.mxu0 %v4472_v57  ;;  %v4827_v49 = vmul.f32 %v10759_v31, %v4823_v61  ;;  %v4777_v48 = vsel %vm4774_vm1, %v4776_v15, %v4772_v18  ;;  %v4758_v26 = vand.u32 2147483647, %v10434_v34  ;;  %vm4754_vm3 = vweird.f32 %v10434_v34  ;;  %v5105_v37 = vld [vmem:[#allocation3 + $0x1b8] sm:$0xff]  ;;  %v5104_v4 = vld [vmem:[#allocation3 + $0x1b0] sm:$0xff]  ;;  %v5103_v62 = vld [vmem:[#allocation3 + $0x1a8] sm:$0xff] }
 0xa4c   :  { %v5000_v50 = vadd.f32 %v4999_v0, %v11425_v8  ;;  %5773 = vmatmul.msk.f32.vlgmr.msrb.gmra.mxu0 %vm4905_vm2, %v6203_v36  ;;  %v4822_v24 = vsub.f32 1.0, %v4777_v48  ;;  %v4753_v39 = vadd.f32 %v10499_v63, %v4752_v52  ;;  %v4760_v55 = vand.u32 2147483648, %v10434_v34  ;;  %vm4756_vm5 = vmor %vm4754_vm3, %vm4755_vm4  ;;  %v5061_v19 = vld [vmem:[#allocation3 + $0x58] sm:$0xff]  ;;  %v5102_v43 = vld [vmem:[#allocation3 + $0x1a0] sm:$0xff] }
 0xa4d   :  { %v4835_v40 = vadd.f32 %v4831_v47, %v4827_v49  ;;  %v4830_v46 = vmul.f32 %v4777_v48, %v11426_v13  ;;  %vm4759_vm6 = vcmp.eq.f32.partialorder %v4758_v26, 8.507059e+37  ;;  %5201 = vmatpush.msra.mxu0 %v5113_v27  ;;  %v5060_v20 = vld [vmem:[#allocation3 + $0x50] sm:$0xff]  ;;  %v5101_v10 = vld [vmem:[#allocation3 + $0x198] sm:$0xff]  ;;  %v5059_v16 = vld [vmem:[#allocation3 + $0x48] sm:$0xff] }
 0xa4e   :  { %v5044_v25 = vmax.f32 %v5000_v50, 0.0  ;;  %v4826_v31 = vmul.f32 %v10727_v28, %v4822_v24  ;;  %v4757_v22 = vsel %vm4756_vm5, %v10499_v63, %v4753_v39  ;;  %v4761_v2 = vor.u32 1.1754944e-38, %v4760_v55  ;;  %v6204_v28 = vld [vmem:[%s10878_s22 + $0x8] sm:$0xff]  ;;  %v5100_v57 = vld [vmem:[#allocation3 + $0x190] sm:$0xff]  ;;  %v5058_v61 = vld [vmem:[#allocation3 + $0x40] sm:$0xff] }
 0xa4f   :  { %4927 = vmatpush.msrb.mxu1 %v4835_v40  ;;  %5202 = vmatpush.msra.mxu0 %v5112_v1  ;;  %v5099_v15 = vld [vmem:[#allocation3 + $0x188] sm:$0xff]  ;;  %v5057_v0 = vld [vmem:[#allocation3 + $0x38] sm:$0xff]  ;;  %v5098_v58 = vld [vmem:[#allocation3 + $0x180] sm:$0xff] }
 0xa50   :  { %5194 = vmatmul.f32.gmra.mxu3 %v5044_v25  ;;  %v4834_v29 = vadd.f32 %v4830_v46, %v4826_v31  ;;  %v4762_v6 = vsel %vm4759_vm6, %v4761_v2, %v4757_v22  ;;  %v5056_v47 = vld [vmem:[#allocation3 + $0x30] sm:$0xff]  ;;  %v5055_v18 = vld [vmem:[#allocation3 + $0x28] sm:$0xff]  ;;  %v5054_v52 = vld [vmem:[#allocation3 + $0x20] sm:$0xff] }
 0xa51   :  { %v4821_v7 = vsub.f32 1.0, %v4762_v6  ;;  %v4829_v32 = vmul.f32 %v4762_v6, %v11427_v5  ;;  %5203 = vmatpush.msra.mxu0 %v5111_v42  ;;  %v5053_v50 = vld [vmem:[#allocation3 + $0x18] sm:$0xff]  ;;  %v5052_v49 = vld [vmem:[#allocation3 + $0x10] sm:$0xff]  ;;  %v5051_v48 = vld [vmem:[#allocation3 + $0x8] sm:$0xff] }
 0xa52   :  { %4928 = vmatpush.msrb.mxu1 %v4834_v29  ;;  %v5050_v26 = vld [vmem:[#allocation3] sm:$0xff] }
 0xa53   :  { %v5002_v11 = vpop.f32.mrf.mxu3  ;;  %v4825_v34 = vmul.f32 %v10682_v3, %v4821_v7  ;;  %v6205_v3 = vld [vmem:[%s10878_s22 + $0x10] sm:$0xff]  ;;  %5204 = vmatpush.msra.mxu0 %v5110_v23  ;;  %s6265_s22 = smov [#allocation6]  }
 0xa54   :  { %v5003_v56 = vadd.f32 %v5002_v11, %v11428_v44  ;;  %5774 = vmatmul.msk.f32.gmra.mxu0 %vm4905_vm2, %v6204_v28  ;;  %s5238_s19 = sshll.u32 %s6265_s22, 4  ;;  %s5239_s19 = int_to_ptr.vmem [resolvable:$true] %s5238_s19 }
 0xa55   :  { %v4833_v63 = vadd.f32 %v4829_v32, %v4825_v34  ;;  %5205 = vmatpush.msra.mxu0 %v5109_v12 }
 0xa56   :  { %v5048_v21 = vmax.f32 %v5003_v56, 0.0 }
 0xa57   :  { %4929 = vmatpush.msrb.mxu1 %v4833_v63  ;;  %5206 = vmatpush.msra.mxu0 %v5108_v35 }
 0xa58   :  { %5197 = vmatmul.f32.gmra.mxu3 %v5048_v21 }
 0xa59   :  { %4930 = vmatpush.msrb.mxu1 %v11429_v33  ;;  %5207 = vmatpush.msra.mxu0 %v5107_v59 }
 0xa5b   :  { %4931 = vmatpush.msrb.mxu1 %v11430_v45  ;;  %5208 = vmatpush.msra.mxu0 %v5106_v51 }
 0xa5c   :  { %5775 = vmatmul.msk.f32.gmra.mxu0 %vm4905_vm2, %v6205_v3 }
 0xa5d   :  { %4932 = vmatpush.msrb.mxu1 %v11431_v30  ;;  %5209 = vmatpush.msra.mxu0 %v5105_v37 }
 0xa5f   :  { %4933 = vmatpush.msrb.mxu1 %v11432_v17  ;;  %5210 = vmatpush.msra.mxu0 %v5104_v4 }
 0xa60   :  { %5761 = vmatmul.msk.f32.vlgmr.msrb.gmra.mxu1 %vm4905_vm2, %v6203_v36 }
 0xa61   :  { %5114 = vmatpush.msra.mxu1 %v5065_v41  ;;  %5211 = vmatpush.msra.mxu0 %v5103_v62 }
 0xa63   :  { %5115 = vmatpush.msra.mxu1 %v5064_v14  ;;  %5212 = vmatpush.msra.mxu0 %v5102_v43 }
 0xa64   :  { %5776 = vmatmul.msk.f32.gmra.mxu0 %vm4905_vm2, %v6206_v60 }
 0xa65   :  { %5116 = vmatpush.msra.mxu1 %v5063_v54  ;;  %5213 = vmatpush.msra.mxu0 %v5101_v10 }
 0xa67   :  { %5117 = vmatpush.msra.mxu1 %v5062_v53  ;;  %5214 = vmatpush.msra.mxu0 %v5100_v57 }
 0xa68   :  { %5762 = vmatmul.msk.f32.gmra.mxu1 %vm4905_vm2, %v6204_v28 }
 0xa69   :  { %5118 = vmatpush.msra.mxu1 %v5061_v19  ;;  %5215 = vmatpush.msra.mxu0 %v5099_v15 }
 0xa6b   :  { %5119 = vmatpush.msra.mxu1 %v5060_v20  ;;  %5216 = vmatpush.msra.mxu0 %v5098_v58 }
 0xa6d   :  { %5120 = vmatpush.msra.mxu1 %v5059_v16 }
 0xa6f   :  { %5121 = vmatpush.msra.mxu1 %v5058_v61 }
 0xa70   :  { %5763 = vmatmul.msk.f32.gmra.mxu1 %vm4905_vm2, %v6205_v3 }
 0xa71   :  { %5122 = vmatpush.msra.mxu1 %v5057_v0 }
 0xa73   :  { %5123 = vmatpush.msra.mxu1 %v5056_v47 }
 0xa75   :  { %5124 = vmatpush.msra.mxu1 %v5055_v18 }
 0xa77   :  { %5125 = vmatpush.msra.mxu1 %v5054_v52 }
 0xa78   :  { %5764 = vmatmul.msk.f32.gmra.mxu1 %vm4905_vm2, %v6206_v60  ;;  %v5160_v45 = vpop.f32.mrf.mxu2 }
 0xa79   :  { %5126 = vmatpush.msra.mxu1 %v5053_v50 }
 0xa7b   :  { %5127 = vmatpush.msra.mxu1 %v5052_v49 }
 0xa7d   :  { %5128 = vmatpush.msra.mxu1 %v5051_v48 }
 0xa7f   :  { %5129 = vmatpush.msra.mxu1 %v5050_v26 }
 0xac3   :  { %v5189_v3 = vpop.f32.mrf.mxu3 }
 0xac9   :  { %v5022_v36 = vpop.f32.mrf.mxu0 }
 0xaca   :  { %v5023_v24 = vadd.f32 %v5022_v36, %v10267_v38 }
 0xacb   :  { %v5192_v42 = vpop.f32.mrf.mxu3 }
 0xacc   :  { %v5037_v39 = vmax.f32 %v5023_v24, 0.0 }
 0xace   :  { %5217 = vmatmul.f32.vlgmr.msra.gmra.mxu0 %v5037_v39 }
 0xad1   :  { %v5025_v55 = vpop.f32.mrf.mxu0 }
 0xad2   :  { %v5026_v25 = vadd.f32 %v5025_v55, %v11420_v9 }
 0xad4   :  { %v5041_v40 = vmax.f32 %v5026_v25, 0.0 }
 0xad6   :  { %5220 = vmatmul.f32.gmra.mxu0 %v5041_v40 }
 0xad9   :  { %v5028_v31 = vpop.f32.mrf.mxu0 }
 0xada   :  { %v5029_v13 = vadd.f32 %v5028_v31, %v11425_v8 }
 0xadc   :  { %v5045_v46 = vmax.f32 %v5029_v13, 0.0 }
 0xadd   :  { %v4935_v22 = vpop.f32.mrf.mxu1 }
 0xade   :  { %v4936_v2 = vadd.f32 %v4935_v22, %v10267_v38  ;;  %5223 = vmatmul.f32.gmra.mxu0 %v5045_v46 }
 0xae0   :  { %v5034_v29 = vmax.f32 %v4936_v2, 0.0 }
 0xae1   :  { %v5031_v6 = vpop.f32.mrf.mxu0 }
 0xae2   :  { %5130 = vmatmul.f32.vlgmr.msra.gmra.mxu1 %v5034_v29  ;;  %v5032_v7 = vadd.f32 %v5031_v6, %v11428_v44 }
 0xae4   :  { %v5049_v11 = vmax.f32 %v5032_v7, 0.0 }
 0xae5   :  { %v4938_v34 = vpop.f32.mrf.mxu1 }
 0xae6   :  { %v4939_v5 = vadd.f32 %v4938_v34, %v11420_v9  ;;  %5226 = vmatmul.f32.gmra.mxu0 %v5049_v11  ;;  %v5163_v9 = vpop.f32.mrf.mxu2 }
 0xae8   :  { %v5038_v32 = vmax.f32 %v4939_v5, 0.0 }
 0xaea   :  { %5133 = vmatmul.f32.gmra.mxu1 %v5038_v32 }
 0xaed   :  { %v4941_v56 = vpop.f32.mrf.mxu1 }
 0xaee   :  { %v4942_v28 = vadd.f32 %v4941_v56, %v11425_v8  ;;  %v5166_v12 = vpop.f32.mrf.mxu2 }
 0xaf0   :  { %v5042_v63 = vmax.f32 %v4942_v28, 0.0 }
 0xaf2   :  { %5136 = vmatmul.f32.gmra.mxu1 %v5042_v63 }
 0xaf5   :  { %v4944_v21 = vpop.f32.mrf.mxu1 }
 0xaf6   :  { %v4945_v38 = vadd.f32 %v4944_v21, %v11428_v44  ;;  %v5195_v44 = vpop.f32.mrf.mxu3  ;;  %v5169_v4 = vpop.f32.mrf.mxu2 }
 0xaf8   :  { %v5046_v33 = vmax.f32 %v4945_v38, 0.0 }
 0xafa   :  { %5139 = vmatmul.f32.gmra.mxu1 %v5046_v33 }
 0xafe   :  { %v5198_v43 = vpop.f32.mrf.mxu3 }
 0xb4b   :  { %v5218_v30 = vpop.f32.mrf.mxu0 }
 0xb53   :  { %v5221_v41 = vpop.f32.mrf.mxu0 }
 0xb5b   :  { %v5224_v59 = vpop.f32.mrf.mxu0 }
 0xb5f   :  { %v5131_v17 = vpop.f32.mrf.mxu1 }
 0xb60   :  { %v5161_v60 = vadd.f32 %v5160_v45, %v5131_v17 }
 0xb62   :  { %v5190_v27 = vadd.f32 %v5189_v3, %v5161_v60 }
 0xb63   :  { %v5227_v10 = vpop.f32.mrf.mxu0 }
 0xb64   :  { %v5219_v1 = vadd.f32 %v5218_v30, %v5190_v27 }
 0xb66   :  { %5230 = vst [vmem:[#allocation6] sm:$0xff] %v5219_v1 }
 0xb67   :  { %v5134_v14 = vpop.f32.mrf.mxu1 }
 0xb68   :  { %v5164_v8 = vadd.f32 %v5163_v9, %v5134_v14 }
 0xb6a   :  { %v5193_v23 = vadd.f32 %v5192_v42, %v5164_v8 }
 0xb6c   :  { %v5222_v54 = vadd.f32 %v5221_v41, %v5193_v23 }
 0xb6e   :  { %5231 = vst [vmem:[#allocation6 + $0x8] sm:$0xff] %v5222_v54 }
 0xb6f   :  { %v5137_v53 = vpop.f32.mrf.mxu1 }
 0xb70   :  { %v5167_v35 = vadd.f32 %v5166_v12, %v5137_v53 }
 0xb72   :  { %v5196_v51 = vadd.f32 %v5195_v44, %v5167_v35 }
 0xb74   :  { %v5225_v37 = vadd.f32 %v5224_v59, %v5196_v51 }
 0xb76   :  { %5232 = vst [vmem:[#allocation6 + $0x10] sm:$0xff] %v5225_v37 }
 0xb77   :  { %v5140_v62 = vpop.f32.mrf.mxu1 }
 0xb78   :  { %v5170_v19 = vadd.f32 %v5169_v4, %v5140_v62 }
 0xb7a   :  { %v5199_v20 = vadd.f32 %v5198_v43, %v5170_v19 }
 0xb7c   :  { %v5228_v16 = vadd.f32 %v5227_v10, %v5199_v20 }
 0xb7e   :  { %5233 = vst [vmem:[#allocation6 + $0x18] sm:$0xff] %v5228_v16 }
 0xb7f   :  { %5246 = dma.vmem_to_hbm [thread:$0]  %s5239_s19, 512, %s5241_s12, [#allocation5], %s6260_s29, %s6260_s29, %s6261_s0  }
 0xb80   :  { %6257 = dma.done.wait [#allocation5], 512  }
 0xb81   :  { %6258 = vsyncadd [#allocation5], 4294966784 }
 0xb82   :  { %5251 = vsyncpa [#allocation4], 1 }
 0xb83   :  { %5252 = vsyncpa [#allocation5], 1 }

</bundles_post_ra>
